<compile_context>
chip_gen: v6e
topology: v6e:2x2x1
jax: 0.10.0
libtpu: 0.0.40
codegen_flags: <defaults>
</compile_context>

<pallas_src>
import jax
import jax.numpy as jnp
import numpy as np
from jax import lax
from jax.experimental import pallas as pl
from jax.experimental.pallas import tpu as pltpu

H0, W0 = 32, 96              # input spatial size implied by fc1 = 6*38*32
C = 32                       # channel count of every conv layer
BN_EPS = 1e-5
FC1_IN = 6 * 38 * C          # 7296 (torch (h, w, c)-ordered flatten, see init_params)
FC1_OUT, FC2_OUT, FC3_OUT = 1024, 64, 2

# ---- packed-grid geometry (python ints); one packed row = 4 widths x 32 ch ----
WB1 = 23                     # conv1/conv2 grid width blocks (92 / 4)
R1, R1P = 28 * WB1, 648      # conv1 rows (644), padded (chunkable, covers conv2 reads)
R2 = 24 * WB1                # conv2 rows (552)
WBP = 11                     # pooled / conv3-5 grid width blocks (44 / 4)
RP, RPP = 12 * WBP, 136      # pooled rows (132) + padded
R3, R3P = 10 * WBP, 112      # conv3 rows (110) + padded
R4, R4P = 8 * WBP, 96        # conv4 rows (88) + padded
R5 = 6 * WBP                 # conv5 rows (66)
FEAT_ROWS = 6 * 10           # 60 lane-dense feature rows (width padded 38 -> 40)
FC1_IN_PACKED = FEAT_ROWS * 128   # 7680
C1_CHUNK, C2_CHUNK = 216, 184     # row chunks (multiples of 8 and of WB1)


# ============================== kernels =====================================

def _conv_stack_kernel(pin_ref, w1_ref, b1_ref, w2_ref, b2_ref, bn1s_ref, bn1b_ref,
                       w3_ref, b3_ref, w4_ref, b4_ref, bn2s_ref, bn2b_ref,
                       w5_ref, b5_ref, bn3s_ref, bn3b_ref,
                       feat_ref, a1_ref, a2_ref, p_ref, a3_ref, a4_ref):
    f32 = jnp.float32

    # ---- conv1 (1 -> 32, 5x5) + ReLU: im2col rows x packed weight, 3 chunks.
    def conv1_chunk(i, c):
        r0 = pl.multiple_of(i * C1_CHUNK, 8)
        a1_ref[pl.ds(r0, C1_CHUNK), :] = jnp.maximum(
            jnp.dot(pin_ref[pl.ds(r0, C1_CHUNK), :], w1_ref[...],
                    preferred_element_type=f32) + b1_ref[...], 0.0)
        return c

    lax.fori_loop(0, R1P // C1_CHUNK, conv1_chunk, 0)

    # ---- conv2 (32 -> 32, 5x5) + ReLU + BN1 (folded), 3 chunks of 184 rows.
    def conv2_chunk(i, c):
        r0 = pl.multiple_of(i * C2_CHUNK, 8)
        acc = jnp.zeros((C2_CHUNK, 128), f32)
        for di in range(5):
            off = di * WB1
            acc += jnp.dot(a1_ref[pl.ds(r0 + off, C2_CHUNK), :], w2_ref[di, 0],
                           preferred_element_type=f32)
            acc += jnp.dot(a1_ref[pl.ds(r0 + off + 1, C2_CHUNK), :], w2_ref[di, 1],
                           preferred_element_type=f32)
        a2_ref[pl.ds(r0, C2_CHUNK), :] = (jnp.maximum(acc + b2_ref[...], 0.0)
                                          * bn1s_ref[...] + bn1b_ref[...])
        return c

    lax.fori_loop(0, R2 // C2_CHUNK, conv2_chunk, 0)

    # ---- 2x2 max-pool (stride 2): (24 x 23 wb) grid -> (12 x 11 wb) grid.
    for ho in range(12):
        re, ro = 2 * ho * WB1, (2 * ho + 1) * WB1
        ev = jnp.maximum(a2_ref[pl.ds(re, WBP, stride=2), :],
                         a2_ref[pl.ds(ro, WBP, stride=2), :])      # even width blocks
        od = jnp.maximum(a2_ref[pl.ds(re + 1, WBP, stride=2), :],
                         a2_ref[pl.ds(ro + 1, WBP, stride=2), :])  # odd width blocks
        out_rows = pl.ds(ho * WBP, WBP)
        p_ref[out_rows, 0:32] = jnp.maximum(ev[:, 0:32], ev[:, 32:64])
        p_ref[out_rows, 32:64] = jnp.maximum(ev[:, 64:96], ev[:, 96:128])
        p_ref[out_rows, 64:96] = jnp.maximum(od[:, 0:32], od[:, 32:64])
        p_ref[out_rows, 96:128] = jnp.maximum(od[:, 64:96], od[:, 96:128])
    p_ref[pl.ds(RP, RPP - RP), :] = jnp.zeros((RPP - RP, 128), f32)

    # ---- 3x3 conv on the 11-block-wide grid: 6 (rows,128)x(128,128) matmuls.
    def conv3x3(src_ref, rows, w_ref):
        acc = jnp.zeros((rows, 128), f32)
        for di in range(3):
            off = di * WBP
            acc += jnp.dot(src_ref[pl.ds(off, rows), :], w_ref[di, 0],
                           preferred_element_type=f32)
            acc += jnp.dot(src_ref[pl.ds(off + 1, rows), :], w_ref[di, 1],
                           preferred_element_type=f32)
        return acc

    # conv3 + ReLU
    a3_ref[pl.ds(0, R3), :] = jnp.maximum(conv3x3(p_ref, R3, w3_ref) + b3_ref[...], 0.0)
    a3_ref[pl.ds(R3, R3P - R3), :] = jnp.zeros((R3P - R3, 128), f32)

    # conv4 + ReLU + BN2
    a4_ref[pl.ds(0, R4), :] = (jnp.maximum(conv3x3(a3_ref, R4, w4_ref) + b4_ref[...], 0.0)
                               * bn2s_ref[...] + bn2b_ref[...])
    a4_ref[pl.ds(R4, R4P - R4), :] = jnp.zeros((R4P - R4, 128), f32)

    # conv5 + ReLU + BN3
    a5 = (jnp.maximum(conv3x3(a4_ref, R5, w5_ref) + b5_ref[...], 0.0)
          * bn3s_ref[...] + bn3b_ref[...])

    # ---- lane-dense feature gather: per h keep width blocks 0..9 (widths 0..39;
    #      the repacked fc1 weight has zero rows for the padded widths 38/39).
    for h in range(6):
        feat_ref[pl.ds(h * 10, 10), :] = a5[h * WBP:h * WBP + 10]


def _mlp_kernel(f_ref, w1_ref, b1_ref, w2_ref, b2_ref, w3_ref, b3_ref, out_ref, acc_ref):
    k = pl.program_id(0)

    @pl.when(k == 0)
    def _():
        acc_ref[...] = jnp.zeros_like(acc_ref)

    acc_ref[...] += jnp.dot(f_ref[...].astype(jnp.bfloat16), w1_ref[...],
                            preferred_element_type=jnp.float32)

    @pl.when(k == pl.num_programs(0) - 1)
    def _():
        # TODO(synk): F.dropout(p=0.5) after fc1/fc2 is stochastic (and active even
        # at eval in the torch code); treated as identity here.
        h1 = jnp.maximum(acc_ref[...] + b1_ref[...], 0.0)
        h2 = jnp.maximum(jnp.dot(h1, w2_ref[...], preferred_element_type=jnp.float32)
                         + b2_ref[...], 0.0)
        out_ref[...] = (jnp.dot(h2, w3_ref[...], preferred_element_type=jnp.float32)
                        + b3_ref[...])


# ========================= host-side layout packing ==========================

def _im2col_conv1(x):
    """(n, 1, 32, 96) -> (n, 648, 128): row = (h, w_block) of the conv1 output grid,
    lane = di*8 + w_off patch element (zero padded to 128 lanes / 648 rows)."""
    n = x.shape[0]
    img = x.reshape(n, H0, W0).astype(jnp.float32)
    cols = []
    for di in range(5):
        for woff in range(8):
            cols.append(img[:, di:di + 28, woff:woff + 89:4])   # (n, 28, 23)
    pat = jnp.stack(cols, axis=-1).reshape(n, R1, 40)
    return jnp.pad(pat, ((0, 0), (0, R1P - R1), (0, 128 - 40)))


def _pack_conv1(w1):
    """(25, 1, 32) conv1 taps -> (128, 128) im2col block weight.
    Row = di*8 + w_off (zero rows 40..127), lane = w_sub_out*32 + c_out."""
    zero = jnp.zeros((1, C), w1.dtype)
    rows = []
    for di in range(5):
        for woff in range(8):
            cols = []
            for so in range(4):
                dj = woff - so
                cols.append(w1[di * 5 + dj] if 0 <= dj < 5 else zero)
            rows.append(jnp.concatenate(cols, axis=1))           # (1, 128)
    return jnp.pad(jnp.concatenate(rows, axis=0), ((0, 128 - 40), (0, 0)))


def _pack_conv(w, kk):
    """(kk*kk, 32, 32) conv taps -> (kk, 2, 128, 128) lane-packed block weights.
    [di, a] maps input block (wb + a) lanes (w_sub_in, c_in) to output block wb
    lanes (w_sub_out, c_out) for height tap di, folding all width taps dj."""
    zero = jnp.zeros((C, C), w.dtype)
    blocks = []
    for di in range(kk):
        for off in (0, 4):
            rows = []
            for si in range(4):
                cols = []
                for so in range(4):
                    dj = si + off - so
                    cols.append(w[di * kk + dj] if 0 <= dj < kk else zero)
                rows.append(jnp.concatenate(cols, axis=1))        # (32, 128)
            blocks.append(jnp.concatenate(rows, axis=0))          # (128, 128)
    return jnp.stack(blocks, axis=0).reshape(kk, 2, 4 * C, 4 * C)


def _pack_fc1(w_fc1):
    """(7296, 1024) (h, w, c)-ordered fc1 weight -> (7680, 1024) matching the
    lane-dense packed features (width padded 38 -> 40 with zero rows)."""
    w = w_fc1.reshape(6, 38, C, FC1_OUT)
    return jnp.pad(w, ((0, 0), (0, 2), (0, 0), (0, 0))).reshape(FC1_IN_PACKED, FC1_OUT)


# ================================ forward ====================================

def gaze_train_forward(x, p):
    """x: (N, 1, 32, 96) float32 NCHW -> (N, 2) float32."""
    n = x.shape[0]
    assert x.shape[1:] == (1, H0, W0), "GazeTrain's fc1 (6*38*32) implies 1x32x96 inputs"

    # ---- cheap host-side, layout-only packing --------------------------------
    pin = _im2col_conv1(x)                                    # (n, 648, 128)
    w1p = _pack_conv1(p["w1"])
    w2p = _pack_conv(p["w2"], 5)
    w3p, w4p, w5p = (_pack_conv(p[k], 3) for k in ("w3", "w4", "w5"))

    tile4 = lambda v: jnp.tile(v.reshape(1, C), (1, 4))       # per-channel -> 128 lanes

    def bn_fold(prefix):
        s = p[prefix + "_gamma"] / jnp.sqrt(p[prefix + "_var"] + BN_EPS)
        return tile4(s), tile4(p[prefix + "_beta"] - p[prefix + "_mean"] * s)

    bn1s, bn1b = bn_fold("bn1")
    bn2s, bn2b = bn_fold("bn2")
    bn3s, bn3b = bn_fold("bn3")
    b1p, b2p, b3p, b4p, b5p = (tile4(p[k]) for k in ("b1", "b2", "b3", "b4", "b5"))

    wspec = lambda shape: pl.BlockSpec(shape, lambda b, _s=shape: (0,) * len(_s))

    conv_in_specs = [
        pl.BlockSpec((None, R1P, 128), lambda b: (b, 0, 0)),   # im2col input, per image
        wspec((128, 128)), wspec((1, 128)),                    # conv1
        wspec((5, 2, 128, 128)), wspec((1, 128)),              # conv2
        wspec((1, 128)), wspec((1, 128)),                      # bn1
        wspec((3, 2, 128, 128)), wspec((1, 128)),              # conv3
        wspec((3, 2, 128, 128)), wspec((1, 128)),              # conv4
        wspec((1, 128)), wspec((1, 128)),                      # bn2
        wspec((3, 2, 128, 128)), wspec((1, 128)),              # conv5
        wspec((1, 128)), wspec((1, 128)),                      # bn3
    ]

    feats = pl.pallas_call(
        _conv_stack_kernel,
        out_shape=jax.ShapeDtypeStruct((n, FEAT_ROWS, 128), jnp.float32),
        grid_spec=pltpu.PrefetchScalarGridSpec(
            num_scalar_prefetch=0,
            grid=(n,),
            in_specs=conv_in_specs,
            out_specs=pl.BlockSpec((None, FEAT_ROWS, 128), lambda b: (b, 0, 0)),
            scratch_shapes=[
                pltpu.VMEM((R1P, 128), jnp.float32),    # conv1 output
                pltpu.VMEM((R2, 128), jnp.float32),     # conv2 + bn1 output
                pltpu.VMEM((RPP, 128), jnp.float32),    # pooled
                pltpu.VMEM((R3P, 128), jnp.float32),    # conv3 output
                pltpu.VMEM((R4P, 128), jnp.float32),    # conv4 + bn2 output
            ],
        ),
        compiler_params=pltpu.CompilerParams(dimension_semantics=("parallel",)),
    )(pin, w1p, b1p, w2p, b2p, bn1s, bn1b, w3p, b3p, w4p, b4p, bn2s, bn2b,
      w5p, b5p, bn3s, bn3b)

    # contiguous reshape only (layout already lane-dense); fc1 weight rows are
    # scattered to this layout and stored bf16 (the MLP is fc1-bandwidth bound).
    feats2 = feats.reshape(n, FC1_IN_PACKED)
    w_fc1p = _pack_fc1(p["w_fc1"]).astype(jnp.bfloat16)

    tk = 2560                                                 # 7680 = 3 * 2560
    y = pl.pallas_call(
        _mlp_kernel,
        out_shape=jax.ShapeDtypeStruct((n, FC3_OUT), jnp.float32),
        grid_spec=pltpu.PrefetchScalarGridSpec(
            num_scalar_prefetch=0,
            grid=(FC1_IN_PACKED // tk,),
            in_specs=[
                pl.BlockSpec((n, tk), lambda k: (0, k)),
                pl.BlockSpec((tk, FC1_OUT), lambda k: (k, 0)),
                pl.BlockSpec((1, FC1_OUT), lambda k: (0, 0)),
                pl.BlockSpec((FC1_OUT, FC2_OUT), lambda k: (0, 0)),
                pl.BlockSpec((1, FC2_OUT), lambda k: (0, 0)),
                pl.BlockSpec((FC2_OUT, FC3_OUT), lambda k: (0, 0)),
                pl.BlockSpec((1, FC3_OUT), lambda k: (0, 0)),
            ],
            out_specs=pl.BlockSpec((n, FC3_OUT), lambda k: (0, 0)),
            scratch_shapes=[pltpu.VMEM((n, FC1_OUT), jnp.float32)],
        ),
        compiler_params=pltpu.CompilerParams(
            dimension_semantics=("arbitrary",),
            vmem_limit_bytes=32 * 1024 * 1024),
    )(feats2, w_fc1p, p["b_fc1"], p["w_fc2"], p["b_fc2"], p["w_fc3"], p["b_fc3"])
    return y


# ========================== params & pure-JAX reference ======================

def init_params(key):
    """Deterministic synthetic parameters in kernel-friendly layouts.

    Conv weights: (kh*kw, Cin, Cout)  (torch: (Cout, Cin, kh, kw));
    fc weights:   (in, out)           (torch: (out, in));
    fc1's input dim is (h, w, c)-ordered (torch flattens NCHW -> (c, h, w)), so a
    real checkpoint would additionally need its fc1 input rows permuted.
    """
    ks = jax.random.split(key, 28)
    it = iter(ks)

    def unif(k, shape, fan_in):
        b = 1.0 / float(np.sqrt(fan_in))
        return jax.random.uniform(k, shape, jnp.float32, -b, b)

    def conv(kk, cin, cout):
        fan = cin * kk * kk
        return unif(next(it), (kk * kk, cin, cout), fan), unif(next(it), (1, cout), fan)

    p = {}
    p["w1"], p["b1"] = conv(5, 1, C)
    p["w2"], p["b2"] = conv(5, C, C)
    p["w3"], p["b3"] = conv(3, C, C)
    p["w4"], p["b4"] = conv(3, C, C)
    p["w5"], p["b5"] = conv(3, C, C)
    for name in ("bn1", "bn2", "bn3"):
        p[name + "_gamma"] = jax.random.uniform(next(it), (C,), jnp.float32, 0.5, 1.5)
        p[name + "_beta"] = jax.random.uniform(next(it), (C,), jnp.float32, -0.5, 0.5)
        p[name + "_mean"] = jax.random.uniform(next(it), (C,), jnp.float32, -0.5, 0.5)
        p[name + "_var"] = jax.random.uniform(next(it), (C,), jnp.float32, 0.5, 1.5)
    p["w_fc1"] = unif(next(it), (FC1_IN, FC1_OUT), FC1_IN)
    p["b_fc1"] = unif(next(it), (1, FC1_OUT), FC1_IN)
    p["w_fc2"] = unif(next(it), (FC1_OUT, FC2_OUT), FC1_OUT)
    p["b_fc2"] = unif(next(it), (1, FC2_OUT), FC1_OUT)
    p["w_fc3"] = unif(next(it), (FC2_OUT, FC3_OUT), FC2_OUT)
    p["b_fc3"] = unif(next(it), (1, FC3_OUT), FC2_OUT)
    return p


def reference(x, p):
    """Pure-JAX forward matching the torch module (eval-mode BN, dropout = identity)."""
    hi = jax.lax.Precision.HIGHEST

    def conv(a, w, b, kk):
        nb, hh, ww, _ = a.shape
        ho, wo = hh - kk + 1, ww - kk + 1
        out = jnp.zeros((nb, ho, wo, w.shape[-1]), jnp.float32)
        for di in range(kk):
            for dj in range(kk):
                out = out + jnp.einsum("nhwc,cd->nhwd", a[:, di:di + ho, dj:dj + wo, :],
                                       w[di * kk + dj], precision=hi)
        return out + b.reshape(1, 1, 1, -1)

    def bn(a, name):
        return ((a - p[name + "_mean"]) / jnp.sqrt(p[name + "_var"] + BN_EPS)
                * p[name + "_gamma"] + p[name + "_beta"])

    relu = lambda z: jnp.maximum(z, 0.0)

    a = x.astype(jnp.float32).transpose(0, 2, 3, 1)                 # NCHW -> NHWC
    a = relu(conv(a, p["w1"], p["b1"], 5))
    a = bn(relu(conv(a, p["w2"], p["b2"], 5)), "bn1")
    nb, hh, ww, cc = a.shape
    a = a.reshape(nb, hh // 2, 2, ww // 2, 2, cc).max(axis=(2, 4))  # MaxPool2d(2)
    a = relu(conv(a, p["w3"], p["b3"], 3))
    a = bn(relu(conv(a, p["w4"], p["b4"], 3)), "bn2")
    a = bn(relu(conv(a, p["w5"], p["b5"], 3)), "bn3")
    f = a.reshape(nb, -1)                                           # (h, w, c)-ordered
    h1 = relu(jnp.dot(f, p["w_fc1"], precision=hi) + p["b_fc1"])
    h2 = relu(jnp.dot(h1, p["w_fc2"], precision=hi) + p["b_fc2"])
    return jnp.dot(h2, p["w_fc3"], precision=hi) + p["b_fc3"]


if __name__ == "__main__":
    key = jax.random.PRNGKey(0)
    k_param, k_x = jax.random.split(key)
    params = init_params(k_param)

    batch = 2
    x = jax.random.normal(k_x, (batch, 1, H0, W0), jnp.float32)

    y = jax.block_until_ready(gaze_train_forward(x, params))
    y_ref = jax.block_until_ready(reference(x, params))

    # tolerance accommodates MXU bf16-pass accumulation and the bf16-stored fc1 weight
    np.testing.assert_allclose(np.asarray(y), np.asarray(y_ref), rtol=2e-2, atol=2e-2)
    print("KERNEL_OK")
</pallas_src>

<mosaic_0001>
module attributes {stable_mosaic.version = 11 : i64} {
  func.func @_conv_stack_kernel(%arg0: i32, %arg1: memref<1x648x128xf32, #tpu.memory_space<vmem>>, %arg2: memref<128x128xf32, #tpu.memory_space<vmem>>, %arg3: memref<1x128xf32, #tpu.memory_space<vmem>>, %arg4: memref<5x2x128x128xf32, #tpu.memory_space<vmem>>, %arg5: memref<1x128xf32, #tpu.memory_space<vmem>>, %arg6: memref<1x128xf32, #tpu.memory_space<vmem>>, %arg7: memref<1x128xf32, #tpu.memory_space<vmem>>, %arg8: memref<3x2x128x128xf32, #tpu.memory_space<vmem>>, %arg9: memref<1x128xf32, #tpu.memory_space<vmem>>, %arg10: memref<3x2x128x128xf32, #tpu.memory_space<vmem>>, %arg11: memref<1x128xf32, #tpu.memory_space<vmem>>, %arg12: memref<1x128xf32, #tpu.memory_space<vmem>>, %arg13: memref<1x128xf32, #tpu.memory_space<vmem>>, %arg14: memref<3x2x128x128xf32, #tpu.memory_space<vmem>>, %arg15: memref<1x128xf32, #tpu.memory_space<vmem>>, %arg16: memref<1x128xf32, #tpu.memory_space<vmem>>, %arg17: memref<1x128xf32, #tpu.memory_space<vmem>>, %arg18: memref<1x60x128xf32, #tpu.memory_space<vmem>>, %arg19: memref<648x128xf32, #tpu.memory_space<vmem>>, %arg20: memref<552x128xf32, #tpu.memory_space<vmem>>, %arg21: memref<136x128xf32, #tpu.memory_space<vmem>>, %arg22: memref<112x128xf32, #tpu.memory_space<vmem>>, %arg23: memref<96x128xf32, #tpu.memory_space<vmem>>) attributes {dimension_semantics = [#tpu.dimension_semantics<parallel>], iteration_bounds = array<i64: 2>, scalar_prefetch = 0 : i64, scratch_operands = 5 : i64, tpu.core_type = #tpu.core_type<tc>, window_params = [{transform_indices = @transform_0, window_bounds = array<i64: 1, 648, 128>}, {pipeline_mode = #tpu.pipeline_mode<synchronous>, transform_indices = @transform_1, window_bounds = array<i64: 128, 128>}, {pipeline_mode = #tpu.pipeline_mode<synchronous>, transform_indices = @transform_2, window_bounds = array<i64: 1, 128>}, {pipeline_mode = #tpu.pipeline_mode<synchronous>, transform_indices = @transform_3, window_bounds = array<i64: 5, 2, 128, 128>}, {pipeline_mode = #tpu.pipeline_mode<synchronous>, transform_indices = @transform_4, window_bounds = array<i64: 1, 128>}, {pipeline_mode = #tpu.pipeline_mode<synchronous>, transform_indices = @transform_5, window_bounds = array<i64: 1, 128>}, {pipeline_mode = #tpu.pipeline_mode<synchronous>, transform_indices = @transform_6, window_bounds = array<i64: 1, 128>}, {pipeline_mode = #tpu.pipeline_mode<synchronous>, transform_indices = @transform_7, window_bounds = array<i64: 3, 2, 128, 128>}, {pipeline_mode = #tpu.pipeline_mode<synchronous>, transform_indices = @transform_8, window_bounds = array<i64: 1, 128>}, {pipeline_mode = #tpu.pipeline_mode<synchronous>, transform_indices = @transform_9, window_bounds = array<i64: 3, 2, 128, 128>}, {pipeline_mode = #tpu.pipeline_mode<synchronous>, transform_indices = @transform_10, window_bounds = array<i64: 1, 128>}, {pipeline_mode = #tpu.pipeline_mode<synchronous>, transform_indices = @transform_11, window_bounds = array<i64: 1, 128>}, {pipeline_mode = #tpu.pipeline_mode<synchronous>, transform_indices = @transform_12, window_bounds = array<i64: 1, 128>}, {pipeline_mode = #tpu.pipeline_mode<synchronous>, transform_indices = @transform_13, window_bounds = array<i64: 3, 2, 128, 128>}, {pipeline_mode = #tpu.pipeline_mode<synchronous>, transform_indices = @transform_14, window_bounds = array<i64: 1, 128>}, {pipeline_mode = #tpu.pipeline_mode<synchronous>, transform_indices = @transform_15, window_bounds = array<i64: 1, 128>}, {pipeline_mode = #tpu.pipeline_mode<synchronous>, transform_indices = @transform_16, window_bounds = array<i64: 1, 128>}, {transform_indices = @transform_17, window_bounds = array<i64: 1, 60, 128>}]} {
    %c0_i32 = arith.constant 0 : i32
    %c3_i32 = arith.constant 3 : i32
    %0 = arith.addi %c0_i32, %c3_i32 : i32
    %c1_i32 = arith.constant 1 : i32
    scf.for %arg24 = %c0_i32 to %0 step %c1_i32  : i32 {
      %c216_i32 = arith.constant 216 : i32
      %418 = arith.muli %arg24, %c216_i32 : i32
      %419 = tpu.assume_multiple %418, 8 : i32
      %c0_303 = arith.constant 0 : index
      %420 = arith.index_cast %419 : i32 to index
      %c0_304 = arith.constant 0 : index
      %421 = vector.load %arg1[%c0_303, %420, %c0_304] : memref<1x648x128xf32, #tpu.memory_space<vmem>>, vector<1x216x128xf32>
      %422 = vector.shape_cast %421 : vector<1x216x128xf32> to vector<216x128xf32>
      %c0_305 = arith.constant 0 : index
      %c0_306 = arith.constant 0 : index
      %423 = vector.load %arg2[%c0_305, %c0_306] : memref<128x128xf32, #tpu.memory_space<vmem>>, vector<128x128xf32>
      %cst_307 = arith.constant dense<0.000000e+00> : vector<216x128xf32>
      %424 = tpu.matmul %422, %423, %cst_307 {dimension_numbers = #tpu.dot_dimension_numbers<[1], [0], [0], [1], [0, 0, 1, 1], [], []>} : vector<216x128xf32>, vector<128x128xf32>, vector<216x128xf32> -> vector<216x128xf32>
      %c0_308 = arith.constant 0 : index
      %c0_309 = arith.constant 0 : index
      %425 = vector.load %arg3[%c0_308, %c0_309] : memref<1x128xf32, #tpu.memory_space<vmem>>, vector<1x128xf32>
      %426 = vector.broadcast %425 : vector<1x128xf32> to vector<216x128xf32>
      %427 = arith.addf %424, %426 : vector<216x128xf32>
      %cst_310 = arith.constant 0.000000e+00 : f32
      %428 = vector.broadcast %cst_310 : f32 to vector<216x128xf32>
      %429 = arith.maximumf %427, %428 : vector<216x128xf32>
      %430 = arith.index_cast %419 : i32 to index
      %c0_311 = arith.constant 0 : index
      %431 = vector.load %arg19[%430, %c0_311] : memref<648x128xf32, #tpu.memory_space<vmem>>, vector<216x128xf32>
      tpu.vector_store %arg19[%430, %c0_311], %429 {strides = array<i32>} : memref<648x128xf32, #tpu.memory_space<vmem>>, vector<216x128xf32>,
    }
    %c3_i32_0 = arith.constant 3 : i32
    %c0_i32_1 = arith.constant 0 : i32
    %c3_i32_2 = arith.constant 3 : i32
    %1 = arith.addi %c0_i32_1, %c3_i32_2 : i32
    %c1_i32_3 = arith.constant 1 : i32
    scf.for %arg24 = %c0_i32_1 to %1 step %c1_i32_3  : i32 {
      %c184_i32 = arith.constant 184 : i32
      %418 = arith.muli %arg24, %c184_i32 : i32
      %419 = tpu.assume_multiple %418, 8 : i32
      %cst_303 = arith.constant 0.000000e+00 : f32
      %420 = vector.broadcast %cst_303 : f32 to vector<184x128xf32>
      %c0_i32_304 = arith.constant 0 : i32
      %421 = arith.addi %419, %c0_i32_304 : i32
      %422 = arith.index_cast %421 : i32 to index
      %c0_305 = arith.constant 0 : index
      %423 = vector.load %arg19[%422, %c0_305] : memref<648x128xf32, #tpu.memory_space<vmem>>, vector<184x128xf32>
      %c0_306 = arith.constant 0 : index
      %c0_307 = arith.constant 0 : index
      %c0_308 = arith.constant 0 : index
      %c0_309 = arith.constant 0 : index
      %424 = vector.load %arg4[%c0_306, %c0_307, %c0_308, %c0_309] : memref<5x2x128x128xf32, #tpu.memory_space<vmem>>, vector<1x1x128x128xf32>
      %425 = vector.shape_cast %424 : vector<1x1x128x128xf32> to vector<128x128xf32>
      %cst_310 = arith.constant dense<0.000000e+00> : vector<184x128xf32>
      %426 = tpu.matmul %423, %425, %cst_310 {dimension_numbers = #tpu.dot_dimension_numbers<[1], [0], [0], [1], [0, 0, 1, 1], [], []>} : vector<184x128xf32>, vector<128x128xf32>, vector<184x128xf32> -> vector<184x128xf32>
      %427 = arith.addf %420, %426 : vector<184x128xf32>
      %c0_i32_311 = arith.constant 0 : i32
      %428 = arith.addi %419, %c0_i32_311 : i32
      %c1_i32_312 = arith.constant 1 : i32
      %429 = arith.addi %428, %c1_i32_312 : i32
      %430 = arith.index_cast %429 : i32 to index
      %c0_313 = arith.constant 0 : index
      %431 = vector.load %arg19[%430, %c0_313] : memref<648x128xf32, #tpu.memory_space<vmem>>, vector<184x128xf32>
      %c0_314 = arith.constant 0 : index
      %c1_315 = arith.constant 1 : index
      %c0_316 = arith.constant 0 : index
      %c0_317 = arith.constant 0 : index
      %432 = vector.load %arg4[%c0_314, %c1_315, %c0_316, %c0_317] : memref<5x2x128x128xf32, #tpu.memory_space<vmem>>, vector<1x1x128x128xf32>
      %433 = vector.shape_cast %432 : vector<1x1x128x128xf32> to vector<128x128xf32>
      %cst_318 = arith.constant dense<0.000000e+00> : vector<184x128xf32>
      %434 = tpu.matmul %431, %433, %cst_318 {dimension_numbers = #tpu.dot_dimension_numbers<[1], [0], [0], [1], [0, 0, 1, 1], [], []>} : vector<184x128xf32>, vector<128x128xf32>, vector<184x128xf32> -> vector<184x128xf32>
      %435 = arith.addf %427, %434 : vector<184x128xf32>
      %c23_i32 = arith.constant 23 : i32
      %436 = arith.addi %419, %c23_i32 : i32
      %437 = arith.index_cast %436 : i32 to index
      %c0_319 = arith.constant 0 : index
      %438 = vector.load %arg19[%437, %c0_319] : memref<648x128xf32, #tpu.memory_space<vmem>>, vector<184x128xf32>
      %c1_320 = arith.constant 1 : index
      %c0_321 = arith.constant 0 : index
      %c0_322 = arith.constant 0 : index
      %c0_323 = arith.constant 0 : index
      %439 = vector.load %arg4[%c1_320, %c0_321, %c0_322, %c0_323] : memref<5x2x128x128xf32, #tpu.memory_space<vmem>>, vector<1x1x128x128xf32>
      %440 = vector.shape_cast %439 : vector<1x1x128x128xf32> to vector<128x128xf32>
      %cst_324 = arith.constant dense<0.000000e+00> : vector<184x128xf32>
      %441 = tpu.matmul %438, %440, %cst_324 {dimension_numbers = #tpu.dot_dimension_numbers<[1], [0], [0], [1], [0, 0, 1, 1], [], []>} : vector<184x128xf32>, vector<128x128xf32>, vector<184x128xf32> -> vector<184x128xf32>
      %442 = arith.addf %435, %441 : vector<184x128xf32>
      %c23_i32_325 = arith.constant 23 : i32
      %443 = arith.addi %419, %c23_i32_325 : i32
      %c1_i32_326 = arith.constant 1 : i32
      %444 = arith.addi %443, %c1_i32_326 : i32
      %445 = arith.index_cast %444 : i32 to index
      %c0_327 = arith.constant 0 : index
      %446 = vector.load %arg19[%445, %c0_327] : memref<648x128xf32, #tpu.memory_space<vmem>>, vector<184x128xf32>
      %c1_328 = arith.constant 1 : index
      %c1_329 = arith.constant 1 : index
      %c0_330 = arith.constant 0 : index
      %c0_331 = arith.constant 0 : index
      %447 = vector.load %arg4[%c1_328, %c1_329, %c0_330, %c0_331] : memref<5x2x128x128xf32, #tpu.memory_space<vmem>>, vector<1x1x128x128xf32>
      %448 = vector.shape_cast %447 : vector<1x1x128x128xf32> to vector<128x128xf32>
      %cst_332 = arith.constant dense<0.000000e+00> : vector<184x128xf32>
      %449 = tpu.matmul %446, %448, %cst_332 {dimension_numbers = #tpu.dot_dimension_numbers<[1], [0], [0], [1], [0, 0, 1, 1], [], []>} : vector<184x128xf32>, vector<128x128xf32>, vector<184x128xf32> -> vector<184x128xf32>
      %450 = arith.addf %442, %449 : vector<184x128xf32>
      %c46_i32 = arith.constant 46 : i32
      %451 = arith.addi %419, %c46_i32 : i32
      %452 = arith.index_cast %451 : i32 to index
      %c0_333 = arith.constant 0 : index
      %453 = vector.load %arg19[%452, %c0_333] : memref<648x128xf32, #tpu.memory_space<vmem>>, vector<184x128xf32>
      %c2_334 = arith.constant 2 : index
      %c0_335 = arith.constant 0 : index
      %c0_336 = arith.constant 0 : index
      %c0_337 = arith.constant 0 : index
      %454 = vector.load %arg4[%c2_334, %c0_335, %c0_336, %c0_337] : memref<5x2x128x128xf32, #tpu.memory_space<vmem>>, vector<1x1x128x128xf32>
      %455 = vector.shape_cast %454 : vector<1x1x128x128xf32> to vector<128x128xf32>
      %cst_338 = arith.constant dense<0.000000e+00> : vector<184x128xf32>
      %456 = tpu.matmul %453, %455, %cst_338 {dimension_numbers = #tpu.dot_dimension_numbers<[1], [0], [0], [1], [0, 0, 1, 1], [], []>} : vector<184x128xf32>, vector<128x128xf32>, vector<184x128xf32> -> vector<184x128xf32>
      %457 = arith.addf %450, %456 : vector<184x128xf32>
      %c46_i32_339 = arith.constant 46 : i32
      %458 = arith.addi %419, %c46_i32_339 : i32
      %c1_i32_340 = arith.constant 1 : i32
      %459 = arith.addi %458, %c1_i32_340 : i32
      %460 = arith.index_cast %459 : i32 to index
      %c0_341 = arith.constant 0 : index
      %461 = vector.load %arg19[%460, %c0_341] : memref<648x128xf32, #tpu.memory_space<vmem>>, vector<184x128xf32>
      %c2_342 = arith.constant 2 : index
      %c1_343 = arith.constant 1 : index
      %c0_344 = arith.constant 0 : index
      %c0_345 = arith.constant 0 : index
      %462 = vector.load %arg4[%c2_342, %c1_343, %c0_344, %c0_345] : memref<5x2x128x128xf32, #tpu.memory_space<vmem>>, vector<1x1x128x128xf32>
      %463 = vector.shape_cast %462 : vector<1x1x128x128xf32> to vector<128x128xf32>
      %cst_346 = arith.constant dense<0.000000e+00> : vector<184x128xf32>
      %464 = tpu.matmul %461, %463, %cst_346 {dimension_numbers = #tpu.dot_dimension_numbers<[1], [0], [0], [1], [0, 0, 1, 1], [], []>} : vector<184x128xf32>, vector<128x128xf32>, vector<184x128xf32> -> vector<184x128xf32>
      %465 = arith.addf %457, %464 : vector<184x128xf32>
      %c69_i32 = arith.constant 69 : i32
      %466 = arith.addi %419, %c69_i32 : i32
      %467 = arith.index_cast %466 : i32 to index
      %c0_347 = arith.constant 0 : index
      %468 = vector.load %arg19[%467, %c0_347] : memref<648x128xf32, #tpu.memory_space<vmem>>, vector<184x128xf32>
      %c3 = arith.constant 3 : index
      %c0_348 = arith.constant 0 : index
      %c0_349 = arith.constant 0 : index
      %c0_350 = arith.constant 0 : index
      %469 = vector.load %arg4[%c3, %c0_348, %c0_349, %c0_350] : memref<5x2x128x128xf32, #tpu.memory_space<vmem>>, vector<1x1x128x128xf32>
      %470 = vector.shape_cast %469 : vector<1x1x128x128xf32> to vector<128x128xf32>
      %cst_351 = arith.constant dense<0.000000e+00> : vector<184x128xf32>
      %471 = tpu.matmul %468, %470, %cst_351 {dimension_numbers = #tpu.dot_dimension_numbers<[1], [0], [0], [1], [0, 0, 1, 1], [], []>} : vector<184x128xf32>, vector<128x128xf32>, vector<184x128xf32> -> vector<184x128xf32>
      %472 = arith.addf %465, %471 : vector<184x128xf32>
      %c69_i32_352 = arith.constant 69 : i32
      %473 = arith.addi %419, %c69_i32_352 : i32
      %c1_i32_353 = arith.constant 1 : i32
      %474 = arith.addi %473, %c1_i32_353 : i32
      %475 = arith.index_cast %474 : i32 to index
      %c0_354 = arith.constant 0 : index
      %476 = vector.load %arg19[%475, %c0_354] : memref<648x128xf32, #tpu.memory_space<vmem>>, vector<184x128xf32>
      %c3_355 = arith.constant 3 : index
      %c1_356 = arith.constant 1 : index
      %c0_357 = arith.constant 0 : index
      %c0_358 = arith.constant 0 : index
      %477 = vector.load %arg4[%c3_355, %c1_356, %c0_357, %c0_358] : memref<5x2x128x128xf32, #tpu.memory_space<vmem>>, vector<1x1x128x128xf32>
      %478 = vector.shape_cast %477 : vector<1x1x128x128xf32> to vector<128x128xf32>
      %cst_359 = arith.constant dense<0.000000e+00> : vector<184x128xf32>
      %479 = tpu.matmul %476, %478, %cst_359 {dimension_numbers = #tpu.dot_dimension_numbers<[1], [0], [0], [1], [0, 0, 1, 1], [], []>} : vector<184x128xf32>, vector<128x128xf32>, vector<184x128xf32> -> vector<184x128xf32>
      %480 = arith.addf %472, %479 : vector<184x128xf32>
      %c92_i32 = arith.constant 92 : i32
      %481 = arith.addi %419, %c92_i32 : i32
      %482 = arith.index_cast %481 : i32 to index
      %c0_360 = arith.constant 0 : index
      %483 = vector.load %arg19[%482, %c0_360] : memref<648x128xf32, #tpu.memory_space<vmem>>, vector<184x128xf32>
      %c4 = arith.constant 4 : index
      %c0_361 = arith.constant 0 : index
      %c0_362 = arith.constant 0 : index
      %c0_363 = arith.constant 0 : index
      %484 = vector.load %arg4[%c4, %c0_361, %c0_362, %c0_363] : memref<5x2x128x128xf32, #tpu.memory_space<vmem>>, vector<1x1x128x128xf32>
      %485 = vector.shape_cast %484 : vector<1x1x128x128xf32> to vector<128x128xf32>
      %cst_364 = arith.constant dense<0.000000e+00> : vector<184x128xf32>
      %486 = tpu.matmul %483, %485, %cst_364 {dimension_numbers = #tpu.dot_dimension_numbers<[1], [0], [0], [1], [0, 0, 1, 1], [], []>} : vector<184x128xf32>, vector<128x128xf32>, vector<184x128xf32> -> vector<184x128xf32>
      %487 = arith.addf %480, %486 : vector<184x128xf32>
      %c92_i32_365 = arith.constant 92 : i32
      %488 = arith.addi %419, %c92_i32_365 : i32
      %c1_i32_366 = arith.constant 1 : i32
      %489 = arith.addi %488, %c1_i32_366 : i32
      %490 = arith.index_cast %489 : i32 to index
      %c0_367 = arith.constant 0 : index
      %491 = vector.load %arg19[%490, %c0_367] : memref<648x128xf32, #tpu.memory_space<vmem>>, vector<184x128xf32>
      %c4_368 = arith.constant 4 : index
      %c1_369 = arith.constant 1 : index
      %c0_370 = arith.constant 0 : index
      %c0_371 = arith.constant 0 : index
      %492 = vector.load %arg4[%c4_368, %c1_369, %c0_370, %c0_371] : memref<5x2x128x128xf32, #tpu.memory_space<vmem>>, vector<1x1x128x128xf32>
      %493 = vector.shape_cast %492 : vector<1x1x128x128xf32> to vector<128x128xf32>
      %cst_372 = arith.constant dense<0.000000e+00> : vector<184x128xf32>
      %494 = tpu.matmul %491, %493, %cst_372 {dimension_numbers = #tpu.dot_dimension_numbers<[1], [0], [0], [1], [0, 0, 1, 1], [], []>} : vector<184x128xf32>, vector<128x128xf32>, vector<184x128xf32> -> vector<184x128xf32>
      %495 = arith.addf %487, %494 : vector<184x128xf32>
      %c0_373 = arith.constant 0 : index
      %c0_374 = arith.constant 0 : index
      %496 = vector.load %arg5[%c0_373, %c0_374] : memref<1x128xf32, #tpu.memory_space<vmem>>, vector<1x128xf32>
      %497 = vector.broadcast %496 : vector<1x128xf32> to vector<184x128xf32>
      %498 = arith.addf %495, %497 : vector<184x128xf32>
      %cst_375 = arith.constant 0.000000e+00 : f32
      %499 = vector.broadcast %cst_375 : f32 to vector<184x128xf32>
      %500 = arith.maximumf %498, %499 : vector<184x128xf32>
      %c0_376 = arith.constant 0 : index
      %c0_377 = arith.constant 0 : index
      %501 = vector.load %arg6[%c0_376, %c0_377] : memref<1x128xf32, #tpu.memory_space<vmem>>, vector<1x128xf32>
      %502 = vector.broadcast %501 : vector<1x128xf32> to vector<184x128xf32>
      %503 = arith.mulf %500, %502 : vector<184x128xf32>
      %c0_378 = arith.constant 0 : index
      %c0_379 = arith.constant 0 : index
      %504 = vector.load %arg7[%c0_378, %c0_379] : memref<1x128xf32, #tpu.memory_space<vmem>>, vector<1x128xf32>
      %505 = vector.broadcast %504 : vector<1x128xf32> to vector<184x128xf32>
      %506 = arith.addf %503, %505 : vector<184x128xf32>
      %507 = arith.index_cast %419 : i32 to index
      %c0_380 = arith.constant 0 : index
      %508 = vector.load %arg20[%507, %c0_380] : memref<552x128xf32, #tpu.memory_space<vmem>>, vector<184x128xf32>
      tpu.vector_store %arg20[%507, %c0_380], %506 {strides = array<i32>} : memref<552x128xf32, #tpu.memory_space<vmem>>, vector<184x128xf32>,
    }
    %c3_i32_4 = arith.constant 3 : i32
    %c0 = arith.constant 0 : index
    %c0_5 = arith.constant 0 : index
    %2 = tpu.strided_load %arg20[%c0, %c0_5] {strides = array<i32: 2, 1>} : memref<552x128xf32, #tpu.memory_space<vmem>>, vector<11x128xf32>
    %c23 = arith.constant 23 : index
    %c0_6 = arith.constant 0 : index
    %3 = tpu.strided_load %arg20[%c23, %c0_6] {strides = array<i32: 2, 1>} : memref<552x128xf32, #tpu.memory_space<vmem>>, vector<11x128xf32>
    %4 = arith.maximumf %2, %3 : vector<11x128xf32>
    %c1 = arith.constant 1 : index
    %c0_7 = arith.constant 0 : index
    %5 = tpu.strided_load %arg20[%c1, %c0_7] {strides = array<i32: 2, 1>} : memref<552x128xf32, #tpu.memory_space<vmem>>, vector<11x128xf32>
    %c24 = arith.constant 24 : index
    %c0_8 = arith.constant 0 : index
    %6 = tpu.strided_load %arg20[%c24, %c0_8] {strides = array<i32: 2, 1>} : memref<552x128xf32, #tpu.memory_space<vmem>>, vector<11x128xf32>
    %7 = arith.maximumf %5, %6 : vector<11x128xf32>
    %8 = vector.extract_strided_slice %4 {offsets = [0, 0], sizes = [11, 32], strides = [1, 1]} : vector<11x128xf32> to vector<11x32xf32>
    %9 = vector.extract_strided_slice %4 {offsets = [0, 32], sizes = [11, 32], strides = [1, 1]} : vector<11x128xf32> to vector<11x32xf32>
    %10 = arith.maximumf %8, %9 : vector<11x32xf32>
    %c0_9 = arith.constant 0 : index
    %c0_10 = arith.constant 0 : index
    %11 = vector.load %arg21[%c0_9, %c0_10] : memref<136x128xf32, #tpu.memory_space<vmem>>, vector<11x32xf32>
    tpu.vector_store %arg21[%c0_9, %c0_10], %10 {strides = array<i32>} : memref<136x128xf32, #tpu.memory_space<vmem>>, vector<11x32xf32>,
    %12 = vector.extract_strided_slice %4 {offsets = [0, 64], sizes = [11, 32], strides = [1, 1]} : vector<11x128xf32> to vector<11x32xf32>
    %13 = vector.extract_strided_slice %4 {offsets = [0, 96], sizes = [11, 32], strides = [1, 1]} : vector<11x128xf32> to vector<11x32xf32>
    %14 = arith.maximumf %12, %13 : vector<11x32xf32>
    %c0_11 = arith.constant 0 : index
    %c32 = arith.constant 32 : index
    %15 = vector.load %arg21[%c0_11, %c32] : memref<136x128xf32, #tpu.memory_space<vmem>>, vector<11x32xf32>
    tpu.vector_store %arg21[%c0_11, %c32], %14 {strides = array<i32>} : memref<136x128xf32, #tpu.memory_space<vmem>>, vector<11x32xf32>,
    %16 = vector.extract_strided_slice %7 {offsets = [0, 0], sizes = [11, 32], strides = [1, 1]} : vector<11x128xf32> to vector<11x32xf32>
    %17 = vector.extract_strided_slice %7 {offsets = [0, 32], sizes = [11, 32], strides = [1, 1]} : vector<11x128xf32> to vector<11x32xf32>
    %18 = arith.maximumf %16, %17 : vector<11x32xf32>
    %c0_12 = arith.constant 0 : index
    %c64 = arith.constant 64 : index
    %19 = vector.load %arg21[%c0_12, %c64] : memref<136x128xf32, #tpu.memory_space<vmem>>, vector<11x32xf32>
    tpu.vector_store %arg21[%c0_12, %c64], %18 {strides = array<i32>} : memref<136x128xf32, #tpu.memory_space<vmem>>, vector<11x32xf32>,
    %20 = vector.extract_strided_slice %7 {offsets = [0, 64], sizes = [11, 32], strides = [1, 1]} : vector<11x128xf32> to vector<11x32xf32>
    %21 = vector.extract_strided_slice %7 {offsets = [0, 96], sizes = [11, 32], strides = [1, 1]} : vector<11x128xf32> to vector<11x32xf32>
    %22 = arith.maximumf %20, %21 : vector<11x32xf32>
    %c0_13 = arith.constant 0 : index
    %c96 = arith.constant 96 : index
    %23 = vector.load %arg21[%c0_13, %c96] : memref<136x128xf32, #tpu.memory_space<vmem>>, vector<11x32xf32>
    tpu.vector_store %arg21[%c0_13, %c96], %22 {strides = array<i32>} : memref<136x128xf32, #tpu.memory_space<vmem>>, vector<11x32xf32>,
    %c46 = arith.constant 46 : index
    %c0_14 = arith.constant 0 : index
    %24 = tpu.strided_load %arg20[%c46, %c0_14] {strides = array<i32: 2, 1>} : memref<552x128xf32, #tpu.memory_space<vmem>>, vector<11x128xf32>
    %c69 = arith.constant 69 : index
    %c0_15 = arith.constant 0 : index
    %25 = tpu.strided_load %arg20[%c69, %c0_15] {strides = array<i32: 2, 1>} : memref<552x128xf32, #tpu.memory_space<vmem>>, vector<11x128xf32>
    %26 = arith.maximumf %24, %25 : vector<11x128xf32>
    %c47 = arith.constant 47 : index
    %c0_16 = arith.constant 0 : index
    %27 = tpu.strided_load %arg20[%c47, %c0_16] {strides = array<i32: 2, 1>} : memref<552x128xf32, #tpu.memory_space<vmem>>, vector<11x128xf32>
    %c70 = arith.constant 70 : index
    %c0_17 = arith.constant 0 : index
    %28 = tpu.strided_load %arg20[%c70, %c0_17] {strides = array<i32: 2, 1>} : memref<552x128xf32, #tpu.memory_space<vmem>>, vector<11x128xf32>
    %29 = arith.maximumf %27, %28 : vector<11x128xf32>
    %30 = vector.extract_strided_slice %26 {offsets = [0, 0], sizes = [11, 32], strides = [1, 1]} : vector<11x128xf32> to vector<11x32xf32>
    %31 = vector.extract_strided_slice %26 {offsets = [0, 32], sizes = [11, 32], strides = [1, 1]} : vector<11x128xf32> to vector<11x32xf32>
    %32 = arith.maximumf %30, %31 : vector<11x32xf32>
    %c11 = arith.constant 11 : index
    %c0_18 = arith.constant 0 : index
    %33 = vector.load %arg21[%c11, %c0_18] : memref<136x128xf32, #tpu.memory_space<vmem>>, vector<11x32xf32>
    tpu.vector_store %arg21[%c11, %c0_18], %32 {strides = array<i32>} : memref<136x128xf32, #tpu.memory_space<vmem>>, vector<11x32xf32>,
    %34 = vector.extract_strided_slice %26 {offsets = [0, 64], sizes = [11, 32], strides = [1, 1]} : vector<11x128xf32> to vector<11x32xf32>
    %35 = vector.extract_strided_slice %26 {offsets = [0, 96], sizes = [11, 32], strides = [1, 1]} : vector<11x128xf32> to vector<11x32xf32>
    %36 = arith.maximumf %34, %35 : vector<11x32xf32>
    %c11_19 = arith.constant 11 : index
    %c32_20 = arith.constant 32 : index
    %37 = vector.load %arg21[%c11_19, %c32_20] : memref<136x128xf32, #tpu.memory_space<vmem>>, vector<11x32xf32>
    tpu.vector_store %arg21[%c11_19, %c32_20], %36 {strides = array<i32>} : memref<136x128xf32, #tpu.memory_space<vmem>>, vector<11x32xf32>,
    %38 = vector.extract_strided_slice %29 {offsets = [0, 0], sizes = [11, 32], strides = [1, 1]} : vector<11x128xf32> to vector<11x32xf32>
    %39 = vector.extract_strided_slice %29 {offsets = [0, 32], sizes = [11, 32], strides = [1, 1]} : vector<11x128xf32> to vector<11x32xf32>
    %40 = arith.maximumf %38, %39 : vector<11x32xf32>
    %c11_21 = arith.constant 11 : index
    %c64_22 = arith.constant 64 : index
    %41 = vector.load %arg21[%c11_21, %c64_22] : memref<136x128xf32, #tpu.memory_space<vmem>>, vector<11x32xf32>
    tpu.vector_store %arg21[%c11_21, %c64_22], %40 {strides = array<i32>} : memref<136x128xf32, #tpu.memory_space<vmem>>, vector<11x32xf32>,
    %42 = vector.extract_strided_slice %29 {offsets = [0, 64], sizes = [11, 32], strides = [1, 1]} : vector<11x128xf32> to vector<11x32xf32>
    %43 = vector.extract_strided_slice %29 {offsets = [0, 96], sizes = [11, 32], strides = [1, 1]} : vector<11x128xf32> to vector<11x32xf32>
    %44 = arith.maximumf %42, %43 : vector<11x32xf32>
    %c11_23 = arith.constant 11 : index
    %c96_24 = arith.constant 96 : index
    %45 = vector.load %arg21[%c11_23, %c96_24] : memref<136x128xf32, #tpu.memory_space<vmem>>, vector<11x32xf32>
    tpu.vector_store %arg21[%c11_23, %c96_24], %44 {strides = array<i32>} : memref<136x128xf32, #tpu.memory_space<vmem>>, vector<11x32xf32>,
    %c92 = arith.constant 92 : index
    %c0_25 = arith.constant 0 : index
    %46 = tpu.strided_load %arg20[%c92, %c0_25] {strides = array<i32: 2, 1>} : memref<552x128xf32, #tpu.memory_space<vmem>>, vector<11x128xf32>
    %c115 = arith.constant 115 : index
    %c0_26 = arith.constant 0 : index
    %47 = tpu.strided_load %arg20[%c115, %c0_26] {strides = array<i32: 2, 1>} : memref<552x128xf32, #tpu.memory_space<vmem>>, vector<11x128xf32>
    %48 = arith.maximumf %46, %47 : vector<11x128xf32>
    %c93 = arith.constant 93 : index
    %c0_27 = arith.constant 0 : index
    %49 = tpu.strided_load %arg20[%c93, %c0_27] {strides = array<i32: 2, 1>} : memref<552x128xf32, #tpu.memory_space<vmem>>, vector<11x128xf32>
    %c116 = arith.constant 116 : index
    %c0_28 = arith.constant 0 : index
    %50 = tpu.strided_load %arg20[%c116, %c0_28] {strides = array<i32: 2, 1>} : memref<552x128xf32, #tpu.memory_space<vmem>>, vector<11x128xf32>
    %51 = arith.maximumf %49, %50 : vector<11x128xf32>
    %52 = vector.extract_strided_slice %48 {offsets = [0, 0], sizes = [11, 32], strides = [1, 1]} : vector<11x128xf32> to vector<11x32xf32>
    %53 = vector.extract_strided_slice %48 {offsets = [0, 32], sizes = [11, 32], strides = [1, 1]} : vector<11x128xf32> to vector<11x32xf32>
    %54 = arith.maximumf %52, %53 : vector<11x32xf32>
    %c22 = arith.constant 22 : index
    %c0_29 = arith.constant 0 : index
    %55 = vector.load %arg21[%c22, %c0_29] : memref<136x128xf32, #tpu.memory_space<vmem>>, vector<11x32xf32>
    tpu.vector_store %arg21[%c22, %c0_29], %54 {strides = array<i32>} : memref<136x128xf32, #tpu.memory_space<vmem>>, vector<11x32xf32>,
    %56 = vector.extract_strided_slice %48 {offsets = [0, 64], sizes = [11, 32], strides = [1, 1]} : vector<11x128xf32> to vector<11x32xf32>
    %57 = vector.extract_strided_slice %48 {offsets = [0, 96], sizes = [11, 32], strides = [1, 1]} : vector<11x128xf32> to vector<11x32xf32>
    %58 = arith.maximumf %56, %57 : vector<11x32xf32>
    %c22_30 = arith.constant 22 : index
    %c32_31 = arith.constant 32 : index
    %59 = vector.load %arg21[%c22_30, %c32_31] : memref<136x128xf32, #tpu.memory_space<vmem>>, vector<11x32xf32>
    tpu.vector_store %arg21[%c22_30, %c32_31], %58 {strides = array<i32>} : memref<136x128xf32, #tpu.memory_space<vmem>>, vector<11x32xf32>,
    %60 = vector.extract_strided_slice %51 {offsets = [0, 0], sizes = [11, 32], strides = [1, 1]} : vector<11x128xf32> to vector<11x32xf32>
    %61 = vector.extract_strided_slice %51 {offsets = [0, 32], sizes = [11, 32], strides = [1, 1]} : vector<11x128xf32> to vector<11x32xf32>
    %62 = arith.maximumf %60, %61 : vector<11x32xf32>
    %c22_32 = arith.constant 22 : index
    %c64_33 = arith.constant 64 : index
    %63 = vector.load %arg21[%c22_32, %c64_33] : memref<136x128xf32, #tpu.memory_space<vmem>>, vector<11x32xf32>
    tpu.vector_store %arg21[%c22_32, %c64_33], %62 {strides = array<i32>} : memref<136x128xf32, #tpu.memory_space<vmem>>, vector<11x32xf32>,
    %64 = vector.extract_strided_slice %51 {offsets = [0, 64], sizes = [11, 32], strides = [1, 1]} : vector<11x128xf32> to vector<11x32xf32>
    %65 = vector.extract_strided_slice %51 {offsets = [0, 96], sizes = [11, 32], strides = [1, 1]} : vector<11x128xf32> to vector<11x32xf32>
    %66 = arith.maximumf %64, %65 : vector<11x32xf32>
    %c22_34 = arith.constant 22 : index
    %c96_35 = arith.constant 96 : index
    %67 = vector.load %arg21[%c22_34, %c96_35] : memref<136x128xf32, #tpu.memory_space<vmem>>, vector<11x32xf32>
    tpu.vector_store %arg21[%c22_34, %c96_35], %66 {strides = array<i32>} : memref<136x128xf32, #tpu.memory_space<vmem>>, vector<11x32xf32>,
    %c138 = arith.constant 138 : index
    %c0_36 = arith.constant 0 : index
    %68 = tpu.strided_load %arg20[%c138, %c0_36] {strides = array<i32: 2, 1>} : memref<552x128xf32, #tpu.memory_space<vmem>>, vector<11x128xf32>
    %c161 = arith.constant 161 : index
    %c0_37 = arith.constant 0 : index
    %69 = tpu.strided_load %arg20[%c161, %c0_37] {strides = array<i32: 2, 1>} : memref<552x128xf32, #tpu.memory_space<vmem>>, vector<11x128xf32>
    %70 = arith.maximumf %68, %69 : vector<11x128xf32>
    %c139 = arith.constant 139 : index
    %c0_38 = arith.constant 0 : index
    %71 = tpu.strided_load %arg20[%c139, %c0_38] {strides = array<i32: 2, 1>} : memref<552x128xf32, #tpu.memory_space<vmem>>, vector<11x128xf32>
    %c162 = arith.constant 162 : index
    %c0_39 = arith.constant 0 : index
    %72 = tpu.strided_load %arg20[%c162, %c0_39] {strides = array<i32: 2, 1>} : memref<552x128xf32, #tpu.memory_space<vmem>>, vector<11x128xf32>
    %73 = arith.maximumf %71, %72 : vector<11x128xf32>
    %74 = vector.extract_strided_slice %70 {offsets = [0, 0], sizes = [11, 32], strides = [1, 1]} : vector<11x128xf32> to vector<11x32xf32>
    %75 = vector.extract_strided_slice %70 {offsets = [0, 32], sizes = [11, 32], strides = [1, 1]} : vector<11x128xf32> to vector<11x32xf32>
    %76 = arith.maximumf %74, %75 : vector<11x32xf32>
    %c33 = arith.constant 33 : index
    %c0_40 = arith.constant 0 : index
    %77 = vector.load %arg21[%c33, %c0_40] : memref<136x128xf32, #tpu.memory_space<vmem>>, vector<11x32xf32>
    tpu.vector_store %arg21[%c33, %c0_40], %76 {strides = array<i32>} : memref<136x128xf32, #tpu.memory_space<vmem>>, vector<11x32xf32>,
    %78 = vector.extract_strided_slice %70 {offsets = [0, 64], sizes = [11, 32], strides = [1, 1]} : vector<11x128xf32> to vector<11x32xf32>
    %79 = vector.extract_strided_slice %70 {offsets = [0, 96], sizes = [11, 32], strides = [1, 1]} : vector<11x128xf32> to vector<11x32xf32>
    %80 = arith.maximumf %78, %79 : vector<11x32xf32>
    %c33_41 = arith.constant 33 : index
    %c32_42 = arith.constant 32 : index
    %81 = vector.load %arg21[%c33_41, %c32_42] : memref<136x128xf32, #tpu.memory_space<vmem>>, vector<11x32xf32>
    tpu.vector_store %arg21[%c33_41, %c32_42], %80 {strides = array<i32>} : memref<136x128xf32, #tpu.memory_space<vmem>>, vector<11x32xf32>,
    %82 = vector.extract_strided_slice %73 {offsets = [0, 0], sizes = [11, 32], strides = [1, 1]} : vector<11x128xf32> to vector<11x32xf32>
    %83 = vector.extract_strided_slice %73 {offsets = [0, 32], sizes = [11, 32], strides = [1, 1]} : vector<11x128xf32> to vector<11x32xf32>
    %84 = arith.maximumf %82, %83 : vector<11x32xf32>
    %c33_43 = arith.constant 33 : index
    %c64_44 = arith.constant 64 : index
    %85 = vector.load %arg21[%c33_43, %c64_44] : memref<136x128xf32, #tpu.memory_space<vmem>>, vector<11x32xf32>
    tpu.vector_store %arg21[%c33_43, %c64_44], %84 {strides = array<i32>} : memref<136x128xf32, #tpu.memory_space<vmem>>, vector<11x32xf32>,
    %86 = vector.extract_strided_slice %73 {offsets = [0, 64], sizes = [11, 32], strides = [1, 1]} : vector<11x128xf32> to vector<11x32xf32>
    %87 = vector.extract_strided_slice %73 {offsets = [0, 96], sizes = [11, 32], strides = [1, 1]} : vector<11x128xf32> to vector<11x32xf32>
    %88 = arith.maximumf %86, %87 : vector<11x32xf32>
    %c33_45 = arith.constant 33 : index
    %c96_46 = arith.constant 96 : index
    %89 = vector.load %arg21[%c33_45, %c96_46] : memref<136x128xf32, #tpu.memory_space<vmem>>, vector<11x32xf32>
    tpu.vector_store %arg21[%c33_45, %c96_46], %88 {strides = array<i32>} : memref<136x128xf32, #tpu.memory_space<vmem>>, vector<11x32xf32>,
    %c184 = arith.constant 184 : index
    %c0_47 = arith.constant 0 : index
    %90 = tpu.strided_load %arg20[%c184, %c0_47] {strides = array<i32: 2, 1>} : memref<552x128xf32, #tpu.memory_space<vmem>>, vector<11x128xf32>
    %c207 = arith.constant 207 : index
    %c0_48 = arith.constant 0 : index
    %91 = tpu.strided_load %arg20[%c207, %c0_48] {strides = array<i32: 2, 1>} : memref<552x128xf32, #tpu.memory_space<vmem>>, vector<11x128xf32>
    %92 = arith.maximumf %90, %91 : vector<11x128xf32>
    %c185 = arith.constant 185 : index
    %c0_49 = arith.constant 0 : index
    %93 = tpu.strided_load %arg20[%c185, %c0_49] {strides = array<i32: 2, 1>} : memref<552x128xf32, #tpu.memory_space<vmem>>, vector<11x128xf32>
    %c208 = arith.constant 208 : index
    %c0_50 = arith.constant 0 : index
    %94 = tpu.strided_load %arg20[%c208, %c0_50] {strides = array<i32: 2, 1>} : memref<552x128xf32, #tpu.memory_space<vmem>>, vector<11x128xf32>
    %95 = arith.maximumf %93, %94 : vector<11x128xf32>
    %96 = vector.extract_strided_slice %92 {offsets = [0, 0], sizes = [11, 32], strides = [1, 1]} : vector<11x128xf32> to vector<11x32xf32>
    %97 = vector.extract_strided_slice %92 {offsets = [0, 32], sizes = [11, 32], strides = [1, 1]} : vector<11x128xf32> to vector<11x32xf32>
    %98 = arith.maximumf %96, %97 : vector<11x32xf32>
    %c44 = arith.constant 44 : index
    %c0_51 = arith.constant 0 : index
    %99 = vector.load %arg21[%c44, %c0_51] : memref<136x128xf32, #tpu.memory_space<vmem>>, vector<11x32xf32>
    tpu.vector_store %arg21[%c44, %c0_51], %98 {strides = array<i32>} : memref<136x128xf32, #tpu.memory_space<vmem>>, vector<11x32xf32>,
    %100 = vector.extract_strided_slice %92 {offsets = [0, 64], sizes = [11, 32], strides = [1, 1]} : vector<11x128xf32> to vector<11x32xf32>
    %101 = vector.extract_strided_slice %92 {offsets = [0, 96], sizes = [11, 32], strides = [1, 1]} : vector<11x128xf32> to vector<11x32xf32>
    %102 = arith.maximumf %100, %101 : vector<11x32xf32>
    %c44_52 = arith.constant 44 : index
    %c32_53 = arith.constant 32 : index
    %103 = vector.load %arg21[%c44_52, %c32_53] : memref<136x128xf32, #tpu.memory_space<vmem>>, vector<11x32xf32>
    tpu.vector_store %arg21[%c44_52, %c32_53], %102 {strides = array<i32>} : memref<136x128xf32, #tpu.memory_space<vmem>>, vector<11x32xf32>,
    %104 = vector.extract_strided_slice %95 {offsets = [0, 0], sizes = [11, 32], strides = [1, 1]} : vector<11x128xf32> to vector<11x32xf32>
    %105 = vector.extract_strided_slice %95 {offsets = [0, 32], sizes = [11, 32], strides = [1, 1]} : vector<11x128xf32> to vector<11x32xf32>
    %106 = arith.maximumf %104, %105 : vector<11x32xf32>
    %c44_54 = arith.constant 44 : index
    %c64_55 = arith.constant 64 : index
    %107 = vector.load %arg21[%c44_54, %c64_55] : memref<136x128xf32, #tpu.memory_space<vmem>>, vector<11x32xf32>
    tpu.vector_store %arg21[%c44_54, %c64_55], %106 {strides = array<i32>} : memref<136x128xf32, #tpu.memory_space<vmem>>, vector<11x32xf32>,
    %108 = vector.extract_strided_slice %95 {offsets = [0, 64], sizes = [11, 32], strides = [1, 1]} : vector<11x128xf32> to vector<11x32xf32>
    %109 = vector.extract_strided_slice %95 {offsets = [0, 96], sizes = [11, 32], strides = [1, 1]} : vector<11x128xf32> to vector<11x32xf32>
    %110 = arith.maximumf %108, %109 : vector<11x32xf32>
    %c44_56 = arith.constant 44 : index
    %c96_57 = arith.constant 96 : index
    %111 = vector.load %arg21[%c44_56, %c96_57] : memref<136x128xf32, #tpu.memory_space<vmem>>, vector<11x32xf32>
    tpu.vector_store %arg21[%c44_56, %c96_57], %110 {strides = array<i32>} : memref<136x128xf32, #tpu.memory_space<vmem>>, vector<11x32xf32>,
    %c230 = arith.constant 230 : index
    %c0_58 = arith.constant 0 : index
    %112 = tpu.strided_load %arg20[%c230, %c0_58] {strides = array<i32: 2, 1>} : memref<552x128xf32, #tpu.memory_space<vmem>>, vector<11x128xf32>
    %c253 = arith.constant 253 : index
    %c0_59 = arith.constant 0 : index
    %113 = tpu.strided_load %arg20[%c253, %c0_59] {strides = array<i32: 2, 1>} : memref<552x128xf32, #tpu.memory_space<vmem>>, vector<11x128xf32>
    %114 = arith.maximumf %112, %113 : vector<11x128xf32>
    %c231 = arith.constant 231 : index
    %c0_60 = arith.constant 0 : index
    %115 = tpu.strided_load %arg20[%c231, %c0_60] {strides = array<i32: 2, 1>} : memref<552x128xf32, #tpu.memory_space<vmem>>, vector<11x128xf32>
    %c254 = arith.constant 254 : index
    %c0_61 = arith.constant 0 : index
    %116 = tpu.strided_load %arg20[%c254, %c0_61] {strides = array<i32: 2, 1>} : memref<552x128xf32, #tpu.memory_space<vmem>>, vector<11x128xf32>
    %117 = arith.maximumf %115, %116 : vector<11x128xf32>
    %118 = vector.extract_strided_slice %114 {offsets = [0, 0], sizes = [11, 32], strides = [1, 1]} : vector<11x128xf32> to vector<11x32xf32>
    %119 = vector.extract_strided_slice %114 {offsets = [0, 32], sizes = [11, 32], strides = [1, 1]} : vector<11x128xf32> to vector<11x32xf32>
    %120 = arith.maximumf %118, %119 : vector<11x32xf32>
    %c55 = arith.constant 55 : index
    %c0_62 = arith.constant 0 : index
    %121 = vector.load %arg21[%c55, %c0_62] : memref<136x128xf32, #tpu.memory_space<vmem>>, vector<11x32xf32>
    tpu.vector_store %arg21[%c55, %c0_62], %120 {strides = array<i32>} : memref<136x128xf32, #tpu.memory_space<vmem>>, vector<11x32xf32>,
    %122 = vector.extract_strided_slice %114 {offsets = [0, 64], sizes = [11, 32], strides = [1, 1]} : vector<11x128xf32> to vector<11x32xf32>
    %123 = vector.extract_strided_slice %114 {offsets = [0, 96], sizes = [11, 32], strides = [1, 1]} : vector<11x128xf32> to vector<11x32xf32>
    %124 = arith.maximumf %122, %123 : vector<11x32xf32>
    %c55_63 = arith.constant 55 : index
    %c32_64 = arith.constant 32 : index
    %125 = vector.load %arg21[%c55_63, %c32_64] : memref<136x128xf32, #tpu.memory_space<vmem>>, vector<11x32xf32>
    tpu.vector_store %arg21[%c55_63, %c32_64], %124 {strides = array<i32>} : memref<136x128xf32, #tpu.memory_space<vmem>>, vector<11x32xf32>,
    %126 = vector.extract_strided_slice %117 {offsets = [0, 0], sizes = [11, 32], strides = [1, 1]} : vector<11x128xf32> to vector<11x32xf32>
    %127 = vector.extract_strided_slice %117 {offsets = [0, 32], sizes = [11, 32], strides = [1, 1]} : vector<11x128xf32> to vector<11x32xf32>
    %128 = arith.maximumf %126, %127 : vector<11x32xf32>
    %c55_65 = arith.constant 55 : index
    %c64_66 = arith.constant 64 : index
    %129 = vector.load %arg21[%c55_65, %c64_66] : memref<136x128xf32, #tpu.memory_space<vmem>>, vector<11x32xf32>
    tpu.vector_store %arg21[%c55_65, %c64_66], %128 {strides = array<i32>} : memref<136x128xf32, #tpu.memory_space<vmem>>, vector<11x32xf32>,
    %130 = vector.extract_strided_slice %117 {offsets = [0, 64], sizes = [11, 32], strides = [1, 1]} : vector<11x128xf32> to vector<11x32xf32>
    %131 = vector.extract_strided_slice %117 {offsets = [0, 96], sizes = [11, 32], strides = [1, 1]} : vector<11x128xf32> to vector<11x32xf32>
    %132 = arith.maximumf %130, %131 : vector<11x32xf32>
    %c55_67 = arith.constant 55 : index
    %c96_68 = arith.constant 96 : index
    %133 = vector.load %arg21[%c55_67, %c96_68] : memref<136x128xf32, #tpu.memory_space<vmem>>, vector<11x32xf32>
    tpu.vector_store %arg21[%c55_67, %c96_68], %132 {strides = array<i32>} : memref<136x128xf32, #tpu.memory_space<vmem>>, vector<11x32xf32>,
    %c276 = arith.constant 276 : index
    %c0_69 = arith.constant 0 : index
    %134 = tpu.strided_load %arg20[%c276, %c0_69] {strides = array<i32: 2, 1>} : memref<552x128xf32, #tpu.memory_space<vmem>>, vector<11x128xf32>
    %c299 = arith.constant 299 : index
    %c0_70 = arith.constant 0 : index
    %135 = tpu.strided_load %arg20[%c299, %c0_70] {strides = array<i32: 2, 1>} : memref<552x128xf32, #tpu.memory_space<vmem>>, vector<11x128xf32>
    %136 = arith.maximumf %134, %135 : vector<11x128xf32>
    %c277 = arith.constant 277 : index
    %c0_71 = arith.constant 0 : index
    %137 = tpu.strided_load %arg20[%c277, %c0_71] {strides = array<i32: 2, 1>} : memref<552x128xf32, #tpu.memory_space<vmem>>, vector<11x128xf32>
    %c300 = arith.constant 300 : index
    %c0_72 = arith.constant 0 : index
    %138 = tpu.strided_load %arg20[%c300, %c0_72] {strides = array<i32: 2, 1>} : memref<552x128xf32, #tpu.memory_space<vmem>>, vector<11x128xf32>
    %139 = arith.maximumf %137, %138 : vector<11x128xf32>
    %140 = vector.extract_strided_slice %136 {offsets = [0, 0], sizes = [11, 32], strides = [1, 1]} : vector<11x128xf32> to vector<11x32xf32>
    %141 = vector.extract_strided_slice %136 {offsets = [0, 32], sizes = [11, 32], strides = [1, 1]} : vector<11x128xf32> to vector<11x32xf32>
    %142 = arith.maximumf %140, %141 : vector<11x32xf32>
    %c66 = arith.constant 66 : index
    %c0_73 = arith.constant 0 : index
    %143 = vector.load %arg21[%c66, %c0_73] : memref<136x128xf32, #tpu.memory_space<vmem>>, vector<11x32xf32>
    tpu.vector_store %arg21[%c66, %c0_73], %142 {strides = array<i32>} : memref<136x128xf32, #tpu.memory_space<vmem>>, vector<11x32xf32>,
    %144 = vector.extract_strided_slice %136 {offsets = [0, 64], sizes = [11, 32], strides = [1, 1]} : vector<11x128xf32> to vector<11x32xf32>
    %145 = vector.extract_strided_slice %136 {offsets = [0, 96], sizes = [11, 32], strides = [1, 1]} : vector<11x128xf32> to vector<11x32xf32>
    %146 = arith.maximumf %144, %145 : vector<11x32xf32>
    %c66_74 = arith.constant 66 : index
    %c32_75 = arith.constant 32 : index
    %147 = vector.load %arg21[%c66_74, %c32_75] : memref<136x128xf32, #tpu.memory_space<vmem>>, vector<11x32xf32>
    tpu.vector_store %arg21[%c66_74, %c32_75], %146 {strides = array<i32>} : memref<136x128xf32, #tpu.memory_space<vmem>>, vector<11x32xf32>,
    %148 = vector.extract_strided_slice %139 {offsets = [0, 0], sizes = [11, 32], strides = [1, 1]} : vector<11x128xf32> to vector<11x32xf32>
    %149 = vector.extract_strided_slice %139 {offsets = [0, 32], sizes = [11, 32], strides = [1, 1]} : vector<11x128xf32> to vector<11x32xf32>
    %150 = arith.maximumf %148, %149 : vector<11x32xf32>
    %c66_76 = arith.constant 66 : index
    %c64_77 = arith.constant 64 : index
    %151 = vector.load %arg21[%c66_76, %c64_77] : memref<136x128xf32, #tpu.memory_space<vmem>>, vector<11x32xf32>
    tpu.vector_store %arg21[%c66_76, %c64_77], %150 {strides = array<i32>} : memref<136x128xf32, #tpu.memory_space<vmem>>, vector<11x32xf32>,
    %152 = vector.extract_strided_slice %139 {offsets = [0, 64], sizes = [11, 32], strides = [1, 1]} : vector<11x128xf32> to vector<11x32xf32>
    %153 = vector.extract_strided_slice %139 {offsets = [0, 96], sizes = [11, 32], strides = [1, 1]} : vector<11x128xf32> to vector<11x32xf32>
    %154 = arith.maximumf %152, %153 : vector<11x32xf32>
    %c66_78 = arith.constant 66 : index
    %c96_79 = arith.constant 96 : index
    %155 = vector.load %arg21[%c66_78, %c96_79] : memref<136x128xf32, #tpu.memory_space<vmem>>, vector<11x32xf32>
    tpu.vector_store %arg21[%c66_78, %c96_79], %154 {strides = array<i32>} : memref<136x128xf32, #tpu.memory_space<vmem>>, vector<11x32xf32>,
    %c322 = arith.constant 322 : index
    %c0_80 = arith.constant 0 : index
    %156 = tpu.strided_load %arg20[%c322, %c0_80] {strides = array<i32: 2, 1>} : memref<552x128xf32, #tpu.memory_space<vmem>>, vector<11x128xf32>
    %c345 = arith.constant 345 : index
    %c0_81 = arith.constant 0 : index
    %157 = tpu.strided_load %arg20[%c345, %c0_81] {strides = array<i32: 2, 1>} : memref<552x128xf32, #tpu.memory_space<vmem>>, vector<11x128xf32>
    %158 = arith.maximumf %156, %157 : vector<11x128xf32>
    %c323 = arith.constant 323 : index
    %c0_82 = arith.constant 0 : index
    %159 = tpu.strided_load %arg20[%c323, %c0_82] {strides = array<i32: 2, 1>} : memref<552x128xf32, #tpu.memory_space<vmem>>, vector<11x128xf32>
    %c346 = arith.constant 346 : index
    %c0_83 = arith.constant 0 : index
    %160 = tpu.strided_load %arg20[%c346, %c0_83] {strides = array<i32: 2, 1>} : memref<552x128xf32, #tpu.memory_space<vmem>>, vector<11x128xf32>
    %161 = arith.maximumf %159, %160 : vector<11x128xf32>
    %162 = vector.extract_strided_slice %158 {offsets = [0, 0], sizes = [11, 32], strides = [1, 1]} : vector<11x128xf32> to vector<11x32xf32>
    %163 = vector.extract_strided_slice %158 {offsets = [0, 32], sizes = [11, 32], strides = [1, 1]} : vector<11x128xf32> to vector<11x32xf32>
    %164 = arith.maximumf %162, %163 : vector<11x32xf32>
    %c77 = arith.constant 77 : index
    %c0_84 = arith.constant 0 : index
    %165 = vector.load %arg21[%c77, %c0_84] : memref<136x128xf32, #tpu.memory_space<vmem>>, vector<11x32xf32>
    tpu.vector_store %arg21[%c77, %c0_84], %164 {strides = array<i32>} : memref<136x128xf32, #tpu.memory_space<vmem>>, vector<11x32xf32>,
    %166 = vector.extract_strided_slice %158 {offsets = [0, 64], sizes = [11, 32], strides = [1, 1]} : vector<11x128xf32> to vector<11x32xf32>
    %167 = vector.extract_strided_slice %158 {offsets = [0, 96], sizes = [11, 32], strides = [1, 1]} : vector<11x128xf32> to vector<11x32xf32>
    %168 = arith.maximumf %166, %167 : vector<11x32xf32>
    %c77_85 = arith.constant 77 : index
    %c32_86 = arith.constant 32 : index
    %169 = vector.load %arg21[%c77_85, %c32_86] : memref<136x128xf32, #tpu.memory_space<vmem>>, vector<11x32xf32>
    tpu.vector_store %arg21[%c77_85, %c32_86], %168 {strides = array<i32>} : memref<136x128xf32, #tpu.memory_space<vmem>>, vector<11x32xf32>,
    %170 = vector.extract_strided_slice %161 {offsets = [0, 0], sizes = [11, 32], strides = [1, 1]} : vector<11x128xf32> to vector<11x32xf32>
    %171 = vector.extract_strided_slice %161 {offsets = [0, 32], sizes = [11, 32], strides = [1, 1]} : vector<11x128xf32> to vector<11x32xf32>
    %172 = arith.maximumf %170, %171 : vector<11x32xf32>
    %c77_87 = arith.constant 77 : index
    %c64_88 = arith.constant 64 : index
    %173 = vector.load %arg21[%c77_87, %c64_88] : memref<136x128xf32, #tpu.memory_space<vmem>>, vector<11x32xf32>
    tpu.vector_store %arg21[%c77_87, %c64_88], %172 {strides = array<i32>} : memref<136x128xf32, #tpu.memory_space<vmem>>, vector<11x32xf32>,
    %174 = vector.extract_strided_slice %161 {offsets = [0, 64], sizes = [11, 32], strides = [1, 1]} : vector<11x128xf32> to vector<11x32xf32>
    %175 = vector.extract_strided_slice %161 {offsets = [0, 96], sizes = [11, 32], strides = [1, 1]} : vector<11x128xf32> to vector<11x32xf32>
    %176 = arith.maximumf %174, %175 : vector<11x32xf32>
    %c77_89 = arith.constant 77 : index
    %c96_90 = arith.constant 96 : index
    %177 = vector.load %arg21[%c77_89, %c96_90] : memref<136x128xf32, #tpu.memory_space<vmem>>, vector<11x32xf32>
    tpu.vector_store %arg21[%c77_89, %c96_90], %176 {strides = array<i32>} : memref<136x128xf32, #tpu.memory_space<vmem>>, vector<11x32xf32>,
    %c368 = arith.constant 368 : index
    %c0_91 = arith.constant 0 : index
    %178 = tpu.strided_load %arg20[%c368, %c0_91] {strides = array<i32: 2, 1>} : memref<552x128xf32, #tpu.memory_space<vmem>>, vector<11x128xf32>
    %c391 = arith.constant 391 : index
    %c0_92 = arith.constant 0 : index
    %179 = tpu.strided_load %arg20[%c391, %c0_92] {strides = array<i32: 2, 1>} : memref<552x128xf32, #tpu.memory_space<vmem>>, vector<11x128xf32>
    %180 = arith.maximumf %178, %179 : vector<11x128xf32>
    %c369 = arith.constant 369 : index
    %c0_93 = arith.constant 0 : index
    %181 = tpu.strided_load %arg20[%c369, %c0_93] {strides = array<i32: 2, 1>} : memref<552x128xf32, #tpu.memory_space<vmem>>, vector<11x128xf32>
    %c392 = arith.constant 392 : index
    %c0_94 = arith.constant 0 : index
    %182 = tpu.strided_load %arg20[%c392, %c0_94] {strides = array<i32: 2, 1>} : memref<552x128xf32, #tpu.memory_space<vmem>>, vector<11x128xf32>
    %183 = arith.maximumf %181, %182 : vector<11x128xf32>
    %184 = vector.extract_strided_slice %180 {offsets = [0, 0], sizes = [11, 32], strides = [1, 1]} : vector<11x128xf32> to vector<11x32xf32>
    %185 = vector.extract_strided_slice %180 {offsets = [0, 32], sizes = [11, 32], strides = [1, 1]} : vector<11x128xf32> to vector<11x32xf32>
    %186 = arith.maximumf %184, %185 : vector<11x32xf32>
    %c88 = arith.constant 88 : index
    %c0_95 = arith.constant 0 : index
    %187 = vector.load %arg21[%c88, %c0_95] : memref<136x128xf32, #tpu.memory_space<vmem>>, vector<11x32xf32>
    tpu.vector_store %arg21[%c88, %c0_95], %186 {strides = array<i32>} : memref<136x128xf32, #tpu.memory_space<vmem>>, vector<11x32xf32>,
    %188 = vector.extract_strided_slice %180 {offsets = [0, 64], sizes = [11, 32], strides = [1, 1]} : vector<11x128xf32> to vector<11x32xf32>
    %189 = vector.extract_strided_slice %180 {offsets = [0, 96], sizes = [11, 32], strides = [1, 1]} : vector<11x128xf32> to vector<11x32xf32>
    %190 = arith.maximumf %188, %189 : vector<11x32xf32>
    %c88_96 = arith.constant 88 : index
    %c32_97 = arith.constant 32 : index
    %191 = vector.load %arg21[%c88_96, %c32_97] : memref<136x128xf32, #tpu.memory_space<vmem>>, vector<11x32xf32>
    tpu.vector_store %arg21[%c88_96, %c32_97], %190 {strides = array<i32>} : memref<136x128xf32, #tpu.memory_space<vmem>>, vector<11x32xf32>,
    %192 = vector.extract_strided_slice %183 {offsets = [0, 0], sizes = [11, 32], strides = [1, 1]} : vector<11x128xf32> to vector<11x32xf32>
    %193 = vector.extract_strided_slice %183 {offsets = [0, 32], sizes = [11, 32], strides = [1, 1]} : vector<11x128xf32> to vector<11x32xf32>
    %194 = arith.maximumf %192, %193 : vector<11x32xf32>
    %c88_98 = arith.constant 88 : index
    %c64_99 = arith.constant 64 : index
    %195 = vector.load %arg21[%c88_98, %c64_99] : memref<136x128xf32, #tpu.memory_space<vmem>>, vector<11x32xf32>
    tpu.vector_store %arg21[%c88_98, %c64_99], %194 {strides = array<i32>} : memref<136x128xf32, #tpu.memory_space<vmem>>, vector<11x32xf32>,
    %196 = vector.extract_strided_slice %183 {offsets = [0, 64], sizes = [11, 32], strides = [1, 1]} : vector<11x128xf32> to vector<11x32xf32>
    %197 = vector.extract_strided_slice %183 {offsets = [0, 96], sizes = [11, 32], strides = [1, 1]} : vector<11x128xf32> to vector<11x32xf32>
    %198 = arith.maximumf %196, %197 : vector<11x32xf32>
    %c88_100 = arith.constant 88 : index
    %c96_101 = arith.constant 96 : index
    %199 = vector.load %arg21[%c88_100, %c96_101] : memref<136x128xf32, #tpu.memory_space<vmem>>, vector<11x32xf32>
    tpu.vector_store %arg21[%c88_100, %c96_101], %198 {strides = array<i32>} : memref<136x128xf32, #tpu.memory_space<vmem>>, vector<11x32xf32>,
    %c414 = arith.constant 414 : index
    %c0_102 = arith.constant 0 : index
    %200 = tpu.strided_load %arg20[%c414, %c0_102] {strides = array<i32: 2, 1>} : memref<552x128xf32, #tpu.memory_space<vmem>>, vector<11x128xf32>
    %c437 = arith.constant 437 : index
    %c0_103 = arith.constant 0 : index
    %201 = tpu.strided_load %arg20[%c437, %c0_103] {strides = array<i32: 2, 1>} : memref<552x128xf32, #tpu.memory_space<vmem>>, vector<11x128xf32>
    %202 = arith.maximumf %200, %201 : vector<11x128xf32>
    %c415 = arith.constant 415 : index
    %c0_104 = arith.constant 0 : index
    %203 = tpu.strided_load %arg20[%c415, %c0_104] {strides = array<i32: 2, 1>} : memref<552x128xf32, #tpu.memory_space<vmem>>, vector<11x128xf32>
    %c438 = arith.constant 438 : index
    %c0_105 = arith.constant 0 : index
    %204 = tpu.strided_load %arg20[%c438, %c0_105] {strides = array<i32: 2, 1>} : memref<552x128xf32, #tpu.memory_space<vmem>>, vector<11x128xf32>
    %205 = arith.maximumf %203, %204 : vector<11x128xf32>
    %206 = vector.extract_strided_slice %202 {offsets = [0, 0], sizes = [11, 32], strides = [1, 1]} : vector<11x128xf32> to vector<11x32xf32>
    %207 = vector.extract_strided_slice %202 {offsets = [0, 32], sizes = [11, 32], strides = [1, 1]} : vector<11x128xf32> to vector<11x32xf32>
    %208 = arith.maximumf %206, %207 : vector<11x32xf32>
    %c99 = arith.constant 99 : index
    %c0_106 = arith.constant 0 : index
    %209 = vector.load %arg21[%c99, %c0_106] : memref<136x128xf32, #tpu.memory_space<vmem>>, vector<11x32xf32>
    tpu.vector_store %arg21[%c99, %c0_106], %208 {strides = array<i32>} : memref<136x128xf32, #tpu.memory_space<vmem>>, vector<11x32xf32>,
    %210 = vector.extract_strided_slice %202 {offsets = [0, 64], sizes = [11, 32], strides = [1, 1]} : vector<11x128xf32> to vector<11x32xf32>
    %211 = vector.extract_strided_slice %202 {offsets = [0, 96], sizes = [11, 32], strides = [1, 1]} : vector<11x128xf32> to vector<11x32xf32>
    %212 = arith.maximumf %210, %211 : vector<11x32xf32>
    %c99_107 = arith.constant 99 : index
    %c32_108 = arith.constant 32 : index
    %213 = vector.load %arg21[%c99_107, %c32_108] : memref<136x128xf32, #tpu.memory_space<vmem>>, vector<11x32xf32>
    tpu.vector_store %arg21[%c99_107, %c32_108], %212 {strides = array<i32>} : memref<136x128xf32, #tpu.memory_space<vmem>>, vector<11x32xf32>,
    %214 = vector.extract_strided_slice %205 {offsets = [0, 0], sizes = [11, 32], strides = [1, 1]} : vector<11x128xf32> to vector<11x32xf32>
    %215 = vector.extract_strided_slice %205 {offsets = [0, 32], sizes = [11, 32], strides = [1, 1]} : vector<11x128xf32> to vector<11x32xf32>
    %216 = arith.maximumf %214, %215 : vector<11x32xf32>
    %c99_109 = arith.constant 99 : index
    %c64_110 = arith.constant 64 : index
    %217 = vector.load %arg21[%c99_109, %c64_110] : memref<136x128xf32, #tpu.memory_space<vmem>>, vector<11x32xf32>
    tpu.vector_store %arg21[%c99_109, %c64_110], %216 {strides = array<i32>} : memref<136x128xf32, #tpu.memory_space<vmem>>, vector<11x32xf32>,
    %218 = vector.extract_strided_slice %205 {offsets = [0, 64], sizes = [11, 32], strides = [1, 1]} : vector<11x128xf32> to vector<11x32xf32>
    %219 = vector.extract_strided_slice %205 {offsets = [0, 96], sizes = [11, 32], strides = [1, 1]} : vector<11x128xf32> to vector<11x32xf32>
    %220 = arith.maximumf %218, %219 : vector<11x32xf32>
    %c99_111 = arith.constant 99 : index
    %c96_112 = arith.constant 96 : index
    %221 = vector.load %arg21[%c99_111, %c96_112] : memref<136x128xf32, #tpu.memory_space<vmem>>, vector<11x32xf32>
    tpu.vector_store %arg21[%c99_111, %c96_112], %220 {strides = array<i32>} : memref<136x128xf32, #tpu.memory_space<vmem>>, vector<11x32xf32>,
    %c460 = arith.constant 460 : index
    %c0_113 = arith.constant 0 : index
    %222 = tpu.strided_load %arg20[%c460, %c0_113] {strides = array<i32: 2, 1>} : memref<552x128xf32, #tpu.memory_space<vmem>>, vector<11x128xf32>
    %c483 = arith.constant 483 : index
    %c0_114 = arith.constant 0 : index
    %223 = tpu.strided_load %arg20[%c483, %c0_114] {strides = array<i32: 2, 1>} : memref<552x128xf32, #tpu.memory_space<vmem>>, vector<11x128xf32>
    %224 = arith.maximumf %222, %223 : vector<11x128xf32>
    %c461 = arith.constant 461 : index
    %c0_115 = arith.constant 0 : index
    %225 = tpu.strided_load %arg20[%c461, %c0_115] {strides = array<i32: 2, 1>} : memref<552x128xf32, #tpu.memory_space<vmem>>, vector<11x128xf32>
    %c484 = arith.constant 484 : index
    %c0_116 = arith.constant 0 : index
    %226 = tpu.strided_load %arg20[%c484, %c0_116] {strides = array<i32: 2, 1>} : memref<552x128xf32, #tpu.memory_space<vmem>>, vector<11x128xf32>
    %227 = arith.maximumf %225, %226 : vector<11x128xf32>
    %228 = vector.extract_strided_slice %224 {offsets = [0, 0], sizes = [11, 32], strides = [1, 1]} : vector<11x128xf32> to vector<11x32xf32>
    %229 = vector.extract_strided_slice %224 {offsets = [0, 32], sizes = [11, 32], strides = [1, 1]} : vector<11x128xf32> to vector<11x32xf32>
    %230 = arith.maximumf %228, %229 : vector<11x32xf32>
    %c110 = arith.constant 110 : index
    %c0_117 = arith.constant 0 : index
    %231 = vector.load %arg21[%c110, %c0_117] : memref<136x128xf32, #tpu.memory_space<vmem>>, vector<11x32xf32>
    tpu.vector_store %arg21[%c110, %c0_117], %230 {strides = array<i32>} : memref<136x128xf32, #tpu.memory_space<vmem>>, vector<11x32xf32>,
    %232 = vector.extract_strided_slice %224 {offsets = [0, 64], sizes = [11, 32], strides = [1, 1]} : vector<11x128xf32> to vector<11x32xf32>
    %233 = vector.extract_strided_slice %224 {offsets = [0, 96], sizes = [11, 32], strides = [1, 1]} : vector<11x128xf32> to vector<11x32xf32>
    %234 = arith.maximumf %232, %233 : vector<11x32xf32>
    %c110_118 = arith.constant 110 : index
    %c32_119 = arith.constant 32 : index
    %235 = vector.load %arg21[%c110_118, %c32_119] : memref<136x128xf32, #tpu.memory_space<vmem>>, vector<11x32xf32>
    tpu.vector_store %arg21[%c110_118, %c32_119], %234 {strides = array<i32>} : memref<136x128xf32, #tpu.memory_space<vmem>>, vector<11x32xf32>,
    %236 = vector.extract_strided_slice %227 {offsets = [0, 0], sizes = [11, 32], strides = [1, 1]} : vector<11x128xf32> to vector<11x32xf32>
    %237 = vector.extract_strided_slice %227 {offsets = [0, 32], sizes = [11, 32], strides = [1, 1]} : vector<11x128xf32> to vector<11x32xf32>
    %238 = arith.maximumf %236, %237 : vector<11x32xf32>
    %c110_120 = arith.constant 110 : index
    %c64_121 = arith.constant 64 : index
    %239 = vector.load %arg21[%c110_120, %c64_121] : memref<136x128xf32, #tpu.memory_space<vmem>>, vector<11x32xf32>
    tpu.vector_store %arg21[%c110_120, %c64_121], %238 {strides = array<i32>} : memref<136x128xf32, #tpu.memory_space<vmem>>, vector<11x32xf32>,
    %240 = vector.extract_strided_slice %227 {offsets = [0, 64], sizes = [11, 32], strides = [1, 1]} : vector<11x128xf32> to vector<11x32xf32>
    %241 = vector.extract_strided_slice %227 {offsets = [0, 96], sizes = [11, 32], strides = [1, 1]} : vector<11x128xf32> to vector<11x32xf32>
    %242 = arith.maximumf %240, %241 : vector<11x32xf32>
    %c110_122 = arith.constant 110 : index
    %c96_123 = arith.constant 96 : index
    %243 = vector.load %arg21[%c110_122, %c96_123] : memref<136x128xf32, #tpu.memory_space<vmem>>, vector<11x32xf32>
    tpu.vector_store %arg21[%c110_122, %c96_123], %242 {strides = array<i32>} : memref<136x128xf32, #tpu.memory_space<vmem>>, vector<11x32xf32>,
    %c506 = arith.constant 506 : index
    %c0_124 = arith.constant 0 : index
    %244 = tpu.strided_load %arg20[%c506, %c0_124] {strides = array<i32: 2, 1>} : memref<552x128xf32, #tpu.memory_space<vmem>>, vector<11x128xf32>
    %c529 = arith.constant 529 : index
    %c0_125 = arith.constant 0 : index
    %245 = tpu.strided_load %arg20[%c529, %c0_125] {strides = array<i32: 2, 1>} : memref<552x128xf32, #tpu.memory_space<vmem>>, vector<11x128xf32>
    %246 = arith.maximumf %244, %245 : vector<11x128xf32>
    %c507 = arith.constant 507 : index
    %c0_126 = arith.constant 0 : index
    %247 = tpu.strided_load %arg20[%c507, %c0_126] {strides = array<i32: 2, 1>} : memref<552x128xf32, #tpu.memory_space<vmem>>, vector<11x128xf32>
    %c530 = arith.constant 530 : index
    %c0_127 = arith.constant 0 : index
    %248 = tpu.strided_load %arg20[%c530, %c0_127] {strides = array<i32: 2, 1>} : memref<552x128xf32, #tpu.memory_space<vmem>>, vector<11x128xf32>
    %249 = arith.maximumf %247, %248 : vector<11x128xf32>
    %250 = vector.extract_strided_slice %246 {offsets = [0, 0], sizes = [11, 32], strides = [1, 1]} : vector<11x128xf32> to vector<11x32xf32>
    %251 = vector.extract_strided_slice %246 {offsets = [0, 32], sizes = [11, 32], strides = [1, 1]} : vector<11x128xf32> to vector<11x32xf32>
    %252 = arith.maximumf %250, %251 : vector<11x32xf32>
    %c121 = arith.constant 121 : index
    %c0_128 = arith.constant 0 : index
    %253 = vector.load %arg21[%c121, %c0_128] : memref<136x128xf32, #tpu.memory_space<vmem>>, vector<11x32xf32>
    tpu.vector_store %arg21[%c121, %c0_128], %252 {strides = array<i32>} : memref<136x128xf32, #tpu.memory_space<vmem>>, vector<11x32xf32>,
    %254 = vector.extract_strided_slice %246 {offsets = [0, 64], sizes = [11, 32], strides = [1, 1]} : vector<11x128xf32> to vector<11x32xf32>
    %255 = vector.extract_strided_slice %246 {offsets = [0, 96], sizes = [11, 32], strides = [1, 1]} : vector<11x128xf32> to vector<11x32xf32>
    %256 = arith.maximumf %254, %255 : vector<11x32xf32>
    %c121_129 = arith.constant 121 : index
    %c32_130 = arith.constant 32 : index
    %257 = vector.load %arg21[%c121_129, %c32_130] : memref<136x128xf32, #tpu.memory_space<vmem>>, vector<11x32xf32>
    tpu.vector_store %arg21[%c121_129, %c32_130], %256 {strides = array<i32>} : memref<136x128xf32, #tpu.memory_space<vmem>>, vector<11x32xf32>,
    %258 = vector.extract_strided_slice %249 {offsets = [0, 0], sizes = [11, 32], strides = [1, 1]} : vector<11x128xf32> to vector<11x32xf32>
    %259 = vector.extract_strided_slice %249 {offsets = [0, 32], sizes = [11, 32], strides = [1, 1]} : vector<11x128xf32> to vector<11x32xf32>
    %260 = arith.maximumf %258, %259 : vector<11x32xf32>
    %c121_131 = arith.constant 121 : index
    %c64_132 = arith.constant 64 : index
    %261 = vector.load %arg21[%c121_131, %c64_132] : memref<136x128xf32, #tpu.memory_space<vmem>>, vector<11x32xf32>
    tpu.vector_store %arg21[%c121_131, %c64_132], %260 {strides = array<i32>} : memref<136x128xf32, #tpu.memory_space<vmem>>, vector<11x32xf32>,
    %262 = vector.extract_strided_slice %249 {offsets = [0, 64], sizes = [11, 32], strides = [1, 1]} : vector<11x128xf32> to vector<11x32xf32>
    %263 = vector.extract_strided_slice %249 {offsets = [0, 96], sizes = [11, 32], strides = [1, 1]} : vector<11x128xf32> to vector<11x32xf32>
    %264 = arith.maximumf %262, %263 : vector<11x32xf32>
    %c121_133 = arith.constant 121 : index
    %c96_134 = arith.constant 96 : index
    %265 = vector.load %arg21[%c121_133, %c96_134] : memref<136x128xf32, #tpu.memory_space<vmem>>, vector<11x32xf32>
    tpu.vector_store %arg21[%c121_133, %c96_134], %264 {strides = array<i32>} : memref<136x128xf32, #tpu.memory_space<vmem>>, vector<11x32xf32>,
    %cst = arith.constant 0.000000e+00 : f32
    %266 = vector.broadcast %cst : f32 to vector<4x128xf32>
    %c132 = arith.constant 132 : index
    %c0_135 = arith.constant 0 : index
    %267 = vector.load %arg21[%c132, %c0_135] : memref<136x128xf32, #tpu.memory_space<vmem>>, vector<4x128xf32>
    tpu.vector_store %arg21[%c132, %c0_135], %266 {strides = array<i32>} : memref<136x128xf32, #tpu.memory_space<vmem>>, vector<4x128xf32>,
    %cst_136 = arith.constant 0.000000e+00 : f32
    %268 = vector.broadcast %cst_136 : f32 to vector<110x128xf32>
    %c0_137 = arith.constant 0 : index
    %c0_138 = arith.constant 0 : index
    %269 = vector.load %arg21[%c0_137, %c0_138] : memref<136x128xf32, #tpu.memory_space<vmem>>, vector<110x128xf32>
    %c0_139 = arith.constant 0 : index
    %c0_140 = arith.constant 0 : index
    %c0_141 = arith.constant 0 : index
    %c0_142 = arith.constant 0 : index
    %270 = vector.load %arg8[%c0_139, %c0_140, %c0_141, %c0_142] : memref<3x2x128x128xf32, #tpu.memory_space<vmem>>, vector<1x1x128x128xf32>
    %271 = vector.shape_cast %270 : vector<1x1x128x128xf32> to vector<128x128xf32>
    %cst_143 = arith.constant dense<0.000000e+00> : vector<110x128xf32>
    %272 = tpu.matmul %269, %271, %cst_143 {dimension_numbers = #tpu.dot_dimension_numbers<[1], [0], [0], [1], [0, 0, 1, 1], [], []>} : vector<110x128xf32>, vector<128x128xf32>, vector<110x128xf32> -> vector<110x128xf32>
    %273 = arith.addf %268, %272 : vector<110x128xf32>
    %c1_144 = arith.constant 1 : index
    %c0_145 = arith.constant 0 : index
    %274 = vector.load %arg21[%c1_144, %c0_145] : memref<136x128xf32, #tpu.memory_space<vmem>>, vector<110x128xf32>
    %c0_146 = arith.constant 0 : index
    %c1_147 = arith.constant 1 : index
    %c0_148 = arith.constant 0 : index
    %c0_149 = arith.constant 0 : index
    %275 = vector.load %arg8[%c0_146, %c1_147, %c0_148, %c0_149] : memref<3x2x128x128xf32, #tpu.memory_space<vmem>>, vector<1x1x128x128xf32>
    %276 = vector.shape_cast %275 : vector<1x1x128x128xf32> to vector<128x128xf32>
    %cst_150 = arith.constant dense<0.000000e+00> : vector<110x128xf32>
    %277 = tpu.matmul %274, %276, %cst_150 {dimension_numbers = #tpu.dot_dimension_numbers<[1], [0], [0], [1], [0, 0, 1, 1], [], []>} : vector<110x128xf32>, vector<128x128xf32>, vector<110x128xf32> -> vector<110x128xf32>
    %278 = arith.addf %273, %277 : vector<110x128xf32>
    %c11_151 = arith.constant 11 : index
    %c0_152 = arith.constant 0 : index
    %279 = vector.load %arg21[%c11_151, %c0_152] : memref<136x128xf32, #tpu.memory_space<vmem>>, vector<110x128xf32>
    %c1_153 = arith.constant 1 : index
    %c0_154 = arith.constant 0 : index
    %c0_155 = arith.constant 0 : index
    %c0_156 = arith.constant 0 : index
    %280 = vector.load %arg8[%c1_153, %c0_154, %c0_155, %c0_156] : memref<3x2x128x128xf32, #tpu.memory_space<vmem>>, vector<1x1x128x128xf32>
    %281 = vector.shape_cast %280 : vector<1x1x128x128xf32> to vector<128x128xf32>
    %cst_157 = arith.constant dense<0.000000e+00> : vector<110x128xf32>
    %282 = tpu.matmul %279, %281, %cst_157 {dimension_numbers = #tpu.dot_dimension_numbers<[1], [0], [0], [1], [0, 0, 1, 1], [], []>} : vector<110x128xf32>, vector<128x128xf32>, vector<110x128xf32> -> vector<110x128xf32>
    %283 = arith.addf %278, %282 : vector<110x128xf32>
    %c12 = arith.constant 12 : index
    %c0_158 = arith.constant 0 : index
    %284 = vector.load %arg21[%c12, %c0_158] : memref<136x128xf32, #tpu.memory_space<vmem>>, vector<110x128xf32>
    %c1_159 = arith.constant 1 : index
    %c1_160 = arith.constant 1 : index
    %c0_161 = arith.constant 0 : index
    %c0_162 = arith.constant 0 : index
    %285 = vector.load %arg8[%c1_159, %c1_160, %c0_161, %c0_162] : memref<3x2x128x128xf32, #tpu.memory_space<vmem>>, vector<1x1x128x128xf32>
    %286 = vector.shape_cast %285 : vector<1x1x128x128xf32> to vector<128x128xf32>
    %cst_163 = arith.constant dense<0.000000e+00> : vector<110x128xf32>
    %287 = tpu.matmul %284, %286, %cst_163 {dimension_numbers = #tpu.dot_dimension_numbers<[1], [0], [0], [1], [0, 0, 1, 1], [], []>} : vector<110x128xf32>, vector<128x128xf32>, vector<110x128xf32> -> vector<110x128xf32>
    %288 = arith.addf %283, %287 : vector<110x128xf32>
    %c22_164 = arith.constant 22 : index
    %c0_165 = arith.constant 0 : index
    %289 = vector.load %arg21[%c22_164, %c0_165] : memref<136x128xf32, #tpu.memory_space<vmem>>, vector<110x128xf32>
    %c2 = arith.constant 2 : index
    %c0_166 = arith.constant 0 : index
    %c0_167 = arith.constant 0 : index
    %c0_168 = arith.constant 0 : index
    %290 = vector.load %arg8[%c2, %c0_166, %c0_167, %c0_168] : memref<3x2x128x128xf32, #tpu.memory_space<vmem>>, vector<1x1x128x128xf32>
    %291 = vector.shape_cast %290 : vector<1x1x128x128xf32> to vector<128x128xf32>
    %cst_169 = arith.constant dense<0.000000e+00> : vector<110x128xf32>
    %292 = tpu.matmul %289, %291, %cst_169 {dimension_numbers = #tpu.dot_dimension_numbers<[1], [0], [0], [1], [0, 0, 1, 1], [], []>} : vector<110x128xf32>, vector<128x128xf32>, vector<110x128xf32> -> vector<110x128xf32>
    %293 = arith.addf %288, %292 : vector<110x128xf32>
    %c23_170 = arith.constant 23 : index
    %c0_171 = arith.constant 0 : index
    %294 = vector.load %arg21[%c23_170, %c0_171] : memref<136x128xf32, #tpu.memory_space<vmem>>, vector<110x128xf32>
    %c2_172 = arith.constant 2 : index
    %c1_173 = arith.constant 1 : index
    %c0_174 = arith.constant 0 : index
    %c0_175 = arith.constant 0 : index
    %295 = vector.load %arg8[%c2_172, %c1_173, %c0_174, %c0_175] : memref<3x2x128x128xf32, #tpu.memory_space<vmem>>, vector<1x1x128x128xf32>
    %296 = vector.shape_cast %295 : vector<1x1x128x128xf32> to vector<128x128xf32>
    %cst_176 = arith.constant dense<0.000000e+00> : vector<110x128xf32>
    %297 = tpu.matmul %294, %296, %cst_176 {dimension_numbers = #tpu.dot_dimension_numbers<[1], [0], [0], [1], [0, 0, 1, 1], [], []>} : vector<110x128xf32>, vector<128x128xf32>, vector<110x128xf32> -> vector<110x128xf32>
    %298 = arith.addf %293, %297 : vector<110x128xf32>
    %c0_177 = arith.constant 0 : index
    %c0_178 = arith.constant 0 : index
    %299 = vector.load %arg9[%c0_177, %c0_178] : memref<1x128xf32, #tpu.memory_space<vmem>>, vector<1x128xf32>
    %300 = vector.broadcast %299 : vector<1x128xf32> to vector<110x128xf32>
    %301 = arith.addf %298, %300 : vector<110x128xf32>
    %cst_179 = arith.constant 0.000000e+00 : f32
    %302 = vector.broadcast %cst_179 : f32 to vector<110x128xf32>
    %303 = arith.maximumf %301, %302 : vector<110x128xf32>
    %c0_180 = arith.constant 0 : index
    %c0_181 = arith.constant 0 : index
    %304 = vector.load %arg22[%c0_180, %c0_181] : memref<112x128xf32, #tpu.memory_space<vmem>>, vector<110x128xf32>
    tpu.vector_store %arg22[%c0_180, %c0_181], %303 {strides = array<i32>} : memref<112x128xf32, #tpu.memory_space<vmem>>, vector<110x128xf32>,
    %cst_182 = arith.constant 0.000000e+00 : f32
    %305 = vector.broadcast %cst_182 : f32 to vector<2x128xf32>
    %c110_183 = arith.constant 110 : index
    %c0_184 = arith.constant 0 : index
    %306 = vector.load %arg22[%c110_183, %c0_184] : memref<112x128xf32, #tpu.memory_space<vmem>>, vector<2x128xf32>
    tpu.vector_store %arg22[%c110_183, %c0_184], %305 {strides = array<i32>} : memref<112x128xf32, #tpu.memory_space<vmem>>, vector<2x128xf32>,
    %cst_185 = arith.constant 0.000000e+00 : f32
    %307 = vector.broadcast %cst_185 : f32 to vector<88x128xf32>
    %c0_186 = arith.constant 0 : index
    %c0_187 = arith.constant 0 : index
    %308 = vector.load %arg22[%c0_186, %c0_187] : memref<112x128xf32, #tpu.memory_space<vmem>>, vector<88x128xf32>
    %c0_188 = arith.constant 0 : index
    %c0_189 = arith.constant 0 : index
    %c0_190 = arith.constant 0 : index
    %c0_191 = arith.constant 0 : index
    %309 = vector.load %arg10[%c0_188, %c0_189, %c0_190, %c0_191] : memref<3x2x128x128xf32, #tpu.memory_space<vmem>>, vector<1x1x128x128xf32>
    %310 = vector.shape_cast %309 : vector<1x1x128x128xf32> to vector<128x128xf32>
    %cst_192 = arith.constant dense<0.000000e+00> : vector<88x128xf32>
    %311 = tpu.matmul %308, %310, %cst_192 {dimension_numbers = #tpu.dot_dimension_numbers<[1], [0], [0], [1], [0, 0, 1, 1], [], []>} : vector<88x128xf32>, vector<128x128xf32>, vector<88x128xf32> -> vector<88x128xf32>
    %312 = arith.addf %307, %311 : vector<88x128xf32>
    %c1_193 = arith.constant 1 : index
    %c0_194 = arith.constant 0 : index
    %313 = vector.load %arg22[%c1_193, %c0_194] : memref<112x128xf32, #tpu.memory_space<vmem>>, vector<88x128xf32>
    %c0_195 = arith.constant 0 : index
    %c1_196 = arith.constant 1 : index
    %c0_197 = arith.constant 0 : index
    %c0_198 = arith.constant 0 : index
    %314 = vector.load %arg10[%c0_195, %c1_196, %c0_197, %c0_198] : memref<3x2x128x128xf32, #tpu.memory_space<vmem>>, vector<1x1x128x128xf32>
    %315 = vector.shape_cast %314 : vector<1x1x128x128xf32> to vector<128x128xf32>
    %cst_199 = arith.constant dense<0.000000e+00> : vector<88x128xf32>
    %316 = tpu.matmul %313, %315, %cst_199 {dimension_numbers = #tpu.dot_dimension_numbers<[1], [0], [0], [1], [0, 0, 1, 1], [], []>} : vector<88x128xf32>, vector<128x128xf32>, vector<88x128xf32> -> vector<88x128xf32>
    %317 = arith.addf %312, %316 : vector<88x128xf32>
    %c11_200 = arith.constant 11 : index
    %c0_201 = arith.constant 0 : index
    %318 = vector.load %arg22[%c11_200, %c0_201] : memref<112x128xf32, #tpu.memory_space<vmem>>, vector<88x128xf32>
    %c1_202 = arith.constant 1 : index
    %c0_203 = arith.constant 0 : index
    %c0_204 = arith.constant 0 : index
    %c0_205 = arith.constant 0 : index
    %319 = vector.load %arg10[%c1_202, %c0_203, %c0_204, %c0_205] : memref<3x2x128x128xf32, #tpu.memory_space<vmem>>, vector<1x1x128x128xf32>
    %320 = vector.shape_cast %319 : vector<1x1x128x128xf32> to vector<128x128xf32>
    %cst_206 = arith.constant dense<0.000000e+00> : vector<88x128xf32>
    %321 = tpu.matmul %318, %320, %cst_206 {dimension_numbers = #tpu.dot_dimension_numbers<[1], [0], [0], [1], [0, 0, 1, 1], [], []>} : vector<88x128xf32>, vector<128x128xf32>, vector<88x128xf32> -> vector<88x128xf32>
    %322 = arith.addf %317, %321 : vector<88x128xf32>
    %c12_207 = arith.constant 12 : index
    %c0_208 = arith.constant 0 : index
    %323 = vector.load %arg22[%c12_207, %c0_208] : memref<112x128xf32, #tpu.memory_space<vmem>>, vector<88x128xf32>
    %c1_209 = arith.constant 1 : index
    %c1_210 = arith.constant 1 : index
    %c0_211 = arith.constant 0 : index
    %c0_212 = arith.constant 0 : index
    %324 = vector.load %arg10[%c1_209, %c1_210, %c0_211, %c0_212] : memref<3x2x128x128xf32, #tpu.memory_space<vmem>>, vector<1x1x128x128xf32>
    %325 = vector.shape_cast %324 : vector<1x1x128x128xf32> to vector<128x128xf32>
    %cst_213 = arith.constant dense<0.000000e+00> : vector<88x128xf32>
    %326 = tpu.matmul %323, %325, %cst_213 {dimension_numbers = #tpu.dot_dimension_numbers<[1], [0], [0], [1], [0, 0, 1, 1], [], []>} : vector<88x128xf32>, vector<128x128xf32>, vector<88x128xf32> -> vector<88x128xf32>
    %327 = arith.addf %322, %326 : vector<88x128xf32>
    %c22_214 = arith.constant 22 : index
    %c0_215 = arith.constant 0 : index
    %328 = vector.load %arg22[%c22_214, %c0_215] : memref<112x128xf32, #tpu.memory_space<vmem>>, vector<88x128xf32>
    %c2_216 = arith.constant 2 : index
    %c0_217 = arith.constant 0 : index
    %c0_218 = arith.constant 0 : index
    %c0_219 = arith.constant 0 : index
    %329 = vector.load %arg10[%c2_216, %c0_217, %c0_218, %c0_219] : memref<3x2x128x128xf32, #tpu.memory_space<vmem>>, vector<1x1x128x128xf32>
    %330 = vector.shape_cast %329 : vector<1x1x128x128xf32> to vector<128x128xf32>
    %cst_220 = arith.constant dense<0.000000e+00> : vector<88x128xf32>
    %331 = tpu.matmul %328, %330, %cst_220 {dimension_numbers = #tpu.dot_dimension_numbers<[1], [0], [0], [1], [0, 0, 1, 1], [], []>} : vector<88x128xf32>, vector<128x128xf32>, vector<88x128xf32> -> vector<88x128xf32>
    %332 = arith.addf %327, %331 : vector<88x128xf32>
    %c23_221 = arith.constant 23 : index
    %c0_222 = arith.constant 0 : index
    %333 = vector.load %arg22[%c23_221, %c0_222] : memref<112x128xf32, #tpu.memory_space<vmem>>, vector<88x128xf32>
    %c2_223 = arith.constant 2 : index
    %c1_224 = arith.constant 1 : index
    %c0_225 = arith.constant 0 : index
    %c0_226 = arith.constant 0 : index
    %334 = vector.load %arg10[%c2_223, %c1_224, %c0_225, %c0_226] : memref<3x2x128x128xf32, #tpu.memory_space<vmem>>, vector<1x1x128x128xf32>
    %335 = vector.shape_cast %334 : vector<1x1x128x128xf32> to vector<128x128xf32>
    %cst_227 = arith.constant dense<0.000000e+00> : vector<88x128xf32>
    %336 = tpu.matmul %333, %335, %cst_227 {dimension_numbers = #tpu.dot_dimension_numbers<[1], [0], [0], [1], [0, 0, 1, 1], [], []>} : vector<88x128xf32>, vector<128x128xf32>, vector<88x128xf32> -> vector<88x128xf32>
    %337 = arith.addf %332, %336 : vector<88x128xf32>
    %c0_228 = arith.constant 0 : index
    %c0_229 = arith.constant 0 : index
    %338 = vector.load %arg11[%c0_228, %c0_229] : memref<1x128xf32, #tpu.memory_space<vmem>>, vector<1x128xf32>
    %339 = vector.broadcast %338 : vector<1x128xf32> to vector<88x128xf32>
    %340 = arith.addf %337, %339 : vector<88x128xf32>
    %cst_230 = arith.constant 0.000000e+00 : f32
    %341 = vector.broadcast %cst_230 : f32 to vector<88x128xf32>
    %342 = arith.maximumf %340, %341 : vector<88x128xf32>
    %c0_231 = arith.constant 0 : index
    %c0_232 = arith.constant 0 : index
    %343 = vector.load %arg12[%c0_231, %c0_232] : memref<1x128xf32, #tpu.memory_space<vmem>>, vector<1x128xf32>
    %344 = vector.broadcast %343 : vector<1x128xf32> to vector<88x128xf32>
    %345 = arith.mulf %342, %344 : vector<88x128xf32>
    %c0_233 = arith.constant 0 : index
    %c0_234 = arith.constant 0 : index
    %346 = vector.load %arg13[%c0_233, %c0_234] : memref<1x128xf32, #tpu.memory_space<vmem>>, vector<1x128xf32>
    %347 = vector.broadcast %346 : vector<1x128xf32> to vector<88x128xf32>
    %348 = arith.addf %345, %347 : vector<88x128xf32>
    %c0_235 = arith.constant 0 : index
    %c0_236 = arith.constant 0 : index
    %349 = vector.load %arg23[%c0_235, %c0_236] : memref<96x128xf32, #tpu.memory_space<vmem>>, vector<88x128xf32>
    tpu.vector_store %arg23[%c0_235, %c0_236], %348 {strides = array<i32>} : memref<96x128xf32, #tpu.memory_space<vmem>>, vector<88x128xf32>,
    %cst_237 = arith.constant 0.000000e+00 : f32
    %350 = vector.broadcast %cst_237 : f32 to vector<8x128xf32>
    %c88_238 = arith.constant 88 : index
    %c0_239 = arith.constant 0 : index
    %351 = vector.load %arg23[%c88_238, %c0_239] : memref<96x128xf32, #tpu.memory_space<vmem>>, vector<8x128xf32>
    tpu.vector_store %arg23[%c88_238, %c0_239], %350 {strides = array<i32>} : memref<96x128xf32, #tpu.memory_space<vmem>>, vector<8x128xf32>,
    %cst_240 = arith.constant 0.000000e+00 : f32
    %352 = vector.broadcast %cst_240 : f32 to vector<66x128xf32>
    %c0_241 = arith.constant 0 : index
    %c0_242 = arith.constant 0 : index
    %353 = vector.load %arg23[%c0_241, %c0_242] : memref<96x128xf32, #tpu.memory_space<vmem>>, vector<66x128xf32>
    %c0_243 = arith.constant 0 : index
    %c0_244 = arith.constant 0 : index
    %c0_245 = arith.constant 0 : index
    %c0_246 = arith.constant 0 : index
    %354 = vector.load %arg14[%c0_243, %c0_244, %c0_245, %c0_246] : memref<3x2x128x128xf32, #tpu.memory_space<vmem>>, vector<1x1x128x128xf32>
    %355 = vector.shape_cast %354 : vector<1x1x128x128xf32> to vector<128x128xf32>
    %cst_247 = arith.constant dense<0.000000e+00> : vector<66x128xf32>
    %356 = tpu.matmul %353, %355, %cst_247 {dimension_numbers = #tpu.dot_dimension_numbers<[1], [0], [0], [1], [0, 0, 1, 1], [], []>} : vector<66x128xf32>, vector<128x128xf32>, vector<66x128xf32> -> vector<66x128xf32>
    %357 = arith.addf %352, %356 : vector<66x128xf32>
    %c1_248 = arith.constant 1 : index
    %c0_249 = arith.constant 0 : index
    %358 = vector.load %arg23[%c1_248, %c0_249] : memref<96x128xf32, #tpu.memory_space<vmem>>, vector<66x128xf32>
    %c0_250 = arith.constant 0 : index
    %c1_251 = arith.constant 1 : index
    %c0_252 = arith.constant 0 : index
    %c0_253 = arith.constant 0 : index
    %359 = vector.load %arg14[%c0_250, %c1_251, %c0_252, %c0_253] : memref<3x2x128x128xf32, #tpu.memory_space<vmem>>, vector<1x1x128x128xf32>
    %360 = vector.shape_cast %359 : vector<1x1x128x128xf32> to vector<128x128xf32>
    %cst_254 = arith.constant dense<0.000000e+00> : vector<66x128xf32>
    %361 = tpu.matmul %358, %360, %cst_254 {dimension_numbers = #tpu.dot_dimension_numbers<[1], [0], [0], [1], [0, 0, 1, 1], [], []>} : vector<66x128xf32>, vector<128x128xf32>, vector<66x128xf32> -> vector<66x128xf32>
    %362 = arith.addf %357, %361 : vector<66x128xf32>
    %c11_255 = arith.constant 11 : index
    %c0_256 = arith.constant 0 : index
    %363 = vector.load %arg23[%c11_255, %c0_256] : memref<96x128xf32, #tpu.memory_space<vmem>>, vector<66x128xf32>
    %c1_257 = arith.constant 1 : index
    %c0_258 = arith.constant 0 : index
    %c0_259 = arith.constant 0 : index
    %c0_260 = arith.constant 0 : index
    %364 = vector.load %arg14[%c1_257, %c0_258, %c0_259, %c0_260] : memref<3x2x128x128xf32, #tpu.memory_space<vmem>>, vector<1x1x128x128xf32>
    %365 = vector.shape_cast %364 : vector<1x1x128x128xf32> to vector<128x128xf32>
    %cst_261 = arith.constant dense<0.000000e+00> : vector<66x128xf32>
    %366 = tpu.matmul %363, %365, %cst_261 {dimension_numbers = #tpu.dot_dimension_numbers<[1], [0], [0], [1], [0, 0, 1, 1], [], []>} : vector<66x128xf32>, vector<128x128xf32>, vector<66x128xf32> -> vector<66x128xf32>
    %367 = arith.addf %362, %366 : vector<66x128xf32>
    %c12_262 = arith.constant 12 : index
    %c0_263 = arith.constant 0 : index
    %368 = vector.load %arg23[%c12_262, %c0_263] : memref<96x128xf32, #tpu.memory_space<vmem>>, vector<66x128xf32>
    %c1_264 = arith.constant 1 : index
    %c1_265 = arith.constant 1 : index
    %c0_266 = arith.constant 0 : index
    %c0_267 = arith.constant 0 : index
    %369 = vector.load %arg14[%c1_264, %c1_265, %c0_266, %c0_267] : memref<3x2x128x128xf32, #tpu.memory_space<vmem>>, vector<1x1x128x128xf32>
    %370 = vector.shape_cast %369 : vector<1x1x128x128xf32> to vector<128x128xf32>
    %cst_268 = arith.constant dense<0.000000e+00> : vector<66x128xf32>
    %371 = tpu.matmul %368, %370, %cst_268 {dimension_numbers = #tpu.dot_dimension_numbers<[1], [0], [0], [1], [0, 0, 1, 1], [], []>} : vector<66x128xf32>, vector<128x128xf32>, vector<66x128xf32> -> vector<66x128xf32>
    %372 = arith.addf %367, %371 : vector<66x128xf32>
    %c22_269 = arith.constant 22 : index
    %c0_270 = arith.constant 0 : index
    %373 = vector.load %arg23[%c22_269, %c0_270] : memref<96x128xf32, #tpu.memory_space<vmem>>, vector<66x128xf32>
    %c2_271 = arith.constant 2 : index
    %c0_272 = arith.constant 0 : index
    %c0_273 = arith.constant 0 : index
    %c0_274 = arith.constant 0 : index
    %374 = vector.load %arg14[%c2_271, %c0_272, %c0_273, %c0_274] : memref<3x2x128x128xf32, #tpu.memory_space<vmem>>, vector<1x1x128x128xf32>
    %375 = vector.shape_cast %374 : vector<1x1x128x128xf32> to vector<128x128xf32>
    %cst_275 = arith.constant dense<0.000000e+00> : vector<66x128xf32>
    %376 = tpu.matmul %373, %375, %cst_275 {dimension_numbers = #tpu.dot_dimension_numbers<[1], [0], [0], [1], [0, 0, 1, 1], [], []>} : vector<66x128xf32>, vector<128x128xf32>, vector<66x128xf32> -> vector<66x128xf32>
    %377 = arith.addf %372, %376 : vector<66x128xf32>
    %c23_276 = arith.constant 23 : index
    %c0_277 = arith.constant 0 : index
    %378 = vector.load %arg23[%c23_276, %c0_277] : memref<96x128xf32, #tpu.memory_space<vmem>>, vector<66x128xf32>
    %c2_278 = arith.constant 2 : index
    %c1_279 = arith.constant 1 : index
    %c0_280 = arith.constant 0 : index
    %c0_281 = arith.constant 0 : index
    %379 = vector.load %arg14[%c2_278, %c1_279, %c0_280, %c0_281] : memref<3x2x128x128xf32, #tpu.memory_space<vmem>>, vector<1x1x128x128xf32>
    %380 = vector.shape_cast %379 : vector<1x1x128x128xf32> to vector<128x128xf32>
    %cst_282 = arith.constant dense<0.000000e+00> : vector<66x128xf32>
    %381 = tpu.matmul %378, %380, %cst_282 {dimension_numbers = #tpu.dot_dimension_numbers<[1], [0], [0], [1], [0, 0, 1, 1], [], []>} : vector<66x128xf32>, vector<128x128xf32>, vector<66x128xf32> -> vector<66x128xf32>
    %382 = arith.addf %377, %381 : vector<66x128xf32>
    %c0_283 = arith.constant 0 : index
    %c0_284 = arith.constant 0 : index
    %383 = vector.load %arg15[%c0_283, %c0_284] : memref<1x128xf32, #tpu.memory_space<vmem>>, vector<1x128xf32>
    %384 = vector.broadcast %383 : vector<1x128xf32> to vector<66x128xf32>
    %385 = arith.addf %382, %384 : vector<66x128xf32>
    %cst_285 = arith.constant 0.000000e+00 : f32
    %386 = vector.broadcast %cst_285 : f32 to vector<66x128xf32>
    %387 = arith.maximumf %385, %386 : vector<66x128xf32>
    %c0_286 = arith.constant 0 : index
    %c0_287 = arith.constant 0 : index
    %388 = vector.load %arg16[%c0_286, %c0_287] : memref<1x128xf32, #tpu.memory_space<vmem>>, vector<1x128xf32>
    %389 = vector.broadcast %388 : vector<1x128xf32> to vector<66x128xf32>
    %390 = arith.mulf %387, %389 : vector<66x128xf32>
    %c0_288 = arith.constant 0 : index
    %c0_289 = arith.constant 0 : index
    %391 = vector.load %arg17[%c0_288, %c0_289] : memref<1x128xf32, #tpu.memory_space<vmem>>, vector<1x128xf32>
    %392 = vector.broadcast %391 : vector<1x128xf32> to vector<66x128xf32>
    %393 = arith.addf %390, %392 : vector<66x128xf32>
    %394 = vector.extract_strided_slice %393 {offsets = [0, 0], sizes = [10, 128], strides = [1, 1]} : vector<66x128xf32> to vector<10x128xf32>
    %c0_290 = arith.constant 0 : index
    %c0_291 = arith.constant 0 : index
    %c0_292 = arith.constant 0 : index
    %395 = vector.load %arg18[%c0_290, %c0_291, %c0_292] : memref<1x60x128xf32, #tpu.memory_space<vmem>>, vector<1x10x128xf32>
    %396 = vector.shape_cast %395 : vector<1x10x128xf32> to vector<10x128xf32>
    %397 = vector.shape_cast %394 : vector<10x128xf32> to vector<1x10x128xf32>
    tpu.vector_store %arg18[%c0_290, %c0_291, %c0_292], %397 {strides = array<i32>} : memref<1x60x128xf32, #tpu.memory_space<vmem>>, vector<1x10x128xf32>,
    %398 = vector.extract_strided_slice %393 {offsets = [11, 0], sizes = [10, 128], strides = [1, 1]} : vector<66x128xf32> to vector<10x128xf32>
    %c0_293 = arith.constant 0 : index
    %c10 = arith.constant 10 : index
    %c0_294 = arith.constant 0 : index
    %399 = vector.load %arg18[%c0_293, %c10, %c0_294] : memref<1x60x128xf32, #tpu.memory_space<vmem>>, vector<1x10x128xf32>
    %400 = vector.shape_cast %399 : vector<1x10x128xf32> to vector<10x128xf32>
    %401 = vector.shape_cast %398 : vector<10x128xf32> to vector<1x10x128xf32>
    tpu.vector_store %arg18[%c0_293, %c10, %c0_294], %401 {strides = array<i32>} : memref<1x60x128xf32, #tpu.memory_space<vmem>>, vector<1x10x128xf32>,
    %402 = vector.extract_strided_slice %393 {offsets = [22, 0], sizes = [10, 128], strides = [1, 1]} : vector<66x128xf32> to vector<10x128xf32>
    %c0_295 = arith.constant 0 : index
    %c20 = arith.constant 20 : index
    %c0_296 = arith.constant 0 : index
    %403 = vector.load %arg18[%c0_295, %c20, %c0_296] : memref<1x60x128xf32, #tpu.memory_space<vmem>>, vector<1x10x128xf32>
    %404 = vector.shape_cast %403 : vector<1x10x128xf32> to vector<10x128xf32>
    %405 = vector.shape_cast %402 : vector<10x128xf32> to vector<1x10x128xf32>
    tpu.vector_store %arg18[%c0_295, %c20, %c0_296], %405 {strides = array<i32>} : memref<1x60x128xf32, #tpu.memory_space<vmem>>, vector<1x10x128xf32>,
    %406 = vector.extract_strided_slice %393 {offsets = [33, 0], sizes = [10, 128], strides = [1, 1]} : vector<66x128xf32> to vector<10x128xf32>
    %c0_297 = arith.constant 0 : index
    %c30 = arith.constant 30 : index
    %c0_298 = arith.constant 0 : index
    %407 = vector.load %arg18[%c0_297, %c30, %c0_298] : memref<1x60x128xf32, #tpu.memory_space<vmem>>, vector<1x10x128xf32>
    %408 = vector.shape_cast %407 : vector<1x10x128xf32> to vector<10x128xf32>
    %409 = vector.shape_cast %406 : vector<10x128xf32> to vector<1x10x128xf32>
    tpu.vector_store %arg18[%c0_297, %c30, %c0_298], %409 {strides = array<i32>} : memref<1x60x128xf32, #tpu.memory_space<vmem>>, vector<1x10x128xf32>,
    %410 = vector.extract_strided_slice %393 {offsets = [44, 0], sizes = [10, 128], strides = [1, 1]} : vector<66x128xf32> to vector<10x128xf32>
    %c0_299 = arith.constant 0 : index
    %c40 = arith.constant 40 : index
    %c0_300 = arith.constant 0 : index
    %411 = vector.load %arg18[%c0_299, %c40, %c0_300] : memref<1x60x128xf32, #tpu.memory_space<vmem>>, vector<1x10x128xf32>
    %412 = vector.shape_cast %411 : vector<1x10x128xf32> to vector<10x128xf32>
    %413 = vector.shape_cast %410 : vector<10x128xf32> to vector<1x10x128xf32>
    tpu.vector_store %arg18[%c0_299, %c40, %c0_300], %413 {strides = array<i32>} : memref<1x60x128xf32, #tpu.memory_space<vmem>>, vector<1x10x128xf32>,
    %414 = vector.extract_strided_slice %393 {offsets = [55, 0], sizes = [10, 128], strides = [1, 1]} : vector<66x128xf32> to vector<10x128xf32>
    %c0_301 = arith.constant 0 : index
    %c50 = arith.constant 50 : index
    %c0_302 = arith.constant 0 : index
    %415 = vector.load %arg18[%c0_301, %c50, %c0_302] : memref<1x60x128xf32, #tpu.memory_space<vmem>>, vector<1x10x128xf32>
    %416 = vector.shape_cast %415 : vector<1x10x128xf32> to vector<10x128xf32>
    %417 = vector.shape_cast %414 : vector<10x128xf32> to vector<1x10x128xf32>
    tpu.vector_store %arg18[%c0_301, %c50, %c0_302], %417 {strides = array<i32>} : memref<1x60x128xf32, #tpu.memory_space<vmem>>, vector<1x10x128xf32>,
    return
  }
  func.func @transform_0(%arg0: i32) -> (i32, i32, i32) {
    %c0_i32 = arith.constant 0 : i32
    %c0_i32_0 = arith.constant 0 : i32
    %c0_i32_1 = arith.constant 0 : i32
    return %arg0, %c0_i32, %c0_i32_0 : i32, i32, i32
  }
  func.func @transform_1(%arg0: i32) -> (i32, i32) {
    %c0_i32 = arith.constant 0 : i32
    %c0_i32_0 = arith.constant 0 : i32
    %c0_i32_1 = arith.constant 0 : i32
    return %c0_i32, %c0_i32_0 : i32, i32
  }
  func.func @transform_2(%arg0: i32) -> (i32, i32) {
    %c0_i32 = arith.constant 0 : i32
    %c0_i32_0 = arith.constant 0 : i32
    %c0_i32_1 = arith.constant 0 : i32
    return %c0_i32, %c0_i32_0 : i32, i32
  }
  func.func @transform_3(%arg0: i32) -> (i32, i32, i32, i32) {
    %c0_i32 = arith.constant 0 : i32
    %c0_i32_0 = arith.constant 0 : i32
    %c0_i32_1 = arith.constant 0 : i32
    %c0_i32_2 = arith.constant 0 : i32
    %c0_i32_3 = arith.constant 0 : i32
    return %c0_i32, %c0_i32_0, %c0_i32_1, %c0_i32_2 : i32, i32, i32, i32
  }
  func.func @transform_4(%arg0: i32) -> (i32, i32) {
    %c0_i32 = arith.constant 0 : i32
    %c0_i32_0 = arith.constant 0 : i32
    %c0_i32_1 = arith.constant 0 : i32
    return %c0_i32, %c0_i32_0 : i32, i32
  }
  func.func @transform_5(%arg0: i32) -> (i32, i32) {
    %c0_i32 = arith.constant 0 : i32
    %c0_i32_0 = arith.constant 0 : i32
    %c0_i32_1 = arith.constant 0 : i32
    return %c0_i32, %c0_i32_0 : i32, i32
  }
  func.func @transform_6(%arg0: i32) -> (i32, i32) {
    %c0_i32 = arith.constant 0 : i32
    %c0_i32_0 = arith.constant 0 : i32
    %c0_i32_1 = arith.constant 0 : i32
    return %c0_i32, %c0_i32_0 : i32, i32
  }
  func.func @transform_7(%arg0: i32) -> (i32, i32, i32, i32) {
    %c0_i32 = arith.constant 0 : i32
    %c0_i32_0 = arith.constant 0 : i32
    %c0_i32_1 = arith.constant 0 : i32
    %c0_i32_2 = arith.constant 0 : i32
    %c0_i32_3 = arith.constant 0 : i32
    return %c0_i32, %c0_i32_0, %c0_i32_1, %c0_i32_2 : i32, i32, i32, i32
  }
  func.func @transform_8(%arg0: i32) -> (i32, i32) {
    %c0_i32 = arith.constant 0 : i32
    %c0_i32_0 = arith.constant 0 : i32
    %c0_i32_1 = arith.constant 0 : i32
    return %c0_i32, %c0_i32_0 : i32, i32
  }
  func.func @transform_9(%arg0: i32) -> (i32, i32, i32, i32) {
    %c0_i32 = arith.constant 0 : i32
    %c0_i32_0 = arith.constant 0 : i32
    %c0_i32_1 = arith.constant 0 : i32
    %c0_i32_2 = arith.constant 0 : i32
    %c0_i32_3 = arith.constant 0 : i32
    return %c0_i32, %c0_i32_0, %c0_i32_1, %c0_i32_2 : i32, i32, i32, i32
  }
  func.func @transform_10(%arg0: i32) -> (i32, i32) {
    %c0_i32 = arith.constant 0 : i32
    %c0_i32_0 = arith.constant 0 : i32
    %c0_i32_1 = arith.constant 0 : i32
    return %c0_i32, %c0_i32_0 : i32, i32
  }
  func.func @transform_11(%arg0: i32) -> (i32, i32) {
    %c0_i32 = arith.constant 0 : i32
    %c0_i32_0 = arith.constant 0 : i32
    %c0_i32_1 = arith.constant 0 : i32
    return %c0_i32, %c0_i32_0 : i32, i32
  }
  func.func @transform_12(%arg0: i32) -> (i32, i32) {
    %c0_i32 = arith.constant 0 : i32
    %c0_i32_0 = arith.constant 0 : i32
    %c0_i32_1 = arith.constant 0 : i32
    return %c0_i32, %c0_i32_0 : i32, i32
  }
  func.func @transform_13(%arg0: i32) -> (i32, i32, i32, i32) {
    %c0_i32 = arith.constant 0 : i32
    %c0_i32_0 = arith.constant 0 : i32
    %c0_i32_1 = arith.constant 0 : i32
    %c0_i32_2 = arith.constant 0 : i32
    %c0_i32_3 = arith.constant 0 : i32
    return %c0_i32, %c0_i32_0, %c0_i32_1, %c0_i32_2 : i32, i32, i32, i32
  }
  func.func @transform_14(%arg0: i32) -> (i32, i32) {
    %c0_i32 = arith.constant 0 : i32
    %c0_i32_0 = arith.constant 0 : i32
    %c0_i32_1 = arith.constant 0 : i32
    return %c0_i32, %c0_i32_0 : i32, i32
  }
  func.func @transform_15(%arg0: i32) -> (i32, i32) {
    %c0_i32 = arith.constant 0 : i32
    %c0_i32_0 = arith.constant 0 : i32
    %c0_i32_1 = arith.constant 0 : i32
    return %c0_i32, %c0_i32_0 : i32, i32
  }
  func.func @transform_16(%arg0: i32) -> (i32, i32) {
    %c0_i32 = arith.constant 0 : i32
    %c0_i32_0 = arith.constant 0 : i32
    %c0_i32_1 = arith.constant 0 : i32
    return %c0_i32, %c0_i32_0 : i32, i32
  }
  func.func @transform_17(%arg0: i32) -> (i32, i32, i32) {
    %c0_i32 = arith.constant 0 : i32
    %c0_i32_0 = arith.constant 0 : i32
    %c0_i32_1 = arith.constant 0 : i32
    return %arg0, %c0_i32, %c0_i32_0 : i32, i32, i32
  }
}

</mosaic_0001>

<bundles_post_ra>
// kernel: tpu_custom_call.1
= control target key start
LH: loop header
LB: loop body
LE: loop exit
PB: predicated region body
PF: predicated region fallthrough
CT: control target
= control target key end

     0   :  { %s14511_s0 = inlined_call_operand.hbm [shape: f32[2,648,128], index: 0, kind: input, shape index: {}]   ;;  %s14512_s1 = inlined_call_operand.hbm [shape: f32[128,128], index: 1, kind: input, shape index: {}]   ;;  %s14513_s2 = inlined_call_operand.vmem [shape: f32[1,128], index: 2, kind: input, shape index: {}]   ;;  %s14514_s3 = inlined_call_operand.hbm [shape: f32[5,2,128,128], index: 3, kind: input, shape index: {}]   ;;  %s14515_s4 = inlined_call_operand.vmem [shape: f32[1,128], index: 4, kind: input, shape index: {}]   ;;  %s14516_s5 = inlined_call_operand.vmem [shape: f32[1,128], index: 5, kind: input, shape index: {}]   ;;  %s14517_s6 = inlined_call_operand.vmem [shape: f32[1,128], index: 6, kind: input, shape index: {}]   ;;  %s14518_s7 = inlined_call_operand.hbm [shape: f32[3,2,128,128], index: 7, kind: input, shape index: {}]   ;;  %s14519_s8 = inlined_call_operand.vmem [shape: f32[1,128], index: 8, kind: input, shape index: {}]   ;;  %s14520_s9 = inlined_call_operand.hbm [shape: f32[3,2,128,128], index: 9, kind: input, shape index: {}]   ;;  %s14521_s10 = inlined_call_operand.vmem [shape: f32[1,128], index: 10, kind: input, shape index: {}]   ;;  %s14522_s11 = inlined_call_operand.vmem [shape: f32[1,128], index: 11, kind: input, shape index: {}]   ;;  %s14523_s12 = inlined_call_operand.vmem [shape: f32[1,128], index: 12, kind: input, shape index: {}]   ;;  %s14524_s13 = inlined_call_operand.hbm [shape: f32[3,2,128,128], index: 13, kind: input, shape index: {}]   ;;  %s14525_s14 = inlined_call_operand.vmem [shape: f32[1,128], index: 14, kind: input, shape index: {}]   ;;  %s14526_s15 = inlined_call_operand.vmem [shape: f32[1,128], index: 15, kind: input, shape index: {}]   ;;  %s14527_s16 = inlined_call_operand.vmem [shape: f32[1,128], index: 16, kind: input, shape index: {}]   ;;  %s14528_s17 = inlined_call_operand.vmem [shape: f32[2,60,128], index: 17, kind: output, shape index: {}]  }
   0x1   :  { %14537 = sst [smem:[#allocation26_spill]] %s14511_s0 }
   0x2   :  { %14538 = sst [smem:[#allocation27_spill]] %s14512_s1 }
   0x3   :  { %14539 = sst [smem:[#allocation28_spill]] %s14514_s3 }
   0x4   :  { %14540 = sst [smem:[#allocation29_spill]] %s14518_s7 }
   0x5   :  { %14541 = sst [smem:[#allocation30_spill]] %s14520_s9 }
   0x6   :  { %14542 = sst [smem:[#allocation31_spill]] %s14525_s14 }
   0x7   :  { %14543 = sst [smem:[#allocation32_spill]] %s14526_s15 }
   0x8   :  { %14544 = sst [smem:[#allocation33_spill]] %s14527_s16 }
   0x9   :  { %22 = vsyncpa [#allocation8], 0 }
   0xa   :  { %24 = vsyncpa [#allocation8 + $0x1], 0 }
   0xb   :  { %25 = vsyncpa [#allocation10], 0 }
   0xc   :  { %26 = vsyncpa [#allocation13], 0 }
   0xd   :  { %27 = vsyncpa [#allocation16], 0  ;;  %s11370_s24 = smov 0   ;;  %s11372_s25 = smov 0  }
   0xe   :  { %s11374_s26 = smov 0   ;;  %s11376_s27 = smov 0  }
   0xf LB: > { %s11263_s28 = smov [#allocation9]   ;;  %s11391_s0 = sadd.s32 4294967295, %s11253_s27   ;;  %s11253_s27 = sphi %s11376_s27, %s14582_s27   ;;  %s11249_s26 = sphi %s11374_s26, %s14581_s26   ;;  %s11245_s25 = sphi %s11372_s25, %s14580_s25   ;;  %s11241_s24 = sphi %s11370_s24, %s14579_s24  }
  0x10   : > { %s438_s29 = sshll.u32 %s11263_s28, 4  ;;  %p7540_p0 = scmp.ge.s32.totalorder %s11253_s27, 1  ;;  %s439_s29 = int_to_ptr.vmem [resolvable:$true] %s438_s29 }
  0x11   : > { %p14532_p1 = scmp.eq.s32.totalorder %s11391_s0, 0  ;;  %p426_p2 = scmp.lt.s32.totalorder %s11253_s27, 3 }
  0x12   : > { %s11264_s18 = smov [#allocation12]   ;;  %s11265_s20 = smov [#allocation11]  }
  0x13   : > { %p11396_p3 = pnand %p7540_p0, %p426_p2  ;;  %s476_s19 = sshll.u32 %s11264_s18, 4  ;;  %s11408_s19 = int_to_ptr.vmem [resolvable:$true] %s476_s19 }
  0x14   : > { %s454_s21 = sshll.u32 %s11265_s20, 4  ;;  %s11052_s23 = scalar_lea.vmem %s439_s29, 2048  ;;  %s11410_s21 = int_to_ptr.vmem [resolvable:$true] %s454_s21 }
  0x15   : > { %s14545_s30 = scalar_select %p11396_p3, 1, 0 }
  0x16   : > { %p10944_p4 = pneg %p11396_p3  ;;  %p11053_p7 = scmp.ne.s32.totalorder %s439_s29, %s11052_s23 }
  0x17   : > { %p11060_p10 = scmp.lt.s32.totalorder %s439_s29, %s439_s29  ;;  %p11061_p11 = scmp.lt.s32.totalorder %s11052_s23, %s11052_s23 }
  0x18   : > { %p11404_p5 = pnand %p10944_p4, %p14532_p1 }
  0x19   : > { %p11062_p12 = por %p11061_p11, %p11060_p10 }
  0x1a   : > { %p11414_p6 = pneg %p11404_p5 }
  0x1c   : > { %p11055_p8 = pnand %p11053_p7, %p11414_p6 }
  0x1e   : > { %p11056_p9 = pneg %p11055_p8 }
  0x20   : > { %p11063_p13 = pnand %p11062_p12, %p11056_p9 }
  0x22   : > { %11066 = shalt.err (!%p11063_p13)
}
  0x23   : > { %s14530_s28 = smov 128   ;;  %s14531_s18 = smov 8  }
  0x24   : > { %s14548_s15 = sld [smem:[#allocation27_spill]]  ;;  %s11078_s14 = scalar_lea.vmem %s11408_s19, 12288 }
  0x25   : > { %p11079_p0 = scmp.ne.s32.totalorder %s11408_s19, %s11078_s14  ;;  %p11086_p7 = scmp.lt.s32.totalorder %s11408_s19, %s11408_s19 }
  0x26   : > { %p11087_p8 = scmp.lt.s32.totalorder %s11078_s14, %s11078_s14 }
  0x27   : > { %p11081_p2 = pnand %p11079_p0, %p11414_p6 }
  0x28   : > { %p11088_p9 = por %p11087_p8, %p11086_p7 }
  0x29   : > { %p11082_p4 = pneg %p11081_p2 }
  0x2a   : > { %10947 = dma.hbm_to_vmem [thread:$0]  (!%p11404_p5), %s14548_s15, 2048, %s439_s29, [#allocation10], %s14530_s28, %s14530_s28, %s14531_s18  }
  0x2b   : > { %p11089_p10 = pnand %p11088_p9, %p11082_p4 }
  0x2d   : > { %11092 = shalt.err (!%p11089_p10)
}
  0x2e   : > { %s14549_s7 = sld [smem:[#allocation29_spill]]  ;;  %s11104_s15 = scalar_lea.vmem %s11410_s21, 20480 }
  0x2f   : > { %p11105_p11 = scmp.ne.s32.totalorder %s11410_s21, %s11104_s15  ;;  %p11112_p0 = scmp.lt.s32.totalorder %s11410_s21, %s11410_s21 }
  0x30   : > { %p11113_p2 = scmp.lt.s32.totalorder %s11104_s15, %s11104_s15 }
  0x31   : > { %p11107_p12 = pnand %p11105_p11, %p11414_p6 }
  0x32   : > { %p11114_p4 = por %p11113_p2, %p11112_p0 }
  0x33   : > { %p11108_p13 = pneg %p11107_p12 }
  0x34   : > { %10953 = dma.hbm_to_vmem [thread:$0]  (!%p11404_p5), %s14549_s7, 12288, %s11408_s19, [#allocation13], %s14530_s28, %s14530_s28, %s14531_s18  }
  0x35   : > { %p11115_p7 = pnand %p11114_p4, %p11108_p13 }
  0x37   : > { %11118 = shalt.err (!%p11115_p7)
}
  0x38   : > { %s14550_s3 = sld [smem:[#allocation28_spill]]  ;;  %s11268_s19 = smov [#allocation14]  }
  0x39   : > { %s492_s20 = sshll.u32 %s11268_s19, 4  ;;  %s11269_s23 = smov [#allocation15]   ;;  %s493_s20 = int_to_ptr.vmem [resolvable:$true] %s492_s20 }
  0x3a   : > { %s514_s16 = sshll.u32 %s11269_s23, 4  ;;  %s11130_s15 = scalar_lea.vmem %s493_s20, 12288  ;;  %s515_s16 = int_to_ptr.vmem [resolvable:$true] %s514_s16 }
  0x3b   : > { %p11131_p8 = scmp.ne.s32.totalorder %s493_s20, %s11130_s15  ;;  %p11138_p11 = scmp.lt.s32.totalorder %s493_s20, %s493_s20 }
  0x3c   : > { %p11139_p12 = scmp.lt.s32.totalorder %s11130_s15, %s11130_s15 }
  0x3d   : > { %p11133_p9 = pnand %p11131_p8, %p11414_p6 }
  0x3e   : > { %10950 = dma.hbm_to_vmem [thread:$0]  (!%p11404_p5), %s14550_s3, 20480, %s11410_s21, [#allocation10], %s14530_s28, %s14530_s28, %s14531_s18  }
  0x3f   : > { %p11134_p10 = pneg %p11133_p9  ;;  %p11140_p13 = por %p11139_p12, %p11138_p11 }
  0x41   : > { %p11141_p0 = pnand %p11140_p13, %p11134_p10 }
  0x43   : > { %11144 = shalt.err (!%p11141_p0)
}
  0x44   : > { %s14551_s9 = sld [smem:[#allocation30_spill]]  ;;  %s11156_s29 = scalar_lea.vmem %s515_s16, 12288 }
  0x45   : > { %p11157_p2 = scmp.ne.s32.totalorder %s515_s16, %s11156_s29  ;;  %p11164_p8 = scmp.lt.s32.totalorder %s515_s16, %s515_s16 }
  0x46   : > { %p11165_p9 = scmp.lt.s32.totalorder %s11156_s29, %s11156_s29 }
  0x47   : > { %p11159_p4 = pnand %p11157_p2, %p11414_p6 }
  0x48   : > { %p11166_p10 = por %p11165_p9, %p11164_p8 }
  0x49   : > { %p11160_p7 = pneg %p11159_p4 }
  0x4a   : > { %10956 = dma.hbm_to_vmem [thread:$0]  (!%p11404_p5), %s14551_s9, 12288, %s493_s20, [#allocation13], %s14530_s28, %s14530_s28, %s14531_s18  }
  0x4b   : > { %p11167_p11 = pnand %p11166_p10, %p11160_p7 }
  0x4d   : > { %11170 = shalt.err (!%p11167_p11)
}
  0x4e   : > { %10959 = dma.hbm_to_vmem [thread:$0]  (!%p11404_p5), %s14524_s13, 12288, %s515_s16, [#allocation16], %s14530_s28, %s14530_s28, %s14531_s18  }
  0x4f   : > { %s11479_s1 = sadd.s32 1, %s11253_s27   ;;  %s40_s20 = sadd.s32 1, %s11249_s26 }
  0x50   : > { %s37_s22 = ssub.s32 %s11253_s27, %s11479_s1  ;;  %p47_p12 = scmp.ne.s32.totalorder %s11249_s26, %s11245_s25 }
  0x51   : > { %p38_p6 = scmp.eq.s32.totalorder %s37_s22, 0  ;;  %p48_p13 = scmp.eq.s32.totalorder %s11253_s27, 0 }
  0x52   : > { %p53_p0 = scmp.ne.s32.totalorder %s11245_s25, %s11241_s24  ;;  %p10969_p7 = scmp.lt.s32.totalorder %s11253_s27, 2 }
  0x53   : > { %s11490_s15 = scalar_select %p38_p6, %s11249_s26, %s40_s20  }
  0x54   : > { %p49_p2 = por %p48_p13, %p47_p12  ;;  %p11494_p4 = por %p14532_p1, %p53_p0 }
  0x55   : > { %s537_s14 = sand.u32 1, %s11249_s26   ;;  %s10920_s29 = smul.u32 10368, %s11253_s27 }
  0x56   : > { %s14552_s21 = scalar_select %p11494_p4, 1, 0 }
  0x57   : > { %s10919_s16 = smul.u32 648, %s537_s14  ;;  %p11501_p5 = pnand %p10969_p7, %p49_p2 }
  0x58   : > { %s14554_s28 = sld [smem:[#allocation26_spill]]  ;;  %s11512_s3 = scalar_lea.sflag [#allocation8], %s537_s14 }
  0x59   : > { %s541_s20 = scalar_lea.vmem [#allocation7], %s10919_s16  ;;  %p11173_p9 = pneg %p11501_p5 }
  0x5a   : > { %s548_s18 = sshll.u32 %s541_s20, 4  ;;  %s11510_s18 = int_to_ptr.vmem [resolvable:$true] %s548_s18 }
  0x5e   : > { %s11508_s24 = scalar_lea.hbm %s14554_s28, %s10920_s29  ;;  %s11176_s29 = scalar_lea.hbm %s14554_s28, 20736 }
  0x5f   : > { %s11171_s27 = scalar_lea.hbm %s11508_s24, 10368  ;;  %p11177_p6 = scmp.lt.s32.totalorder %s11508_s24, %s14554_s28 }
  0x60   : > { %p11172_p8 = scmp.ne.s32.totalorder %s11508_s24, %s11171_s27  ;;  %p11178_p12 = scmp.lt.s32.totalorder %s11176_s29, %s11171_s27 }
  0x62   : > { %p11174_p10 = pnand %p11173_p9, %p11172_p8  ;;  %p11179_p13 = por %p11178_p12, %p11177_p6 }
  0x64   : > { %p11175_p11 = pneg %p11174_p10 }
  0x66   : > { %p11180_p0 = pnand %p11179_p13, %p11175_p11 }
  0x68   : > { %11183 = shalt.err (!%p11180_p0)
}
  0x69   : > { %s11184_s14 = scalar_lea.vmem %s11510_s18, 10368  ;;  %s11270_s16 = smov [#allocation7]  }
  0x6a   : > { %p11185_p2 = scmp.ne.s32.totalorder %s11510_s18, %s11184_s14  ;;  %s11189_s20 = sshll.u32 %s11270_s16, 4  ;;  %s11190_s20 = int_to_ptr.vmem [resolvable:$false] %s11189_s20 }
  0x6b   : > { %s11191_s7 = scalar_lea.vmem %s11190_s20, 20736  ;;  %p11192_p10 = scmp.lt.s32.totalorder %s11510_s18, %s11190_s20 }
  0x6c   : > { %p11187_p7 = pnand %p11185_p2, %p11173_p9  ;;  %p11193_p1 = scmp.lt.s32.totalorder %s11191_s7, %s11184_s14 }
  0x6e   : > { %p11188_p8 = pneg %p11187_p7  ;;  %p11194_p4 = por %p11193_p1, %p11192_p10 }
  0x70   : > { %p11195_p3 = pnand %p11194_p4, %p11188_p8 }
  0x72   : > { %11198 = shalt.err (!%p11195_p3)
}
  0x73   : > { %s14555_s9 = smov 8   ;;  %s14556_s27 = smov 128  }
  0x74   : > { %10963 = dma.hbm_to_vmem [thread:$0]  (!%p11501_p5), %s11508_s24, 10368, %s11510_s18, %s11512_s3, %s14556_s27, %s14556_s27, %s14555_s9  }
  0x75   : > { %p14557_p9 = scmp.ne.s32.totalorder %s14545_s30, 0 }
  0x77   : > { %560 = sbr.rel (%p14557_p9) target bundleno = 2413 (0x96d), region = 88 }
  0x7c   : > { %s562_s23 = sand.u32 1, %s11245_s25   ;;  %p14558_p1 = scmp.ne.s32.totalorder %s14552_s21, 0 }
  0x7d   : > { %s11539_s29 = smul.u32 648, %s562_s23  ;;  %s563_s22 = scalar_lea.sflag [#allocation8], %s562_s23 }
  0x7f   : > { %s566_s14 = scalar_lea.vmem [#allocation7], %s11539_s29 }
  0x80   : > { %11224 = dma.done.wait (%p14558_p1), %s563_s22, 10368  }
  0x81   : > { %11226 = vsyncadd (%p14558_p1), %s563_s22, 4294956928  ;;  %p14559_p3 = scmp.eq.s32.totalorder %s11391_s0, 0 }
  0x83   : > { %11228 = dma.done.wait (%p14559_p3), [#allocation10], 22528   ;;  %p14560_p4 = pmov %p14559_p3 }
  0x84   : > { %p14561_p5 = pmov %p14559_p3 }
  0x85   : > { %11230 = vsyncadd (%p14560_p4), [#allocation10], 4294944768 }
  0x86   : > { %11232 = dma.done.wait (%p14561_p5), [#allocation13], 24576   ;;  %p14562_p11 = pmov %p14559_p3 }
  0x87   : > { %p14563_p6 = pmov %p14559_p3 }
  0x88   : > { %11234 = vsyncadd (%p14562_p11), [#allocation13], 4294942720 }
  0x89   : > { %11236 = dma.done.wait (%p14563_p6), [#allocation16], 12288   ;;  %p14564_p12 = pmov %p14559_p3 }
  0x8a   : > { %p637_p13 = scmp.lt.s32.totalorder %s11391_s0, 1  ;;  %s11565_s19 = smov 0  }
  0x8b   : > { %11238 = vsyncadd (%p14564_p12), [#allocation16], 4294955008 }
  0x8c   : > { %s14584_s0 = smov (!%p637_p13, %s11391_s0), 1 }
  0x8d   : > { %s7776_s3 = sshll.u32 %s14584_s0, 6 }
  0x8e   : > { %s11563_s21 = scalar_lea.vmem %s14528_s17, %s7776_s3 }
  0x8f LB: >> { %v692_v0 = vld [vmem:[#allocation9 + $0x78] sm:$0xff]  ;;  %v11271_v1 = vmov 0.0   ;;  %v691_v2 = vld [vmem:[#allocation9 + $0x70] sm:$0xff]  ;;  %v690_v3 = vld [vmem:[#allocation9 + $0x68] sm:$0xff]  ;;  %s648_s0 = smul.u32 216, %s11257_s19  ;;  %vm11272_vm0 = vmmov 0   ;;  %s11257_s19 = sphi %s11565_s19, %s647_s19  }
  0x90   : >> { %8702 = vmatprep.subr.mxu0 %v11271_v1  ;;  %10887 = vmatprep.subr.mxu1 %v11271_v1  ;;  %v689_v4 = vld [vmem:[#allocation9 + $0x60] sm:$0xff]  ;;  %v688_v5 = vld [vmem:[#allocation9 + $0x58] sm:$0xff]  ;;  %v687_v6 = vld [vmem:[#allocation9 + $0x50] sm:$0xff]  ;;  %s647_s19 = sadd.s32 1, %s11257_s19  }
  0x91   : >> { %8703 = vmatpush3.msra.mxu0 %v692_v0  ;;  %10903 = vmatpush3.msra.mxu1 %v692_v0  ;;  %v686_v7 = vld [vmem:[#allocation9 + $0x48] sm:$0xff]  ;;  %v685_v8 = vld [vmem:[#allocation9 + $0x40] sm:$0xff]  ;;  %v684_v9 = vld [vmem:[#allocation9 + $0x38] sm:$0xff]  ;;  %s11603_s24 = scalar_lea.vmem %s566_s14, %s648_s0 [#allocation7]  ;;  %s11699_s7 = scalar_lea.vmem [#allocation2], %s648_s0 }
  0x92   : >> { %8704 = vmatprep.subr.mxu0 %v11271_v1  ;;  %10888 = vmatprep.subr.mxu1 %v11271_v1  ;;  %v683_v10 = vld [vmem:[#allocation9 + $0x30] sm:$0xff]  ;;  %v682_v11 = vld [vmem:[#allocation9 + $0x28] sm:$0xff]  ;;  %v681_v12 = vld [vmem:[#allocation9 + $0x20] sm:$0xff]  ;;  %p644_p0 = scmp.ge.s32.totalorder %s647_s19, 3  }
  0x93   : >> { %8705 = vmatpush3.msra.mxu0 %v691_v2  ;;  %10904 = vmatpush3.msra.mxu1 %v691_v2  ;;  %v680_v13 = vld [vmem:[#allocation9 + $0x18] sm:$0xff]  ;;  %v679_v14 = vld [vmem:[#allocation9 + $0x10] sm:$0xff]  ;;  %v678_v15 = vld [vmem:[#allocation9 + $0x8] sm:$0xff]  ;;  %s11756_s9 = smov (%p644_p0), 0  }
  0x94   : >> { %8706 = vmatprep.subr.mxu0 %v11271_v1  ;;  %10889 = vmatprep.subr.mxu1 %v11271_v1  ;;  %v677_v16 = vld [vmem:[#allocation9] sm:$0xff]  ;;  %v650_v17 = vld [vmem:[%s11603_s24] sm:$0xff]  ;;  %v664_v18 = vld [vmem:[%s11603_s24 + $0x70] sm:$0xff] }
  0x95   : >> { %8707 = vmatpush3.msra.mxu0 %v690_v3  ;;  %10905 = vmatpush3.msra.mxu1 %v690_v3  ;;  %v651_v19 = vld [vmem:[%s11603_s24 + $0x8] sm:$0xff]  ;;  %v665_v20 = vld [vmem:[%s11603_s24 + $0x78] sm:$0xff]  ;;  %v652_v21 = vld [vmem:[%s11603_s24 + $0x10] sm:$0xff] }
  0x96   : >> { %8708 = vmatprep.subr.mxu0 %v11271_v1  ;;  %10890 = vmatprep.subr.mxu1 %v11271_v1  ;;  %v666_v22 = vld [vmem:[%s11603_s24 + $0x80] sm:$0xff]  ;;  %v653_v23 = vld [vmem:[%s11603_s24 + $0x18] sm:$0xff]  ;;  %v667_v24 = vld [vmem:[%s11603_s24 + $0x88] sm:$0xff] }
  0x97   : >> { %8709 = vmatpush3.msra.mxu0 %v689_v4  ;;  %10906 = vmatpush3.msra.mxu1 %v689_v4  ;;  %v654_v25 = vld [vmem:[%s11603_s24 + $0x20] sm:$0xff]  ;;  %v668_v26 = vld [vmem:[%s11603_s24 + $0x90] sm:$0xff]  ;;  %v655_v27 = vld [vmem:[%s11603_s24 + $0x28] sm:$0xff] }
  0x98   : >> { %8710 = vmatprep.subr.mxu0 %v11271_v1  ;;  %10891 = vmatprep.subr.mxu1 %v11271_v1  ;;  %v669_v28 = vld [vmem:[%s11603_s24 + $0x98] sm:$0xff]  ;;  %v656_v29 = vld [vmem:[%s11603_s24 + $0x30] sm:$0xff]  ;;  %v670_v30 = vld [vmem:[%s11603_s24 + $0xa0] sm:$0xff] }
  0x99   : >> { %8711 = vmatpush3.msra.mxu0 %v688_v5  ;;  %10907 = vmatpush3.msra.mxu1 %v688_v5  ;;  %v657_v31 = vld [vmem:[%s11603_s24 + $0x38] sm:$0xff]  ;;  %v671_v32 = vld [vmem:[%s11603_s24 + $0xa8] sm:$0xff]  ;;  %v658_v33 = vld [vmem:[%s11603_s24 + $0x40] sm:$0xff] }
  0x9a   : >> { %8712 = vmatprep.subr.mxu0 %v11271_v1  ;;  %10892 = vmatprep.subr.mxu1 %v11271_v1  ;;  %v672_v34 = vld [vmem:[%s11603_s24 + $0xb0] sm:$0xff]  ;;  %v659_v35 = vld [vmem:[%s11603_s24 + $0x48] sm:$0xff]  ;;  %v673_v36 = vld [vmem:[%s11603_s24 + $0xb8] sm:$0xff] }
  0x9b   : >> { %8713 = vmatpush3.msra.mxu0 %v687_v6  ;;  %10908 = vmatpush3.msra.mxu1 %v687_v6  ;;  %v660_v37 = vld [vmem:[%s11603_s24 + $0x50] sm:$0xff]  ;;  %v674_v38 = vld [vmem:[%s11603_s24 + $0xc0] sm:$0xff]  ;;  %v661_v39 = vld [vmem:[%s11603_s24 + $0x58] sm:$0xff] }
  0x9c   : >> { %8714 = vmatprep.subr.mxu0 %v11271_v1  ;;  %10893 = vmatprep.subr.mxu1 %v11271_v1  ;;  %v675_v40 = vld [vmem:[%s11603_s24 + $0xc8] sm:$0xff]  ;;  %v662_v41 = vld [vmem:[%s11603_s24 + $0x60] sm:$0xff]  ;;  %v676_v42 = vld [vmem:[%s11603_s24 + $0xd0] sm:$0xff] }
  0x9d   : >> { %8715 = vmatpush3.msra.mxu0 %v686_v7  ;;  %10909 = vmatpush3.msra.mxu1 %v686_v7  ;;  %v663_v43 = vld [vmem:[%s11603_s24 + $0x68] sm:$0xff]  ;;  %v11693_v44 = vld [vmem:[%s14513_s2] ss:$0 sm:$0xff] }
  0x9e   : >> { %8716 = vmatprep.subr.mxu0 %v11271_v1  ;;  %10894 = vmatprep.subr.mxu1 %v11271_v1 }
  0x9f   : >> { %8717 = vmatpush3.msra.mxu0 %v685_v8  ;;  %10910 = vmatpush3.msra.mxu1 %v685_v8 }
  0xa0   : >> { %8718 = vmatprep.subr.mxu0 %v11271_v1  ;;  %10895 = vmatprep.subr.mxu1 %v11271_v1 }
  0xa1   : >> { %8719 = vmatpush3.msra.mxu0 %v684_v9  ;;  %10911 = vmatpush3.msra.mxu1 %v684_v9 }
  0xa2   : >> { %8720 = vmatprep.subr.mxu0 %v11271_v1  ;;  %10896 = vmatprep.subr.mxu1 %v11271_v1 }
  0xa3   : >> { %8721 = vmatpush3.msra.mxu0 %v683_v10  ;;  %10912 = vmatpush3.msra.mxu1 %v683_v10 }
  0xa4   : >> { %8722 = vmatprep.subr.mxu0 %v11271_v1  ;;  %10897 = vmatprep.subr.mxu1 %v11271_v1 }
  0xa5   : >> { %8723 = vmatpush3.msra.mxu0 %v682_v11  ;;  %10913 = vmatpush3.msra.mxu1 %v682_v11 }
  0xa6   : >> { %8724 = vmatprep.subr.mxu0 %v11271_v1  ;;  %10898 = vmatprep.subr.mxu1 %v11271_v1 }
  0xa7   : >> { %8725 = vmatpush3.msra.mxu0 %v681_v12  ;;  %10914 = vmatpush3.msra.mxu1 %v681_v12 }
  0xa8   : >> { %8726 = vmatprep.subr.mxu0 %v11271_v1  ;;  %10899 = vmatprep.subr.mxu1 %v11271_v1 }
  0xa9   : >> { %8727 = vmatpush3.msra.mxu0 %v680_v13  ;;  %10915 = vmatpush3.msra.mxu1 %v680_v13 }
  0xaa   : >> { %8728 = vmatprep.subr.mxu0 %v11271_v1  ;;  %10900 = vmatprep.subr.mxu1 %v11271_v1 }
  0xab   : >> { %8729 = vmatpush3.msra.mxu0 %v679_v14  ;;  %10916 = vmatpush3.msra.mxu1 %v679_v14 }
  0xac   : >> { %8730 = vmatprep.subr.mxu0 %v11271_v1  ;;  %10901 = vmatprep.subr.mxu1 %v11271_v1 }
  0xad   : >> { %8731 = vmatpush3.msra.mxu0 %v678_v15  ;;  %10917 = vmatpush3.msra.mxu1 %v678_v15 }
  0xae   : >> { %8732 = vmatprep.subr.mxu0 %v11271_v1  ;;  %8734 = vmatprep.mubr.msk.f32.mxu0 %vm11272_vm0, %v11271_v1 }
  0xaf   : >> { %8733 = vmatpush3.msra.mxu0 %v677_v16  ;;  %10902 = vmatprep.subr.mxu1 %v11271_v1 }
  0xb0   : >> { %8735 = vmatmul.mubr.f32.vlgmr.msra.gmra.mxu0 %v650_v17  ;;  %10918 = vmatpush3.msra.mxu1 %v677_v16 }
  0xb1   : >> { %8776 = vmatprep.mubr.msk.f32.mxu1 %vm11272_vm0, %v11271_v1  ;;  %8737 = vmatprep.mubr.msk.f32.mxu0 %vm11272_vm0, %v11271_v1 }
  0xb2   : >> { %8777 = vmatmul.mubr.f32.vlgmr.msra.gmra.mxu1 %v664_v18 }
  0xb3   : >> { %8779 = vmatprep.mubr.msk.f32.mxu1 %vm11272_vm0, %v11271_v1 }
  0xb4   : >> { %8738 = vmatmul.mubr.f32.gmra.mxu0 %v651_v19 }
  0xb5   : >> { %8740 = vmatprep.mubr.msk.f32.mxu0 %vm11272_vm0, %v11271_v1 }
  0xb6   : >> { %8780 = vmatmul.mubr.f32.gmra.mxu1 %v665_v20 }
  0xb7   : >> { %8782 = vmatprep.mubr.msk.f32.mxu1 %vm11272_vm0, %v11271_v1 }
  0xb8   : >> { %8741 = vmatmul.mubr.f32.gmra.mxu0 %v652_v21 }
  0xb9   : >> { %8743 = vmatprep.mubr.msk.f32.mxu0 %vm11272_vm0, %v11271_v1 }
  0xba   : >> { %8783 = vmatmul.mubr.f32.gmra.mxu1 %v666_v22 }
  0xbb   : >> { %8785 = vmatprep.mubr.msk.f32.mxu1 %vm11272_vm0, %v11271_v1 }
  0xbc   : >> { %8744 = vmatmul.mubr.f32.gmra.mxu0 %v653_v23 }
  0xbd   : >> { %8746 = vmatprep.mubr.msk.f32.mxu0 %vm11272_vm0, %v11271_v1 }
  0xbe   : >> { %8786 = vmatmul.mubr.f32.gmra.mxu1 %v667_v24 }
  0xbf   : >> { %8788 = vmatprep.mubr.msk.f32.mxu1 %vm11272_vm0, %v11271_v1 }
  0xc0   : >> { %8747 = vmatmul.mubr.f32.gmra.mxu0 %v654_v25 }
  0xc1   : >> { %8749 = vmatprep.mubr.msk.f32.mxu0 %vm11272_vm0, %v11271_v1 }
  0xc2   : >> { %8789 = vmatmul.mubr.f32.gmra.mxu1 %v668_v26 }
  0xc3   : >> { %8791 = vmatprep.mubr.msk.f32.mxu1 %vm11272_vm0, %v11271_v1 }
  0xc4   : >> { %8750 = vmatmul.mubr.f32.gmra.mxu0 %v655_v27 }
  0xc5   : >> { %8752 = vmatprep.mubr.msk.f32.mxu0 %vm11272_vm0, %v11271_v1 }
  0xc6   : >> { %8792 = vmatmul.mubr.f32.gmra.mxu1 %v669_v28 }
  0xc7   : >> { %8794 = vmatprep.mubr.msk.f32.mxu1 %vm11272_vm0, %v11271_v1 }
  0xc8   : >> { %8753 = vmatmul.mubr.f32.gmra.mxu0 %v656_v29 }
  0xc9   : >> { %8755 = vmatprep.mubr.msk.f32.mxu0 %vm11272_vm0, %v11271_v1 }
  0xca   : >> { %8795 = vmatmul.mubr.f32.gmra.mxu1 %v670_v30 }
  0xcb   : >> { %8797 = vmatprep.mubr.msk.f32.mxu1 %vm11272_vm0, %v11271_v1 }
  0xcc   : >> { %8756 = vmatmul.mubr.f32.gmra.mxu0 %v657_v31 }
  0xcd   : >> { %8758 = vmatprep.mubr.msk.f32.mxu0 %vm11272_vm0, %v11271_v1 }
  0xce   : >> { %8798 = vmatmul.mubr.f32.gmra.mxu1 %v671_v32 }
  0xcf   : >> { %8800 = vmatprep.mubr.msk.f32.mxu1 %vm11272_vm0, %v11271_v1 }
  0xd0   : >> { %8759 = vmatmul.mubr.f32.gmra.mxu0 %v658_v33 }
  0xd1   : >> { %8761 = vmatprep.mubr.msk.f32.mxu0 %vm11272_vm0, %v11271_v1 }
  0xd2   : >> { %8801 = vmatmul.mubr.f32.gmra.mxu1 %v672_v34 }
  0xd3   : >> { %8803 = vmatprep.mubr.msk.f32.mxu1 %vm11272_vm0, %v11271_v1 }
  0xd4   : >> { %8762 = vmatmul.mubr.f32.gmra.mxu0 %v659_v35 }
  0xd5   : >> { %8764 = vmatprep.mubr.msk.f32.mxu0 %vm11272_vm0, %v11271_v1 }
  0xd6   : >> { %8804 = vmatmul.mubr.f32.gmra.mxu1 %v673_v36 }
  0xd7   : >> { %8806 = vmatprep.mubr.msk.f32.mxu1 %vm11272_vm0, %v11271_v1 }
  0xd8   : >> { %8765 = vmatmul.mubr.f32.gmra.mxu0 %v660_v37 }
  0xd9   : >> { %8767 = vmatprep.mubr.msk.f32.mxu0 %vm11272_vm0, %v11271_v1 }
  0xda   : >> { %8807 = vmatmul.mubr.f32.gmra.mxu1 %v674_v38 }
  0xdb   : >> { %8809 = vmatprep.mubr.msk.f32.mxu1 %vm11272_vm0, %v11271_v1 }
  0xdc   : >> { %8768 = vmatmul.mubr.f32.gmra.mxu0 %v661_v39 }
  0xdd   : >> { %8770 = vmatprep.mubr.msk.f32.mxu0 %vm11272_vm0, %v11271_v1 }
  0xde   : >> { %8810 = vmatmul.mubr.f32.gmra.mxu1 %v675_v40 }
  0xdf   : >> { %8812 = vmatprep.mubr.msk.f32.mxu1 %vm11272_vm0, %v11271_v1 }
  0xe0   : >> { %8771 = vmatmul.mubr.f32.gmra.mxu0 %v662_v41 }
  0xe1   : >> { %8773 = vmatprep.mubr.msk.f32.mxu0 %vm11272_vm0, %v11271_v1 }
  0xe2   : >> { %8813 = vmatmul.mubr.f32.gmra.mxu1 %v676_v42 }
  0xe4   : >> { %8774 = vmatmul.mubr.f32.gmra.mxu0 %v663_v43 }
 0x170   : >> { %v766_v45 = vpop.f32.mrf.mxu0 }
 0x171   : >> { %v767_v46 = vadd.f32 %v11693_v44, %v766_v45 }
 0x172   : >> { %v8736_v47 = vpop.f32.mrf.mxu0  ;;  %v836_v48 = vpop.f32.mrf.mxu1 }
 0x173   : >> { %v900_v49 = vmax.f32 %v767_v46, 0.0  ;;  %v837_v50 = vadd.f32 %v11693_v44, %v836_v48 }
 0x174   : >> { %v771_v51 = vpop.f32.mrf.mxu0  ;;  %v8778_v52 = vpop.f32.mrf.mxu1 }
 0x175   : >> { %928 = vst [vmem:[%s11699_s7] sm:$0xff] %v900_v49  ;;  %v914_v53 = vmax.f32 %v837_v50, 0.0  ;;  %v772_v54 = vadd.f32 %v11693_v44, %v771_v51 }
 0x176   : >> { %v8739_v55 = vpop.f32.mrf.mxu0  ;;  %v841_v56 = vpop.f32.mrf.mxu1 }
 0x177   : >> { %942 = vst [vmem:[%s11699_s7 + $0x70] sm:$0xff] %v914_v53  ;;  %v901_v57 = vmax.f32 %v772_v54, 0.0  ;;  %v842_v58 = vadd.f32 %v11693_v44, %v841_v56 }
 0x178   : >> { %v776_v59 = vpop.f32.mrf.mxu0  ;;  %v8781_v60 = vpop.f32.mrf.mxu1 }
 0x179   : >> { %929 = vst [vmem:[%s11699_s7 + $0x8] sm:$0xff] %v901_v57  ;;  %v915_v61 = vmax.f32 %v842_v58, 0.0  ;;  %v777_v62 = vadd.f32 %v11693_v44, %v776_v59 }
 0x17a   : >> { %v8742_v63 = vpop.f32.mrf.mxu0  ;;  %v846_v0 = vpop.f32.mrf.mxu1 }
 0x17b   : >> { %943 = vst [vmem:[%s11699_s7 + $0x78] sm:$0xff] %v915_v61  ;;  %v902_v1 = vmax.f32 %v777_v62, 0.0  ;;  %v847_v2 = vadd.f32 %v11693_v44, %v846_v0 }
 0x17c   : >> { %v781_v3 = vpop.f32.mrf.mxu0  ;;  %v8784_v4 = vpop.f32.mrf.mxu1 }
 0x17d   : >> { %930 = vst [vmem:[%s11699_s7 + $0x10] sm:$0xff] %v902_v1  ;;  %v916_v5 = vmax.f32 %v847_v2, 0.0  ;;  %v782_v6 = vadd.f32 %v11693_v44, %v781_v3 }
 0x17e   : >> { %v8745_v7 = vpop.f32.mrf.mxu0  ;;  %v851_v8 = vpop.f32.mrf.mxu1 }
 0x17f   : >> { %944 = vst [vmem:[%s11699_s7 + $0x80] sm:$0xff] %v916_v5  ;;  %v903_v9 = vmax.f32 %v782_v6, 0.0  ;;  %v852_v10 = vadd.f32 %v11693_v44, %v851_v8 }
 0x180   : >> { %v786_v11 = vpop.f32.mrf.mxu0  ;;  %v8787_v12 = vpop.f32.mrf.mxu1 }
 0x181   : >> { %931 = vst [vmem:[%s11699_s7 + $0x18] sm:$0xff] %v903_v9  ;;  %v917_v13 = vmax.f32 %v852_v10, 0.0  ;;  %v787_v14 = vadd.f32 %v11693_v44, %v786_v11 }
 0x182   : >> { %v8748_v15 = vpop.f32.mrf.mxu0  ;;  %v856_v16 = vpop.f32.mrf.mxu1 }
 0x183   : >> { %945 = vst [vmem:[%s11699_s7 + $0x88] sm:$0xff] %v917_v13  ;;  %v904_v17 = vmax.f32 %v787_v14, 0.0  ;;  %v857_v18 = vadd.f32 %v11693_v44, %v856_v16 }
 0x184   : >> { %v791_v19 = vpop.f32.mrf.mxu0  ;;  %v8790_v20 = vpop.f32.mrf.mxu1 }
 0x185   : >> { %932 = vst [vmem:[%s11699_s7 + $0x20] sm:$0xff] %v904_v17  ;;  %v918_v21 = vmax.f32 %v857_v18, 0.0  ;;  %v792_v22 = vadd.f32 %v11693_v44, %v791_v19 }
 0x186   : >> { %v8751_v23 = vpop.f32.mrf.mxu0  ;;  %v861_v24 = vpop.f32.mrf.mxu1 }
 0x187   : >> { %946 = vst [vmem:[%s11699_s7 + $0x90] sm:$0xff] %v918_v21  ;;  %v905_v25 = vmax.f32 %v792_v22, 0.0  ;;  %v862_v26 = vadd.f32 %v11693_v44, %v861_v24 }
 0x188   : >> { %v796_v27 = vpop.f32.mrf.mxu0  ;;  %v8793_v28 = vpop.f32.mrf.mxu1 }
 0x189   : >> { %933 = vst [vmem:[%s11699_s7 + $0x28] sm:$0xff] %v905_v25  ;;  %v919_v29 = vmax.f32 %v862_v26, 0.0  ;;  %v797_v30 = vadd.f32 %v11693_v44, %v796_v27 }
 0x18a   : >> { %v8754_v31 = vpop.f32.mrf.mxu0  ;;  %v866_v32 = vpop.f32.mrf.mxu1 }
 0x18b   : >> { %947 = vst [vmem:[%s11699_s7 + $0x98] sm:$0xff] %v919_v29  ;;  %v906_v33 = vmax.f32 %v797_v30, 0.0  ;;  %v867_v34 = vadd.f32 %v11693_v44, %v866_v32 }
 0x18c   : >> { %v801_v35 = vpop.f32.mrf.mxu0  ;;  %v8796_v36 = vpop.f32.mrf.mxu1 }
 0x18d   : >> { %934 = vst [vmem:[%s11699_s7 + $0x30] sm:$0xff] %v906_v33  ;;  %v920_v37 = vmax.f32 %v867_v34, 0.0  ;;  %v802_v38 = vadd.f32 %v11693_v44, %v801_v35 }
 0x18e   : >> { %v8757_v39 = vpop.f32.mrf.mxu0  ;;  %v871_v40 = vpop.f32.mrf.mxu1 }
 0x18f   : >> { %948 = vst [vmem:[%s11699_s7 + $0xa0] sm:$0xff] %v920_v37  ;;  %v907_v41 = vmax.f32 %v802_v38, 0.0  ;;  %v872_v42 = vadd.f32 %v11693_v44, %v871_v40 }
 0x190   : >> { %v806_v43 = vpop.f32.mrf.mxu0  ;;  %v8799_v45 = vpop.f32.mrf.mxu1 }
 0x191   : >> { %935 = vst [vmem:[%s11699_s7 + $0x38] sm:$0xff] %v907_v41  ;;  %v921_v46 = vmax.f32 %v872_v42, 0.0  ;;  %v807_v47 = vadd.f32 %v11693_v44, %v806_v43 }
 0x192   : >> { %v8760_v48 = vpop.f32.mrf.mxu0  ;;  %v876_v49 = vpop.f32.mrf.mxu1 }
 0x193   : >> { %949 = vst [vmem:[%s11699_s7 + $0xa8] sm:$0xff] %v921_v46  ;;  %v908_v50 = vmax.f32 %v807_v47, 0.0  ;;  %v877_v51 = vadd.f32 %v11693_v44, %v876_v49 }
 0x194   : >> { %v811_v52 = vpop.f32.mrf.mxu0  ;;  %v8802_v53 = vpop.f32.mrf.mxu1 }
 0x195   : >> { %936 = vst [vmem:[%s11699_s7 + $0x40] sm:$0xff] %v908_v50  ;;  %v922_v54 = vmax.f32 %v877_v51, 0.0  ;;  %v812_v55 = vadd.f32 %v11693_v44, %v811_v52 }
 0x196   : >> { %v8763_v56 = vpop.f32.mrf.mxu0  ;;  %v881_v57 = vpop.f32.mrf.mxu1 }
 0x197   : >> { %950 = vst [vmem:[%s11699_s7 + $0xb0] sm:$0xff] %v922_v54  ;;  %v909_v58 = vmax.f32 %v812_v55, 0.0  ;;  %v882_v59 = vadd.f32 %v11693_v44, %v881_v57 }
 0x198   : >> { %v816_v60 = vpop.f32.mrf.mxu0  ;;  %v8805_v61 = vpop.f32.mrf.mxu1 }
 0x199   : >> { %937 = vst [vmem:[%s11699_s7 + $0x48] sm:$0xff] %v909_v58  ;;  %v923_v62 = vmax.f32 %v882_v59, 0.0  ;;  %v817_v63 = vadd.f32 %v11693_v44, %v816_v60 }
 0x19a   : >> { %v8766_v0 = vpop.f32.mrf.mxu0  ;;  %v886_v1 = vpop.f32.mrf.mxu1 }
 0x19b   : >> { %951 = vst [vmem:[%s11699_s7 + $0xb8] sm:$0xff] %v923_v62  ;;  %v910_v2 = vmax.f32 %v817_v63, 0.0  ;;  %v887_v3 = vadd.f32 %v11693_v44, %v886_v1 }
 0x19c   : >> { %v821_v4 = vpop.f32.mrf.mxu0  ;;  %v8808_v5 = vpop.f32.mrf.mxu1 }
 0x19d   : >> { %938 = vst [vmem:[%s11699_s7 + $0x50] sm:$0xff] %v910_v2  ;;  %v924_v6 = vmax.f32 %v887_v3, 0.0  ;;  %v822_v7 = vadd.f32 %v11693_v44, %v821_v4 }
 0x19e   : >> { %v8769_v8 = vpop.f32.mrf.mxu0  ;;  %v891_v9 = vpop.f32.mrf.mxu1 }
 0x19f   : >> { %952 = vst [vmem:[%s11699_s7 + $0xc0] sm:$0xff] %v924_v6  ;;  %v911_v10 = vmax.f32 %v822_v7, 0.0  ;;  %v892_v11 = vadd.f32 %v11693_v44, %v891_v9 }
 0x1a0   : >> { %v826_v12 = vpop.f32.mrf.mxu0  ;;  %v8811_v13 = vpop.f32.mrf.mxu1 }
 0x1a1   : >> { %939 = vst [vmem:[%s11699_s7 + $0x58] sm:$0xff] %v911_v10  ;;  %v925_v14 = vmax.f32 %v892_v11, 0.0  ;;  %v827_v15 = vadd.f32 %v11693_v44, %v826_v12 }
 0x1a2   : >> { %v8772_v16 = vpop.f32.mrf.mxu0  ;;  %v896_v17 = vpop.f32.mrf.mxu1 }
 0x1a3   : >> { %953 = vst [vmem:[%s11699_s7 + $0xc8] sm:$0xff] %v925_v14  ;;  %v912_v18 = vmax.f32 %v827_v15, 0.0  ;;  %v897_v19 = vadd.f32 %v11693_v44, %v896_v17 }
 0x1a4   : >> { %v831_v20 = vpop.f32.mrf.mxu0  ;;  %v8814_v21 = vpop.f32.mrf.mxu1 }
 0x1a5   : >> { %940 = vst [vmem:[%s11699_s7 + $0x60] sm:$0xff] %v912_v18  ;;  %v926_v22 = vmax.f32 %v897_v19, 0.0  ;;  %v832_v23 = vadd.f32 %v11693_v44, %v831_v20  ;;  %646 = sbr.rel (!%p644_p0) target bundleno = 143 (0x8f), region = 294 }
 0x1a6   : >> { %v8775_v24 = vpop.f32.mrf.mxu0 }
 0x1a7   : >> { %954 = vst [vmem:[%s11699_s7 + $0xd0] sm:$0xff] %v926_v22  ;;  %v913_v25 = vmax.f32 %v832_v23, 0.0 }
 0x1a9   : >> { %941 = vst [vmem:[%s11699_s7 + $0x68] sm:$0xff] %v913_v25 }
 0x1aa LB: >> { %v1043_v26 = vld [vmem:[#allocation11 + $0xf8] sm:$0xff]  ;;  %v11273_v44 = vmov 0.0   ;;  %v1042_v28 = vld [vmem:[#allocation11 + $0xf0] sm:$0xff]  ;;  %v1041_v30 = vld [vmem:[#allocation11 + $0xe8] sm:$0xff]  ;;  %s961_s27 = smul.u32 184, %s11261_s9  ;;  %vm11274_vm1 = vmmov 0   ;;  %s11261_s9 = sphi %s11756_s9, %s960_s9  }
 0x1ab   : >> { %v1001_v27 = vld [vmem:[#allocation11 + $0x78] sm:$0xff]  ;;  %8815 = vmatprep.subr.mxu0 %v11273_v44  ;;  %8916 = vmatprep.subr.mxu1 %v11273_v44  ;;  %v1000_v29 = vld [vmem:[#allocation11 + $0x70] sm:$0xff]  ;;  %v999_v31 = vld [vmem:[#allocation11 + $0x68] sm:$0xff]  ;;  %s960_s9 = sadd.s32 1, %s11261_s9  }
 0x1ac   : >> { %8816 = vmatpush3.msra.mxu0 %v1043_v26  ;;  %8917 = vmatpush3.msra.mxu1 %v1001_v27  ;;  %v1040_v32 = vld [vmem:[#allocation11 + $0xe0] sm:$0xff]  ;;  %v1039_v34 = vld [vmem:[#allocation11 + $0xd8] sm:$0xff]  ;;  %v1038_v36 = vld [vmem:[#allocation11 + $0xd0] sm:$0xff]  ;;  %s11794_s23 = scalar_lea.vmem [#allocation2], %s961_s27  ;;  %s13133_s19 = scalar_lea.vmem [#allocation3], %s961_s27 }
 0x1ad   : >> { %8817 = vmatprep.subr.mxu0 %v11273_v44  ;;  %8918 = vmatprep.subr.mxu1 %v11273_v44  ;;  %v998_v33 = vld [vmem:[#allocation11 + $0x60] sm:$0xff]  ;;  %v997_v35 = vld [vmem:[#allocation11 + $0x58] sm:$0xff]  ;;  %v996_v37 = vld [vmem:[#allocation11 + $0x50] sm:$0xff]  ;;  %p957_p2 = scmp.ge.s32.totalorder %s960_s9, 3  }
 0x1ae   : >> { %8818 = vmatpush3.msra.mxu0 %v1042_v28  ;;  %8919 = vmatpush3.msra.mxu1 %v1000_v29  ;;  %v1037_v38 = vld [vmem:[#allocation11 + $0xc8] sm:$0xff]  ;;  %v1036_v40 = vld [vmem:[#allocation11 + $0xc0] sm:$0xff]  ;;  %v1035_v42 = vld [vmem:[#allocation11 + $0xb8] sm:$0xff]  ;;  %s11275_s0 = smov (%p957_p2), 96   ;;  %vm3530_vm2 = vcmask (%p957_p2), 261120   ;;  %vm3532_vm3 = vcmask (%p957_p2), 256000  }
 0x1af   : >> { %8819 = vmatprep.subr.mxu0 %v11273_v44  ;;  %8920 = vmatprep.subr.mxu1 %v11273_v44  ;;  %v995_v39 = vld [vmem:[#allocation11 + $0x48] sm:$0xff]  ;;  %v994_v41 = vld [vmem:[#allocation11 + $0x40] sm:$0xff]  ;;  %v993_v43 = vld [vmem:[#allocation11 + $0x38] sm:$0xff]  ;;  %s11276_s24 = smov (%p957_p2), 64   ;;  %s11277_s16 = smov (%p957_p2), 32   ;;  %vm3542_vm4 = vcmask (%p957_p2), 523520  }
 0x1b0   : >> { %8820 = vmatpush3.msra.mxu0 %v1041_v30  ;;  %8921 = vmatpush3.msra.mxu1 %v999_v31  ;;  %v1034_v45 = vld [vmem:[#allocation11 + $0xb0] sm:$0xff]  ;;  %v1033_v47 = vld [vmem:[#allocation11 + $0xa8] sm:$0xff]  ;;  %v1032_v49 = vld [vmem:[#allocation11 + $0xa0] sm:$0xff]  ;;  %vm3544_vm5 = vcmask (%p957_p2), 518400   ;;  %vm3566_vm6 = vcmask (%p957_p2), 780800   ;;  %vm3564_vm7 = vcmask (%p957_p2), 785920  }
 0x1b1   : >> { %8821 = vmatprep.subr.mxu0 %v11273_v44  ;;  %8922 = vmatprep.subr.mxu1 %v11273_v44  ;;  %v992_v46 = vld [vmem:[#allocation11 + $0x30] sm:$0xff]  ;;  %v991_v48 = vld [vmem:[#allocation11 + $0x28] sm:$0xff]  ;;  %v990_v50 = vld [vmem:[#allocation11 + $0x20] sm:$0xff]  ;;  %vm3576_vm8 = vcmask (%p957_p2), 1043200   ;;  %vm3574_vm9 = vcmask (%p957_p2), 1048320   ;;  %vm11279_vm10 = vmmov (%p957_p2), 0  }
 0x1b2   : >> { %8822 = vmatpush3.msra.mxu0 %v1040_v32  ;;  %8923 = vmatpush3.msra.mxu1 %v998_v33  ;;  %v1031_v51 = vld [vmem:[#allocation11 + $0x98] sm:$0xff]  ;;  %v1030_v53 = vld [vmem:[#allocation11 + $0x90] sm:$0xff]  ;;  %v1029_v55 = vld [vmem:[#allocation11 + $0x88] sm:$0xff]  ;;  %s14576_s18 = sld [smem:[#allocation31_spill]] (%p957_p2) }
 0x1b3   : >> { %8823 = vmatprep.subr.mxu0 %v11273_v44  ;;  %8924 = vmatprep.subr.mxu1 %v11273_v44  ;;  %v989_v52 = vld [vmem:[#allocation11 + $0x18] sm:$0xff]  ;;  %v988_v54 = vld [vmem:[#allocation11 + $0x10] sm:$0xff]  ;;  %v987_v56 = vld [vmem:[#allocation11 + $0x8] sm:$0xff]  ;;  %s14578_s7 = sld [smem:[#allocation33_spill]] (%p957_p2) }
 0x1b4   : >> { %8824 = vmatpush3.msra.mxu0 %v1039_v34  ;;  %8925 = vmatpush3.msra.mxu1 %v997_v35  ;;  %v1028_v57 = vld [vmem:[#allocation11 + $0x80] sm:$0xff]  ;;  %v7557_v58 = vld [vmem:[%s11794_s23 + $0x1] sm:$0xff]  ;;  %v1445_v61 = vld [vmem:[#allocation11 + $0x178] sm:$0xff] }
 0x1b5   : >> { %8825 = vmatprep.subr.mxu0 %v11273_v44  ;;  %8926 = vmatprep.subr.mxu1 %v11273_v44  ;;  %v986_v59 = vld [vmem:[#allocation11] sm:$0xff]  ;;  %v963_v60 = vld [vmem:[%s11794_s23] sm:$0xff]  ;;  %v1690_v62 = vld [vmem:[#allocation11 + $0x1f8] sm:$0xff] }
 0x1b6   : >> { %8826 = vmatpush3.msra.mxu0 %v1038_v36  ;;  %8927 = vmatpush3.msra.mxu1 %v996_v37  ;;  %v7558_v63 = vld [vmem:[%s11794_s23 + $0x9] sm:$0xff]  ;;  %v7559_v2 = vld [vmem:[%s11794_s23 + $0x11] sm:$0xff]  ;;  %v1443_v5 = vld [vmem:[#allocation11 + $0x168] sm:$0xff] }
 0x1b7   : >> { %8827 = vmatprep.subr.mxu0 %v11273_v44  ;;  %8928 = vmatprep.subr.mxu1 %v11273_v44  ;;  %v964_v0 = vld [vmem:[%s11794_s23 + $0x8] sm:$0xff]  ;;  %v965_v4 = vld [vmem:[%s11794_s23 + $0x10] sm:$0xff]  ;;  %v7560_v6 = vld [vmem:[%s11794_s23 + $0x19] sm:$0xff] }
 0x1b8   : >> { %8828 = vmatpush3.msra.mxu0 %v1037_v38  ;;  %8929 = vmatpush3.msra.mxu1 %v995_v39  ;;  %v1444_v1 = vld [vmem:[#allocation11 + $0x170] sm:$0xff]  ;;  %v1688_v7 = vld [vmem:[#allocation11 + $0x1e8] sm:$0xff]  ;;  %v11827_v8 = vld [vmem:[%s11794_s23 + $0x18] sm:$0xff] }
 0x1b9   : >> { %8829 = vmatprep.subr.mxu0 %v11273_v44  ;;  %8930 = vmatprep.subr.mxu1 %v11273_v44  ;;  %v1689_v3 = vld [vmem:[#allocation11 + $0x1f0] sm:$0xff]  ;;  %v1442_v9 = vld [vmem:[#allocation11 + $0x160] sm:$0xff]  ;;  %v11838_v12 = vld [vmem:[%s11794_s23 + $0x20] sm:$0xff] }
 0x1ba   : >> { %8830 = vmatpush3.msra.mxu0 %v1036_v40  ;;  %8931 = vmatpush3.msra.mxu1 %v994_v41  ;;  %v7561_v10 = vld [vmem:[%s11794_s23 + $0x21] sm:$0xff]  ;;  %v1687_v11 = vld [vmem:[#allocation11 + $0x1e0] sm:$0xff]  ;;  %v1441_v13 = vld [vmem:[#allocation11 + $0x158] sm:$0xff] }
 0x1bb   : >> { %8831 = vmatprep.subr.mxu0 %v11273_v44  ;;  %8932 = vmatprep.subr.mxu1 %v11273_v44  ;;  %v7562_v14 = vld [vmem:[%s11794_s23 + $0x29] sm:$0xff]  ;;  %v7563_v18 = vld [vmem:[%s11794_s23 + $0x31] sm:$0xff]  ;;  %v1439_v21 = vld [vmem:[#allocation11 + $0x148] sm:$0xff] }
 0x1bc   : >> { %8832 = vmatpush3.msra.mxu0 %v1035_v42  ;;  %8933 = vmatpush3.msra.mxu1 %v993_v43  ;;  %v1686_v15 = vld [vmem:[#allocation11 + $0x1d8] sm:$0xff]  ;;  %v11849_v16 = vld [vmem:[%s11794_s23 + $0x28] sm:$0xff]  ;;  %v7564_v22 = vld [vmem:[%s11794_s23 + $0x39] sm:$0xff] }
 0x1bd   : >> { %8833 = vmatprep.subr.mxu0 %v11273_v44  ;;  %8934 = vmatprep.subr.mxu1 %v11273_v44  ;;  %v1440_v17 = vld [vmem:[#allocation11 + $0x150] sm:$0xff]  ;;  %v11860_v20 = vld [vmem:[%s11794_s23 + $0x30] sm:$0xff]  ;;  %v1684_v23 = vld [vmem:[#allocation11 + $0x1c8] sm:$0xff] }
 0x1be   : >> { %8834 = vmatpush3.msra.mxu0 %v1034_v45  ;;  %8935 = vmatpush3.msra.mxu1 %v992_v46  ;;  %v1685_v19 = vld [vmem:[#allocation11 + $0x1d0] sm:$0xff]  ;;  %v11871_v24 = vld [vmem:[%s11794_s23 + $0x38] sm:$0xff]  ;;  %v11882_v28 = vld [vmem:[%s11794_s23 + $0x40] sm:$0xff] }
 0x1bf   : >> { %8835 = vmatprep.subr.mxu0 %v11273_v44  ;;  %8936 = vmatprep.subr.mxu1 %v11273_v44  ;;  %v1438_v25 = vld [vmem:[#allocation11 + $0x140] sm:$0xff]  ;;  %v7565_v26 = vld [vmem:[%s11794_s23 + $0x41] sm:$0xff]  ;;  %v1437_v29 = vld [vmem:[#allocation11 + $0x138] sm:$0xff] }
 0x1c0   : >> { %8836 = vmatpush3.msra.mxu0 %v1033_v47  ;;  %8937 = vmatpush3.msra.mxu1 %v991_v48  ;;  %v1683_v27 = vld [vmem:[#allocation11 + $0x1c0] sm:$0xff]  ;;  %v7566_v30 = vld [vmem:[%s11794_s23 + $0x49] sm:$0xff]  ;;  %v1435_v37 = vld [vmem:[#allocation11 + $0x128] sm:$0xff] }
 0x1c1   : >> { %8837 = vmatprep.subr.mxu0 %v11273_v44  ;;  %8938 = vmatprep.subr.mxu1 %v11273_v44  ;;  %v1682_v31 = vld [vmem:[#allocation11 + $0x1b8] sm:$0xff]  ;;  %v11893_v32 = vld [vmem:[%s11794_s23 + $0x48] sm:$0xff]  ;;  %v7568_v38 = vld [vmem:[%s11794_s23 + $0x59] sm:$0xff] }
 0x1c2   : >> { %8838 = vmatpush3.msra.mxu0 %v1032_v49  ;;  %8939 = vmatpush3.msra.mxu1 %v990_v50  ;;  %v1436_v33 = vld [vmem:[#allocation11 + $0x130] sm:$0xff]  ;;  %v7567_v34 = vld [vmem:[%s11794_s23 + $0x51] sm:$0xff]  ;;  %v1680_v39 = vld [vmem:[#allocation11 + $0x1a8] sm:$0xff] }
 0x1c3   : >> { %8839 = vmatprep.subr.mxu0 %v11273_v44  ;;  %8940 = vmatprep.subr.mxu1 %v11273_v44  ;;  %v1681_v35 = vld [vmem:[#allocation11 + $0x1b0] sm:$0xff]  ;;  %v11904_v36 = vld [vmem:[%s11794_s23 + $0x50] sm:$0xff]  ;;  %v11915_v40 = vld [vmem:[%s11794_s23 + $0x58] sm:$0xff] }
 0x1c4   : >> { %8840 = vmatpush3.msra.mxu0 %v1031_v51  ;;  %8941 = vmatpush3.msra.mxu1 %v989_v52  ;;  %v1434_v41 = vld [vmem:[#allocation11 + $0x120] sm:$0xff]  ;;  %v7569_v42 = vld [vmem:[%s11794_s23 + $0x61] sm:$0xff]  ;;  %v1433_v46 = vld [vmem:[#allocation11 + $0x118] sm:$0xff] }
 0x1c5   : >> { %8841 = vmatprep.subr.mxu0 %v11273_v44  ;;  %8942 = vmatprep.subr.mxu1 %v11273_v44  ;;  %v1679_v43 = vld [vmem:[#allocation11 + $0x1a0] sm:$0xff]  ;;  %v11926_v45 = vld [vmem:[%s11794_s23 + $0x60] sm:$0xff]  ;;  %v7570_v47 = vld [vmem:[%s11794_s23 + $0x69] sm:$0xff] }
 0x1c6   : >> { %8842 = vmatpush3.msra.mxu0 %v1030_v53  ;;  %8943 = vmatpush3.msra.mxu1 %v988_v54  ;;  %v1678_v48 = vld [vmem:[#allocation11 + $0x198] sm:$0xff]  ;;  %v11937_v49 = vld [vmem:[%s11794_s23 + $0x68] sm:$0xff]  ;;  %v1431_v54 = vld [vmem:[#allocation11 + $0x108] sm:$0xff] }
 0x1c7   : >> { %8843 = vmatprep.subr.mxu0 %v11273_v44  ;;  %8944 = vmatprep.subr.mxu1 %v11273_v44  ;;  %v1432_v50 = vld [vmem:[#allocation11 + $0x110] sm:$0xff]  ;;  %v7571_v51 = vld [vmem:[%s11794_s23 + $0x71] sm:$0xff] }
 0x1c8   : >> { %8844 = vmatpush3.msra.mxu0 %v1029_v55  ;;  %8945 = vmatpush3.msra.mxu1 %v987_v56  ;;  %v1677_v52 = vld [vmem:[#allocation11 + $0x190] sm:$0xff]  ;;  %v11948_v53 = vld [vmem:[%s11794_s23 + $0x70] sm:$0xff]  ;;  %v7572_v55 = vld [vmem:[%s11794_s23 + $0x79] sm:$0xff] }
 0x1c9   : >> { %8845 = vmatprep.subr.mxu0 %v11273_v44  ;;  %8847 = vmatprep.mubr.msk.f32.mxu0 %vm11274_vm1, %v11273_v44  ;;  %v1676_v56 = vld [vmem:[#allocation11 + $0x188] sm:$0xff] }
 0x1ca   : >> { %8846 = vmatpush3.msra.mxu0 %v1028_v57  ;;  %8946 = vmatprep.subr.mxu1 %v11273_v44  ;;  %v11959_v57 = vld [vmem:[%s11794_s23 + $0x78] sm:$0xff] }
 0x1cb   : >> { %8848 = vmatmul.mubr.f32.vlgmr.msra.gmra.mxu0 %v7557_v58  ;;  %8947 = vmatpush3.msra.mxu1 %v986_v59  ;;  %v1430_v58 = vld [vmem:[#allocation11 + $0x100] sm:$0xff]  ;;  %v7573_v59 = vld [vmem:[%s11794_s23 + $0x81] sm:$0xff] }
 0x1cc   : >> { %8948 = vmatprep.mubr.msk.f32.mxu1 %vm11274_vm1, %v11273_v44  ;;  %9017 = vmatprep.subr.mxu0 %v11273_v44 }
 0x1cd   : >> { %8949 = vmatmul.mubr.f32.vlgmr.msra.gmra.mxu1 %v963_v60  ;;  %9018 = vmatpush3.msra.mxu0 %v1445_v61  ;;  %v1675_v60 = vld [vmem:[#allocation11 + $0x180] sm:$0xff]  ;;  %v11970_v61 = vld [vmem:[%s11794_s23 + $0x80] sm:$0xff] }
 0x1ce   : >> { %9118 = vmatprep.subr.mxu1 %v11273_v44  ;;  %8850 = vmatprep.mubr.msk.f32.mxu0 %vm11274_vm1, %v11273_v44 }
 0x1cf   : >> { %9119 = vmatpush3.msra.mxu1 %v1690_v62  ;;  %8851 = vmatmul.mubr.f32.gmra.mxu0 %v7558_v63  ;;  %v7574_v62 = vld [vmem:[%s11794_s23 + $0x89] sm:$0xff] }
 0x1d0   : >> { %8951 = vmatprep.mubr.msk.f32.mxu1 %vm11274_vm1, %v11273_v44  ;;  %9019 = vmatprep.subr.mxu0 %v11273_v44  ;;  %v11981_v63 = vld [vmem:[%s11794_s23 + $0x88] sm:$0xff] }
 0x1d1   : >> { %8952 = vmatmul.mubr.f32.gmra.mxu1 %v964_v0  ;;  %8853 = vmatprep.mubr.msk.f32.mxu0 %vm11274_vm1, %v11273_v44  ;;  %v7575_v0 = vld [vmem:[%s11794_s23 + $0x91] sm:$0xff] }
 0x1d2   : >> { %9020 = vmatpush3.msra.mxu0 %v1444_v1  ;;  %8954 = vmatprep.mubr.msk.f32.mxu1 %vm11274_vm1, %v11273_v44  ;;  %v11991_v1 = vld [vmem:[%s11794_s23 + $0x90] sm:$0xff] }
 0x1d3   : >> { %8854 = vmatmul.mubr.f32.gmra.mxu0 %v7559_v2  ;;  %9120 = vmatprep.subr.mxu1 %v11273_v44  ;;  %v7576_v2 = vld [vmem:[%s11794_s23 + $0x99] sm:$0xff] }
 0x1d4   : >> { %9121 = vmatpush3.msra.mxu1 %v1689_v3  ;;  %8856 = vmatprep.mubr.msk.f32.mxu0 %vm11274_vm1, %v11273_v44  ;;  %v12000_v3 = vld [vmem:[%s11794_s23 + $0x98] sm:$0xff] }
 0x1d5   : >> { %8955 = vmatmul.mubr.f32.gmra.mxu1 %v965_v4  ;;  %9021 = vmatprep.subr.mxu0 %v11273_v44  ;;  %v7577_v4 = vld [vmem:[%s11794_s23 + $0xa1] sm:$0xff] }
 0x1d6   : >> { %8957 = vmatprep.mubr.msk.f32.mxu1 %vm11274_vm1, %v11273_v44  ;;  %9022 = vmatpush3.msra.mxu0 %v1443_v5  ;;  %v12009_v5 = vld [vmem:[%s11794_s23 + $0xa0] sm:$0xff] }
 0x1d7   : >> { %8857 = vmatmul.mubr.f32.gmra.mxu0 %v7560_v6  ;;  %9122 = vmatprep.subr.mxu1 %v11273_v44  ;;  %v7578_v6 = vld [vmem:[%s11794_s23 + $0xa9] sm:$0xff] }
 0x1d8   : >> { %8859 = vmatprep.mubr.msk.f32.mxu0 %vm11274_vm1, %v11273_v44  ;;  %9123 = vmatpush3.msra.mxu1 %v1688_v7  ;;  %v12018_v7 = vld [vmem:[%s11794_s23 + $0xa8] sm:$0xff] }
 0x1d9   : >> { %8958 = vmatmul.mubr.f32.gmra.mxu1 %v11827_v8  ;;  %9023 = vmatprep.subr.mxu0 %v11273_v44 }
 0x1da   : >> { %8960 = vmatprep.mubr.msk.f32.mxu1 %vm11274_vm1, %v11273_v44  ;;  %9024 = vmatpush3.msra.mxu0 %v1442_v9  ;;  %v7579_v9 = vld [vmem:[%s11794_s23 + $0xb1] sm:$0xff] }
 0x1db   : >> { %8860 = vmatmul.mubr.f32.gmra.mxu0 %v7561_v10  ;;  %9124 = vmatprep.subr.mxu1 %v11273_v44  ;;  %v12027_v10 = vld [vmem:[%s11794_s23 + $0xb0] sm:$0xff] }
 0x1dc   : >> { %8862 = vmatprep.mubr.msk.f32.mxu0 %vm11274_vm1, %v11273_v44  ;;  %9125 = vmatpush3.msra.mxu1 %v1687_v11  ;;  %v7580_v11 = vld [vmem:[%s11794_s23 + $0x17] sm:$0xff] }
 0x1dd   : >> { %8961 = vmatmul.mubr.f32.gmra.mxu1 %v11838_v12  ;;  %9025 = vmatprep.subr.mxu0 %v11273_v44 }
 0x1de   : >> { %8963 = vmatprep.mubr.msk.f32.mxu1 %vm11274_vm1, %v11273_v44  ;;  %9026 = vmatpush3.msra.mxu0 %v1441_v13  ;;  %v1935_v13 = vld [vmem:[#allocation11 + $0x278] sm:$0xff] }
 0x1df   : >> { %8863 = vmatmul.mubr.f32.gmra.mxu0 %v7562_v14  ;;  %9126 = vmatprep.subr.mxu1 %v11273_v44  ;;  %v2180_v14 = vld [vmem:[#allocation11 + $0x2f8] sm:$0xff] }
 0x1e0   : >> { %8865 = vmatprep.mubr.msk.f32.mxu0 %vm11274_vm1, %v11273_v44  ;;  %9127 = vmatpush3.msra.mxu1 %v1686_v15  ;;  %v7581_v15 = vld [vmem:[%s11794_s23 + $0x1f] sm:$0xff] }
 0x1e1   : >> { %8964 = vmatmul.mubr.f32.gmra.mxu1 %v11849_v16  ;;  %9027 = vmatprep.subr.mxu0 %v11273_v44 }
 0x1e2   : >> { %8966 = vmatprep.mubr.msk.f32.mxu1 %vm11274_vm1, %v11273_v44  ;;  %9028 = vmatpush3.msra.mxu0 %v1440_v17  ;;  %v1934_v17 = vld [vmem:[#allocation11 + $0x270] sm:$0xff] }
 0x1e3   : >> { %8866 = vmatmul.mubr.f32.gmra.mxu0 %v7563_v18  ;;  %9128 = vmatprep.subr.mxu1 %v11273_v44  ;;  %v2179_v18 = vld [vmem:[#allocation11 + $0x2f0] sm:$0xff] }
 0x1e4   : >> { %8868 = vmatprep.mubr.msk.f32.mxu0 %vm11274_vm1, %v11273_v44  ;;  %9129 = vmatpush3.msra.mxu1 %v1685_v19  ;;  %v7582_v19 = vld [vmem:[%s11794_s23 + $0x27] sm:$0xff] }
 0x1e5   : >> { %8967 = vmatmul.mubr.f32.gmra.mxu1 %v11860_v20  ;;  %9029 = vmatprep.subr.mxu0 %v11273_v44 }
 0x1e6   : >> { %8969 = vmatprep.mubr.msk.f32.mxu1 %vm11274_vm1, %v11273_v44  ;;  %9030 = vmatpush3.msra.mxu0 %v1439_v21  ;;  %v2178_v21 = vld [vmem:[#allocation11 + $0x2e8] sm:$0xff] }
 0x1e7   : >> { %8869 = vmatmul.mubr.f32.gmra.mxu0 %v7564_v22  ;;  %9130 = vmatprep.subr.mxu1 %v11273_v44  ;;  %v12054_v22 = vld [vmem:[%s11794_s23 + $0x2f] sm:$0xff] }
 0x1e8   : >> { %8871 = vmatprep.mubr.msk.f32.mxu0 %vm11274_vm1, %v11273_v44  ;;  %9131 = vmatpush3.msra.mxu1 %v1684_v23  ;;  %v2177_v23 = vld [vmem:[#allocation11 + $0x2e0] sm:$0xff] }
 0x1e9   : >> { %8970 = vmatmul.mubr.f32.gmra.mxu1 %v11871_v24  ;;  %9031 = vmatprep.subr.mxu0 %v11273_v44 }
 0x1ea   : >> { %8972 = vmatprep.mubr.msk.f32.mxu1 %vm11274_vm1, %v11273_v44  ;;  %9032 = vmatpush3.msra.mxu0 %v1438_v25  ;;  %v12065_v25 = vld [vmem:[%s11794_s23 + $0x37] sm:$0xff] }
 0x1eb   : >> { %8872 = vmatmul.mubr.f32.gmra.mxu0 %v7565_v26  ;;  %9132 = vmatprep.subr.mxu1 %v11273_v44  ;;  %v2176_v26 = vld [vmem:[#allocation11 + $0x2d8] sm:$0xff] }
 0x1ec   : >> { %8874 = vmatprep.mubr.msk.f32.mxu0 %vm11274_vm1, %v11273_v44  ;;  %9133 = vmatpush3.msra.mxu1 %v1683_v27  ;;  %v12076_v27 = vld [vmem:[%s11794_s23 + $0x3f] sm:$0xff] }
 0x1ed   : >> { %8973 = vmatmul.mubr.f32.gmra.mxu1 %v11882_v28  ;;  %9033 = vmatprep.subr.mxu0 %v11273_v44 }
 0x1ee   : >> { %8975 = vmatprep.mubr.msk.f32.mxu1 %vm11274_vm1, %v11273_v44  ;;  %9034 = vmatpush3.msra.mxu0 %v1437_v29  ;;  %v2175_v29 = vld [vmem:[#allocation11 + $0x2d0] sm:$0xff] }
 0x1ef   : >> { %8875 = vmatmul.mubr.f32.gmra.mxu0 %v7566_v30  ;;  %9134 = vmatprep.subr.mxu1 %v11273_v44  ;;  %v12087_v30 = vld [vmem:[%s11794_s23 + $0x47] sm:$0xff] }
 0x1f0   : >> { %8877 = vmatprep.mubr.msk.f32.mxu0 %vm11274_vm1, %v11273_v44  ;;  %9135 = vmatpush3.msra.mxu1 %v1682_v31  ;;  %v2174_v31 = vld [vmem:[#allocation11 + $0x2c8] sm:$0xff] }
 0x1f1   : >> { %8976 = vmatmul.mubr.f32.gmra.mxu1 %v11893_v32  ;;  %9035 = vmatprep.subr.mxu0 %v11273_v44 }
 0x1f2   : >> { %8978 = vmatprep.mubr.msk.f32.mxu1 %vm11274_vm1, %v11273_v44  ;;  %9036 = vmatpush3.msra.mxu0 %v1436_v33  ;;  %v12098_v33 = vld [vmem:[%s11794_s23 + $0x4f] sm:$0xff] }
 0x1f3   : >> { %8878 = vmatmul.mubr.f32.gmra.mxu0 %v7567_v34  ;;  %9136 = vmatprep.subr.mxu1 %v11273_v44  ;;  %v2173_v34 = vld [vmem:[#allocation11 + $0x2c0] sm:$0xff] }
 0x1f4   : >> { %8880 = vmatprep.mubr.msk.f32.mxu0 %vm11274_vm1, %v11273_v44  ;;  %9137 = vmatpush3.msra.mxu1 %v1681_v35  ;;  %v12109_v35 = vld [vmem:[%s11794_s23 + $0x57] sm:$0xff] }
 0x1f5   : >> { %8979 = vmatmul.mubr.f32.gmra.mxu1 %v11904_v36  ;;  %9037 = vmatprep.subr.mxu0 %v11273_v44 }
 0x1f6   : >> { %8981 = vmatprep.mubr.msk.f32.mxu1 %vm11274_vm1, %v11273_v44  ;;  %9038 = vmatpush3.msra.mxu0 %v1435_v37  ;;  %v2172_v37 = vld [vmem:[#allocation11 + $0x2b8] sm:$0xff] }
 0x1f7   : >> { %8881 = vmatmul.mubr.f32.gmra.mxu0 %v7568_v38  ;;  %9138 = vmatprep.subr.mxu1 %v11273_v44  ;;  %v12120_v38 = vld [vmem:[%s11794_s23 + $0x5f] sm:$0xff] }
 0x1f8   : >> { %8883 = vmatprep.mubr.msk.f32.mxu0 %vm11274_vm1, %v11273_v44  ;;  %9139 = vmatpush3.msra.mxu1 %v1680_v39  ;;  %v2171_v39 = vld [vmem:[#allocation11 + $0x2b0] sm:$0xff] }
 0x1f9   : >> { %8982 = vmatmul.mubr.f32.gmra.mxu1 %v11915_v40  ;;  %9039 = vmatprep.subr.mxu0 %v11273_v44 }
 0x1fa   : >> { %8984 = vmatprep.mubr.msk.f32.mxu1 %vm11274_vm1, %v11273_v44  ;;  %9040 = vmatpush3.msra.mxu0 %v1434_v41  ;;  %v12131_v41 = vld [vmem:[%s11794_s23 + $0x67] sm:$0xff] }
 0x1fb   : >> { %8884 = vmatmul.mubr.f32.gmra.mxu0 %v7569_v42  ;;  %9140 = vmatprep.subr.mxu1 %v11273_v44  ;;  %v2170_v42 = vld [vmem:[#allocation11 + $0x2a8] sm:$0xff] }
 0x1fc   : >> { %8886 = vmatprep.mubr.msk.f32.mxu0 %vm11274_vm1, %v11273_v44  ;;  %9141 = vmatpush3.msra.mxu1 %v1679_v43  ;;  %v12142_v43 = vld [vmem:[%s11794_s23 + $0x6f] sm:$0xff] }
 0x1fd   : >> { %8985 = vmatmul.mubr.f32.gmra.mxu1 %v11926_v45  ;;  %9041 = vmatprep.subr.mxu0 %v11273_v44 }
 0x1fe   : >> { %8987 = vmatprep.mubr.msk.f32.mxu1 %vm11274_vm1, %v11273_v44  ;;  %9042 = vmatpush3.msra.mxu0 %v1433_v46  ;;  %v2169_v46 = vld [vmem:[#allocation11 + $0x2a0] sm:$0xff] }
 0x1ff   : >> { %8887 = vmatmul.mubr.f32.gmra.mxu0 %v7570_v47  ;;  %9142 = vmatprep.subr.mxu1 %v11273_v44  ;;  %v12153_v47 = vld [vmem:[%s11794_s23 + $0x77] sm:$0xff] }
 0x200   : >> { %8889 = vmatprep.mubr.msk.f32.mxu0 %vm11274_vm1, %v11273_v44  ;;  %9143 = vmatpush3.msra.mxu1 %v1678_v48  ;;  %v1923_v48 = vld [vmem:[#allocation11 + $0x218] sm:$0xff] }
 0x201   : >> { %8988 = vmatmul.mubr.f32.gmra.mxu1 %v11937_v49  ;;  %9043 = vmatprep.subr.mxu0 %v11273_v44 }
 0x202   : >> { %8990 = vmatprep.mubr.msk.f32.mxu1 %vm11274_vm1, %v11273_v44  ;;  %9044 = vmatpush3.msra.mxu0 %v1432_v50  ;;  %v12164_v50 = vld [vmem:[%s11794_s23 + $0x7f] sm:$0xff] }
 0x203   : >> { %8890 = vmatmul.mubr.f32.gmra.mxu0 %v7571_v51  ;;  %9144 = vmatprep.subr.mxu1 %v11273_v44  ;;  %v1922_v51 = vld [vmem:[#allocation11 + $0x210] sm:$0xff] }
 0x204   : >> { %8892 = vmatprep.mubr.msk.f32.mxu0 %vm11274_vm1, %v11273_v44  ;;  %9145 = vmatpush3.msra.mxu1 %v1677_v52  ;;  %v2167_v52 = vld [vmem:[#allocation11 + $0x290] sm:$0xff] }
 0x205   : >> { %8991 = vmatmul.mubr.f32.gmra.mxu1 %v11948_v53  ;;  %9045 = vmatprep.subr.mxu0 %v11273_v44 }
 0x206   : >> { %8993 = vmatprep.mubr.msk.f32.mxu1 %vm11274_vm1, %v11273_v44  ;;  %9046 = vmatpush3.msra.mxu0 %v1431_v54  ;;  %v1921_v54 = vld [vmem:[#allocation11 + $0x208] sm:$0xff] }
 0x207   : >> { %8893 = vmatmul.mubr.f32.gmra.mxu0 %v7572_v55  ;;  %9146 = vmatprep.subr.mxu1 %v11273_v44  ;;  %v2166_v55 = vld [vmem:[#allocation11 + $0x288] sm:$0xff] }
 0x208   : >> { %8895 = vmatprep.mubr.msk.f32.mxu0 %vm11274_vm1, %v11273_v44  ;;  %9147 = vmatpush3.msra.mxu1 %v1676_v56  ;;  %v12186_v56 = vld [vmem:[%s11794_s23 + $0x8f] sm:$0xff] }
 0x209   : >> { %8994 = vmatmul.mubr.f32.gmra.mxu1 %v11959_v57  ;;  %9047 = vmatprep.subr.mxu0 %v11273_v44 }
 0x20a   : >> { %8996 = vmatprep.mubr.msk.f32.mxu1 %vm11274_vm1, %v11273_v44  ;;  %9048 = vmatpush3.msra.mxu0 %v1430_v58  ;;  %v2165_v58 = vld [vmem:[#allocation11 + $0x280] sm:$0xff] }
 0x20b   : >> { %8896 = vmatmul.mubr.f32.gmra.mxu0 %v7573_v59  ;;  %9148 = vmatprep.subr.mxu1 %v11273_v44  ;;  %v12197_v59 = vld [vmem:[%s11794_s23 + $0x97] sm:$0xff] }
 0x20c   : >> { %8898 = vmatprep.mubr.msk.f32.mxu0 %vm11274_vm1, %v11273_v44  ;;  %9149 = vmatpush3.msra.mxu1 %v1675_v60  ;;  %v12208_v60 = vld [vmem:[%s11794_s23 + $0x9f] sm:$0xff] }
 0x20d   : >> { %8997 = vmatmul.mubr.f32.gmra.mxu1 %v11970_v61  ;;  %9219 = vmatprep.subr.mxu0 %v11273_v44 }
 0x20e   : >> { %8999 = vmatprep.mubr.msk.f32.mxu1 %vm11274_vm1, %v11273_v44  ;;  %9320 = vmatprep.subr.mxu1 %v11273_v44 }
 0x20f   : >> { %8899 = vmatmul.mubr.f32.gmra.mxu0 %v7574_v62  ;;  %v12226_v62 = vld [vmem:[%s11794_s23 + $0xaf] sm:$0xff] }
 0x210   : >> { %8901 = vmatprep.mubr.msk.f32.mxu0 %vm11274_vm1, %v11273_v44 }
 0x211   : >> { %9000 = vmatmul.mubr.f32.gmra.mxu1 %v11981_v63 }
 0x212   : >> { %9002 = vmatprep.mubr.msk.f32.mxu1 %vm11274_vm1, %v11273_v44 }
 0x213   : >> { %8902 = vmatmul.mubr.f32.gmra.mxu0 %v7575_v0  ;;  %v7623_v0 = vld [vmem:[%s11794_s23 + $0xb8] sm:$0xff] }
 0x214   : >> { %8904 = vmatprep.mubr.msk.f32.mxu0 %vm11274_vm1, %v11273_v44 }
 0x215   : >> { %9003 = vmatmul.mubr.f32.gmra.mxu1 %v11991_v1 }
 0x216   : >> { %9005 = vmatprep.mubr.msk.f32.mxu1 %vm11274_vm1, %v11273_v44 }
 0x217   : >> { %8905 = vmatmul.mubr.f32.gmra.mxu0 %v7576_v2  ;;  %v7624_v2 = vld [vmem:[%s11794_s23 + $0xc0] sm:$0xff] }
 0x218   : >> { %8907 = vmatprep.mubr.msk.f32.mxu0 %vm11274_vm1, %v11273_v44 }
 0x219   : >> { %9006 = vmatmul.mubr.f32.gmra.mxu1 %v12000_v3 }
 0x21a   : >> { %9008 = vmatprep.mubr.msk.f32.mxu1 %vm11274_vm1, %v11273_v44 }
 0x21b   : >> { %8908 = vmatmul.mubr.f32.gmra.mxu0 %v7577_v4  ;;  %v7625_v4 = vld [vmem:[%s11794_s23 + $0xc8] sm:$0xff] }
 0x21c   : >> { %8910 = vmatprep.mubr.msk.f32.mxu0 %vm11274_vm1, %v11273_v44 }
 0x21d   : >> { %9009 = vmatmul.mubr.f32.gmra.mxu1 %v12009_v5 }
 0x21e   : >> { %9011 = vmatprep.mubr.msk.f32.mxu1 %vm11274_vm1, %v11273_v44 }
 0x21f   : >> { %8911 = vmatmul.mubr.f32.gmra.mxu0 %v7578_v6  ;;  %v2425_v6 = vld [vmem:[#allocation11 + $0x378] sm:$0xff] }
 0x220   : >> { %8913 = vmatprep.mubr.msk.f32.mxu0 %vm11274_vm1, %v11273_v44 }
 0x221   : >> { %9012 = vmatmul.mubr.f32.gmra.mxu1 %v12018_v7 }
 0x222   : >> { %9014 = vmatprep.mubr.msk.f32.mxu1 %vm11274_vm1, %v11273_v44 }
 0x223   : >> { %8914 = vmatmul.mubr.f32.gmra.mxu0 %v7579_v9  ;;  %v7627_v9 = vld [vmem:[%s11794_s23 + $0x36] sm:$0xff] }
 0x224   : >> { %9049 = vmatprep.mubr.msk.f32.mxu0 %vm11274_vm1, %v11273_v44 }
 0x225   : >> { %9015 = vmatmul.mubr.f32.gmra.mxu1 %v12027_v10 }
 0x226   : >> { %9150 = vmatprep.mubr.msk.f32.mxu1 %vm11274_vm1, %v11273_v44 }
 0x227   : >> { %9050 = vmatmul.mubr.f32.vlgmr.msra.gmra.mxu0 %v7580_v11  ;;  %v2669_v11 = vld [vmem:[#allocation11 + $0x3f0] sm:$0xff] }
 0x228   : >> { %9220 = vmatpush3.msra.mxu0 %v1935_v13  ;;  %9052 = vmatprep.mubr.msk.f32.mxu0 %vm11274_vm1, %v11273_v44  ;;  %v7628_v13 = vld [vmem:[%s11794_s23 + $0x3e] sm:$0xff] }
 0x229   : >> { %9151 = vmatmul.mubr.f32.vlgmr.msra.gmra.mxu1 %v11827_v8  ;;  %9221 = vmatprep.subr.mxu0 %v11273_v44  ;;  %v1933_v8 = vld [vmem:[#allocation11 + $0x268] sm:$0xff] }
 0x22a   : >> { %9321 = vmatpush3.msra.mxu1 %v2180_v14  ;;  %9153 = vmatprep.mubr.msk.f32.mxu1 %vm11274_vm1, %v11273_v44  ;;  %v2423_v14 = vld [vmem:[#allocation11 + $0x368] sm:$0xff] }
 0x22b   : >> { %9053 = vmatmul.mubr.f32.gmra.mxu0 %v7581_v15  ;;  %9322 = vmatprep.subr.mxu1 %v11273_v44 }
 0x22c   : >> { %9055 = vmatprep.mubr.msk.f32.mxu0 %vm11274_vm1, %v11273_v44  ;;  %9222 = vmatpush3.msra.mxu0 %v1934_v17  ;;  %v2668_v17 = vld [vmem:[#allocation11 + $0x3e8] sm:$0xff] }
 0x22d   : >> { %9154 = vmatmul.mubr.f32.gmra.mxu1 %v11838_v12  ;;  %9223 = vmatprep.subr.mxu0 %v11273_v44  ;;  %v1932_v12 = vld [vmem:[#allocation11 + $0x260] sm:$0xff] }
 0x22e   : >> { %9156 = vmatprep.mubr.msk.f32.mxu1 %vm11274_vm1, %v11273_v44  ;;  %9323 = vmatpush3.msra.mxu1 %v2179_v18  ;;  %v12284_v18 = vld [vmem:[%s11794_s23 + $0x46] sm:$0xff] }
 0x22f   : >> { %9056 = vmatmul.mubr.f32.gmra.mxu0 %v7582_v19  ;;  %9324 = vmatprep.subr.mxu1 %v11273_v44 }
 0x230   : >> { %9058 = vmatprep.mubr.msk.f32.mxu0 %vm11274_vm1, %v11273_v44  ;;  %9224 = vmatpush3.msra.mxu0 %v1933_v8 }
 0x231   : >> { %9157 = vmatmul.mubr.f32.gmra.mxu1 %v11849_v16  ;;  %9225 = vmatprep.subr.mxu0 %v11273_v44  ;;  %v1931_v16 = vld [vmem:[#allocation11 + $0x258] sm:$0xff] }
 0x232   : >> { %9159 = vmatprep.mubr.msk.f32.mxu1 %vm11274_vm1, %v11273_v44  ;;  %9325 = vmatpush3.msra.mxu1 %v2178_v21  ;;  %v2422_v21 = vld [vmem:[#allocation11 + $0x360] sm:$0xff] }
 0x233   : >> { %9059 = vmatmul.mubr.f32.gmra.mxu0 %v12054_v22  ;;  %9326 = vmatprep.subr.mxu1 %v11273_v44 }
 0x234   : >> { %9061 = vmatprep.mubr.msk.f32.mxu0 %vm11274_vm1, %v11273_v44  ;;  %9226 = vmatpush3.msra.mxu0 %v1932_v12 }
 0x235   : >> { %9160 = vmatmul.mubr.f32.gmra.mxu1 %v11860_v20  ;;  %9227 = vmatprep.subr.mxu0 %v11273_v44  ;;  %v1930_v20 = vld [vmem:[#allocation11 + $0x250] sm:$0xff] }
 0x236   : >> { %9162 = vmatprep.mubr.msk.f32.mxu1 %vm11274_vm1, %v11273_v44  ;;  %9327 = vmatpush3.msra.mxu1 %v2177_v23 }
 0x237   : >> { %9062 = vmatmul.mubr.f32.gmra.mxu0 %v12065_v25  ;;  %9328 = vmatprep.subr.mxu1 %v11273_v44 }
 0x238   : >> { %9064 = vmatprep.mubr.msk.f32.mxu0 %vm11274_vm1, %v11273_v44  ;;  %9228 = vmatpush3.msra.mxu0 %v1931_v16  ;;  %v12297_v16 = vld [vmem:[%s11794_s23 + $0x4e] sm:$0xff] }
 0x239   : >> { %9163 = vmatmul.mubr.f32.gmra.mxu1 %v11871_v24  ;;  %9229 = vmatprep.subr.mxu0 %v11273_v44  ;;  %v1929_v24 = vld [vmem:[#allocation11 + $0x248] sm:$0xff] }
 0x23a   : >> { %9165 = vmatprep.mubr.msk.f32.mxu1 %vm11274_vm1, %v11273_v44  ;;  %9329 = vmatpush3.msra.mxu1 %v2176_v26 }
 0x23b   : >> { %9065 = vmatmul.mubr.f32.gmra.mxu0 %v12076_v27  ;;  %9330 = vmatprep.subr.mxu1 %v11273_v44 }
 0x23c   : >> { %9067 = vmatprep.mubr.msk.f32.mxu0 %vm11274_vm1, %v11273_v44  ;;  %9230 = vmatpush3.msra.mxu0 %v1930_v20  ;;  %v2421_v20 = vld [vmem:[#allocation11 + $0x358] sm:$0xff] }
 0x23d   : >> { %9166 = vmatmul.mubr.f32.gmra.mxu1 %v11882_v28  ;;  %9231 = vmatprep.subr.mxu0 %v11273_v44  ;;  %v1928_v28 = vld [vmem:[#allocation11 + $0x240] sm:$0xff] }
 0x23e   : >> { %9168 = vmatprep.mubr.msk.f32.mxu1 %vm11274_vm1, %v11273_v44  ;;  %9331 = vmatpush3.msra.mxu1 %v2175_v29 }
 0x23f   : >> { %9068 = vmatmul.mubr.f32.gmra.mxu0 %v12087_v30  ;;  %9332 = vmatprep.subr.mxu1 %v11273_v44 }
 0x240   : >> { %9070 = vmatprep.mubr.msk.f32.mxu0 %vm11274_vm1, %v11273_v44  ;;  %9232 = vmatpush3.msra.mxu0 %v1929_v24 }
 0x241   : >> { %9169 = vmatmul.mubr.f32.gmra.mxu1 %v11893_v32  ;;  %9233 = vmatprep.subr.mxu0 %v11273_v44  ;;  %v1927_v32 = vld [vmem:[#allocation11 + $0x238] sm:$0xff] }
 0x242   : >> { %9171 = vmatprep.mubr.msk.f32.mxu1 %vm11274_vm1, %v11273_v44  ;;  %9333 = vmatpush3.msra.mxu1 %v2174_v31 }
 0x243   : >> { %9071 = vmatmul.mubr.f32.gmra.mxu0 %v12098_v33  ;;  %9334 = vmatprep.subr.mxu1 %v11273_v44 }
 0x244   : >> { %9073 = vmatprep.mubr.msk.f32.mxu0 %vm11274_vm1, %v11273_v44  ;;  %9234 = vmatpush3.msra.mxu0 %v1928_v28  ;;  %v2666_v28 = vld [vmem:[#allocation11 + $0x3d8] sm:$0xff] }
 0x245   : >> { %9172 = vmatmul.mubr.f32.gmra.mxu1 %v11904_v36  ;;  %9235 = vmatprep.subr.mxu0 %v11273_v44  ;;  %v1926_v36 = vld [vmem:[#allocation11 + $0x230] sm:$0xff] }
 0x246   : >> { %9174 = vmatprep.mubr.msk.f32.mxu1 %vm11274_vm1, %v11273_v44  ;;  %9335 = vmatpush3.msra.mxu1 %v2173_v34 }
 0x247   : >> { %9074 = vmatmul.mubr.f32.gmra.mxu0 %v12109_v35  ;;  %9336 = vmatprep.subr.mxu1 %v11273_v44 }
 0x248   : >> { %9076 = vmatprep.mubr.msk.f32.mxu0 %vm11274_vm1, %v11273_v44  ;;  %9236 = vmatpush3.msra.mxu0 %v1927_v32 }
 0x249   : >> { %9175 = vmatmul.mubr.f32.gmra.mxu1 %v11915_v40  ;;  %9237 = vmatprep.subr.mxu0 %v11273_v44  ;;  %v1925_v40 = vld [vmem:[#allocation11 + $0x228] sm:$0xff] }
 0x24a   : >> { %9177 = vmatprep.mubr.msk.f32.mxu1 %vm11274_vm1, %v11273_v44  ;;  %9337 = vmatpush3.msra.mxu1 %v2172_v37  ;;  %v2420_v37 = vld [vmem:[#allocation11 + $0x350] sm:$0xff] }
 0x24b   : >> { %9077 = vmatmul.mubr.f32.gmra.mxu0 %v12120_v38  ;;  %9338 = vmatprep.subr.mxu1 %v11273_v44 }
 0x24c   : >> { %9079 = vmatprep.mubr.msk.f32.mxu0 %vm11274_vm1, %v11273_v44  ;;  %9238 = vmatpush3.msra.mxu0 %v1926_v36 }
 0x24d   : >> { %9178 = vmatmul.mubr.f32.gmra.mxu1 %v11926_v45  ;;  %9239 = vmatprep.subr.mxu0 %v11273_v44  ;;  %v1924_v45 = vld [vmem:[#allocation11 + $0x220] sm:$0xff] }
 0x24e   : >> { %9180 = vmatprep.mubr.msk.f32.mxu1 %vm11274_vm1, %v11273_v44  ;;  %9339 = vmatpush3.msra.mxu1 %v2171_v39 }
 0x24f   : >> { %9080 = vmatmul.mubr.f32.gmra.mxu0 %v12131_v41  ;;  %9340 = vmatprep.subr.mxu1 %v11273_v44 }
 0x250   : >> { %9082 = vmatprep.mubr.msk.f32.mxu0 %vm11274_vm1, %v11273_v44  ;;  %9240 = vmatpush3.msra.mxu0 %v1925_v40 }
 0x251   : >> { %9181 = vmatmul.mubr.f32.gmra.mxu1 %v11937_v49  ;;  %9241 = vmatprep.subr.mxu0 %v11273_v44  ;;  %v2168_v49 = vld [vmem:[#allocation11 + $0x298] sm:$0xff] }
 0x252   : >> { %9183 = vmatprep.mubr.msk.f32.mxu1 %vm11274_vm1, %v11273_v44  ;;  %9341 = vmatpush3.msra.mxu1 %v2170_v42  ;;  %v2665_v42 = vld [vmem:[#allocation11 + $0x3d0] sm:$0xff] }
 0x253   : >> { %9083 = vmatmul.mubr.f32.gmra.mxu0 %v12142_v43  ;;  %9342 = vmatprep.subr.mxu1 %v11273_v44 }
 0x254   : >> { %9085 = vmatprep.mubr.msk.f32.mxu0 %vm11274_vm1, %v11273_v44  ;;  %9242 = vmatpush3.msra.mxu0 %v1924_v45 }
 0x255   : >> { %9184 = vmatmul.mubr.f32.gmra.mxu1 %v11948_v53  ;;  %9243 = vmatprep.subr.mxu0 %v11273_v44  ;;  %v12175_v53 = vld [vmem:[%s11794_s23 + $0x87] sm:$0xff] }
 0x256   : >> { %9186 = vmatprep.mubr.msk.f32.mxu1 %vm11274_vm1, %v11273_v44  ;;  %9343 = vmatpush3.msra.mxu1 %v2169_v46 }
 0x257   : >> { %9086 = vmatmul.mubr.f32.gmra.mxu0 %v12153_v47  ;;  %9344 = vmatprep.subr.mxu1 %v11273_v44 }
 0x258   : >> { %9088 = vmatprep.mubr.msk.f32.mxu0 %vm11274_vm1, %v11273_v44  ;;  %9244 = vmatpush3.msra.mxu0 %v1923_v48  ;;  %v2419_v48 = vld [vmem:[#allocation11 + $0x348] sm:$0xff] }
 0x259   : >> { %9187 = vmatmul.mubr.f32.gmra.mxu1 %v11959_v57  ;;  %9245 = vmatprep.subr.mxu0 %v11273_v44  ;;  %v1920_v57 = vld [vmem:[#allocation11 + $0x200] sm:$0xff] }
 0x25a   : >> { %9189 = vmatprep.mubr.msk.f32.mxu1 %vm11274_vm1, %v11273_v44  ;;  %9345 = vmatpush3.msra.mxu1 %v2168_v49 }
 0x25b   : >> { %9089 = vmatmul.mubr.f32.gmra.mxu0 %v12164_v50  ;;  %9346 = vmatprep.subr.mxu1 %v11273_v44 }
 0x25c   : >> { %9091 = vmatprep.mubr.msk.f32.mxu0 %vm11274_vm1, %v11273_v44  ;;  %9246 = vmatpush3.msra.mxu0 %v1922_v51 }
 0x25d   : >> { %9190 = vmatmul.mubr.f32.gmra.mxu1 %v11970_v61  ;;  %9247 = vmatprep.subr.mxu0 %v11273_v44  ;;  %v12217_v61 = vld [vmem:[%s11794_s23 + $0xa7] sm:$0xff] }
 0x25e   : >> { %9192 = vmatprep.mubr.msk.f32.mxu1 %vm11274_vm1, %v11273_v44  ;;  %9347 = vmatpush3.msra.mxu1 %v2167_v52 }
 0x25f   : >> { %9092 = vmatmul.mubr.f32.gmra.mxu0 %v12175_v53  ;;  %9348 = vmatprep.subr.mxu1 %v11273_v44 }
 0x260   : >> { %9094 = vmatprep.mubr.msk.f32.mxu0 %vm11274_vm1, %v11273_v44  ;;  %9248 = vmatpush3.msra.mxu0 %v1921_v54  ;;  %v2664_v54 = vld [vmem:[#allocation11 + $0x3c8] sm:$0xff] }
 0x261   : >> { %9193 = vmatmul.mubr.f32.gmra.mxu1 %v11981_v63  ;;  %9249 = vmatprep.subr.mxu0 %v11273_v44  ;;  %v12235_v63 = vld [vmem:[%s11794_s23 + $0xb7] sm:$0xff] }
 0x262   : >> { %9195 = vmatprep.mubr.msk.f32.mxu1 %vm11274_vm1, %v11273_v44  ;;  %9349 = vmatpush3.msra.mxu1 %v2166_v55 }
 0x263   : >> { %9095 = vmatmul.mubr.f32.gmra.mxu0 %v12186_v56  ;;  %9350 = vmatprep.subr.mxu1 %v11273_v44 }
 0x264   : >> { %9097 = vmatprep.mubr.msk.f32.mxu0 %vm11274_vm1, %v11273_v44  ;;  %9250 = vmatpush3.msra.mxu0 %v1920_v57 }
 0x265   : >> { %9196 = vmatmul.mubr.f32.gmra.mxu1 %v11991_v1  ;;  %9421 = vmatprep.subr.mxu0 %v11273_v44  ;;  %v12245_v1 = vld [vmem:[%s11794_s23 + $0xbf] sm:$0xff] }
 0x266   : >> { %9198 = vmatprep.mubr.msk.f32.mxu1 %vm11274_vm1, %v11273_v44  ;;  %9351 = vmatpush3.msra.mxu1 %v2165_v58  ;;  %v2418_v58 = vld [vmem:[#allocation11 + $0x340] sm:$0xff] }
 0x267   : >> { %9098 = vmatmul.mubr.f32.gmra.mxu0 %v12197_v59  ;;  %9522 = vmatprep.subr.mxu1 %v11273_v44 }
 0x268   : >> { %9100 = vmatprep.mubr.msk.f32.mxu0 %vm11274_vm1, %v11273_v44 }
 0x269   : >> { %9199 = vmatmul.mubr.f32.gmra.mxu1 %v12000_v3  ;;  %v12254_v3 = vld [vmem:[%s11794_s23 + $0xc7] sm:$0xff] }
 0x26a   : >> { %9201 = vmatprep.mubr.msk.f32.mxu1 %vm11274_vm1, %v11273_v44 }
 0x26b   : >> { %9101 = vmatmul.mubr.f32.gmra.mxu0 %v12208_v60 }
 0x26c   : >> { %9103 = vmatprep.mubr.msk.f32.mxu0 %vm11274_vm1, %v11273_v44 }
 0x26d   : >> { %9202 = vmatmul.mubr.f32.gmra.mxu1 %v12009_v5  ;;  %v7626_v5 = vld [vmem:[%s11794_s23 + $0x2e] sm:$0xff] }
 0x26e   : >> { %9204 = vmatprep.mubr.msk.f32.mxu1 %vm11274_vm1, %v11273_v44 }
 0x26f   : >> { %9104 = vmatmul.mubr.f32.gmra.mxu0 %v12217_v61 }
 0x270   : >> { %9106 = vmatprep.mubr.msk.f32.mxu0 %vm11274_vm1, %v11273_v44 }
 0x271   : >> { %9205 = vmatmul.mubr.f32.gmra.mxu1 %v12018_v7  ;;  %v2670_v7 = vld [vmem:[#allocation11 + $0x3f8] sm:$0xff] }
 0x272   : >> { %9207 = vmatprep.mubr.msk.f32.mxu1 %vm11274_vm1, %v11273_v44 }
 0x273   : >> { %9107 = vmatmul.mubr.f32.gmra.mxu0 %v12226_v62 }
 0x274   : >> { %9109 = vmatprep.mubr.msk.f32.mxu0 %vm11274_vm1, %v11273_v44 }
 0x275   : >> { %9208 = vmatmul.mubr.f32.gmra.mxu1 %v12027_v10  ;;  %v2424_v10 = vld [vmem:[#allocation11 + $0x370] sm:$0xff] }
 0x276   : >> { %9210 = vmatprep.mubr.msk.f32.mxu1 %vm11274_vm1, %v11273_v44 }
 0x277   : >> { %9110 = vmatmul.mubr.f32.gmra.mxu0 %v12235_v63 }
 0x278   : >> { %9112 = vmatprep.mubr.msk.f32.mxu0 %vm11274_vm1, %v11273_v44 }
 0x279   : >> { %9211 = vmatmul.mubr.f32.gmra.mxu1 %v7623_v0 }
 0x27a   : >> { %9213 = vmatprep.mubr.msk.f32.mxu1 %vm11274_vm1, %v11273_v44 }
 0x27b   : >> { %9113 = vmatmul.mubr.f32.gmra.mxu0 %v12245_v1 }
 0x27c   : >> { %9115 = vmatprep.mubr.msk.f32.mxu0 %vm11274_vm1, %v11273_v44 }
 0x27d   : >> { %9214 = vmatmul.mubr.f32.gmra.mxu1 %v7624_v2 }
 0x27e   : >> { %9216 = vmatprep.mubr.msk.f32.mxu1 %vm11274_vm1, %v11273_v44 }
 0x27f   : >> { %9116 = vmatmul.mubr.f32.gmra.mxu0 %v12254_v3 }
 0x280   : >> { %9251 = vmatprep.mubr.msk.f32.mxu0 %vm11274_vm1, %v11273_v44 }
 0x281   : >> { %9217 = vmatmul.mubr.f32.gmra.mxu1 %v7625_v4 }
 0x282   : >> { %9352 = vmatprep.mubr.msk.f32.mxu1 %vm11274_vm1, %v11273_v44 }
 0x283   : >> { %9252 = vmatmul.mubr.f32.vlgmr.msra.gmra.mxu0 %v7626_v5  ;;  %v2663_v5 = vld [vmem:[#allocation11 + $0x3c0] sm:$0xff] }
 0x284   : >> { %9422 = vmatpush3.msra.mxu0 %v2425_v6  ;;  %9254 = vmatprep.mubr.msk.f32.mxu0 %vm11274_vm1, %v11273_v44 }
 0x285   : >> { %9353 = vmatmul.mubr.f32.vlgmr.msra.gmra.mxu1 %v12054_v22  ;;  %9423 = vmatprep.subr.mxu0 %v11273_v44 }
 0x286   : >> { %9523 = vmatpush3.msra.mxu1 %v2670_v7  ;;  %9355 = vmatprep.mubr.msk.f32.mxu1 %vm11274_vm1, %v11273_v44 }
 0x287   : >> { %9255 = vmatmul.mubr.f32.gmra.mxu0 %v7627_v9  ;;  %9524 = vmatprep.subr.mxu1 %v11273_v44  ;;  %v2417_v9 = vld [vmem:[#allocation11 + $0x338] sm:$0xff] }
 0x288   : >> { %9257 = vmatprep.mubr.msk.f32.mxu0 %vm11274_vm1, %v11273_v44  ;;  %9424 = vmatpush3.msra.mxu0 %v2424_v10 }
 0x289   : >> { %9356 = vmatmul.mubr.f32.gmra.mxu1 %v12065_v25  ;;  %9425 = vmatprep.subr.mxu0 %v11273_v44  ;;  %v2667_v25 = vld [vmem:[#allocation11 + $0x3e0] sm:$0xff] }
 0x28a   : >> { %9358 = vmatprep.mubr.msk.f32.mxu1 %vm11274_vm1, %v11273_v44  ;;  %9525 = vmatpush3.msra.mxu1 %v2669_v11 }
 0x28b   : >> { %v1110_v15 = vpop.f32.mrf.mxu0  ;;  %9258 = vmatmul.mubr.f32.gmra.mxu0 %v7628_v13  ;;  %9526 = vmatprep.subr.mxu1 %v11273_v44 }
 0x28c   : >> { %9260 = vmatprep.mubr.msk.f32.mxu0 %vm11274_vm1, %v11273_v44  ;;  %9426 = vmatpush3.msra.mxu0 %v2423_v14  ;;  %v2662_v14 = vld [vmem:[#allocation11 + $0x3b8] sm:$0xff] }
 0x28d   : >> { %v1290_v19 = vpop.f32.mrf.mxu1  ;;  %9359 = vmatmul.mubr.f32.gmra.mxu1 %v12076_v27  ;;  %v8849_v8 = vpop.f32.mrf.mxu0  ;;  %9427 = vmatprep.subr.mxu0 %v11273_v44 }
 0x28e   : >> { %v12288_v22 = vadd.f32 %v1290_v19, %v1110_v15  ;;  %9361 = vmatprep.mubr.msk.f32.mxu1 %vm11274_vm1, %v11273_v44  ;;  %9527 = vmatpush3.msra.mxu1 %v2668_v17  ;;  %v2416_v19 = vld [vmem:[#allocation11 + $0x330] sm:$0xff] }
 0x28f   : >> { %v8950_v12 = vpop.f32.mrf.mxu1  ;;  %v1115_v23 = vpop.f32.mrf.mxu0  ;;  %9261 = vmatmul.mubr.f32.gmra.mxu0 %v12284_v18  ;;  %9528 = vmatprep.subr.mxu1 %v11273_v44 }
 0x290   : >> { %9263 = vmatprep.mubr.msk.f32.mxu0 %vm11274_vm1, %v11273_v44  ;;  %9428 = vmatpush3.msra.mxu0 %v2422_v21 }
 0x291   : >> { %v1295_v26 = vpop.f32.mrf.mxu1  ;;  %9362 = vmatmul.mubr.f32.gmra.mxu1 %v12087_v30  ;;  %v8852_v27 = vpop.f32.mrf.mxu0  ;;  %9429 = vmatprep.subr.mxu0 %v11273_v44  ;;  %v12310_v30 = vld [vmem:[%s11794_s23 + $0x56] sm:$0xff] }
 0x292   : >> { %v12301_v29 = vadd.f32 %v1295_v26, %v1115_v23  ;;  %9364 = vmatprep.mubr.msk.f32.mxu1 %vm11274_vm1, %v11273_v44  ;;  %9529 = vmatpush3.msra.mxu1 %v2667_v25  ;;  %v2661_v23 = vld [vmem:[#allocation11 + $0x3b0] sm:$0xff]  ;;  %v2415_v27 = vld [vmem:[#allocation11 + $0x328] sm:$0xff] }
 0x293   : >> { %v8953_v24 = vpop.f32.mrf.mxu1  ;;  %v1120_v31 = vpop.f32.mrf.mxu0  ;;  %9264 = vmatmul.mubr.f32.gmra.mxu0 %v12297_v16  ;;  %9530 = vmatprep.subr.mxu1 %v11273_v44 }
 0x294   : >> { %9266 = vmatprep.mubr.msk.f32.mxu0 %vm11274_vm1, %v11273_v44  ;;  %9430 = vmatpush3.msra.mxu0 %v2421_v20 }
 0x295   : >> { %v1300_v34 = vpop.f32.mrf.mxu1  ;;  %9365 = vmatmul.mubr.f32.gmra.mxu1 %v12098_v33  ;;  %v8855_v32 = vpop.f32.mrf.mxu0  ;;  %9431 = vmatprep.subr.mxu0 %v11273_v44  ;;  %v12323_v33 = vld [vmem:[%s11794_s23 + $0x5e] sm:$0xff] }
 0x296   : >> { %v12314_v36 = vadd.f32 %v1300_v34, %v1120_v31  ;;  %9367 = vmatprep.mubr.msk.f32.mxu1 %vm11274_vm1, %v11273_v44  ;;  %9531 = vmatpush3.msra.mxu1 %v2666_v28  ;;  %v2660_v28 = vld [vmem:[#allocation11 + $0x3a8] sm:$0xff] }
 0x297   : >> { %v8956_v39 = vpop.f32.mrf.mxu1  ;;  %v1125_v40 = vpop.f32.mrf.mxu0  ;;  %9267 = vmatmul.mubr.f32.gmra.mxu0 %v12310_v30  ;;  %9532 = vmatprep.subr.mxu1 %v11273_v44 }
 0x298   : >> { %9269 = vmatprep.mubr.msk.f32.mxu0 %vm11274_vm1, %v11273_v44  ;;  %9432 = vmatpush3.msra.mxu0 %v2420_v37  ;;  %v2414_v37 = vld [vmem:[#allocation11 + $0x320] sm:$0xff] }
 0x299   : >> { %v1305_v45 = vpop.f32.mrf.mxu1  ;;  %9368 = vmatmul.mubr.f32.gmra.mxu1 %v12109_v35  ;;  %v8858_v46 = vpop.f32.mrf.mxu0  ;;  %9433 = vmatprep.subr.mxu0 %v11273_v44  ;;  %v12336_v35 = vld [vmem:[%s11794_s23 + $0x66] sm:$0xff] }
 0x29a   : >> { %v12327_v49 = vadd.f32 %v1305_v45, %v1125_v40  ;;  %9370 = vmatprep.mubr.msk.f32.mxu1 %vm11274_vm1, %v11273_v44  ;;  %9533 = vmatpush3.msra.mxu1 %v2665_v42  ;;  %v2659_v45 = vld [vmem:[#allocation11 + $0x3a0] sm:$0xff] }
 0x29b   : >> { %v8959_v51 = vpop.f32.mrf.mxu1  ;;  %v1130_v52 = vpop.f32.mrf.mxu0  ;;  %9270 = vmatmul.mubr.f32.gmra.mxu0 %v12323_v33  ;;  %9534 = vmatprep.subr.mxu1 %v11273_v44 }
 0x29c   : >> { %9272 = vmatprep.mubr.msk.f32.mxu0 %vm11274_vm1, %v11273_v44  ;;  %9434 = vmatpush3.msra.mxu0 %v2419_v48  ;;  %v2413_v51 = vld [vmem:[#allocation11 + $0x318] sm:$0xff] }
 0x29d   : >> { %v1310_v55 = vpop.f32.mrf.mxu1  ;;  %9371 = vmatmul.mubr.f32.gmra.mxu1 %v12120_v38  ;;  %v8861_v57 = vpop.f32.mrf.mxu0  ;;  %9435 = vmatprep.subr.mxu0 %v11273_v44  ;;  %v12349_v38 = vld [vmem:[%s11794_s23 + $0x6e] sm:$0xff] }
 0x29e   : >> { %v12340_v0 = vadd.f32 %v1310_v55, %v1130_v52  ;;  %9373 = vmatprep.mubr.msk.f32.mxu1 %vm11274_vm1, %v11273_v44  ;;  %9535 = vmatpush3.msra.mxu1 %v2664_v54  ;;  %v2658_v57 = vld [vmem:[#allocation11 + $0x398] sm:$0xff] }
 0x29f   : >> { %v8962_v2 = vpop.f32.mrf.mxu1  ;;  %v1135_v4 = vpop.f32.mrf.mxu0  ;;  %9273 = vmatmul.mubr.f32.gmra.mxu0 %v12336_v35  ;;  %9536 = vmatprep.subr.mxu1 %v11273_v44 }
 0x2a0   : >> { %9275 = vmatprep.mubr.msk.f32.mxu0 %vm11274_vm1, %v11273_v44  ;;  %9436 = vmatpush3.msra.mxu0 %v2418_v58 }
 0x2a1   : >> { %v1315_v6 = vpop.f32.mrf.mxu1  ;;  %9374 = vmatmul.mubr.f32.gmra.mxu1 %v12131_v41  ;;  %v8864_v7 = vpop.f32.mrf.mxu0  ;;  %9437 = vmatprep.subr.mxu0 %v11273_v44  ;;  %v12362_v41 = vld [vmem:[%s11794_s23 + $0x76] sm:$0xff] }
 0x2a2   : >> { %v12353_v10 = vadd.f32 %v1315_v6, %v1135_v4  ;;  %9376 = vmatprep.mubr.msk.f32.mxu1 %vm11274_vm1, %v11273_v44  ;;  %9537 = vmatpush3.msra.mxu1 %v2663_v5  ;;  %v2412_v4 = vld [vmem:[#allocation11 + $0x310] sm:$0xff] }
 0x2a3   : >> { %v8965_v11 = vpop.f32.mrf.mxu1  ;;  %v1140_v13 = vpop.f32.mrf.mxu0  ;;  %9276 = vmatmul.mubr.f32.gmra.mxu0 %v12349_v38  ;;  %9538 = vmatprep.subr.mxu1 %v11273_v44 }
 0x2a4   : >> { %9278 = vmatprep.mubr.msk.f32.mxu0 %vm11274_vm1, %v11273_v44  ;;  %9438 = vmatpush3.msra.mxu0 %v2417_v9  ;;  %v2657_v9 = vld [vmem:[#allocation11 + $0x390] sm:$0xff] }
 0x2a5   : >> { %v1320_v15 = vpop.f32.mrf.mxu1  ;;  %9377 = vmatmul.mubr.f32.gmra.mxu1 %v12142_v43  ;;  %v8867_v17 = vpop.f32.mrf.mxu0  ;;  %9439 = vmatprep.subr.mxu0 %v11273_v44  ;;  %v12375_v43 = vld [vmem:[%s11794_s23 + $0x7e] sm:$0xff] }
 0x2a6   : >> { %v12366_v8 = vadd.f32 %v1320_v15, %v1140_v13  ;;  %9379 = vmatprep.mubr.msk.f32.mxu1 %vm11274_vm1, %v11273_v44  ;;  %9539 = vmatpush3.msra.mxu1 %v2662_v14  ;;  %v2411_v14 = vld [vmem:[#allocation11 + $0x308] sm:$0xff] }
 0x2a7   : >> { %v8968_v21 = vpop.f32.mrf.mxu1  ;;  %v1145_v12 = vpop.f32.mrf.mxu0  ;;  %9279 = vmatmul.mubr.f32.gmra.mxu0 %v12362_v41  ;;  %9540 = vmatprep.subr.mxu1 %v11273_v44 }
 0x2a8   : >> { %9281 = vmatprep.mubr.msk.f32.mxu0 %vm11274_vm1, %v11273_v44  ;;  %9440 = vmatpush3.msra.mxu0 %v2416_v19  ;;  %v2656_v21 = vld [vmem:[#allocation11 + $0x388] sm:$0xff] }
 0x2a9   : >> { %v1325_v25 = vpop.f32.mrf.mxu1  ;;  %9380 = vmatmul.mubr.f32.gmra.mxu1 %v12153_v47  ;;  %v8870_v26 = vpop.f32.mrf.mxu0  ;;  %9441 = vmatprep.subr.mxu0 %v11273_v44  ;;  %v12388_v47 = vld [vmem:[%s11794_s23 + $0x86] sm:$0xff] }
 0x2aa   : >> { %v12379_v20 = vadd.f32 %v1325_v25, %v1145_v12  ;;  %9382 = vmatprep.mubr.msk.f32.mxu1 %vm11274_vm1, %v11273_v44  ;;  %9541 = vmatpush3.msra.mxu1 %v2661_v23  ;;  %v2410_v25 = vld [vmem:[#allocation11 + $0x300] sm:$0xff] }
 0x2ab   : >> { %v8971_v24 = vpop.f32.mrf.mxu1  ;;  %v1150_v31 = vpop.f32.mrf.mxu0  ;;  %9282 = vmatmul.mubr.f32.gmra.mxu0 %v12375_v43  ;;  %9542 = vmatprep.subr.mxu1 %v11273_v44 }
 0x2ac   : >> { %9284 = vmatprep.mubr.msk.f32.mxu0 %vm11274_vm1, %v11273_v44  ;;  %9442 = vmatpush3.msra.mxu0 %v2415_v27 }
 0x2ad   : >> { %v1330_v34 = vpop.f32.mrf.mxu1  ;;  %9383 = vmatmul.mubr.f32.gmra.mxu1 %v12164_v50  ;;  %v8873_v32 = vpop.f32.mrf.mxu0  ;;  %9443 = vmatprep.subr.mxu0 %v11273_v44  ;;  %v12401_v50 = vld [vmem:[%s11794_s23 + $0x8e] sm:$0xff] }
 0x2ae   : >> { %v12392_v39 = vadd.f32 %v1330_v34, %v1150_v31  ;;  %9385 = vmatprep.mubr.msk.f32.mxu1 %vm11274_vm1, %v11273_v44  ;;  %9543 = vmatpush3.msra.mxu1 %v2660_v28  ;;  %v2655_v31 = vld [vmem:[#allocation11 + $0x380] sm:$0xff] }
 0x2af   : >> { %v8974_v40 = vpop.f32.mrf.mxu1  ;;  %v1155_v42 = vpop.f32.mrf.mxu0  ;;  %9285 = vmatmul.mubr.f32.gmra.mxu0 %v12388_v47  ;;  %9544 = vmatprep.subr.mxu1 %v11273_v44 }
 0x2b0   : >> { %9287 = vmatprep.mubr.msk.f32.mxu0 %vm11274_vm1, %v11273_v44  ;;  %9444 = vmatpush3.msra.mxu0 %v2414_v37 }
 0x2b1   : >> { %v1335_v46 = vpop.f32.mrf.mxu1  ;;  %9386 = vmatmul.mubr.f32.gmra.mxu1 %v12175_v53  ;;  %v8876_v48 = vpop.f32.mrf.mxu0  ;;  %9445 = vmatprep.subr.mxu0 %v11273_v44  ;;  %v12414_v53 = vld [vmem:[%s11794_s23 + $0x96] sm:$0xff] }
 0x2b2   : >> { %v12405_v52 = vadd.f32 %v1335_v46, %v1155_v42  ;;  %9388 = vmatprep.mubr.msk.f32.mxu1 %vm11274_vm1, %v11273_v44  ;;  %9545 = vmatpush3.msra.mxu1 %v2659_v45 }
 0x2b3   : >> { %v8977_v54 = vpop.f32.mrf.mxu1  ;;  %v1160_v55 = vpop.f32.mrf.mxu0  ;;  %9288 = vmatmul.mubr.f32.gmra.mxu0 %v12401_v50  ;;  %9546 = vmatprep.subr.mxu1 %v11273_v44 }
 0x2b4   : >> { %9290 = vmatprep.mubr.msk.f32.mxu0 %vm11274_vm1, %v11273_v44  ;;  %9446 = vmatpush3.msra.mxu0 %v2413_v51  ;;  %v12477_v54 = vld [vmem:[%s11794_s23 + $0xbe] sm:$0xff] }
 0x2b5   : >> { %v1340_v58 = vpop.f32.mrf.mxu1  ;;  %9389 = vmatmul.mubr.f32.gmra.mxu1 %v12186_v56  ;;  %v8879_v2 = vpop.f32.mrf.mxu0  ;;  %9447 = vmatprep.subr.mxu0 %v11273_v44  ;;  %v12427_v56 = vld [vmem:[%s11794_s23 + $0x9e] sm:$0xff] }
 0x2b6   : >> { %v12418_v5 = vadd.f32 %v1340_v58, %v1160_v55  ;;  %9391 = vmatprep.mubr.msk.f32.mxu1 %vm11274_vm1, %v11273_v44  ;;  %9547 = vmatpush3.msra.mxu1 %v2658_v57 }
 0x2b7   : >> { %v8980_v6 = vpop.f32.mrf.mxu1  ;;  %v1165_v7 = vpop.f32.mrf.mxu0  ;;  %9291 = vmatmul.mubr.f32.gmra.mxu0 %v12414_v53  ;;  %9548 = vmatprep.subr.mxu1 %v11273_v44 }
 0x2b8   : >> { %9293 = vmatprep.mubr.msk.f32.mxu0 %vm11274_vm1, %v11273_v44  ;;  %9448 = vmatpush3.msra.mxu0 %v2412_v4  ;;  %v12488_v4 = vld [vmem:[%s11794_s23 + $0xc6] sm:$0xff] }
 0x2b9   : >> { %v1345_v11 = vpop.f32.mrf.mxu1  ;;  %9392 = vmatmul.mubr.f32.gmra.mxu1 %v12197_v59  ;;  %v8882_v13 = vpop.f32.mrf.mxu0  ;;  %9449 = vmatprep.subr.mxu0 %v11273_v44  ;;  %v12440_v59 = vld [vmem:[%s11794_s23 + $0xa6] sm:$0xff] }
 0x2ba   : >> { %v12431_v15 = vadd.f32 %v1345_v11, %v1165_v7  ;;  %9394 = vmatprep.mubr.msk.f32.mxu1 %vm11274_vm1, %v11273_v44  ;;  %9549 = vmatpush3.msra.mxu1 %v2657_v9  ;;  %v12499_v13 = vld [vmem:[%s11794_s23 + $0xce] sm:$0xff] }
 0x2bb   : >> { %v8983_v17 = vpop.f32.mrf.mxu1  ;;  %v1170_v19 = vpop.f32.mrf.mxu0  ;;  %9294 = vmatmul.mubr.f32.gmra.mxu0 %v12427_v56  ;;  %9550 = vmatprep.subr.mxu1 %v11273_v44 }
 0x2bc   : >> { %9296 = vmatprep.mubr.msk.f32.mxu0 %vm11274_vm1, %v11273_v44  ;;  %9450 = vmatpush3.msra.mxu0 %v2411_v14 }
 0x2bd   : >> { %v1350_v12 = vpop.f32.mrf.mxu1  ;;  %9395 = vmatmul.mubr.f32.gmra.mxu1 %v12208_v60  ;;  %v8885_v23 = vpop.f32.mrf.mxu0  ;;  %9451 = vmatprep.subr.mxu0 %v11273_v44  ;;  %v12453_v60 = vld [vmem:[%s11794_s23 + $0xae] sm:$0xff] }
 0x2be   : >> { %v12444_v26 = vadd.f32 %v1350_v12, %v1170_v19  ;;  %9397 = vmatprep.mubr.msk.f32.mxu1 %vm11274_vm1, %v11273_v44  ;;  %9551 = vmatpush3.msra.mxu1 %v2656_v21  ;;  %v7669_v19 = vld [vmem:[%s11794_s23 + $0xcf] sm:$0xff] }
 0x2bf   : >> { %v8986_v27 = vpop.f32.mrf.mxu1  ;;  %v1175_v24 = vpop.f32.mrf.mxu0  ;;  %9297 = vmatmul.mubr.f32.gmra.mxu0 %v12440_v59  ;;  %9552 = vmatprep.subr.mxu1 %v11273_v44  ;;  %v12511_v23 = vld [vmem:[%s11794_s23 + $0xd6] sm:$0xff] }
 0x2c0   : >> { %9299 = vmatprep.mubr.msk.f32.mxu0 %vm11274_vm1, %v11273_v44  ;;  %9452 = vmatpush3.msra.mxu0 %v2410_v25 }
 0x2c1   : >> { %v1355_v28 = vpop.f32.mrf.mxu1  ;;  %9398 = vmatmul.mubr.f32.gmra.mxu1 %v12217_v61  ;;  %v8888_v34 = vpop.f32.mrf.mxu0  ;;  %9623 = vmatprep.subr.mxu0 %v11273_v44  ;;  %v12466_v61 = vld [vmem:[%s11794_s23 + $0xb6] sm:$0xff] }
 0x2c2   : >> { %v12457_v32 = vadd.f32 %v1355_v28, %v1175_v24  ;;  %9400 = vmatprep.mubr.msk.f32.mxu1 %vm11274_vm1, %v11273_v44  ;;  %9553 = vmatpush3.msra.mxu1 %v2655_v31  ;;  %v7670_v24 = vld [vmem:[%s11794_s23 + $0xd7] sm:$0xff] }
 0x2c3   : >> { %v8989_v37 = vpop.f32.mrf.mxu1  ;;  %v1180_v40 = vpop.f32.mrf.mxu0  ;;  %9300 = vmatmul.mubr.f32.gmra.mxu0 %v12453_v60  ;;  %9724 = vmatprep.subr.mxu1 %v11273_v44  ;;  %v12522_v34 = vld [vmem:[%s11794_s23 + $0xde] sm:$0xff] }
 0x2c4   : >> { %9302 = vmatprep.mubr.msk.f32.mxu0 %vm11274_vm1, %v11273_v44 }
 0x2c5   : >> { %v1360_v42 = vpop.f32.mrf.mxu1  ;;  %9401 = vmatmul.mubr.f32.gmra.mxu1 %v12226_v62  ;;  %v8891_v45 = vpop.f32.mrf.mxu0 }
 0x2c6   : >> { %v12469_v46 = vadd.f32 %v1360_v42, %v1180_v40  ;;  %9403 = vmatprep.mubr.msk.f32.mxu1 %vm11274_vm1, %v11273_v44  ;;  %v7671_v45 = vld [vmem:[%s11794_s23 + $0xdf] sm:$0xff] }
 0x2c7   : >> { %v8992_v48 = vpop.f32.mrf.mxu1  ;;  %v1185_v51 = vpop.f32.mrf.mxu0  ;;  %9303 = vmatmul.mubr.f32.gmra.mxu0 %v12466_v61 }
 0x2c8   : >> { %9305 = vmatprep.mubr.msk.f32.mxu0 %vm11274_vm1, %v11273_v44 }
 0x2c9   : >> { %v1365_v55 = vpop.f32.mrf.mxu1  ;;  %9404 = vmatmul.mubr.f32.gmra.mxu1 %v12235_v63  ;;  %v8894_v62 = vpop.f32.mrf.mxu0 }
 0x2ca   : >> { %v12480_v57 = vadd.f32 %v1365_v55, %v1185_v51  ;;  %9406 = vmatprep.mubr.msk.f32.mxu1 %vm11274_vm1, %v11273_v44  ;;  %v7672_v55 = vld [vmem:[%s11794_s23 + $0x45] sm:$0xff] }
 0x2cb   : >> { %v8995_v58 = vpop.f32.mrf.mxu1  ;;  %v1190_v2 = vpop.f32.mrf.mxu0  ;;  %9306 = vmatmul.mubr.f32.gmra.mxu0 %v12477_v54 }
 0x2cc   : >> { %9308 = vmatprep.mubr.msk.f32.mxu0 %vm11274_vm1, %v11273_v44 }
 0x2cd   : >> { %v1370_v6 = vpop.f32.mrf.mxu1  ;;  %9407 = vmatmul.mubr.f32.gmra.mxu1 %v12245_v1  ;;  %v8897_v63 = vpop.f32.mrf.mxu0 }
 0x2ce   : >> { %v12491_v7 = vadd.f32 %v1370_v6, %v1190_v2  ;;  %9409 = vmatprep.mubr.msk.f32.mxu1 %vm11274_vm1, %v11273_v44  ;;  %v2915_v2 = vld [vmem:[#allocation11 + $0x478] sm:$0xff] }
 0x2cf   : >> { %v8998_v9 = vpop.f32.mrf.mxu1  ;;  %v1195_v11 = vpop.f32.mrf.mxu0  ;;  %9309 = vmatmul.mubr.f32.gmra.mxu0 %v12488_v4 }
 0x2d0   : >> { %9311 = vmatprep.mubr.msk.f32.mxu0 %vm11274_vm1, %v11273_v44 }
 0x2d1   : >> { %v1375_v14 = vpop.f32.mrf.mxu1  ;;  %9410 = vmatmul.mubr.f32.gmra.mxu1 %v12254_v3  ;;  %v8900_v1 = vpop.f32.mrf.mxu0 }
 0x2d2   : >> { %v12502_v17 = vadd.f32 %v1375_v14, %v1195_v11  ;;  %9412 = vmatprep.mubr.msk.f32.mxu1 %vm11274_vm1, %v11273_v44  ;;  %v3160_v11 = vld [vmem:[#allocation11 + $0x4f8] sm:$0xff] }
 0x2d3   : >> { %v9001_v21 = vpop.f32.mrf.mxu1  ;;  %v1200_v12 = vpop.f32.mrf.mxu0  ;;  %9312 = vmatmul.mubr.f32.gmra.mxu0 %v12499_v13  ;;  %v7673_v14 = vld [vmem:[%s11794_s23 + $0x4d] sm:$0xff] }
 0x2d4   : >> { %9314 = vmatprep.mubr.msk.f32.mxu0 %vm11274_vm1, %v11273_v44  ;;  %v2914_v21 = vld [vmem:[#allocation11 + $0x470] sm:$0xff] }
 0x2d5   : >> { %v1380_v25 = vpop.f32.mrf.mxu1  ;;  %9413 = vmatmul.mubr.f32.gmra.mxu1 %v7669_v19  ;;  %v8903_v3 = vpop.f32.mrf.mxu0 }
 0x2d6   : >> { %v12513_v27 = vadd.f32 %v1380_v25, %v1200_v12  ;;  %9415 = vmatprep.mubr.msk.f32.mxu1 %vm11274_vm1, %v11273_v44 }
 0x2d7   : >> { %v9004_v31 = vpop.f32.mrf.mxu1  ;;  %v1205_v28 = vpop.f32.mrf.mxu0  ;;  %9315 = vmatmul.mubr.f32.gmra.mxu0 %v12511_v23 }
 0x2d8   : >> { %9317 = vmatprep.mubr.msk.f32.mxu0 %vm11274_vm1, %v11273_v44 }
 0x2d9   : >> { %v1385_v37 = vpop.f32.mrf.mxu1  ;;  %9416 = vmatmul.mubr.f32.gmra.mxu1 %v7670_v24  ;;  %v8906_v40 = vpop.f32.mrf.mxu0  ;;  %v3159_v24 = vld [vmem:[#allocation11 + $0x4f0] sm:$0xff] }
 0x2da   : >> { %v12524_v42 = vadd.f32 %v1385_v37, %v1205_v28  ;;  %9418 = vmatprep.mubr.msk.f32.mxu1 %vm11274_vm1, %v11273_v44  ;;  %v2913_v37 = vld [vmem:[#allocation11 + $0x468] sm:$0xff] }
 0x2db   : >> { %v9007_v48 = vpop.f32.mrf.mxu1  ;;  %v1210_v51 = vpop.f32.mrf.mxu0  ;;  %9318 = vmatmul.mubr.f32.gmra.mxu0 %v12522_v34 }
 0x2dc   : >> { %9453 = vmatprep.mubr.msk.f32.mxu0 %vm11274_vm1, %v11273_v44 }
 0x2dd   : >> { %v1390_v62 = vpop.f32.mrf.mxu1  ;;  %9419 = vmatmul.mubr.f32.gmra.mxu1 %v7671_v45  ;;  %v8909_v58 = vpop.f32.mrf.mxu0 }
 0x2de   : >> { %v12533_v6 = vadd.f32 %v1390_v62, %v1210_v51  ;;  %9554 = vmatprep.mubr.msk.f32.mxu1 %vm11274_vm1, %v11273_v44  ;;  %v3158_v51 = vld [vmem:[#allocation11 + $0x4e8] sm:$0xff] }
 0x2df   : >> { %v9010_v63 = vpop.f32.mrf.mxu1  ;;  %v1215_v9 = vpop.f32.mrf.mxu0  ;;  %9454 = vmatmul.mubr.f32.vlgmr.msra.gmra.mxu0 %v7672_v55 }
 0x2e0   : >> { %9624 = vmatpush3.msra.mxu0 %v2915_v2  ;;  %9456 = vmatprep.mubr.msk.f32.mxu0 %vm11274_vm1, %v11273_v44  ;;  %v2912_v2 = vld [vmem:[#allocation11 + $0x460] sm:$0xff] }
 0x2e1   : >> { %v1395_v1 = vpop.f32.mrf.mxu1  ;;  %9555 = vmatmul.mubr.f32.vlgmr.msra.gmra.mxu1 %v12284_v18  ;;  %v8912_v19 = vpop.f32.mrf.mxu0  ;;  %9625 = vmatprep.subr.mxu0 %v11273_v44  ;;  %v7674_v18 = vld [vmem:[%s11794_s23 + $0x55] sm:$0xff] }
 0x2e2   : >> { %v12542_v12 = vadd.f32 %v1395_v1, %v1215_v9  ;;  %9725 = vmatpush3.msra.mxu1 %v3160_v11  ;;  %9557 = vmatprep.mubr.msk.f32.mxu1 %vm11274_vm1, %v11273_v44  ;;  %v3157_v11 = vld [vmem:[#allocation11 + $0x4e0] sm:$0xff] }
 0x2e3   : >> { %v9013_v25 = vpop.f32.mrf.mxu1  ;;  %v1220_v3 = vpop.f32.mrf.mxu0  ;;  %9457 = vmatmul.mubr.f32.gmra.mxu0 %v7673_v14  ;;  %9726 = vmatprep.subr.mxu1 %v11273_v44 }
 0x2e4   : >> { %9459 = vmatprep.mubr.msk.f32.mxu0 %vm11274_vm1, %v11273_v44  ;;  %9626 = vmatpush3.msra.mxu0 %v2914_v21  ;;  %v2911_v21 = vld [vmem:[#allocation11 + $0x458] sm:$0xff] }
 0x2e5   : >> { %v1400_v31 = vpop.f32.mrf.mxu1  ;;  %9558 = vmatmul.mubr.f32.gmra.mxu1 %v12297_v16  ;;  %v8915_v28 = vpop.f32.mrf.mxu0  ;;  %9627 = vmatprep.subr.mxu0 %v11273_v44  ;;  %v12561_v16 = vld [vmem:[%s11794_s23 + $0x5d] sm:$0xff] }
 0x2e6   : >> { %v12552_v40 = vadd.f32 %v1400_v31, %v1220_v3  ;;  %9560 = vmatprep.mubr.msk.f32.mxu1 %vm11274_vm1, %v11273_v44  ;;  %9727 = vmatpush3.msra.mxu1 %v3159_v24  ;;  %v3156_v24 = vld [vmem:[#allocation11 + $0x4d8] sm:$0xff] }
 0x2e7   : >> { %v9016_v45 = vpop.f32.mrf.mxu1  ;;  %v1512_v48 = vpop.f32.mrf.mxu0  ;;  %9460 = vmatmul.mubr.f32.gmra.mxu0 %v7674_v18  ;;  %9728 = vmatprep.subr.mxu1 %v11273_v44 }
 0x2e8   : >> { %v1626_v55 = vadd.f32 %v1512_v48, %v12288_v22  ;;  %9462 = vmatprep.mubr.msk.f32.mxu0 %vm11274_vm1, %v11273_v44  ;;  %9628 = vmatpush3.msra.mxu0 %v2913_v37  ;;  %v2910_v37 = vld [vmem:[#allocation11 + $0x450] sm:$0xff] }
 0x2e9   : >> { %v1757_v62 = vpop.f32.mrf.mxu1  ;;  %9561 = vmatmul.mubr.f32.gmra.mxu1 %v12310_v30  ;;  %v9051_v58 = vpop.f32.mrf.mxu0  ;;  %9629 = vmatprep.subr.mxu0 %v11273_v44  ;;  %v12575_v30 = vld [vmem:[%s11794_s23 + $0x65] sm:$0xff] }
 0x2ea   : >> { %v12565_v63 = vadd.f32 %v1757_v62, %v1626_v55  ;;  %9563 = vmatprep.mubr.msk.f32.mxu1 %vm11274_vm1, %v11273_v44  ;;  %9729 = vmatpush3.msra.mxu1 %v3158_v51  ;;  %v3155_v51 = vld [vmem:[#allocation11 + $0x4d0] sm:$0xff] }
 0x2eb   : >> { %v9152_v22 = vpop.f32.mrf.mxu1  ;;  %v1517_v9 = vpop.f32.mrf.mxu0  ;;  %9463 = vmatmul.mubr.f32.gmra.mxu0 %v12561_v16  ;;  %9730 = vmatprep.subr.mxu1 %v11273_v44 }
 0x2ec   : >> { %v1627_v14 = vadd.f32 %v1517_v9, %v12301_v29  ;;  %9465 = vmatprep.mubr.msk.f32.mxu0 %vm11274_vm1, %v11273_v44  ;;  %9630 = vmatpush3.msra.mxu0 %v2912_v2  ;;  %v2909_v2 = vld [vmem:[#allocation11 + $0x448] sm:$0xff] }
 0x2ed   : >> { %v1762_v1 = vpop.f32.mrf.mxu1  ;;  %9564 = vmatmul.mubr.f32.gmra.mxu1 %v12323_v33  ;;  %v9054_v19 = vpop.f32.mrf.mxu0  ;;  %9631 = vmatprep.subr.mxu0 %v11273_v44  ;;  %v12589_v33 = vld [vmem:[%s11794_s23 + $0x6d] sm:$0xff] }
 0x2ee   : >> { %v12579_v25 = vadd.f32 %v1762_v1, %v1627_v14  ;;  %9566 = vmatprep.mubr.msk.f32.mxu1 %vm11274_vm1, %v11273_v44  ;;  %9731 = vmatpush3.msra.mxu1 %v3157_v11  ;;  %v3154_v11 = vld [vmem:[#allocation11 + $0x4c8] sm:$0xff] }
 0x2ef   : >> { %v9155_v29 = vpop.f32.mrf.mxu1  ;;  %v1522_v3 = vpop.f32.mrf.mxu0  ;;  %9466 = vmatmul.mubr.f32.gmra.mxu0 %v12575_v30  ;;  %9732 = vmatprep.subr.mxu1 %v11273_v44 }
 0x2f0   : >> { %v1628_v18 = vadd.f32 %v1522_v3, %v12314_v36  ;;  %9468 = vmatprep.mubr.msk.f32.mxu0 %vm11274_vm1, %v11273_v44  ;;  %9632 = vmatpush3.msra.mxu0 %v2911_v21  ;;  %v2908_v21 = vld [vmem:[#allocation11 + $0x440] sm:$0xff] }
 0x2f1   : >> { %v1767_v31 = vpop.f32.mrf.mxu1  ;;  %9567 = vmatmul.mubr.f32.gmra.mxu1 %v12336_v35  ;;  %v9057_v28 = vpop.f32.mrf.mxu0  ;;  %9633 = vmatprep.subr.mxu0 %v11273_v44  ;;  %v12603_v35 = vld [vmem:[%s11794_s23 + $0x75] sm:$0xff] }
 0x2f2   : >> { %v12593_v45 = vadd.f32 %v1767_v31, %v1628_v18  ;;  %9569 = vmatprep.mubr.msk.f32.mxu1 %vm11274_vm1, %v11273_v44  ;;  %9733 = vmatpush3.msra.mxu1 %v3156_v24  ;;  %v3153_v24 = vld [vmem:[#allocation11 + $0x4c0] sm:$0xff] }
 0x2f3   : >> { %v9158_v36 = vpop.f32.mrf.mxu1  ;;  %v1527_v48 = vpop.f32.mrf.mxu0  ;;  %9469 = vmatmul.mubr.f32.gmra.mxu0 %v12589_v33  ;;  %9734 = vmatprep.subr.mxu1 %v11273_v44 }
 0x2f4   : >> { %v1629_v55 = vadd.f32 %v1527_v48, %v12327_v49  ;;  %9471 = vmatprep.mubr.msk.f32.mxu0 %vm11274_vm1, %v11273_v44  ;;  %9634 = vmatpush3.msra.mxu0 %v2910_v37  ;;  %v2907_v37 = vld [vmem:[#allocation11 + $0x438] sm:$0xff] }
 0x2f5   : >> { %v1772_v62 = vpop.f32.mrf.mxu1  ;;  %9570 = vmatmul.mubr.f32.gmra.mxu1 %v12349_v38  ;;  %v9060_v58 = vpop.f32.mrf.mxu0  ;;  %9635 = vmatprep.subr.mxu0 %v11273_v44  ;;  %v12617_v38 = vld [vmem:[%s11794_s23 + $0x7d] sm:$0xff] }
 0x2f6   : >> { %v12607_v22 = vadd.f32 %v1772_v62, %v1629_v55  ;;  %9572 = vmatprep.mubr.msk.f32.mxu1 %vm11274_vm1, %v11273_v44  ;;  %9735 = vmatpush3.msra.mxu1 %v3155_v51  ;;  %v3152_v51 = vld [vmem:[#allocation11 + $0x4b8] sm:$0xff] }
 0x2f7   : >> { %v9161_v49 = vpop.f32.mrf.mxu1  ;;  %v1532_v9 = vpop.f32.mrf.mxu0  ;;  %9472 = vmatmul.mubr.f32.gmra.mxu0 %v12603_v35  ;;  %9736 = vmatprep.subr.mxu1 %v11273_v44 }
 0x2f8   : >> { %v1630_v14 = vadd.f32 %v1532_v9, %v12340_v0  ;;  %9474 = vmatprep.mubr.msk.f32.mxu0 %vm11274_vm1, %v11273_v44  ;;  %9636 = vmatpush3.msra.mxu0 %v2909_v2  ;;  %v2906_v2 = vld [vmem:[#allocation11 + $0x430] sm:$0xff] }
 0x2f9   : >> { %v1777_v1 = vpop.f32.mrf.mxu1  ;;  %9573 = vmatmul.mubr.f32.gmra.mxu1 %v12362_v41  ;;  %v9063_v19 = vpop.f32.mrf.mxu0  ;;  %9637 = vmatprep.subr.mxu0 %v11273_v44  ;;  %v12631_v41 = vld [vmem:[%s11794_s23 + $0x85] sm:$0xff] }
 0x2fa   : >> { %v12621_v29 = vadd.f32 %v1777_v1, %v1630_v14  ;;  %9575 = vmatprep.mubr.msk.f32.mxu1 %vm11274_vm1, %v11273_v44  ;;  %9737 = vmatpush3.msra.mxu1 %v3154_v11  ;;  %v3151_v11 = vld [vmem:[#allocation11 + $0x4b0] sm:$0xff] }
 0x2fb   : >> { %v9164_v0 = vpop.f32.mrf.mxu1  ;;  %v1537_v3 = vpop.f32.mrf.mxu0  ;;  %9475 = vmatmul.mubr.f32.gmra.mxu0 %v12617_v38  ;;  %9738 = vmatprep.subr.mxu1 %v11273_v44 }
 0x2fc   : >> { %v1631_v18 = vadd.f32 %v1537_v3, %v12353_v10  ;;  %9477 = vmatprep.mubr.msk.f32.mxu0 %vm11274_vm1, %v11273_v44  ;;  %9638 = vmatpush3.msra.mxu0 %v2908_v21  ;;  %v2905_v21 = vld [vmem:[#allocation11 + $0x428] sm:$0xff] }
 0x2fd   : >> { %v1782_v31 = vpop.f32.mrf.mxu1  ;;  %9576 = vmatmul.mubr.f32.gmra.mxu1 %v12375_v43  ;;  %v9066_v28 = vpop.f32.mrf.mxu0  ;;  %9639 = vmatprep.subr.mxu0 %v11273_v44  ;;  %v12645_v43 = vld [vmem:[%s11794_s23 + $0x8d] sm:$0xff] }
 0x2fe   : >> { %v12635_v36 = vadd.f32 %v1782_v31, %v1631_v18  ;;  %9578 = vmatprep.mubr.msk.f32.mxu1 %vm11274_vm1, %v11273_v44  ;;  %9739 = vmatpush3.msra.mxu1 %v3153_v24  ;;  %v3150_v24 = vld [vmem:[#allocation11 + $0x4a8] sm:$0xff] }
 0x2ff   : >> { %v9167_v10 = vpop.f32.mrf.mxu1  ;;  %v1542_v48 = vpop.f32.mrf.mxu0  ;;  %9478 = vmatmul.mubr.f32.gmra.mxu0 %v12631_v41  ;;  %9740 = vmatprep.subr.mxu1 %v11273_v44 }
 0x300   : >> { %v1632_v55 = vadd.f32 %v1542_v48, %v12366_v8  ;;  %9480 = vmatprep.mubr.msk.f32.mxu0 %vm11274_vm1, %v11273_v44  ;;  %9640 = vmatpush3.msra.mxu0 %v2907_v37  ;;  %v2904_v37 = vld [vmem:[#allocation11 + $0x420] sm:$0xff] }
 0x301   : >> { %v1787_v62 = vpop.f32.mrf.mxu1  ;;  %9579 = vmatmul.mubr.f32.gmra.mxu1 %v12388_v47  ;;  %v9069_v58 = vpop.f32.mrf.mxu0  ;;  %9641 = vmatprep.subr.mxu0 %v11273_v44  ;;  %v12659_v47 = vld [vmem:[%s11794_s23 + $0x95] sm:$0xff] }
 0x302   : >> { %v12649_v49 = vadd.f32 %v1787_v62, %v1632_v55  ;;  %9581 = vmatprep.mubr.msk.f32.mxu1 %vm11274_vm1, %v11273_v44  ;;  %9741 = vmatpush3.msra.mxu1 %v3152_v51  ;;  %v3149_v51 = vld [vmem:[#allocation11 + $0x4a0] sm:$0xff] }
 0x303   : >> { %v9170_v8 = vpop.f32.mrf.mxu1  ;;  %v1547_v9 = vpop.f32.mrf.mxu0  ;;  %9481 = vmatmul.mubr.f32.gmra.mxu0 %v12645_v43  ;;  %9742 = vmatprep.subr.mxu1 %v11273_v44 }
 0x304   : >> { %v1633_v14 = vadd.f32 %v1547_v9, %v12379_v20  ;;  %9483 = vmatprep.mubr.msk.f32.mxu0 %vm11274_vm1, %v11273_v44  ;;  %9642 = vmatpush3.msra.mxu0 %v2906_v2  ;;  %v2903_v2 = vld [vmem:[#allocation11 + $0x418] sm:$0xff] }
 0x305   : >> { %v1792_v1 = vpop.f32.mrf.mxu1  ;;  %9582 = vmatmul.mubr.f32.gmra.mxu1 %v12401_v50  ;;  %v9072_v19 = vpop.f32.mrf.mxu0  ;;  %9643 = vmatprep.subr.mxu0 %v11273_v44  ;;  %v12673_v50 = vld [vmem:[%s11794_s23 + $0x9d] sm:$0xff] }
 0x306   : >> { %v12663_v0 = vadd.f32 %v1792_v1, %v1633_v14  ;;  %9584 = vmatprep.mubr.msk.f32.mxu1 %vm11274_vm1, %v11273_v44  ;;  %9743 = vmatpush3.msra.mxu1 %v3151_v11  ;;  %v3148_v11 = vld [vmem:[#allocation11 + $0x498] sm:$0xff] }
 0x307   : >> { %v9173_v20 = vpop.f32.mrf.mxu1  ;;  %v1552_v3 = vpop.f32.mrf.mxu0  ;;  %9484 = vmatmul.mubr.f32.gmra.mxu0 %v12659_v47  ;;  %9744 = vmatprep.subr.mxu1 %v11273_v44 }
 0x308   : >> { %v1634_v18 = vadd.f32 %v1552_v3, %v12392_v39  ;;  %9486 = vmatprep.mubr.msk.f32.mxu0 %vm11274_vm1, %v11273_v44  ;;  %9644 = vmatpush3.msra.mxu0 %v2905_v21  ;;  %v2902_v21 = vld [vmem:[#allocation11 + $0x410] sm:$0xff] }
 0x309   : >> { %v1797_v31 = vpop.f32.mrf.mxu1  ;;  %9585 = vmatmul.mubr.f32.gmra.mxu1 %v12414_v53  ;;  %v9075_v28 = vpop.f32.mrf.mxu0  ;;  %9645 = vmatprep.subr.mxu0 %v11273_v44  ;;  %v12687_v53 = vld [vmem:[%s11794_s23 + $0xa5] sm:$0xff] }
 0x30a   : >> { %v12677_v10 = vadd.f32 %v1797_v31, %v1634_v18  ;;  %9587 = vmatprep.mubr.msk.f32.mxu1 %vm11274_vm1, %v11273_v44  ;;  %9745 = vmatpush3.msra.mxu1 %v3150_v24  ;;  %v3147_v24 = vld [vmem:[#allocation11 + $0x490] sm:$0xff] }
 0x30b   : >> { %v9176_v39 = vpop.f32.mrf.mxu1  ;;  %v1557_v48 = vpop.f32.mrf.mxu0  ;;  %9487 = vmatmul.mubr.f32.gmra.mxu0 %v12673_v50  ;;  %9746 = vmatprep.subr.mxu1 %v11273_v44 }
 0x30c   : >> { %v1635_v55 = vadd.f32 %v1557_v48, %v12405_v52  ;;  %9489 = vmatprep.mubr.msk.f32.mxu0 %vm11274_vm1, %v11273_v44  ;;  %9646 = vmatpush3.msra.mxu0 %v2904_v37  ;;  %v2901_v37 = vld [vmem:[#allocation11 + $0x408] sm:$0xff] }
 0x30d   : >> { %v1802_v62 = vpop.f32.mrf.mxu1  ;;  %9588 = vmatmul.mubr.f32.gmra.mxu1 %v12427_v56  ;;  %v9078_v58 = vpop.f32.mrf.mxu0  ;;  %9647 = vmatprep.subr.mxu0 %v11273_v44  ;;  %v12701_v56 = vld [vmem:[%s11794_s23 + $0xad] sm:$0xff] }
 0x30e   : >> { %v12691_v8 = vadd.f32 %v1802_v62, %v1635_v55  ;;  %9590 = vmatprep.mubr.msk.f32.mxu1 %vm11274_vm1, %v11273_v44  ;;  %9747 = vmatpush3.msra.mxu1 %v3149_v51  ;;  %v3146_v51 = vld [vmem:[#allocation11 + $0x488] sm:$0xff] }
 0x30f   : >> { %v9179_v52 = vpop.f32.mrf.mxu1  ;;  %v1562_v9 = vpop.f32.mrf.mxu0  ;;  %9490 = vmatmul.mubr.f32.gmra.mxu0 %v12687_v53  ;;  %9748 = vmatprep.subr.mxu1 %v11273_v44 }
 0x310   : >> { %v1636_v14 = vadd.f32 %v1562_v9, %v12418_v5  ;;  %9492 = vmatprep.mubr.msk.f32.mxu0 %vm11274_vm1, %v11273_v44  ;;  %9648 = vmatpush3.msra.mxu0 %v2903_v2  ;;  %v2900_v2 = vld [vmem:[#allocation11 + $0x400] sm:$0xff] }
 0x311   : >> { %v1807_v1 = vpop.f32.mrf.mxu1  ;;  %9591 = vmatmul.mubr.f32.gmra.mxu1 %v12440_v59  ;;  %v9081_v19 = vpop.f32.mrf.mxu0  ;;  %9649 = vmatprep.subr.mxu0 %v11273_v44  ;;  %v12715_v59 = vld [vmem:[%s11794_s23 + $0xb5] sm:$0xff] }
 0x312   : >> { %v12705_v20 = vadd.f32 %v1807_v1, %v1636_v14  ;;  %9593 = vmatprep.mubr.msk.f32.mxu1 %vm11274_vm1, %v11273_v44  ;;  %9749 = vmatpush3.msra.mxu1 %v3148_v11  ;;  %v3145_v11 = vld [vmem:[#allocation11 + $0x480] sm:$0xff]  ;;  %v12743_v14 = vld [vmem:[%s11794_s23 + $0xc5] sm:$0xff] }
 0x313   : >> { %v9182_v5 = vpop.f32.mrf.mxu1  ;;  %v1567_v3 = vpop.f32.mrf.mxu0  ;;  %9493 = vmatmul.mubr.f32.gmra.mxu0 %v12701_v56  ;;  %9750 = vmatprep.subr.mxu1 %v11273_v44 }
 0x314   : >> { %v1637_v18 = vadd.f32 %v1567_v3, %v12431_v15  ;;  %9495 = vmatprep.mubr.msk.f32.mxu0 %vm11274_vm1, %v11273_v44  ;;  %9650 = vmatpush3.msra.mxu0 %v2902_v21 }
 0x315   : >> { %v1812_v31 = vpop.f32.mrf.mxu1  ;;  %9594 = vmatmul.mubr.f32.gmra.mxu1 %v12453_v60  ;;  %v9084_v28 = vpop.f32.mrf.mxu0  ;;  %9651 = vmatprep.subr.mxu0 %v11273_v44  ;;  %v12729_v60 = vld [vmem:[%s11794_s23 + $0xbd] sm:$0xff] }
 0x316   : >> { %v12719_v39 = vadd.f32 %v1812_v31, %v1637_v18  ;;  %9596 = vmatprep.mubr.msk.f32.mxu1 %vm11274_vm1, %v11273_v44  ;;  %9751 = vmatpush3.msra.mxu1 %v3147_v24  ;;  %v12755_v24 = vld [vmem:[%s11794_s23 + $0xcd] sm:$0xff] }
 0x317   : >> { %v9185_v15 = vpop.f32.mrf.mxu1  ;;  %v1572_v48 = vpop.f32.mrf.mxu0  ;;  %9496 = vmatmul.mubr.f32.gmra.mxu0 %v12715_v59  ;;  %9752 = vmatprep.subr.mxu1 %v11273_v44 }
 0x318   : >> { %v1638_v55 = vadd.f32 %v1572_v48, %v12444_v26  ;;  %9498 = vmatprep.mubr.msk.f32.mxu0 %vm11274_vm1, %v11273_v44  ;;  %9652 = vmatpush3.msra.mxu0 %v2901_v37  ;;  %v12767_v15 = vld [vmem:[%s11794_s23 + $0xd5] sm:$0xff] }
 0x319   : >> { %v1817_v62 = vpop.f32.mrf.mxu1  ;;  %9597 = vmatmul.mubr.f32.gmra.mxu1 %v12466_v61  ;;  %v9087_v58 = vpop.f32.mrf.mxu0  ;;  %9653 = vmatprep.subr.mxu0 %v11273_v44 }
 0x31a   : >> { %v12733_v52 = vadd.f32 %v1817_v62, %v1638_v55  ;;  %9599 = vmatprep.mubr.msk.f32.mxu1 %vm11274_vm1, %v11273_v44  ;;  %9753 = vmatpush3.msra.mxu1 %v3146_v51  ;;  %v12779_v58 = vld [vmem:[%s11794_s23 + $0xdd] sm:$0xff] }
 0x31b   : >> { %v9188_v26 = vpop.f32.mrf.mxu1  ;;  %v1577_v9 = vpop.f32.mrf.mxu0  ;;  %9499 = vmatmul.mubr.f32.gmra.mxu0 %v12729_v60  ;;  %9754 = vmatprep.subr.mxu1 %v11273_v44 }
 0x31c   : >> { %v1639_v61 = vadd.f32 %v1577_v9, %v12457_v32  ;;  %9501 = vmatprep.mubr.msk.f32.mxu0 %vm11274_vm1, %v11273_v44  ;;  %9654 = vmatpush3.msra.mxu0 %v2900_v2 }
 0x31d   : >> { %v1822_v1 = vpop.f32.mrf.mxu1  ;;  %9600 = vmatmul.mubr.f32.gmra.mxu1 %v12477_v54  ;;  %v9090_v19 = vpop.f32.mrf.mxu0 }
 0x31e   : >> { %v12746_v21 = vadd.f32 %v1822_v1, %v1639_v61  ;;  %9602 = vmatprep.mubr.msk.f32.mxu1 %vm11274_vm1, %v11273_v44  ;;  %9755 = vmatpush3.msra.mxu1 %v3145_v11  ;;  %v12791_v61 = vld [vmem:[%s11794_s23 + $0xe5] sm:$0xff] }
 0x31f   : >> { %v9191_v5 = vpop.f32.mrf.mxu1  ;;  %v1582_v3 = vpop.f32.mrf.mxu0  ;;  %9502 = vmatmul.mubr.f32.gmra.mxu0 %v12743_v14 }
 0x320   : >> { %v1640_v32 = vadd.f32 %v1582_v3, %v12469_v46  ;;  %9504 = vmatprep.mubr.msk.f32.mxu0 %vm11274_vm1, %v11273_v44  ;;  %v7715_v5 = vld [vmem:[%s11794_s23 + $0xe6] sm:$0xff] }
 0x321   : >> { %v1827_v54 = vpop.f32.mrf.mxu1  ;;  %9603 = vmatmul.mubr.f32.gmra.mxu1 %v12488_v4  ;;  %v9093_v18 = vpop.f32.mrf.mxu0 }
 0x322   : >> { %v12758_v31 = vadd.f32 %v1827_v54, %v1640_v32  ;;  %9605 = vmatprep.mubr.msk.f32.mxu1 %vm11274_vm1, %v11273_v44  ;;  %v12804_v54 = vld [vmem:[%s11794_s23 + $0xed] sm:$0xff] }
 0x323   : >> { %v9194_v28 = vpop.f32.mrf.mxu1  ;;  %v1587_v37 = vpop.f32.mrf.mxu0  ;;  %9505 = vmatmul.mubr.f32.gmra.mxu0 %v12755_v24 }
 0x324   : >> { %v1641_v46 = vadd.f32 %v1587_v37, %v12480_v57  ;;  %9507 = vmatprep.mubr.msk.f32.mxu0 %vm11274_vm1, %v11273_v44  ;;  %v7716_v37 = vld [vmem:[%s11794_s23 + $0xee] sm:$0xff] }
 0x325   : >> { %v1832_v48 = vpop.f32.mrf.mxu1  ;;  %9606 = vmatmul.mubr.f32.gmra.mxu1 %v12499_v13  ;;  %v9096_v4 = vpop.f32.mrf.mxu0 }
 0x326   : >> { %v12770_v51 = vadd.f32 %v1832_v48, %v1641_v46  ;;  %9608 = vmatprep.mubr.msk.f32.mxu1 %vm11274_vm1, %v11273_v44  ;;  %v12816_v4 = vld [vmem:[%s11794_s23 + $0xf5] sm:$0xff] }
 0x327   : >> { %v9197_v55 = vpop.f32.mrf.mxu1  ;;  %v1592_v62 = vpop.f32.mrf.mxu0  ;;  %9508 = vmatmul.mubr.f32.gmra.mxu0 %v12767_v15 }
 0x328   : >> { %v1642_v57 = vadd.f32 %v1592_v62, %v12491_v7  ;;  %9510 = vmatprep.mubr.msk.f32.mxu0 %vm11274_vm1, %v11273_v44 }
 0x329   : >> { %v1837_v2 = vpop.f32.mrf.mxu1  ;;  %9609 = vmatmul.mubr.f32.gmra.mxu1 %v12511_v23  ;;  %v9099_v13 = vpop.f32.mrf.mxu0 }
 0x32a   : >> { %v12782_v26 = vadd.f32 %v1837_v2, %v1642_v57  ;;  %9611 = vmatprep.mubr.msk.f32.mxu1 %vm11274_vm1, %v11273_v44  ;;  %v7717_v2 = vld [vmem:[%s11794_s23 + $0xf6] sm:$0xff] }
 0x32b   : >> { %v9200_v9 = vpop.f32.mrf.mxu1  ;;  %v1597_v11 = vpop.f32.mrf.mxu0  ;;  %9511 = vmatmul.mubr.f32.gmra.mxu0 %v12779_v58 }
 0x32c   : >> { %v1643_v7 = vadd.f32 %v1597_v11, %v12502_v17  ;;  %9513 = vmatprep.mubr.msk.f32.mxu0 %vm11274_vm1, %v11273_v44  ;;  %v7718_v11 = vld [vmem:[%s11794_s23 + $0x5c] sm:$0xff] }
 0x32d   : >> { %v1842_v1 = vpop.f32.mrf.mxu1  ;;  %9612 = vmatmul.mubr.f32.gmra.mxu1 %v12522_v34  ;;  %v9102_v23 = vpop.f32.mrf.mxu0 }
 0x32e   : >> { %v12794_v19 = vadd.f32 %v1842_v1, %v1643_v7  ;;  %9614 = vmatprep.mubr.msk.f32.mxu1 %vm11274_vm1, %v11273_v44 }
 0x32f   : >> { %v9203_v3 = vpop.f32.mrf.mxu1  ;;  %v1602_v32 = vpop.f32.mrf.mxu0  ;;  %9514 = vmatmul.mubr.f32.gmra.mxu0 %v12791_v61 }
 0x330   : >> { %v1644_v17 = vadd.f32 %v1602_v32, %v12513_v27  ;;  %9516 = vmatprep.mubr.msk.f32.mxu0 %vm11274_vm1, %v11273_v44 }
 0x331   : >> { %v1847_v34 = vpop.f32.mrf.mxu1  ;;  %9615 = vmatmul.mubr.f32.gmra.mxu1 %v7715_v5  ;;  %v9105_v18 = vpop.f32.mrf.mxu0 }
 0x332   : >> { %v12806_v28 = vadd.f32 %v1847_v34, %v1644_v17  ;;  %9617 = vmatprep.mubr.msk.f32.mxu1 %vm11274_vm1, %v11273_v44 }
 0x333   : >> { %v9206_v46 = vpop.f32.mrf.mxu1  ;;  %v1607_v48 = vpop.f32.mrf.mxu0  ;;  %9517 = vmatmul.mubr.f32.gmra.mxu0 %v12804_v54 }
 0x334   : >> { %v1645_v27 = vadd.f32 %v1607_v48, %v12524_v42  ;;  %9519 = vmatprep.mubr.msk.f32.mxu0 %vm11274_vm1, %v11273_v44 }
 0x335   : >> { %v1852_v55 = vpop.f32.mrf.mxu1  ;;  %9618 = vmatmul.mubr.f32.gmra.mxu1 %v7716_v37  ;;  %v9108_v62 = vpop.f32.mrf.mxu0 }
 0x336   : >> { %v12818_v57 = vadd.f32 %v1852_v55, %v1645_v27  ;;  %9620 = vmatprep.mubr.msk.f32.mxu1 %vm11274_vm1, %v11273_v44 }
 0x337   : >> { %v9209_v13 = vpop.f32.mrf.mxu1  ;;  %v1612_v9 = vpop.f32.mrf.mxu0  ;;  %9520 = vmatmul.mubr.f32.gmra.mxu0 %v12816_v4 }
 0x338   : >> { %v1646_v42 = vadd.f32 %v1612_v9, %v12533_v6  ;;  %9655 = vmatprep.mubr.msk.f32.mxu0 %vm11274_vm1, %v11273_v44  ;;  %v7719_v6 = vld [vmem:[%s11794_s23 + $0x64] sm:$0xff] }
 0x339   : >> { %v1857_v7 = vpop.f32.mrf.mxu1  ;;  %9621 = vmatmul.mubr.f32.gmra.mxu1 %v7717_v2  ;;  %v9111_v1 = vpop.f32.mrf.mxu0 }
 0x33a   : >> { %v12828_v23 = vadd.f32 %v1857_v7, %v1646_v42  ;;  %9756 = vmatprep.mubr.msk.f32.mxu1 %vm11274_vm1, %v11273_v44 }
 0x33b   : >> { %v9212_v5 = vpop.f32.mrf.mxu1  ;;  %v1617_v3 = vpop.f32.mrf.mxu0  ;;  %9656 = vmatmul.mubr.f32.vlgmr.msra.gmra.mxu0 %v7718_v11 }
 0x33c   : >> { %v1647_v32 = vadd.f32 %v1617_v3, %v12542_v12  ;;  %9658 = vmatprep.mubr.msk.f32.mxu0 %vm11274_vm1, %v11273_v44  ;;  %v7720_v12 = vld [vmem:[%s11794_s23 + $0x6c] sm:$0xff] }
 0x33d   : >> { %v1862_v17 = vpop.f32.mrf.mxu1  ;;  %9757 = vmatmul.mubr.f32.vlgmr.msra.gmra.mxu1 %v12561_v16  ;;  %v9114_v34 = vpop.f32.mrf.mxu0 }
 0x33e   : >> { %v12837_v18 = vadd.f32 %v1862_v17, %v1647_v32  ;;  %9759 = vmatprep.mubr.msk.f32.mxu1 %vm11274_vm1, %v11273_v44 }
 0x33f   : >> { %v9215_v37 = vpop.f32.mrf.mxu1  ;;  %v1622_v46 = vpop.f32.mrf.mxu0  ;;  %9659 = vmatmul.mubr.f32.gmra.mxu0 %v7719_v6 }
 0x340   : >> { %v1648_v48 = vadd.f32 %v1622_v46, %v12552_v40  ;;  %9661 = vmatprep.mubr.msk.f32.mxu0 %vm11274_vm1, %v11273_v44  ;;  %v7721_v40 = vld [vmem:[%s11794_s23 + $0x74] sm:$0xff] }
 0x341   : >> { %v1867_v27 = vpop.f32.mrf.mxu1  ;;  %9760 = vmatmul.mubr.f32.gmra.mxu1 %v12575_v30  ;;  %v9117_v16 = vpop.f32.mrf.mxu0 }
 0x342   : >> { %v12846_v55 = vadd.f32 %v1867_v27, %v1648_v48  ;;  %9762 = vmatprep.mubr.msk.f32.mxu1 %vm11274_vm1, %v11273_v44 }
 0x343   : >> { %v9218_v62 = vpop.f32.mrf.mxu1  ;;  %v2002_v2 = vpop.f32.mrf.mxu0  ;;  %9662 = vmatmul.mubr.f32.gmra.mxu0 %v7720_v12 }
 0x344   : >> { %v2116_v13 = vadd.f32 %v2002_v2, %v12565_v63  ;;  %9664 = vmatprep.mubr.msk.f32.mxu0 %vm11274_vm1, %v11273_v44  ;;  %v7722_v63 = vld [vmem:[%s11794_s23 + $0x7c] sm:$0xff] }
 0x345   : >> { %v2247_v9 = vpop.f32.mrf.mxu1  ;;  %9763 = vmatmul.mubr.f32.gmra.mxu1 %v12589_v33  ;;  %v9253_v30 = vpop.f32.mrf.mxu0 }
 0x346   : >> { %v12855_v42 = vadd.f32 %v2247_v9, %v2116_v13  ;;  %9765 = vmatprep.mubr.msk.f32.mxu1 %vm11274_vm1, %v11273_v44 }
 0x347   : >> { %v9354_v11 = vpop.f32.mrf.mxu1  ;;  %v2007_v7 = vpop.f32.mrf.mxu0  ;;  %9665 = vmatmul.mubr.f32.gmra.mxu0 %v7721_v40 }
 0x348   : >> { %v2117_v1 = vadd.f32 %v2007_v7, %v12579_v25  ;;  %9667 = vmatprep.mubr.msk.f32.mxu0 %vm11274_vm1, %v11273_v44  ;;  %v7723_v25 = vld [vmem:[%s11794_s23 + $0x84] sm:$0xff] }
 0x349   : >> { %v2252_v5 = vpop.f32.mrf.mxu1  ;;  %9766 = vmatmul.mubr.f32.gmra.mxu1 %v12603_v35  ;;  %v9256_v33 = vpop.f32.mrf.mxu0 }
 0x34a   : >> { %v12864_v3 = vadd.f32 %v2252_v5, %v2117_v1  ;;  %9768 = vmatprep.mubr.msk.f32.mxu1 %vm11274_vm1, %v11273_v44 }
 0x34b   : >> { %v9357_v32 = vpop.f32.mrf.mxu1  ;;  %v2012_v6 = vpop.f32.mrf.mxu0  ;;  %9668 = vmatmul.mubr.f32.gmra.mxu0 %v7722_v63 }
 0x34c   : >> { %v2118_v17 = vadd.f32 %v2012_v6, %v12593_v45  ;;  %9670 = vmatprep.mubr.msk.f32.mxu0 %vm11274_vm1, %v11273_v44  ;;  %v7724_v45 = vld [vmem:[%s11794_s23 + $0x8c] sm:$0xff] }
 0x34d   : >> { %v2257_v34 = vpop.f32.mrf.mxu1  ;;  %9769 = vmatmul.mubr.f32.gmra.mxu1 %v12617_v38  ;;  %v9259_v35 = vpop.f32.mrf.mxu0 }
 0x34e   : >> { %v12873_v37 = vadd.f32 %v2257_v34, %v2118_v17  ;;  %9771 = vmatprep.mubr.msk.f32.mxu1 %vm11274_vm1, %v11273_v44 }
 0x34f   : >> { %v9360_v46 = vpop.f32.mrf.mxu1  ;;  %v2017_v48 = vpop.f32.mrf.mxu0  ;;  %9671 = vmatmul.mubr.f32.gmra.mxu0 %v7723_v25 }
 0x350   : >> { %v2119_v12 = vadd.f32 %v2017_v48, %v12607_v22  ;;  %9673 = vmatprep.mubr.msk.f32.mxu0 %vm11274_vm1, %v11273_v44  ;;  %v7725_v22 = vld [vmem:[%s11794_s23 + $0x94] sm:$0xff] }
 0x351   : >> { %v2262_v27 = vpop.f32.mrf.mxu1  ;;  %9772 = vmatmul.mubr.f32.gmra.mxu1 %v12631_v41  ;;  %v9262_v38 = vpop.f32.mrf.mxu0 }
 0x352   : >> { %v12882_v16 = vadd.f32 %v2262_v27, %v2119_v12  ;;  %9774 = vmatprep.mubr.msk.f32.mxu1 %vm11274_vm1, %v11273_v44 }
 0x353   : >> { %v9363_v62 = vpop.f32.mrf.mxu1  ;;  %v2022_v2 = vpop.f32.mrf.mxu0  ;;  %9674 = vmatmul.mubr.f32.gmra.mxu0 %v7724_v45 }
 0x354   : >> { %v2120_v13 = vadd.f32 %v2022_v2, %v12621_v29  ;;  %9676 = vmatprep.mubr.msk.f32.mxu0 %vm11274_vm1, %v11273_v44  ;;  %v7726_v29 = vld [vmem:[%s11794_s23 + $0x9c] sm:$0xff] }
 0x355   : >> { %v2267_v40 = vpop.f32.mrf.mxu1  ;;  %9775 = vmatmul.mubr.f32.gmra.mxu1 %v12645_v43  ;;  %v9265_v41 = vpop.f32.mrf.mxu0 }
 0x356   : >> { %v12891_v9 = vadd.f32 %v2267_v40, %v2120_v13  ;;  %9777 = vmatprep.mubr.msk.f32.mxu1 %vm11274_vm1, %v11273_v44 }
 0x357   : >> { %v9366_v30 = vpop.f32.mrf.mxu1  ;;  %v2027_v11 = vpop.f32.mrf.mxu0  ;;  %9677 = vmatmul.mubr.f32.gmra.mxu0 %v7725_v22 }
 0x358   : >> { %v2121_v7 = vadd.f32 %v2027_v11, %v12635_v36  ;;  %9679 = vmatprep.mubr.msk.f32.mxu0 %vm11274_vm1, %v11273_v44  ;;  %v7727_v36 = vld [vmem:[%s11794_s23 + $0xa4] sm:$0xff] }
 0x359   : >> { %v2272_v1 = vpop.f32.mrf.mxu1  ;;  %9778 = vmatmul.mubr.f32.gmra.mxu1 %v12659_v47  ;;  %v9268_v43 = vpop.f32.mrf.mxu0 }
 0x35a   : >> { %v12900_v63 = vadd.f32 %v2272_v1, %v2121_v7  ;;  %9780 = vmatprep.mubr.msk.f32.mxu1 %vm11274_vm1, %v11273_v44 }
 0x35b   : >> { %v9369_v5 = vpop.f32.mrf.mxu1  ;;  %v2032_v33 = vpop.f32.mrf.mxu0  ;;  %9680 = vmatmul.mubr.f32.gmra.mxu0 %v7726_v29 }
 0x35c   : >> { %v2122_v32 = vadd.f32 %v2032_v33, %v12649_v49  ;;  %9682 = vmatprep.mubr.msk.f32.mxu0 %vm11274_vm1, %v11273_v44  ;;  %v7728_v49 = vld [vmem:[%s11794_s23 + $0xac] sm:$0xff] }
 0x35d   : >> { %v2277_v6 = vpop.f32.mrf.mxu1  ;;  %9781 = vmatmul.mubr.f32.gmra.mxu1 %v12673_v50  ;;  %v9271_v47 = vpop.f32.mrf.mxu0 }
 0x35e   : >> { %v12909_v17 = vadd.f32 %v2277_v6, %v2122_v32  ;;  %9783 = vmatprep.mubr.msk.f32.mxu1 %vm11274_vm1, %v11273_v44 }
 0x35f   : >> { %v9372_v25 = vpop.f32.mrf.mxu1  ;;  %v2037_v34 = vpop.f32.mrf.mxu0  ;;  %9683 = vmatmul.mubr.f32.gmra.mxu0 %v7727_v36 }
 0x360   : >> { %v2123_v35 = vadd.f32 %v2037_v34, %v12663_v0  ;;  %9685 = vmatprep.mubr.msk.f32.mxu0 %vm11274_vm1, %v11273_v44  ;;  %v7729_v0 = vld [vmem:[%s11794_s23 + $0xb4] sm:$0xff] }
 0x361   : >> { %v2282_v46 = vpop.f32.mrf.mxu1  ;;  %9784 = vmatmul.mubr.f32.gmra.mxu1 %v12687_v53  ;;  %v9274_v50 = vpop.f32.mrf.mxu0 }
 0x362   : >> { %v12918_v48 = vadd.f32 %v2282_v46, %v2123_v35  ;;  %9786 = vmatprep.mubr.msk.f32.mxu1 %vm11274_vm1, %v11273_v44 }
 0x363   : >> { %v9375_v12 = vpop.f32.mrf.mxu1  ;;  %v2042_v45 = vpop.f32.mrf.mxu0  ;;  %9686 = vmatmul.mubr.f32.gmra.mxu0 %v7728_v49 }
 0x364   : >> { %v2124_v27 = vadd.f32 %v2042_v45, %v12677_v10  ;;  %9688 = vmatprep.mubr.msk.f32.mxu0 %vm11274_vm1, %v11273_v44  ;;  %v7730_v10 = vld [vmem:[%s11794_s23 + $0xbc] sm:$0xff] }
 0x365   : >> { %v2287_v38 = vpop.f32.mrf.mxu1  ;;  %9787 = vmatmul.mubr.f32.gmra.mxu1 %v12701_v56  ;;  %v9277_v53 = vpop.f32.mrf.mxu0 }
 0x366   : >> { %v12927_v62 = vadd.f32 %v2287_v38, %v2124_v27  ;;  %9789 = vmatprep.mubr.msk.f32.mxu1 %vm11274_vm1, %v11273_v44 }
 0x367   : >> { %v9378_v2 = vpop.f32.mrf.mxu1  ;;  %v2047_v13 = vpop.f32.mrf.mxu0  ;;  %9689 = vmatmul.mubr.f32.gmra.mxu0 %v7729_v0 }
 0x368   : >> { %v2125_v22 = vadd.f32 %v2047_v13, %v12691_v8  ;;  %9691 = vmatprep.mubr.msk.f32.mxu0 %vm11274_vm1, %v11273_v44  ;;  %v7731_v8 = vld [vmem:[%s11794_s23 + $0xc4] sm:$0xff] }
 0x369   : >> { %v2292_v40 = vpop.f32.mrf.mxu1  ;;  %9790 = vmatmul.mubr.f32.gmra.mxu1 %v12715_v59  ;;  %v9280_v56 = vpop.f32.mrf.mxu0 }
 0x36a   : >> { %v12936_v41 = vadd.f32 %v2292_v40, %v2125_v22  ;;  %9792 = vmatprep.mubr.msk.f32.mxu1 %vm11274_vm1, %v11273_v44 }
 0x36b   : >> { %v9381_v30 = vpop.f32.mrf.mxu1  ;;  %v2052_v11 = vpop.f32.mrf.mxu0  ;;  %9692 = vmatmul.mubr.f32.gmra.mxu0 %v7730_v10 }
 0x36c   : >> { %v2126_v7 = vadd.f32 %v2052_v11, %v12705_v20  ;;  %9694 = vmatprep.mubr.msk.f32.mxu0 %vm11274_vm1, %v11273_v44  ;;  %v7732_v20 = vld [vmem:[%s11794_s23 + $0xcc] sm:$0xff] }
 0x36d   : >> { %v2297_v29 = vpop.f32.mrf.mxu1  ;;  %9793 = vmatmul.mubr.f32.gmra.mxu1 %v12729_v60  ;;  %v9283_v59 = vpop.f32.mrf.mxu0 }
 0x36e   : >> { %v12945_v1 = vadd.f32 %v2297_v29, %v2126_v7  ;;  %9795 = vmatprep.mubr.msk.f32.mxu1 %vm11274_vm1, %v11273_v44 }
 0x36f   : >> { %v9384_v43 = vpop.f32.mrf.mxu1  ;;  %v2057_v5 = vpop.f32.mrf.mxu0  ;;  %9695 = vmatmul.mubr.f32.gmra.mxu0 %v7731_v8 }
 0x370   : >> { %v2127_v33 = vadd.f32 %v2057_v5, %v12719_v39  ;;  %9697 = vmatprep.mubr.msk.f32.mxu0 %vm11274_vm1, %v11273_v44  ;;  %v7733_v39 = vld [vmem:[%s11794_s23 + $0xd4] sm:$0xff]  ;;  %v7738_v5 = vld [vmem:[%s11794_s23 + $0xfc] sm:$0xff] }
 0x371   : >> { %v2302_v32 = vpop.f32.mrf.mxu1  ;;  %9796 = vmatmul.mubr.f32.gmra.mxu1 %v12743_v14  ;;  %v9286_v60 = vpop.f32.mrf.mxu0 }
 0x372   : >> { %v12954_v36 = vadd.f32 %v2302_v32, %v2127_v33  ;;  %9798 = vmatprep.mubr.msk.f32.mxu1 %vm11274_vm1, %v11273_v44  ;;  %v7761_v32 = vld [vmem:[%s11794_s23 + $0xfd] sm:$0xff] }
 0x373   : >> { %v9387_v6 = vpop.f32.mrf.mxu1  ;;  %v2062_v47 = vpop.f32.mrf.mxu0  ;;  %9698 = vmatmul.mubr.f32.gmra.mxu0 %v7732_v20 }
 0x374   : >> { %v2128_v25 = vadd.f32 %v2062_v47, %v12733_v52  ;;  %9700 = vmatprep.mubr.msk.f32.mxu0 %vm11274_vm1, %v11273_v44  ;;  %v7734_v52 = vld [vmem:[%s11794_s23 + $0xdc] sm:$0xff]  ;;  %v7739_v47 = vld [vmem:[%s11794_s23 + $0x104] sm:$0xff] }
 0x375   : >> { %v2307_v34 = vpop.f32.mrf.mxu1  ;;  %9799 = vmatmul.mubr.f32.gmra.mxu1 %v12755_v24  ;;  %v9289_v14 = vpop.f32.mrf.mxu0 }
 0x376   : >> { %v12963_v35 = vadd.f32 %v2307_v34, %v2128_v25  ;;  %9801 = vmatprep.mubr.msk.f32.mxu1 %vm11274_vm1, %v11273_v44  ;;  %v7762_v34 = vld [vmem:[%s11794_s23 + $0x105] sm:$0xff] }
 0x377   : >> { %v9390_v49 = vpop.f32.mrf.mxu1  ;;  %v2067_v46 = vpop.f32.mrf.mxu0  ;;  %9701 = vmatmul.mubr.f32.gmra.mxu0 %v7733_v39 }
 0x378   : >> { %v2129_v50 = vadd.f32 %v2067_v46, %v12746_v21  ;;  %9703 = vmatprep.mubr.msk.f32.mxu0 %vm11274_vm1, %v11273_v44  ;;  %v7735_v21 = vld [vmem:[%s11794_s23 + $0xe4] sm:$0xff] }
 0x379   : >> { %v2312_v12 = vpop.f32.mrf.mxu1  ;;  %9802 = vmatmul.mubr.f32.gmra.mxu1 %v12767_v15  ;;  %v9292_v24 = vpop.f32.mrf.mxu0 }
 0x37a   : >> { %v12972_v45 = vadd.f32 %v2312_v12, %v2129_v50  ;;  %9804 = vmatprep.mubr.msk.f32.mxu1 %vm11274_vm1, %v11273_v44  ;;  %v7763_v24 = vld [vmem:[%s11794_s23 + $0x10d] sm:$0xff] }
 0x37b   : >> { %v9393_v27 = vpop.f32.mrf.mxu1  ;;  %v2072_v0 = vpop.f32.mrf.mxu0  ;;  %9704 = vmatmul.mubr.f32.gmra.mxu0 %v7734_v52 }
 0x37c   : >> { %v2130_v38 = vadd.f32 %v2072_v0, %v12758_v31  ;;  %9706 = vmatprep.mubr.msk.f32.mxu0 %vm11274_vm1, %v11273_v44  ;;  %v7736_v31 = vld [vmem:[%s11794_s23 + $0xec] sm:$0xff] }
 0x37d   : >> { %v2317_v53 = vpop.f32.mrf.mxu1  ;;  %9805 = vmatmul.mubr.f32.gmra.mxu1 %v12779_v58  ;;  %v9295_v15 = vpop.f32.mrf.mxu0 }
 0x37e   : >> { %v12981_v2 = vadd.f32 %v2317_v53, %v2130_v38  ;;  %9807 = vmatprep.mubr.msk.f32.mxu1 %vm11274_vm1, %v11273_v44 }
 0x37f   : >> { %v9396_v13 = vpop.f32.mrf.mxu1  ;;  %v2077_v22 = vpop.f32.mrf.mxu0  ;;  %9707 = vmatmul.mubr.f32.gmra.mxu0 %v7735_v21 }
 0x380   : >> { %v2131_v10 = vadd.f32 %v2077_v22, %v12770_v51  ;;  %9709 = vmatprep.mubr.msk.f32.mxu0 %vm11274_vm1, %v11273_v44  ;;  %v7737_v51 = vld [vmem:[%s11794_s23 + $0xf4] sm:$0xff] }
 0x381   : >> { %v2322_v40 = vpop.f32.mrf.mxu1  ;;  %9808 = vmatmul.mubr.f32.gmra.mxu1 %v12791_v61  ;;  %v9298_v58 = vpop.f32.mrf.mxu0 }
 0x382   : >> { %v12990_v56 = vadd.f32 %v2322_v40, %v2131_v10  ;;  %9810 = vmatprep.mubr.msk.f32.mxu1 %vm11274_vm1, %v11273_v44 }
 0x383   : >> { %v9399_v30 = vpop.f32.mrf.mxu1  ;;  %v2082_v11 = vpop.f32.mrf.mxu0  ;;  %9710 = vmatmul.mubr.f32.gmra.mxu0 %v7736_v31 }
 0x384   : >> { %v2132_v7 = vadd.f32 %v2082_v11, %v12782_v26  ;;  %9712 = vmatprep.mubr.msk.f32.mxu0 %vm11274_vm1, %v11273_v44 }
 0x385   : >> { %v2327_v8 = vpop.f32.mrf.mxu1  ;;  %9811 = vmatmul.mubr.f32.gmra.mxu1 %v12804_v54  ;;  %v9301_v61 = vpop.f32.mrf.mxu0 }
 0x386   : >> { %v12999_v29 = vadd.f32 %v2327_v8, %v2132_v7  ;;  %9813 = vmatprep.mubr.msk.f32.mxu1 %vm11274_vm1, %v11273_v44 }
 0x387   : >> { %v9402_v59 = vpop.f32.mrf.mxu1  ;;  %v2087_v43 = vpop.f32.mrf.mxu0  ;;  %9713 = vmatmul.mubr.f32.gmra.mxu0 %v7737_v51 }
 0x388   : >> { %v2133_v26 = vadd.f32 %v2087_v43, %v12794_v19  ;;  %9715 = vmatprep.mubr.msk.f32.mxu0 %vm11274_vm1, %v11273_v44 }
 0x389   : >> { %v2332_v33 = vpop.f32.mrf.mxu1  ;;  %9814 = vmatmul.mubr.f32.gmra.mxu1 %v12816_v4  ;;  %v9304_v54 = vpop.f32.mrf.mxu0 }
 0x38a   : >> { %v13008_v20 = vadd.f32 %v2332_v33, %v2133_v26  ;;  %9816 = vmatprep.mubr.msk.f32.mxu1 %vm11274_vm1, %v11273_v44 }
 0x38b   : >> { %v9405_v60 = vpop.f32.mrf.mxu1  ;;  %v2092_v6 = vpop.f32.mrf.mxu0  ;;  %9716 = vmatmul.mubr.f32.gmra.mxu0 %v7738_v5 }
 0x38c   : >> { %v2134_v19 = vadd.f32 %v2092_v6, %v12806_v28  ;;  %9718 = vmatprep.mubr.msk.f32.mxu0 %vm11274_vm1, %v11273_v44  ;;  %v7740_v28 = vld [vmem:[%s11794_s23 + $0x10c] sm:$0xff] }
 0x38d   : >> { %v2337_v25 = vpop.f32.mrf.mxu1  ;;  %9817 = vmatmul.mubr.f32.gmra.mxu1 %v7761_v32  ;;  %v9307_v4 = vpop.f32.mrf.mxu0 }
 0x38e   : >> { %v13017_v39 = vadd.f32 %v2337_v25, %v2134_v19  ;;  %9819 = vmatprep.mubr.msk.f32.mxu1 %vm11274_vm1, %v11273_v44 }
 0x38f   : >> { %v9408_v14 = vpop.f32.mrf.mxu1  ;;  %v2097_v49 = vpop.f32.mrf.mxu0  ;;  %9719 = vmatmul.mubr.f32.gmra.mxu0 %v7739_v47 }
 0x390   : >> { %v2135_v46 = vadd.f32 %v2097_v49, %v12818_v57  ;;  %9721 = vmatprep.mubr.msk.f32.mxu0 %vm11274_vm1, %v11273_v44 }
 0x391   : >> { %v2342_v50 = vpop.f32.mrf.mxu1  ;;  %9820 = vmatmul.mubr.f32.gmra.mxu1 %v7762_v34  ;;  %v9310_v52 = vpop.f32.mrf.mxu0 }
 0x392   : >> { %v13026_v12 = vadd.f32 %v2342_v50, %v2135_v46  ;;  %9822 = vmatprep.mubr.msk.f32.mxu1 %vm11274_vm1, %v11273_v44 }
 0x393   : >> { %v9411_v27 = vpop.f32.mrf.mxu1  ;;  %v2102_v0 = vpop.f32.mrf.mxu0  ;;  %9722 = vmatmul.mubr.f32.gmra.mxu0 %v7740_v28 }
 0x394   : >> { %v2136_v38 = vadd.f32 %v2102_v0, %v12828_v23 }
 0x395   : >> { %v2347_v21 = vpop.f32.mrf.mxu1  ;;  %9823 = vmatmul.mubr.f32.gmra.mxu1 %v7763_v24  ;;  %v9313_v57 = vpop.f32.mrf.mxu0 }
 0x396   : >> { %v13032_v53 = vadd.f32 %v2347_v21, %v2136_v38 }
 0x397   : >> { %v9414_v15 = vpop.f32.mrf.mxu1  ;;  %v2107_v13 = vpop.f32.mrf.mxu0 }
 0x398   : >> { %v2137_v22 = vadd.f32 %v2107_v13, %v12837_v18 }
 0x399   : >> { %v2352_v10 = vpop.f32.mrf.mxu1  ;;  %v9316_v31 = vpop.f32.mrf.mxu0 }
 0x39a   : >> { %v13035_v40 = vadd.f32 %v2352_v10, %v2137_v22 }
 0x39b   : >> { %v9417_v44 = vpop.f32.mrf.mxu1  ;;  %v2112_v58 = vpop.f32.mrf.mxu0 }
 0x39c   : >> { %v2138_v30 = vadd.f32 %v2112_v58, %v12846_v55 }
 0x39d   : >> { %v2357_v11 = vpop.f32.mrf.mxu1  ;;  %v9319_v7 = vpop.f32.mrf.mxu0 }
 0x39e   : >> { %v13038_v23 = vadd.f32 %v2357_v11, %v2138_v30 }
 0x39f   : >> { %v9420_v51 = vpop.f32.mrf.mxu1  ;;  %v2492_v8 = vpop.f32.mrf.mxu0 }
 0x3a0   : >> { %v2606_v61 = vadd.f32 %v2492_v8, %v12855_v42 }
 0x3a1   : >> { %v2737_v59 = vpop.f32.mrf.mxu1  ;;  %v9455_v43 = vpop.f32.mrf.mxu0 }
 0x3a2   : >> { %v13041_v26 = vadd.f32 %v2737_v59, %v2606_v61 }
 0x3a3   : >> { %v9556_v18 = vpop.f32.mrf.mxu1  ;;  %v2497_v5 = vpop.f32.mrf.mxu0 }
 0x3a4   : >> { %v2607_v33 = vadd.f32 %v2497_v5, %v12864_v3 }
 0x3a5   : >> { %v2742_v54 = vpop.f32.mrf.mxu1  ;;  %v9458_v32 = vpop.f32.mrf.mxu0 }
 0x3a6   : >> { %v13044_v60 = vadd.f32 %v2742_v54, %v2607_v33 }
 0x3a7   : >> { %v9559_v55 = vpop.f32.mrf.mxu1  ;;  %v2502_v6 = vpop.f32.mrf.mxu0 }
 0x3a8   : >> { %v2608_v19 = vadd.f32 %v2502_v6, %v12873_v37 }
 0x3a9   : >> { %v2747_v47 = vpop.f32.mrf.mxu1  ;;  %v9461_v25 = vpop.f32.mrf.mxu0 }
 0x3aa   : >> { %v13047_v4 = vadd.f32 %v2747_v47, %v2608_v19 }
 0x3ab   : >> { %v9562_v42 = vpop.f32.mrf.mxu1  ;;  %v2507_v34 = vpop.f32.mrf.mxu0 }
 0x3ac   : >> { %v2609_v14 = vadd.f32 %v2507_v34, %v12882_v16 }
 0x3ad   : >> { %v2752_v49 = vpop.f32.mrf.mxu1  ;;  %v9464_v46 = vpop.f32.mrf.mxu0 }
 0x3ae   : >> { %v13050_v28 = vadd.f32 %v2752_v49, %v2609_v14 }
 0x3af   : >> { %v9565_v3 = vpop.f32.mrf.mxu1  ;;  %v2512_v50 = vpop.f32.mrf.mxu0 }
 0x3b0   : >> { %v2610_v52 = vadd.f32 %v2512_v50, %v12891_v9 }
 0x3b1   : >> { %v2757_v24 = vpop.f32.mrf.mxu1  ;;  %v9467_v27 = vpop.f32.mrf.mxu0 }
 0x3b2   : >> { %v13053_v0 = vadd.f32 %v2757_v24, %v2610_v52 }
 0x3b3   : >> { %v9568_v37 = vpop.f32.mrf.mxu1  ;;  %v2517_v38 = vpop.f32.mrf.mxu0 }
 0x3b4   : >> { %v2611_v21 = vadd.f32 %v2517_v38, %v12900_v63 }
 0x3b5   : >> { %v2762_v57 = vpop.f32.mrf.mxu1  ;;  %v9470_v15 = vpop.f32.mrf.mxu0 }
 0x3b6   : >> { %v13056_v13 = vadd.f32 %v2762_v57, %v2611_v21 }
 0x3b7   : >> { %v9571_v16 = vpop.f32.mrf.mxu1  ;;  %v2522_v22 = vpop.f32.mrf.mxu0 }
 0x3b8   : >> { %v2612_v10 = vadd.f32 %v2522_v22, %v12909_v17 }
 0x3b9   : >> { %v2767_v31 = vpop.f32.mrf.mxu1  ;;  %v9473_v44 = vpop.f32.mrf.mxu0 }
 0x3ba   : >> { %v13059_v58 = vadd.f32 %v2767_v31, %v2612_v10 }
 0x3bb   : >> { %v9574_v9 = vpop.f32.mrf.mxu1  ;;  %v2527_v30 = vpop.f32.mrf.mxu0 }
 0x3bc   : >> { %v2613_v11 = vadd.f32 %v2527_v30, %v12918_v48 }
 0x3bd   : >> { %v2772_v7 = vpop.f32.mrf.mxu1  ;;  %v9476_v51 = vpop.f32.mrf.mxu0 }
 0x3be   : >> { %v13062_v8 = vadd.f32 %v2772_v7, %v2613_v11 }
 0x3bf   : >> { %v9577_v63 = vpop.f32.mrf.mxu1  ;;  %v2532_v61 = vpop.f32.mrf.mxu0 }
 0x3c0   : >> { %v2614_v59 = vadd.f32 %v2532_v61, %v12927_v62 }
 0x3c1   : >> { %v2777_v43 = vpop.f32.mrf.mxu1  ;;  %v9479_v18 = vpop.f32.mrf.mxu0 }
 0x3c2   : >> { %v13065_v5 = vadd.f32 %v2777_v43, %v2614_v59 }
 0x3c3   : >> { %v9580_v17 = vpop.f32.mrf.mxu1  ;;  %v2537_v33 = vpop.f32.mrf.mxu0 }
 0x3c4   : >> { %v2615_v54 = vadd.f32 %v2537_v33, %v12936_v41 }
 0x3c5   : >> { %v2782_v32 = vpop.f32.mrf.mxu1  ;;  %v9482_v55 = vpop.f32.mrf.mxu0 }
 0x3c6   : >> { %v13068_v6 = vadd.f32 %v2782_v32, %v2615_v54 }
 0x3c7   : >> { %v9583_v48 = vpop.f32.mrf.mxu1  ;;  %v2542_v19 = vpop.f32.mrf.mxu0 }
 0x3c8   : >> { %v2616_v47 = vadd.f32 %v2542_v19, %v12945_v1 }
 0x3c9   : >> { %v2787_v25 = vpop.f32.mrf.mxu1  ;;  %v9485_v42 = vpop.f32.mrf.mxu0 }
 0x3ca   : >> { %v13071_v34 = vadd.f32 %v2787_v25, %v2616_v47 }
 0x3cb   : >> { %v9586_v62 = vpop.f32.mrf.mxu1  ;;  %v2547_v14 = vpop.f32.mrf.mxu0 }
 0x3cc   : >> { %v2617_v49 = vadd.f32 %v2547_v14, %v12954_v36 }
 0x3cd   : >> { %v2792_v46 = vpop.f32.mrf.mxu1  ;;  %v9488_v3 = vpop.f32.mrf.mxu0 }
 0x3ce   : >> { %v13074_v50 = vadd.f32 %v2792_v46, %v2617_v49 }
 0x3cf   : >> { %v9589_v41 = vpop.f32.mrf.mxu1  ;;  %v2552_v52 = vpop.f32.mrf.mxu0 }
 0x3d0   : >> { %v2618_v24 = vadd.f32 %v2552_v52, %v12963_v35 }
 0x3d1   : >> { %v2797_v27 = vpop.f32.mrf.mxu1  ;;  %v9491_v37 = vpop.f32.mrf.mxu0 }
 0x3d2   : >> { %v13077_v38 = vadd.f32 %v2797_v27, %v2618_v24 }
 0x3d3   : >> { %v9592_v1 = vpop.f32.mrf.mxu1  ;;  %v2557_v21 = vpop.f32.mrf.mxu0 }
 0x3d4   : >> { %v2619_v57 = vadd.f32 %v2557_v21, %v12972_v45 }
 0x3d5   : >> { %v2802_v15 = vpop.f32.mrf.mxu1  ;;  %v9494_v16 = vpop.f32.mrf.mxu0 }
 0x3d6   : >> { %v13080_v22 = vadd.f32 %v2802_v15, %v2619_v57 }
 0x3d7   : >> { %v9595_v36 = vpop.f32.mrf.mxu1  ;;  %v2562_v10 = vpop.f32.mrf.mxu0 }
 0x3d8   : >> { %v2620_v31 = vadd.f32 %v2562_v10, %v12981_v2 }
 0x3d9   : >> { %v2807_v44 = vpop.f32.mrf.mxu1  ;;  %v9497_v9 = vpop.f32.mrf.mxu0 }
 0x3da   : >> { %v13083_v30 = vadd.f32 %v2807_v44, %v2620_v31 }
 0x3db   : >> { %v9598_v35 = vpop.f32.mrf.mxu1  ;;  %v2567_v11 = vpop.f32.mrf.mxu0 }
 0x3dc   : >> { %v2621_v7 = vadd.f32 %v2567_v11, %v12990_v56 }
 0x3dd   : >> { %v2812_v51 = vpop.f32.mrf.mxu1  ;;  %v9500_v63 = vpop.f32.mrf.mxu0 }
 0x3de   : >> { %v13086_v61 = vadd.f32 %v2812_v51, %v2621_v7 }
 0x3df   : >> { %v9601_v45 = vpop.f32.mrf.mxu1  ;;  %v2572_v59 = vpop.f32.mrf.mxu0 }
 0x3e0   : >> { %v2622_v43 = vadd.f32 %v2572_v59, %v12999_v29 }
 0x3e1   : >> { %v2817_v18 = vpop.f32.mrf.mxu1  ;;  %v9503_v17 = vpop.f32.mrf.mxu0 }
 0x3e2   : >> { %v13089_v33 = vadd.f32 %v2817_v18, %v2622_v43 }
 0x3e3   : >> { %v9604_v2 = vpop.f32.mrf.mxu1  ;;  %v2577_v54 = vpop.f32.mrf.mxu0 }
 0x3e4   : >> { %v2623_v32 = vadd.f32 %v2577_v54, %v13008_v20  ;;  %v13120_v2 = vld [vmem:[%s14516_s5] ss:$0 sm:$0xff] }
 0x3e5   : >> { %v2822_v55 = vpop.f32.mrf.mxu1  ;;  %v9506_v48 = vpop.f32.mrf.mxu0 }
 0x3e6   : >> { %v13092_v19 = vadd.f32 %v2822_v55, %v2623_v32  ;;  %v13125_v48 = vld [vmem:[%s14517_s6] ss:$0 sm:$0xff] }
 0x3e7   : >> { %v9607_v56 = vpop.f32.mrf.mxu1  ;;  %v2582_v47 = vpop.f32.mrf.mxu0 }
 0x3e8   : >> { %v2624_v25 = vadd.f32 %v2582_v47, %v13017_v39 }
 0x3e9   : >> { %v2827_v42 = vpop.f32.mrf.mxu1  ;;  %v9509_v62 = vpop.f32.mrf.mxu0 }
 0x3ea   : >> { %v13095_v14 = vadd.f32 %v2827_v42, %v2624_v25 }
 0x3eb   : >> { %v9610_v29 = vpop.f32.mrf.mxu1  ;;  %v2587_v49 = vpop.f32.mrf.mxu0 }
 0x3ec   : >> { %v2625_v46 = vadd.f32 %v2587_v49, %v13026_v12 }
 0x3ed   : >> { %v2832_v3 = vpop.f32.mrf.mxu1  ;;  %v9512_v41 = vpop.f32.mrf.mxu0 }
 0x3ee   : >> { %v13098_v52 = vadd.f32 %v2832_v3, %v2625_v46 }
 0x3ef   : >> { %v9613_v20 = vpop.f32.mrf.mxu1  ;;  %v2592_v24 = vpop.f32.mrf.mxu0 }
 0x3f0   : >> { %v2626_v27 = vadd.f32 %v2592_v24, %v13032_v53 }
 0x3f1   : >> { %v2837_v37 = vpop.f32.mrf.mxu1  ;;  %v9515_v1 = vpop.f32.mrf.mxu0 }
 0x3f2   : >> { %v13101_v21 = vadd.f32 %v2837_v37, %v2626_v27 }
 0x3f3   : >> { %v9616_v39 = vpop.f32.mrf.mxu1  ;;  %v2597_v57 = vpop.f32.mrf.mxu0 }
 0x3f4   : >> { %v2627_v15 = vadd.f32 %v2597_v57, %v13035_v40  ;;  %v13113_v40 = vld [vmem:[%s14515_s4] ss:$0 sm:$0xff] }
 0x3f5   : >> { %v2842_v16 = vpop.f32.mrf.mxu1  ;;  %v9518_v36 = vpop.f32.mrf.mxu0 }
 0x3f6   : >> { %v13104_v10 = vadd.f32 %v2842_v16, %v2627_v15 }
 0x3f7   : >> { %v9619_v12 = vpop.f32.mrf.mxu1  ;;  %v2602_v31 = vpop.f32.mrf.mxu0 }
 0x3f8   : >> { %v2628_v44 = vadd.f32 %v2602_v31, %v13038_v23 }
 0x3f9   : >> { %v2847_v9 = vpop.f32.mrf.mxu1  ;;  %v9521_v35 = vpop.f32.mrf.mxu0 }
 0x3fa   : >> { %v13107_v11 = vadd.f32 %v2847_v9, %v2628_v44 }
 0x3fb   : >> { %v9622_v53 = vpop.f32.mrf.mxu1  ;;  %v2982_v7 = vpop.f32.mrf.mxu0 }
 0x3fc   : >> { %v3096_v51 = vadd.f32 %v2982_v7, %v13041_v26 }
 0x3fd   : >> { %v3227_v63 = vpop.f32.mrf.mxu1  ;;  %v9657_v45 = vpop.f32.mrf.mxu0 }
 0x3fe   : >> { %v3341_v59 = vadd.f32 %v3227_v63, %v3096_v51 }
 0x3ff   : >> { %v9758_v43 = vpop.f32.mrf.mxu1  ;;  %v2987_v18 = vpop.f32.mrf.mxu0 }
 0x400   : >> { %v3371_v23 = vadd.f32 %v13113_v40, %v3341_v59  ;;  %v3097_v17 = vadd.f32 %v2987_v18, %v13044_v60 }
 0x401   : >> { %v3232_v26 = vpop.f32.mrf.mxu1  ;;  %v9660_v54 = vpop.f32.mrf.mxu0 }
 0x402   : >> { %v3394_v32 = vmax.f32 %v3371_v23, 0.0  ;;  %v3342_v55 = vadd.f32 %v3232_v26, %v3097_v17 }
 0x403   : >> { %v9761_v56 = vpop.f32.mrf.mxu1  ;;  %v2992_v47 = vpop.f32.mrf.mxu0 }
 0x404   : >> { %v3424_v25 = vmul.f32 %v13120_v2, %v3394_v32  ;;  %v3372_v60 = vadd.f32 %v13113_v40, %v3342_v55  ;;  %v3098_v42 = vadd.f32 %v2992_v47, %v13047_v4 }
 0x405   : >> { %v3237_v62 = vpop.f32.mrf.mxu1  ;;  %v9663_v29 = vpop.f32.mrf.mxu0 }
 0x406   : >> { %v3454_v49 = vadd.f32 %v13125_v48, %v3424_v25  ;;  %v3395_v46 = vmax.f32 %v3372_v60, 0.0  ;;  %v3343_v3 = vadd.f32 %v3237_v62, %v3098_v42 }
 0x407   : >> { %v9764_v41 = vpop.f32.mrf.mxu1  ;;  %v2997_v20 = vpop.f32.mrf.mxu0 }
 0x408   : >> { %3478 = vst [vmem:[%s13133_s19] sm:$0xff] %v3454_v49  ;;  %v3425_v24 = vmul.f32 %v13120_v2, %v3395_v46  ;;  %v3373_v27 = vadd.f32 %v13113_v40, %v3343_v3  ;;  %v3099_v4 = vadd.f32 %v2997_v20, %v13050_v28 }
 0x409   : >> { %v3242_v37 = vpop.f32.mrf.mxu1  ;;  %v9666_v1 = vpop.f32.mrf.mxu0 }
 0x40a   : >> { %v3455_v39 = vadd.f32 %v13125_v48, %v3425_v24  ;;  %v3396_v57 = vmax.f32 %v3373_v27, 0.0  ;;  %v3344_v15 = vadd.f32 %v3242_v37, %v3099_v4 }
 0x40b   : >> { %v9767_v16 = vpop.f32.mrf.mxu1  ;;  %v3002_v36 = vpop.f32.mrf.mxu0 }
 0x40c   : >> { %3479 = vst [vmem:[%s13133_s19 + $0x8] sm:$0xff] %v3455_v39  ;;  %v3426_v12 = vmul.f32 %v13120_v2, %v3396_v57  ;;  %v3374_v31 = vadd.f32 %v13113_v40, %v3344_v15  ;;  %v3100_v44 = vadd.f32 %v3002_v36, %v13053_v0 }
 0x40d   : >> { %v3247_v9 = vpop.f32.mrf.mxu1  ;;  %v9669_v35 = vpop.f32.mrf.mxu0 }
 0x40e   : >> { %v3456_v28 = vadd.f32 %v13125_v48, %v3426_v12  ;;  %v3397_v53 = vmax.f32 %v3374_v31, 0.0  ;;  %v3345_v7 = vadd.f32 %v3247_v9, %v3100_v44 }
 0x40f   : >> { %v9770_v51 = vpop.f32.mrf.mxu1  ;;  %v3007_v63 = vpop.f32.mrf.mxu0 }
 0x410   : >> { %3480 = vst [vmem:[%s13133_s19 + $0x10] sm:$0xff] %v3456_v28  ;;  %v3427_v45 = vmul.f32 %v13120_v2, %v3397_v53  ;;  %v3375_v59 = vadd.f32 %v13113_v40, %v3345_v7  ;;  %v3101_v43 = vadd.f32 %v3007_v63, %v13056_v13 }
 0x411   : >> { %v3252_v18 = vpop.f32.mrf.mxu1  ;;  %v9672_v23 = vpop.f32.mrf.mxu0 }
 0x412   : >> { %v3457_v0 = vadd.f32 %v13125_v48, %v3427_v45  ;;  %v3398_v17 = vmax.f32 %v3375_v59, 0.0  ;;  %v3346_v26 = vadd.f32 %v3252_v18, %v3101_v43 }
 0x413   : >> { %v9773_v54 = vpop.f32.mrf.mxu1  ;;  %v3012_v32 = vpop.f32.mrf.mxu0 }
 0x414   : >> { %3481 = vst [vmem:[%s13133_s19 + $0x18] sm:$0xff] %v3457_v0  ;;  %v3428_v55 = vmul.f32 %v13120_v2, %v3398_v17  ;;  %v3376_v56 = vadd.f32 %v13113_v40, %v3346_v26  ;;  %v3102_v47 = vadd.f32 %v3012_v32, %v13059_v58 }
 0x415   : >> { %v3257_v25 = vpop.f32.mrf.mxu1  ;;  %v9675_v60 = vpop.f32.mrf.mxu0 }
 0x416   : >> { %v3458_v13 = vadd.f32 %v13125_v48, %v3428_v55  ;;  %v3399_v42 = vmax.f32 %v3376_v56, 0.0  ;;  %v3347_v62 = vadd.f32 %v3257_v25, %v3102_v47 }
 0x417   : >> { %v9776_v29 = vpop.f32.mrf.mxu1  ;;  %v3017_v49 = vpop.f32.mrf.mxu0 }
 0x418   : >> { %3482 = vst [vmem:[%s13133_s19 + $0x20] sm:$0xff] %v3458_v13  ;;  %v3429_v46 = vmul.f32 %v13120_v2, %v3399_v42  ;;  %v3377_v3 = vadd.f32 %v13113_v40, %v3347_v62  ;;  %v3103_v41 = vadd.f32 %v3017_v49, %v13062_v8 }
 0x419   : >> { %v3262_v20 = vpop.f32.mrf.mxu1  ;;  %v9678_v24 = vpop.f32.mrf.mxu0 }
 0x41a   : >> { %v3459_v58 = vadd.f32 %v13125_v48, %v3429_v46  ;;  %v3400_v27 = vmax.f32 %v3377_v3, 0.0  ;;  %v3348_v4 = vadd.f32 %v3262_v20, %v3103_v41 }
 0x41b   : >> { %v9779_v37 = vpop.f32.mrf.mxu1  ;;  %v3022_v1 = vpop.f32.mrf.mxu0 }
 0x41c   : >> { %3483 = vst [vmem:[%s13133_s19 + $0x28] sm:$0xff] %v3459_v58  ;;  %v3430_v39 = vmul.f32 %v13120_v2, %v3400_v27  ;;  %v3378_v57 = vadd.f32 %v13113_v40, %v3348_v4  ;;  %v3104_v15 = vadd.f32 %v3022_v1, %v13065_v5 }
 0x41d   : >> { %v3267_v16 = vpop.f32.mrf.mxu1  ;;  %v9681_v36 = vpop.f32.mrf.mxu0 }
 0x41e   : >> { %v3460_v8 = vadd.f32 %v13125_v48, %v3430_v39  ;;  %v3401_v12 = vmax.f32 %v3378_v57, 0.0  ;;  %v3349_v31 = vadd.f32 %v3267_v16, %v3104_v15 }
 0x41f   : >> { %v9782_v44 = vpop.f32.mrf.mxu1  ;;  %v3027_v9 = vpop.f32.mrf.mxu0 }
 0x420   : >> { %3484 = vst [vmem:[%s13133_s19 + $0x30] sm:$0xff] %v3460_v8  ;;  %v3431_v35 = vmul.f32 %v13120_v2, %v3401_v12  ;;  %v3379_v28 = vadd.f32 %v13113_v40, %v3349_v31  ;;  %v3105_v53 = vadd.f32 %v3027_v9, %v13068_v6 }
 0x421   : >> { %v3272_v7 = vpop.f32.mrf.mxu1  ;;  %v9684_v51 = vpop.f32.mrf.mxu0 }
 0x422   : >> { %v3461_v5 = vadd.f32 %v13125_v48, %v3431_v35  ;;  %v3402_v63 = vmax.f32 %v3379_v28, 0.0  ;;  %v3350_v45 = vadd.f32 %v3272_v7, %v3105_v53 }
 0x423   : >> { %v9785_v59 = vpop.f32.mrf.mxu1  ;;  %v3032_v43 = vpop.f32.mrf.mxu0 }
 0x424   : >> { %3485 = vst [vmem:[%s13133_s19 + $0x38] sm:$0xff] %v3461_v5  ;;  %v3432_v18 = vmul.f32 %v13120_v2, %v3402_v63  ;;  %v3380_v23 = vadd.f32 %v13113_v40, %v3350_v45  ;;  %v3106_v0 = vadd.f32 %v3032_v43, %v13071_v34 }
 0x425   : >> { %v3277_v17 = vpop.f32.mrf.mxu1  ;;  %v9687_v26 = vpop.f32.mrf.mxu0 }
 0x426   : >> { %v3462_v6 = vadd.f32 %v13125_v48, %v3432_v18  ;;  %v3403_v54 = vmax.f32 %v3380_v23, 0.0  ;;  %v3351_v32 = vadd.f32 %v3277_v17, %v3106_v0 }
 0x427   : >> { %v9788_v55 = vpop.f32.mrf.mxu1  ;;  %v3037_v56 = vpop.f32.mrf.mxu0 }
 0x428   : >> { %3486 = vst [vmem:[%s13133_s19 + $0x40] sm:$0xff] %v3462_v6  ;;  %v3433_v47 = vmul.f32 %v13120_v2, %v3403_v54  ;;  %v3381_v25 = vadd.f32 %v13113_v40, %v3351_v32  ;;  %v3107_v60 = vadd.f32 %v3037_v56, %v13074_v50 }
 0x429   : >> { %v3282_v13 = vpop.f32.mrf.mxu1  ;;  %v9690_v42 = vpop.f32.mrf.mxu0 }
 0x42a   : >> { %v3463_v34 = vadd.f32 %v13125_v48, %v3433_v47  ;;  %v3404_v62 = vmax.f32 %v3381_v25, 0.0  ;;  %v3352_v29 = vadd.f32 %v3282_v13, %v3107_v60 }
 0x42b   : >> { %v9791_v49 = vpop.f32.mrf.mxu1  ;;  %v3042_v46 = vpop.f32.mrf.mxu0 }
 0x42c   : >> { %3487 = vst [vmem:[%s13133_s19 + $0x48] sm:$0xff] %v3463_v34  ;;  %v3434_v3 = vmul.f32 %v13120_v2, %v3404_v62  ;;  %v3382_v41 = vadd.f32 %v13113_v40, %v3352_v29  ;;  %v3108_v20 = vadd.f32 %v3042_v46, %v13077_v38 }
 0x42d   : >> { %v3287_v24 = vpop.f32.mrf.mxu1  ;;  %v9693_v58 = vpop.f32.mrf.mxu0 }
 0x42e   : >> { %v3464_v50 = vadd.f32 %v13125_v48, %v3434_v3  ;;  %v3405_v27 = vmax.f32 %v3382_v41, 0.0  ;;  %v3353_v4 = vadd.f32 %v3287_v24, %v3108_v20 }
 0x42f   : >> { %v9794_v37 = vpop.f32.mrf.mxu1  ;;  %v3047_v1 = vpop.f32.mrf.mxu0 }
 0x430   : >> { %3488 = vst [vmem:[%s13133_s19 + $0x50] sm:$0xff] %v3464_v50  ;;  %v3435_v39 = vmul.f32 %v13120_v2, %v3405_v27  ;;  %v3383_v57 = vadd.f32 %v13113_v40, %v3353_v4  ;;  %v3109_v15 = vadd.f32 %v3047_v1, %v13080_v22 }
 0x431   : >> { %v3292_v16 = vpop.f32.mrf.mxu1  ;;  %v9696_v36 = vpop.f32.mrf.mxu0 }
 0x432   : >> { %v3465_v38 = vadd.f32 %v13125_v48, %v3435_v39  ;;  %v3406_v8 = vmax.f32 %v3383_v57, 0.0  ;;  %v3354_v12 = vadd.f32 %v3292_v16, %v3109_v15 }
 0x433   : >> { %v9797_v31 = vpop.f32.mrf.mxu1  ;;  %v3052_v44 = vpop.f32.mrf.mxu0 }
 0x434   : >> { %3489 = vst [vmem:[%s13133_s19 + $0x58] sm:$0xff] %v3465_v38  ;;  %v3436_v9 = vmul.f32 %v13120_v2, %v3406_v8  ;;  %v3384_v35 = vadd.f32 %v13113_v40, %v3354_v12  ;;  %v3110_v28 = vadd.f32 %v3052_v44, %v13083_v30 }
 0x435   : >> { %v3297_v53 = vpop.f32.mrf.mxu1  ;;  %v9699_v7 = vpop.f32.mrf.mxu0 }
 0x436   : >> { %v3466_v22 = vadd.f32 %v13125_v48, %v3436_v9  ;;  %v3407_v51 = vmax.f32 %v3384_v35, 0.0  ;;  %v3355_v5 = vadd.f32 %v3297_v53, %v3110_v28 }
 0x437   : >> { %v9800_v63 = vpop.f32.mrf.mxu1  ;;  %v3057_v45 = vpop.f32.mrf.mxu0 }
 0x438   : >> { %3490 = vst [vmem:[%s13133_s19 + $0x60] sm:$0xff] %v3466_v22  ;;  %v3437_v59 = vmul.f32 %v13120_v2, %v3407_v51  ;;  %v3385_v43 = vadd.f32 %v13113_v40, %v3355_v5  ;;  %v3111_v18 = vadd.f32 %v3057_v45, %v13086_v61 }
 0x439   : >> { %v3302_v23 = vpop.f32.mrf.mxu1  ;;  %v9702_v0 = vpop.f32.mrf.mxu0 }
 0x43a   : >> { %v3467_v30 = vadd.f32 %v13125_v48, %v3437_v59  ;;  %v3408_v17 = vmax.f32 %v3385_v43, 0.0  ;;  %v3356_v26 = vadd.f32 %v3302_v23, %v3111_v18 }
 0x43b   : >> { %v9803_v6 = vpop.f32.mrf.mxu1  ;;  %v3062_v54 = vpop.f32.mrf.mxu0 }
 0x43c   : >> { %3491 = vst [vmem:[%s13133_s19 + $0x68] sm:$0xff] %v3467_v30  ;;  %v3438_v32 = vmul.f32 %v13120_v2, %v3408_v17  ;;  %v3386_v55 = vadd.f32 %v13113_v40, %v3356_v26  ;;  %v3112_v56 = vadd.f32 %v3062_v54, %v13089_v33 }
 0x43d   : >> { %v3307_v47 = vpop.f32.mrf.mxu1  ;;  %v9705_v25 = vpop.f32.mrf.mxu0 }
 0x43e   : >> { %v3468_v61 = vadd.f32 %v13125_v48, %v3438_v32  ;;  %v3409_v60 = vmax.f32 %v3386_v55, 0.0  ;;  %v3357_v13 = vadd.f32 %v3307_v47, %v3112_v56 }
 0x43f   : >> { %v9806_v42 = vpop.f32.mrf.mxu1  ;;  %v3067_v34 = vpop.f32.mrf.mxu0 }
 0x440   : >> { %3492 = vst [vmem:[%s13133_s19 + $0x70] sm:$0xff] %v3468_v61  ;;  %v3439_v62 = vmul.f32 %v13120_v2, %v3409_v60  ;;  %v3387_v29 = vadd.f32 %v13113_v40, %v3357_v13  ;;  %v3113_v49 = vadd.f32 %v3067_v34, %v13092_v19 }
 0x441   : >> { %v3312_v46 = vpop.f32.mrf.mxu1  ;;  %v9708_v3 = vpop.f32.mrf.mxu0 }
 0x442   : >> { %v3469_v33 = vadd.f32 %v13125_v48, %v3439_v62  ;;  %v3410_v41 = vmax.f32 %v3387_v29, 0.0  ;;  %v3358_v20 = vadd.f32 %v3312_v46, %v3113_v49 }
 0x443   : >> { %v9809_v24 = vpop.f32.mrf.mxu1  ;;  %v3072_v58 = vpop.f32.mrf.mxu0 }
 0x444   : >> { %3493 = vst [vmem:[%s13133_s19 + $0x78] sm:$0xff] %v3469_v33  ;;  %v3440_v50 = vmul.f32 %v13120_v2, %v3410_v41  ;;  %v3388_v27 = vadd.f32 %v13113_v40, %v3358_v20  ;;  %v3114_v4 = vadd.f32 %v3072_v58, %v13095_v14 }
 0x445   : >> { %v3317_v37 = vpop.f32.mrf.mxu1  ;;  %v9711_v1 = vpop.f32.mrf.mxu0 }
 0x446   : >> { %v3470_v19 = vadd.f32 %v13125_v48, %v3440_v50  ;;  %v3411_v39 = vmax.f32 %v3388_v27, 0.0  ;;  %v3359_v57 = vadd.f32 %v3317_v37, %v3114_v4 }
 0x447   : >> { %v9812_v15 = vpop.f32.mrf.mxu1  ;;  %v3077_v16 = vpop.f32.mrf.mxu0 }
 0x448   : >> { %3494 = vst [vmem:[%s13133_s19 + $0x80] sm:$0xff] %v3470_v19  ;;  %v3441_v36 = vmul.f32 %v13120_v2, %v3411_v39  ;;  %v3389_v38 = vadd.f32 %v13113_v40, %v3359_v57  ;;  %v3115_v8 = vadd.f32 %v3077_v16, %v13098_v52 }
 0x449   : >> { %v3322_v12 = vpop.f32.mrf.mxu1  ;;  %v9714_v31 = vpop.f32.mrf.mxu0 }
 0x44a   : >> { %v3471_v14 = vadd.f32 %v13125_v48, %v3441_v36  ;;  %v3412_v44 = vmax.f32 %v3389_v38, 0.0  ;;  %v3360_v9 = vadd.f32 %v3322_v12, %v3115_v8 }
 0x44b   : >> { %v9815_v35 = vpop.f32.mrf.mxu1  ;;  %v3082_v28 = vpop.f32.mrf.mxu0 }
 0x44c   : >> { %3495 = vst [vmem:[%s13133_s19 + $0x88] sm:$0xff] %v3471_v14  ;;  %v3442_v53 = vmul.f32 %v13120_v2, %v3412_v44  ;;  %v3390_v7 = vadd.f32 %v13113_v40, %v3360_v9  ;;  %v3116_v22 = vadd.f32 %v3082_v28, %v13101_v21 }
 0x44d   : >> { %v3327_v51 = vpop.f32.mrf.mxu1  ;;  %v9717_v5 = vpop.f32.mrf.mxu0 }
 0x44e   : >> { %v3472_v52 = vadd.f32 %v13125_v48, %v3442_v53  ;;  %v3413_v63 = vmax.f32 %v3390_v7, 0.0  ;;  %v3361_v45 = vadd.f32 %v3327_v51, %v3116_v22 }
 0x44f   : >> { %v9818_v59 = vpop.f32.mrf.mxu1  ;;  %v3087_v43 = vpop.f32.mrf.mxu0 }
 0x450   : >> { %3496 = vst [vmem:[%s13133_s19 + $0x90] sm:$0xff] %v3472_v52  ;;  %v3443_v18 = vmul.f32 %v13120_v2, %v3413_v63  ;;  %v3391_v23 = vadd.f32 %v13113_v40, %v3361_v45  ;;  %v3117_v0 = vadd.f32 %v3087_v43, %v13104_v10 }
 0x451   : >> { %v3332_v30 = vpop.f32.mrf.mxu1  ;;  %v9720_v17 = vpop.f32.mrf.mxu0 }
 0x452   : >> { %v3473_v21 = vadd.f32 %v13125_v48, %v3443_v18  ;;  %v3414_v26 = vmax.f32 %v3391_v23, 0.0  ;;  %v3362_v6 = vadd.f32 %v3332_v30, %v3117_v0 }
 0x453   : >> { %v9821_v54 = vpop.f32.mrf.mxu1  ;;  %v3092_v32 = vpop.f32.mrf.mxu0 }
 0x454   : >> { %3497 = vst [vmem:[%s13133_s19 + $0x98] sm:$0xff] %v3473_v21  ;;  %v3444_v55 = vmul.f32 %v13120_v2, %v3414_v26  ;;  %v3392_v56 = vadd.f32 %v13113_v40, %v3362_v6  ;;  %v3118_v47 = vadd.f32 %v3092_v32, %v13107_v11 }
 0x455   : >> { %v3337_v25 = vpop.f32.mrf.mxu1  ;;  %v9723_v10 = vpop.f32.mrf.mxu0 }
 0x456   : >> { %v3474_v61 = vadd.f32 %v13125_v48, %v3444_v55  ;;  %v3415_v60 = vmax.f32 %v3392_v56, 0.0  ;;  %v3363_v13 = vadd.f32 %v3337_v25, %v3118_v47 }
 0x457   : >> { %v9824_v42 = vpop.f32.mrf.mxu1 }
 0x458   : >> { %3498 = vst [vmem:[%s13133_s19 + $0xa0] sm:$0xff] %v3474_v61  ;;  %v3445_v34 = vmul.f32 %v13120_v2, %v3415_v60  ;;  %v3393_v62 = vadd.f32 %v13113_v40, %v3363_v13 }
 0x45a   : >> { %v3475_v29 = vadd.f32 %v13125_v48, %v3445_v34  ;;  %v3416_v49 = vmax.f32 %v3393_v62, 0.0 }
 0x45c   : >> { %3499 = vst [vmem:[%s13133_s19 + $0xa8] sm:$0xff] %v3475_v29  ;;  %v3446_v46 = vmul.f32 %v13120_v2, %v3416_v49  ;;  %959 = sbr.rel (!%p957_p2) target bundleno = 426 (0x1aa), region = 305 }
 0x45e   : >> { %v3476_v11 = vadd.f32 %v13125_v48, %v3446_v46 }
 0x460   : >> { %3500 = vst [vmem:[%s13133_s19 + $0xb0] sm:$0xff] %v3476_v11 }
 0x467   : > { %v3501_v3 = vld [vmem:[#allocation3] ss:$2 sm:$0xff]  ;;  %v3505_v33 = vld [vmem:[#allocation3 + $0x17] ss:$2 sm:$0xff]  ;;  %v3803_v47 = vld [vmem:[#allocation3 + $0xd0] ss:$2 sm:$0xff] }
 0x468   : > { %v13246_v41 = vmax.f32 %v3501_v3, %v3505_v33  ;;  %v3511_v40 = vld [vmem:[#allocation3 + $0x1] ss:$2 sm:$0xff]  ;;  %v3515_v20 = vld [vmem:[#allocation3 + $0x18] ss:$2 sm:$0xff] }
 0x469   : > { %v13248_v24 = vmax.f32 %v3511_v40, %v3515_v20  ;;  %v3503_v58 = vld [vmem:[#allocation3 + $0x10] ss:$2 sm:$0x7]  ;;  %v3507_v50 = vld [vmem:[#allocation3 + $0x27] ss:$2 sm:$0x7] }
 0x46a   : > { %3522 = vrot.lane.b32.xlu0 %v13246_v41, %s11275_s0  ;;  %v13252_v2 = vmax.f32 %v3503_v58, %v3507_v50  ;;  %v3513_v48 = vld [vmem:[#allocation3 + $0x11] ss:$2 sm:$0x7]  ;;  %v3517_v27 = vld [vmem:[#allocation3 + $0x28] ss:$2 sm:$0x7] }
 0x46b   : > { %3548 = vrot.lane.b32.xlu1 %v13248_v24, %s11275_s0  ;;  %v13256_v4 = vmax.f32 %v3513_v48, %v3517_v27  ;;  %v3579_v37 = vld [vmem:[#allocation3 + $0x2e] ss:$2 sm:$0xff]  ;;  %v3583_v1 = vld [vmem:[#allocation3 + $0x45] ss:$2 sm:$0xff]  ;;  %v3873_v20 = vld [vmem:[#allocation3 + $0xfe] ss:$2 sm:$0xff] }
 0x46c   : > { %v3589_v19 = vld [vmem:[#allocation3 + $0x2f] ss:$2 sm:$0xff]  ;;  %v3593_v39 = vld [vmem:[#allocation3 + $0x46] ss:$2 sm:$0xff]  ;;  %v13260_v57 = vmax.f32 %v3579_v37, %v3583_v1 }
 0x46d   : > { %v13264_v15 = vmax.f32 %v3589_v19, %v3593_v39  ;;  %v3581_v16 = vld [vmem:[#allocation3 + $0x3e] ss:$2 sm:$0x7]  ;;  %v3585_v36 = vld [vmem:[#allocation3 + $0x55] ss:$2 sm:$0x7] }
 0x46e   : > { %3524 = vrot.lane.b32.xlu0 %v13252_v2, %s11275_s0  ;;  %v3649_v38 = vld [vmem:[#allocation3 + $0x5c] ss:$2 sm:$0xff]  ;;  %v3653_v8 = vld [vmem:[#allocation3 + $0x73] ss:$2 sm:$0xff]  ;;  %v13268_v12 = vmax.f32 %v3581_v16, %v3585_v36 }
 0x46f   : > { %3550 = vrot.lane.b32.xlu1 %v13256_v4, %s11275_s0  ;;  %v13272_v31 = vmax.f32 %v3649_v38, %v3653_v8  ;;  %v3591_v14 = vld [vmem:[#allocation3 + $0x3f] ss:$2 sm:$0x7]  ;;  %v3595_v44 = vld [vmem:[#allocation3 + $0x56] ss:$2 sm:$0x7] }
 0x470   : > { %v3651_v9 = vld [vmem:[#allocation3 + $0x6c] ss:$2 sm:$0x7]  ;;  %v3655_v35 = vld [vmem:[#allocation3 + $0x83] ss:$2 sm:$0x7]  ;;  %v13276_v28 = vmax.f32 %v3591_v14, %v3595_v44 }
 0x471   : > { %v13280_v53 = vmax.f32 %v3651_v9, %v3655_v35  ;;  %v3659_v7 = vld [vmem:[#allocation3 + $0x5d] ss:$2 sm:$0xff]  ;;  %v3663_v22 = vld [vmem:[#allocation3 + $0x74] ss:$2 sm:$0xff] }
 0x472   : > { %3600 = vrot.lane.b32.xlu0 %v13260_v57, %s11275_s0  ;;  %v3661_v51 = vld [vmem:[#allocation3 + $0x6d] ss:$2 sm:$0x7]  ;;  %v3665_v5 = vld [vmem:[#allocation3 + $0x84] ss:$2 sm:$0x7]  ;;  %v13284_v52 = vmax.f32 %v3659_v7, %v3663_v22 }
 0x473   : > { %3622 = vrot.lane.b32.xlu1 %v13264_v15, %s11275_s0  ;;  %v13288_v63 = vmax.f32 %v3661_v51, %v3665_v5  ;;  %v3719_v45 = vld [vmem:[#allocation3 + $0x8a] ss:$2 sm:$0xff]  ;;  %v3723_v59 = vld [vmem:[#allocation3 + $0xa1] ss:$2 sm:$0xff]  ;;  %v4013_v5 = vld [vmem:[#allocation3 + $0x15a] ss:$2 sm:$0xff] }
 0x474   : > { %v3721_v43 = vld [vmem:[#allocation3 + $0x9a] ss:$2 sm:$0x7]  ;;  %v3725_v18 = vld [vmem:[#allocation3 + $0xb1] ss:$2 sm:$0x7]  ;;  %v13292_v23 = vmax.f32 %v3719_v45, %v3723_v59 }
 0x475   : > { %v13296_v0 = vmax.f32 %v3721_v43, %v3725_v18  ;;  %v3729_v30 = vld [vmem:[#allocation3 + $0x8b] ss:$2 sm:$0xff]  ;;  %v3733_v17 = vld [vmem:[#allocation3 + $0xa2] ss:$2 sm:$0xff] }
 0x476   : > { %3602 = vrot.lane.b32.xlu0 %v13268_v12, %s11275_s0  ;;  %v3789_v21 = vld [vmem:[#allocation3 + $0xb8] ss:$2 sm:$0xff]  ;;  %v3793_v26 = vld [vmem:[#allocation3 + $0xcf] ss:$2 sm:$0xff]  ;;  %v13300_v6 = vmax.f32 %v3729_v30, %v3733_v17 }
 0x477   : > { %3670 = vrot.lane.b32.xlu1 %v13272_v31, %s11275_s0  ;;  %v13304_v54 = vmax.f32 %v3789_v21, %v3793_v26  ;;  %v3731_v32 = vld [vmem:[#allocation3 + $0x9b] ss:$2 sm:$0x7]  ;;  %v3735_v55 = vld [vmem:[#allocation3 + $0xb2] ss:$2 sm:$0x7] }
 0x478   : > { %v3799_v56 = vld [vmem:[#allocation3 + $0xb9] ss:$2 sm:$0xff]  ;;  %v13308_v25 = vmax.f32 %v3731_v32, %v3735_v55  ;;  %v3791_v61 = vld [vmem:[#allocation3 + $0xc8] ss:$2 sm:$0x7] }
 0x479   : > { %v13312_v10 = vmax.f32 %v3799_v56, %v3803_v47  ;;  %v3795_v60 = vld [vmem:[#allocation3 + $0xdf] ss:$2 sm:$0x7]  ;;  %v3859_v13 = vld [vmem:[#allocation3 + $0xe6] ss:$2 sm:$0xff] }
 0x47a   : > { %3624 = vrot.lane.b32.xlu0 %v13276_v28, %s11275_s0  ;;  %v3863_v42 = vld [vmem:[#allocation3 + $0xfd] ss:$2 sm:$0xff]  ;;  %v13316_v34 = vmax.f32 %v3791_v61, %v3795_v60  ;;  %v3805_v49 = vld [vmem:[#allocation3 + $0xe0] ss:$2 sm:$0x7] }
 0x47b   : > { %3672 = vrot.lane.b32.xlu1 %v13280_v53, %s11275_s0  ;;  %v13320_v62 = vmax.f32 %v3859_v13, %v3863_v42  ;;  %v3801_v29 = vld [vmem:[#allocation3 + $0xc9] ss:$2 sm:$0x7]  ;;  %v3861_v46 = vld [vmem:[#allocation3 + $0xf6] ss:$2 sm:$0x7] }
 0x47c   : > { %v3865_v11 = vld [vmem:[#allocation3 + $0x10d] ss:$2 sm:$0x7]  ;;  %v13324_v3 = vmax.f32 %v3801_v29, %v3805_v49  ;;  %v3871_v58 = vld [vmem:[#allocation3 + $0xf7] ss:$2 sm:$0x7] }
 0x47d   : > { %v13328_v33 = vmax.f32 %v3861_v46, %v3865_v11  ;;  %v3869_v40 = vld [vmem:[#allocation3 + $0xe7] ss:$2 sm:$0xff]  ;;  %v3875_v50 = vld [vmem:[#allocation3 + $0x10e] ss:$2 sm:$0x7] }
 0x47e   : > { %3692 = vrot.lane.b32.xlu0 %v13284_v52, %s11275_s0  ;;  %v13332_v48 = vmax.f32 %v3869_v40, %v3873_v20  ;;  %v13336_v27 = vmax.f32 %v3871_v58, %v3875_v50  ;;  %v3929_v37 = vld [vmem:[#allocation3 + $0x114] ss:$2 sm:$0xff]  ;;  %v3933_v1 = vld [vmem:[#allocation3 + $0x12b] ss:$2 sm:$0xff] }
 0x47f   : > { %3694 = vrot.lane.b32.xlu1 %v13288_v63, %s11275_s0  ;;  %v3931_v19 = vld [vmem:[#allocation3 + $0x124] ss:$2 sm:$0x7]  ;;  %v3935_v39 = vld [vmem:[#allocation3 + $0x13b] ss:$2 sm:$0x7]  ;;  %v13340_v16 = vmax.f32 %v3929_v37, %v3933_v1 }
 0x480   : > { %v13344_v36 = vmax.f32 %v3931_v19, %v3935_v39  ;;  %v3939_v38 = vld [vmem:[#allocation3 + $0x115] ss:$2 sm:$0xff]  ;;  %v3943_v8 = vld [vmem:[#allocation3 + $0x12c] ss:$2 sm:$0xff] }
 0x481   : > { %v3999_v14 = vld [vmem:[#allocation3 + $0x142] ss:$2 sm:$0xff]  ;;  %v4003_v44 = vld [vmem:[#allocation3 + $0x159] ss:$2 sm:$0xff]  ;;  %v13348_v9 = vmax.f32 %v3939_v38, %v3943_v8 }
 0x482   : > { %3740 = vrot.lane.b32.xlu0 %v13292_v23, %s11275_s0  ;;  %v13352_v35 = vmax.f32 %v3999_v14, %v4003_v44  ;;  %v3941_v7 = vld [vmem:[#allocation3 + $0x125] ss:$2 sm:$0x7]  ;;  %v3945_v22 = vld [vmem:[#allocation3 + $0x13c] ss:$2 sm:$0x7] }
 0x483   : > { %3742 = vrot.lane.b32.xlu1 %v13296_v0, %s11275_s0  ;;  %v4009_v51 = vld [vmem:[#allocation3 + $0x143] ss:$2 sm:$0xff]  ;;  %v13356_v45 = vmax.f32 %v3941_v7, %v3945_v22  ;;  %v4001_v43 = vld [vmem:[#allocation3 + $0x152] ss:$2 sm:$0x7] }
 0x484   : > { %v13360_v59 = vmax.f32 %v4009_v51, %v4013_v5  ;;  %v4005_v18 = vld [vmem:[#allocation3 + $0x169] ss:$2 sm:$0x7]  ;;  %v4069_v30 = vld [vmem:[#allocation3 + $0x170] ss:$2 sm:$0xff] }
 0x485   : > { %v4073_v17 = vld [vmem:[#allocation3 + $0x187] ss:$2 sm:$0xff]  ;;  %v13364_v21 = vmax.f32 %v4001_v43, %v4005_v18  ;;  %v4015_v32 = vld [vmem:[#allocation3 + $0x16a] ss:$2 sm:$0x7] }
 0x486   : > { %3762 = vrot.lane.b32.xlu0 %v13300_v6, %s11275_s0  ;;  %v4011_v26 = vld [vmem:[#allocation3 + $0x153] ss:$2 sm:$0x7]  ;;  %v13368_v55 = vmax.f32 %v4069_v30, %v4073_v17  ;;  %v4071_v56 = vld [vmem:[#allocation3 + $0x180] ss:$2 sm:$0x7] }
 0x487   : > { %3810 = vrot.lane.b32.xlu1 %v13304_v54, %s11275_s0  ;;  %v4075_v47 = vld [vmem:[#allocation3 + $0x197] ss:$2 sm:$0x7]  ;;  %v13372_v61 = vmax.f32 %v4011_v26, %v4015_v32  ;;  %v4083_v13 = vld [vmem:[#allocation3 + $0x188] ss:$2 sm:$0xff] }
 0x488   : > { %v4079_v60 = vld [vmem:[#allocation3 + $0x171] ss:$2 sm:$0xff]  ;;  %v13376_v42 = vmax.f32 %v4071_v56, %v4075_v47  ;;  %v4081_v29 = vld [vmem:[#allocation3 + $0x181] ss:$2 sm:$0x7] }
 0x489   : > { %v4085_v49 = vld [vmem:[#allocation3 + $0x198] ss:$2 sm:$0x7]  ;;  %v13380_v46 = vmax.f32 %v4079_v60, %v4083_v13  ;;  %v4139_v11 = vld [vmem:[#allocation3 + $0x19e] ss:$2 sm:$0xff] }
 0x48a   : > { %3764 = vrot.lane.b32.xlu0 %v13308_v25, %s11275_s0  ;;  %v4143_v40 = vld [vmem:[#allocation3 + $0x1b5] ss:$2 sm:$0xff]  ;;  %v13384_v20 = vmax.f32 %v4081_v29, %v4085_v49  ;;  %v4141_v58 = vld [vmem:[#allocation3 + $0x1ae] ss:$2 sm:$0x7] }
 0x48b   : > { %3832 = vrot.lane.b32.xlu1 %v13312_v10, %s11275_s0  ;;  %v4145_v50 = vld [vmem:[#allocation3 + $0x1c5] ss:$2 sm:$0x7]  ;;  %v13388_v37 = vmax.f32 %v4139_v11, %v4143_v40  ;;  %v4153_v19 = vld [vmem:[#allocation3 + $0x1b6] ss:$2 sm:$0xff] }
 0x48c   : > { %v4149_v1 = vld [vmem:[#allocation3 + $0x19f] ss:$2 sm:$0xff]  ;;  %v13392_v39 = vmax.f32 %v4141_v58, %v4145_v50  ;;  %v4209_v38 = vld [vmem:[#allocation3 + $0x1cc] ss:$2 sm:$0xff] }
 0x48d   : > { %v4213_v8 = vld [vmem:[#allocation3 + $0x1e3] ss:$2 sm:$0xff]  ;;  %v13396_v14 = vmax.f32 %v4149_v1, %v4153_v19  ;;  %v4155_v7 = vld [vmem:[#allocation3 + $0x1c6] ss:$2 sm:$0x7] }
 0x48e   : > { %3812 = vrot.lane.b32.xlu0 %v13316_v34, %s11275_s0  ;;  %v4151_v44 = vld [vmem:[#allocation3 + $0x1af] ss:$2 sm:$0x7]  ;;  %v13400_v22 = vmax.f32 %v4209_v38, %v4213_v8  ;;  %v4223_v5 = vld [vmem:[#allocation3 + $0x1e4] ss:$2 sm:$0xff]  ;;  %v4407_v38 = vld [vmem:[#allocation12 + $0xe8] sm:$0xff] }
 0x48f   : > { %3880 = vrot.lane.b32.xlu1 %v13320_v62, %s11275_s0  ;;  %v4219_v51 = vld [vmem:[#allocation3 + $0x1cd] ss:$2 sm:$0xff]  ;;  %v13404_v43 = vmax.f32 %v4151_v44, %v4155_v7  ;;  %v4211_v18 = vld [vmem:[#allocation3 + $0x1dc] ss:$2 sm:$0x7] }
 0x490   : > { %v4215_v30 = vld [vmem:[#allocation3 + $0x1f3] ss:$2 sm:$0x7]  ;;  %v13408_v17 = vmax.f32 %v4219_v51, %v4223_v5  ;;  %v4221_v32 = vld [vmem:[#allocation3 + $0x1dd] ss:$2 sm:$0x7] }
 0x491   : > { %v13412_v26 = vmax.f32 %v4211_v18, %v4215_v30  ;;  %v4225_v56 = vld [vmem:[#allocation3 + $0x1f4] ss:$2 sm:$0x7]  ;;  %v4279_v60 = vld [vmem:[#allocation3 + $0x1fa] ss:$2 sm:$0xff] }
 0x492   : > { %3834 = vrot.lane.b32.xlu0 %v13324_v3, %s11275_s0  ;;  %v13418_v47 = vmax.f32 %v4221_v32, %v4225_v56  ;;  %v4283_v13 = vld [vmem:[#allocation3 + $0x211] ss:$2 sm:$0xff]  ;;  %v4293_v11 = vld [vmem:[#allocation3 + $0x212] ss:$2 sm:$0xff]  ;;  %v4409_v58 = vld [vmem:[#allocation12 + $0xf8] sm:$0xff] }
 0x493   : > { %3882 = vrot.lane.b32.xlu1 %v13328_v33, %s11275_s0  ;;  %v13422_v29 = vmax.f32 %v4279_v60, %v4283_v13  ;;  %v4289_v49 = vld [vmem:[#allocation3 + $0x1fb] ss:$2 sm:$0xff]  ;;  %9825 = vmatprep.subr.mxu0 %v4409_v58  ;;  %v4406_v44 = vld [vmem:[#allocation12 + $0xe0] sm:$0xff] }
 0x494   : > { %v13426_v40 = vmax.f32 %v4289_v49, %v4293_v11  ;;  %v4378_v50 = vld [vmem:[#allocation12 + $0x78] sm:$0xff]  ;;  %9826 = vmatpush3.msra.mxu0 %v4409_v58  ;;  %v4408_v1 = vld [vmem:[#allocation12 + $0xf0] sm:$0xff]  ;;  %v4376_v8 = vld [vmem:[#allocation12 + $0x68] sm:$0xff] }
 0x495   : > { %9878 = vmatprep.subr.mxu1 %v4378_v50  ;;  %v4377_v19 = vld [vmem:[#allocation12 + $0x70] sm:$0xff]  ;;  %9827 = vmatprep.subr.mxu0 %v4408_v1  ;;  %v4375_v7 = vld [vmem:[#allocation12 + $0x60] sm:$0xff]  ;;  %v4405_v51 = vld [vmem:[#allocation12 + $0xd8] sm:$0xff] }
 0x496   : > { %3902 = vrot.lane.b32.xlu0 %v13332_v48, %s11275_s0  ;;  %9879 = vmatpush3.msra.mxu1 %v4378_v50  ;;  %v4374_v5 = vld [vmem:[#allocation12 + $0x58] sm:$0xff]  ;;  %v4404_v18 = vld [vmem:[#allocation12 + $0xd0] sm:$0xff]  ;;  %v4403_v13 = vld [vmem:[#allocation12 + $0xc8] sm:$0xff] }
 0x497   : > { %3904 = vrot.lane.b32.xlu1 %v13336_v27, %s11275_s0  ;;  %9880 = vmatprep.subr.mxu1 %v4377_v19  ;;  %v4373_v30 = vld [vmem:[#allocation12 + $0x50] sm:$0xff]  ;;  %v4372_v49 = vld [vmem:[#allocation12 + $0x48] sm:$0xff]  ;;  %v4402_v11 = vld [vmem:[#allocation12 + $0xc0] sm:$0xff] }
 0x498   : > { %9828 = vmatpush3.msra.mxu0 %v4408_v1  ;;  %9881 = vmatpush3.msra.mxu1 %v4377_v19  ;;  %v4371_v58 = vld [vmem:[#allocation12 + $0x40] sm:$0xff]  ;;  %v4401_v19 = vld [vmem:[#allocation12 + $0xb8] sm:$0xff] }
 0x499   : > { %9829 = vmatprep.subr.mxu0 %v4407_v38  ;;  %9882 = vmatprep.subr.mxu1 %v4376_v8 }
 0x49a   : > { %3950 = vrot.lane.b32.xlu0 %v13340_v16, %s11275_s0  ;;  %9830 = vmatpush3.msra.mxu0 %v4407_v38  ;;  %v4370_v38 = vld [vmem:[#allocation12 + $0x38] sm:$0xff] }
 0x49b   : > { %3952 = vrot.lane.b32.xlu1 %v13344_v36, %s11275_s0  ;;  %9883 = vmatpush3.msra.mxu1 %v4376_v8 }
 0x49c   : > { %9831 = vmatprep.subr.mxu0 %v4406_v44  ;;  %9884 = vmatprep.subr.mxu1 %v4375_v7 }
 0x49d   : > { %9832 = vmatpush3.msra.mxu0 %v4406_v44  ;;  %9885 = vmatpush3.msra.mxu1 %v4375_v7  ;;  %v4400_v7 = vld [vmem:[#allocation12 + $0xb0] sm:$0xff] }
 0x49e   : > { %3972 = vrot.lane.b32.xlu0 %v13348_v9, %s11275_s0  ;;  %9833 = vmatprep.subr.mxu0 %v4405_v51 }
 0x49f   : > { %4020 = vrot.lane.b32.xlu1 %v13352_v35, %s11275_s0  ;;  %9886 = vmatprep.subr.mxu1 %v4374_v5 }
 0x4a0   : > { %9834 = vmatpush3.msra.mxu0 %v4405_v51  ;;  %9887 = vmatpush3.msra.mxu1 %v4374_v5  ;;  %v4369_v51 = vld [vmem:[#allocation12 + $0x30] sm:$0xff] }
 0x4a1   : > { %9835 = vmatprep.subr.mxu0 %v4404_v18  ;;  %9888 = vmatprep.subr.mxu1 %v4373_v30 }
 0x4a2   : > { %3974 = vrot.lane.b32.xlu0 %v13356_v45, %s11275_s0  ;;  %9836 = vmatpush3.msra.mxu0 %v4404_v18 }
 0x4a3   : > { %4042 = vrot.lane.b32.xlu1 %v13360_v59, %s11275_s0  ;;  %9889 = vmatpush3.msra.mxu1 %v4373_v30  ;;  %v4398_v30 = vld [vmem:[#allocation12 + $0xa0] sm:$0xff] }
 0x4a4   : > { %9837 = vmatprep.subr.mxu0 %v4403_v13  ;;  %9890 = vmatprep.subr.mxu1 %v4372_v49 }
 0x4a5   : > { %9838 = vmatpush3.msra.mxu0 %v4403_v13  ;;  %9891 = vmatpush3.msra.mxu1 %v4372_v49  ;;  %v4397_v49 = vld [vmem:[#allocation12 + $0x98] sm:$0xff] }
 0x4a6   : > { %4022 = vrot.lane.b32.xlu0 %v13364_v21, %s11275_s0  ;;  %9839 = vmatprep.subr.mxu0 %v4402_v11 }
 0x4a7   : > { %4090 = vrot.lane.b32.xlu1 %v13368_v55, %s11275_s0  ;;  %9892 = vmatprep.subr.mxu1 %v4371_v58 }
 0x4a8   : > { %9840 = vmatpush3.msra.mxu0 %v4402_v11  ;;  %9893 = vmatpush3.msra.mxu1 %v4371_v58  ;;  %v4366_v11 = vld [vmem:[#allocation12 + $0x18] sm:$0xff] }
 0x4a9   : > { %9841 = vmatprep.subr.mxu0 %v4401_v19  ;;  %9894 = vmatprep.subr.mxu1 %v4370_v38 }
 0x4aa   : > { %4044 = vrot.lane.b32.xlu0 %v13372_v61, %s11275_s0  ;;  %9842 = vmatpush3.msra.mxu0 %v4401_v19  ;;  %v4395_v19 = vld [vmem:[#allocation12 + $0x88] sm:$0xff] }
 0x4ab   : > { %4092 = vrot.lane.b32.xlu1 %v13376_v42, %s11275_s0  ;;  %9895 = vmatpush3.msra.mxu1 %v4370_v38 }
 0x4ac   : > { %9843 = vmatprep.subr.mxu0 %v4400_v7  ;;  %9896 = vmatprep.subr.mxu1 %v4369_v51 }
 0x4ad   : > { %9844 = vmatpush3.msra.mxu0 %v4400_v7  ;;  %9897 = vmatpush3.msra.mxu1 %v4369_v51  ;;  %v4364_v7 = vld [vmem:[#allocation12 + $0x8] sm:$0xff] }
 0x4ae   : > { %4112 = vrot.lane.b32.xlu0 %v13380_v46, %s11275_s0 }
 0x4af   : > { %4114 = vrot.lane.b32.xlu1 %v13384_v20, %s11275_s0 }
 0x4b2   : > { %4160 = vrot.lane.b32.xlu0 %v13388_v37, %s11275_s0 }
 0x4b3   : > { %4162 = vrot.lane.b32.xlu1 %v13392_v39, %s11275_s0 }
 0x4b6   : > { %4182 = vrot.lane.b32.xlu0 %v13396_v14, %s11275_s0 }
 0x4b7   : > { %4230 = vrot.lane.b32.xlu1 %v13400_v22, %s11275_s0 }
 0x4ba   : > { %4184 = vrot.lane.b32.xlu0 %v13404_v43, %s11275_s0 }
 0x4bb   : > { %4252 = vrot.lane.b32.xlu1 %v13408_v17, %s11275_s0 }
 0x4be   : > { %4232 = vrot.lane.b32.xlu0 %v13412_v26, %s11275_s0 }
 0x4c2   : > { %4254 = vrot.lane.b32.xlu0 %v13418_v47, %s11275_s0 }
 0x4c6   : > { %4300 = vrot.lane.b32.xlu0 %v13422_v29, %s11275_s0 }
 0x4ca   : > { %4322 = vrot.lane.b32.xlu0 %v13426_v40, %s11275_s0 }
 0x4dc   : > { %v3523_v32 = vpop.permute.xlu0 %3522 }
 0x4dd   : > { %v3528_v56 = vmax.f32 %v13246_v41, %v3523_v32  ;;  %v3549_v60 = vpop.permute.xlu1 %3548 }
 0x4de   : > { %v3554_v44 = vmax.f32 %v13248_v24, %v3549_v60  ;;  %v4368_v24 = vld [vmem:[#allocation12 + $0x28] sm:$0xff] }
 0x4df   : > { %3531 = vst.msk [vmem:[#allocation4] sm:$0xff] %vm3530_vm2, %v3528_v56  ;;  %3536 = vrot.lane.b32.xlu0 %v3528_v56, %s11275_s0  ;;  %v4367_v56 = vld [vmem:[#allocation12 + $0x20] sm:$0xff]  ;;  %9898 = vmatprep.subr.mxu1 %v4368_v24 }
 0x4e0   : > { %v3525_v50 = vpop.permute.xlu0 %3524  ;;  %9899 = vmatpush3.msra.mxu1 %v4368_v24 }
 0x4e1   : > { %v3529_v41 = vmax.f32 %v13252_v2, %v3525_v50  ;;  %v3551_v1 = vpop.permute.xlu1 %3550  ;;  %9900 = vmatprep.subr.mxu1 %v4367_v56  ;;  %v4396_v50 = vld [vmem:[#allocation12 + $0x90] sm:$0xff] }
 0x4e2   : > { %v3555_v8 = vmax.f32 %v13256_v4, %v3551_v1  ;;  %v4399_v4 = vld [vmem:[#allocation12 + $0xa8] sm:$0xff]  ;;  %9901 = vmatpush3.msra.mxu1 %v4367_v56 }
 0x4e3   : > { %3533 = vst.msk [vmem:[#allocation4 + $0x8] sm:$0x7] %vm3532_vm3, %v3529_v41  ;;  %3538 = vrot.lane.b32.xlu1 %v3529_v41, %s11275_s0  ;;  %9845 = vmatprep.subr.mxu0 %v4399_v4  ;;  %v4365_v41 = vld [vmem:[#allocation12 + $0x10] sm:$0xff] }
 0x4e4   : > { %3560 = vrot.lane.b32.xlu0 %v3555_v8, %s11276_s24  ;;  %v3601_v2 = vpop.permute.xlu0 %3600  ;;  %9846 = vmatpush3.msra.mxu0 %v4399_v4 }
 0x4e5   : > { %v3623_v5 = vpop.permute.xlu1 %3622  ;;  %v3606_v18 = vmax.f32 %v13260_v57, %v3601_v2  ;;  %9847 = vmatprep.subr.mxu0 %v4398_v30  ;;  %9902 = vmatprep.subr.mxu1 %v4366_v11 }
 0x4e6   : > { %9848 = vmatpush3.msra.mxu0 %v4398_v30  ;;  %v3628_v1 = vmax.f32 %v13264_v15, %v3623_v5  ;;  %9903 = vmatpush3.msra.mxu1 %v4366_v11  ;;  %v4363_v15 = vld [vmem:[#allocation12] sm:$0xff] }
 0x4e7   : > { %3558 = vrot.lane.b32.xlu1 %v3554_v44, %s11276_s24  ;;  %3608 = vst.msk [vmem:[#allocation4 + $0xb] sm:$0xff] %vm3530_vm2, %v3606_v18  ;;  %9849 = vmatprep.subr.mxu0 %v4397_v49 }
 0x4e8   : > { %3570 = vrot.lane.b32.xlu0 %v3555_v8, %s11277_s16  ;;  %v3603_v32 = vpop.permute.xlu0 %3602  ;;  %9850 = vmatpush3.msra.mxu0 %v4397_v49 }
 0x4e9   : > { %v3671_v60 = vpop.permute.xlu1 %3670  ;;  %v3607_v57 = vmax.f32 %v13268_v12, %v3603_v32  ;;  %9851 = vmatprep.subr.mxu0 %v4396_v50  ;;  %9904 = vmatprep.subr.mxu1 %v4365_v41 }
 0x4ea   : > { %v3676_v13 = vmax.f32 %v13272_v31, %v3671_v60  ;;  %9852 = vmatpush3.msra.mxu0 %v4396_v50  ;;  %9905 = vmatpush3.msra.mxu1 %v4365_v41 }
 0x4eb   : > { %3612 = vrot.lane.b32.xlu1 %v3606_v18, %s11275_s0  ;;  %3609 = vst.msk [vmem:[#allocation4 + $0x13] sm:$0x7] %vm3532_vm3, %v3607_v57  ;;  %9853 = vmatprep.subr.mxu0 %v4395_v19 }
 0x4ec   : > { %3678 = vst.msk [vmem:[#allocation4 + $0x16] sm:$0xff] %vm3530_vm2, %v3676_v13  ;;  %3682 = vrot.lane.b32.xlu0 %v3676_v13, %s11275_s0  ;;  %v3625_v58 = vpop.permute.xlu0 %3624  ;;  %9906 = vmatprep.subr.mxu1 %v4364_v7 }
 0x4ed   : > { %v3673_v12 = vpop.permute.xlu1 %3672  ;;  %v3629_v38 = vmax.f32 %v13276_v28, %v3625_v58  ;;  %9854 = vmatpush3.msra.mxu0 %v4395_v19  ;;  %9907 = vmatpush3.msra.mxu1 %v4364_v7 }
 0x4ee   : > { %v3677_v31 = vmax.f32 %v13280_v53, %v3673_v12  ;;  %v4394_v53 = vld [vmem:[#allocation12 + $0x80] sm:$0xff]  ;;  %9908 = vmatprep.subr.mxu1 %v4363_v15 }
 0x4ef   : > { %3568 = vrot.lane.b32.xlu1 %v3554_v44, %s11277_s16  ;;  %9855 = vmatprep.subr.mxu0 %v4394_v53 }
 0x4f0   : > { %3679 = vst.msk [vmem:[#allocation4 + $0x1e] sm:$0x7] %vm3532_vm3, %v3677_v31  ;;  %3684 = vrot.lane.b32.xlu0 %v3677_v31, %s11275_s0  ;;  %v3693_v8 = vpop.permute.xlu0 %3692  ;;  %9856 = vmatpush3.msra.mxu0 %v4394_v53 }
 0x4f1   : > { %v3695_v51 = vpop.permute.xlu1 %3694  ;;  %v3698_v44 = vmax.f32 %v13284_v52, %v3693_v8  ;;  %9909 = vmatpush3.msra.mxu1 %v4363_v15 }
 0x4f2   : > { %v3699_v13 = vmax.f32 %v13288_v63, %v3695_v51 }
 0x4f3   : > { %3632 = vrot.lane.b32.xlu1 %v3628_v1, %s11276_s24 }
 0x4f4   : > { %3642 = vrot.lane.b32.xlu0 %v3629_v38, %s11277_s16  ;;  %v3741_v2 = vpop.permute.xlu0 %3740 }
 0x4f5   : > { %v3746_v28 = vmax.f32 %v13292_v23, %v3741_v2  ;;  %v3743_v5 = vpop.permute.xlu1 %3742 }
 0x4f6   : > { %v3747_v18 = vmax.f32 %v13296_v0, %v3743_v5 }
 0x4f7   : > { %3640 = vrot.lane.b32.xlu1 %v3628_v1, %s11277_s16  ;;  %3748 = vst.msk [vmem:[#allocation4 + $0x21] sm:$0xff] %vm3530_vm2, %v3746_v28 }
 0x4f8   : > { %3710 = vrot.lane.b32.xlu0 %v3698_v44, %s11277_s16  ;;  %3749 = vst.msk [vmem:[#allocation4 + $0x29] sm:$0x7] %vm3532_vm3, %v3747_v18  ;;  %v3763_v52 = vpop.permute.xlu0 %3762 }
 0x4f9   : > { %v3811_v4 = vpop.permute.xlu1 %3810  ;;  %v3768_v0 = vmax.f32 %v13300_v6, %v3763_v52 }
 0x4fa   : > { %v3816_v23 = vmax.f32 %v13304_v54, %v3811_v4 }
 0x4fb   : > { %3614 = vrot.lane.b32.xlu1 %v3607_v57, %s11275_s0 }
 0x4fc   : > { %3752 = vrot.lane.b32.xlu0 %v3746_v28, %s11275_s0  ;;  %3818 = vst.msk [vmem:[#allocation4 + $0x2c] sm:$0xff] %vm3530_vm2, %v3816_v23  ;;  %v3765_v24 = vpop.permute.xlu0 %3764 }
 0x4fd   : > { %v3833_v30 = vpop.permute.xlu1 %3832  ;;  %v3769_v32 = vmax.f32 %v13308_v25, %v3765_v24 }
 0x4fe   : > { %v3838_v6 = vmax.f32 %v13312_v10, %v3833_v30 }
 0x4ff   : > { %3634 = vrot.lane.b32.xlu1 %v3629_v38, %s11276_s24 }
 0x500   : > { %3772 = vrot.lane.b32.xlu0 %v3768_v0, %s11276_s24  ;;  %v3813_v56 = vpop.permute.xlu0 %3812 }
 0x501   : > { %v3881_v60 = vpop.permute.xlu1 %3880  ;;  %v3817_v54 = vmax.f32 %v13316_v34, %v3813_v56 }
 0x502   : > { %v3886_v57 = vmax.f32 %v13320_v62, %v3881_v60 }
 0x503   : > { %3702 = vrot.lane.b32.xlu1 %v3698_v44, %s11276_s24  ;;  %3819 = vst.msk [vmem:[#allocation4 + $0x34] sm:$0x7] %vm3532_vm3, %v3817_v54 }
 0x504   : > { %3774 = vrot.lane.b32.xlu0 %v3769_v32, %s11276_s24  ;;  %3888 = vst.msk [vmem:[#allocation4 + $0x37] sm:$0xff] %vm3530_vm2, %v3886_v57  ;;  %v3835_v49 = vpop.permute.xlu0 %3834 }
 0x505   : > { %v3883_v25 = vpop.permute.xlu1 %3882 }
 0x506   : > { %v3887_v11 = vmax.f32 %v13328_v33, %v3883_v25 }
 0x507   : > { %3704 = vrot.lane.b32.xlu1 %v3699_v13, %s11276_s24 }
 0x508   : > { %3842 = vrot.lane.b32.xlu0 %v3838_v6, %s11276_s24  ;;  %3889 = vst.msk [vmem:[#allocation4 + $0x3f] sm:$0x7] %vm3532_vm3, %v3887_v11  ;;  %v3903_v63 = vpop.permute.xlu0 %3902 }
 0x509   : > { %v3905_v34 = vpop.permute.xlu1 %3904  ;;  %v3908_v1 = vmax.f32 %v13332_v48, %v3903_v63 }
 0x50a   : > { %v3909_v28 = vmax.f32 %v13336_v27, %v3905_v34 }
 0x50b   : > { %3712 = vrot.lane.b32.xlu1 %v3699_v13, %s11277_s16  ;;  %v4295_v13 = vld [vmem:[#allocation3 + $0x222] ss:$2 sm:$0x7] }
 0x50c   : > { %3850 = vrot.lane.b32.xlu0 %v3838_v6, %s11277_s16  ;;  %v3951_v62 = vpop.permute.xlu0 %3950 }
 0x50d   : > { %v3956_v10 = vmax.f32 %v13340_v16, %v3951_v62  ;;  %v3953_v58 = vpop.permute.xlu1 %3952  ;;  %v3839_v16 = vmax.f32 %v13324_v3, %v3835_v49 }
 0x50e   : > { %v3957_v12 = vmax.f32 %v13344_v36, %v3953_v58 }
 0x50f   : > { %3754 = vrot.lane.b32.xlu1 %v3747_v18, %s11275_s0  ;;  %3958 = vst.msk [vmem:[#allocation4 + $0x42] sm:$0xff] %vm3530_vm2, %v3956_v10 }
 0x510   : > { %3892 = vrot.lane.b32.xlu0 %v3886_v57, %s11275_s0  ;;  %3959 = vst.msk [vmem:[#allocation4 + $0x4a] sm:$0x7] %vm3532_vm3, %v3957_v12  ;;  %v3973_v33 = vpop.permute.xlu0 %3972  ;;  %v4291_v57 = vld [vmem:[#allocation3 + $0x20b] ss:$2 sm:$0x7] }
 0x511   : > { %v4021_v50 = vpop.permute.xlu1 %4020  ;;  %v3978_v48 = vmax.f32 %v13348_v9, %v3973_v33  ;;  %v13584_v49 = vmax.f32 %v4291_v57, %v4295_v13  ;;  %v4285_v33 = vld [vmem:[#allocation3 + $0x221] ss:$2 sm:$0x7]  ;;  %v4696_v57 = vld [vmem:[#allocation12 + $0x108] sm:$0xff] }
 0x512   : > { %v4026_v31 = vmax.f32 %v13352_v35, %v4021_v50 }
 0x513   : > { %3822 = vrot.lane.b32.xlu1 %v3816_v23, %s11275_s0  ;;  %v13547_v23 = vld [vmem:[#allocation12 + $0x178] sm:$0xff] }
 0x514   : > { %3894 = vrot.lane.b32.xlu0 %v3887_v11, %s11275_s0  ;;  %4028 = vst.msk [vmem:[#allocation4 + $0x4d] sm:$0xff] %vm3530_vm2, %v4026_v31  ;;  %v3975_v36 = vpop.permute.xlu0 %3974  ;;  %9931 = vmatprep.subr.mxu0 %v13547_v23 }
 0x515   : > { %v4043_v41 = vpop.permute.xlu1 %4042  ;;  %v3979_v53 = vmax.f32 %v13356_v45, %v3975_v36 }
 0x516   : > { %v4048_v9 = vmax.f32 %v13360_v59, %v4043_v41 }
 0x517   : > { %3780 = vrot.lane.b32.xlu1 %v3768_v0, %s11277_s16  ;;  %v13549_v0 = vld [vmem:[#allocation12 + $0x1f8] sm:$0xff] }
 0x518   : > { %3852 = vrot.lane.b32.xlu0 %v3839_v16, %s11277_s16  ;;  %v4023_v19 = vpop.permute.xlu0 %4022  ;;  %9984 = vmatprep.subr.mxu1 %v13549_v0 }
 0x519   : > { %v4027_v38 = vmax.f32 %v13364_v21, %v4023_v19  ;;  %v4091_v35 = vpop.permute.xlu1 %4090  ;;  %v4709_v19 = vld [vmem:[#allocation12 + $0x170] sm:$0xff] }
 0x51a   : > { %v4096_v8 = vmax.f32 %v13368_v55, %v4091_v35  ;;  %v4889_v35 = vld [vmem:[#allocation12 + $0x1f0] sm:$0xff] }
 0x51b   : > { %3782 = vrot.lane.b32.xlu1 %v3769_v32, %s11277_s16  ;;  %4029 = vst.msk [vmem:[#allocation4 + $0x55] sm:$0x7] %vm3532_vm3, %v4027_v38 }
 0x51c   : > { %3920 = vrot.lane.b32.xlu0 %v3908_v1, %s11277_s16  ;;  %v4045_v3 = vpop.permute.xlu0 %4044  ;;  %4098 = vst.msk [vmem:[#allocation4 + $0x58] sm:$0xff] %vm3530_vm2, %v4096_v8 }
 0x51d   : > { %v4093_v7 = vpop.permute.xlu1 %4092  ;;  %v4049_v18 = vmax.f32 %v13372_v61, %v4045_v3  ;;  %v4888_v3 = vld [vmem:[#allocation12 + $0x1e8] sm:$0xff] }
 0x51e   : > { %v4097_v51 = vmax.f32 %v13376_v42, %v4093_v7 }
 0x51f   : > { %3824 = vrot.lane.b32.xlu1 %v3817_v54, %s11275_s0 }
 0x520   : > { %3962 = vrot.lane.b32.xlu0 %v3956_v10, %s11275_s0  ;;  %v4113_v21 = vpop.permute.xlu0 %4112  ;;  %4099 = vst.msk [vmem:[#allocation4 + $0x60] sm:$0x7] %vm3532_vm3, %v4097_v51 }
 0x521   : > { %v4115_v55 = vpop.permute.xlu1 %4114 }
 0x522   : > { %v4119_v32 = vmax.f32 %v13384_v20, %v4115_v55  ;;  %v4706_v55 = vld [vmem:[#allocation12 + $0x158] sm:$0xff] }
 0x523   : > { %3844 = vrot.lane.b32.xlu1 %v3839_v16, %s11276_s24 }
 0x524   : > { %3982 = vrot.lane.b32.xlu0 %v3978_v48, %s11276_s24  ;;  %v4161_v15 = vpop.permute.xlu0 %4160 }
 0x525   : > { %v4166_v44 = vmax.f32 %v13388_v37, %v4161_v15  ;;  %v4163_v42 = vpop.permute.xlu1 %4162 }
 0x526   : > { %v13516_v2 = vmax.f32 %v13392_v39, %v4163_v42 }
 0x527   : > { %3912 = vrot.lane.b32.xlu1 %v3908_v1, %s11276_s24  ;;  %4168 = vst.msk [vmem:[#allocation4 + $0x63] sm:$0xff] %vm3530_vm2, %v4166_v44 }
 0x528   : > { %3984 = vrot.lane.b32.xlu0 %v3979_v53, %s11276_s24  ;;  %v4183_v5 = vpop.permute.xlu0 %4182  ;;  %4169 = vst.msk [vmem:[#allocation4 + $0x6b] sm:$0x7] %vm3532_vm3, %v13516_v2 }
 0x529   : > { %v4231_v45 = vpop.permute.xlu1 %4230  ;;  %v4188_v61 = vmax.f32 %v13396_v14, %v4183_v5  ;;  %v4884_v5 = vld [vmem:[#allocation12 + $0x1c8] sm:$0xff] }
 0x52a   : > { %v4236_v37 = vmax.f32 %v13400_v22, %v4231_v45 }
 0x52b   : > { %3914 = vrot.lane.b32.xlu1 %v3909_v28, %s11276_s24 }
 0x52c   : > { %4052 = vrot.lane.b32.xlu0 %v4048_v9, %s11276_s24  ;;  %v4185_v27 = vpop.permute.xlu0 %4184  ;;  %4238 = vst.msk [vmem:[#allocation4 + $0x6e] sm:$0xff] %vm3530_vm2, %v4236_v37 }
 0x52f   : > { %3922 = vrot.lane.b32.xlu1 %v3909_v28, %s11277_s16  ;;  %v4704_v28 = vld [vmem:[#allocation12 + $0x148] sm:$0xff] }
 0x530   : > { %4060 = vrot.lane.b32.xlu0 %v4048_v9, %s11277_s16  ;;  %v4233_v39 = vpop.permute.xlu0 %4232 }
 0x531   : > { %v13532_v59 = vmax.f32 %v13412_v26, %v4233_v39  ;;  %v4118_v26 = vmax.f32 %v13380_v46, %v4113_v21  ;;  %v4189_v46 = vmax.f32 %v13404_v43, %v4185_v27  ;;  %v4887_v21 = vld [vmem:[#allocation12 + $0x1e0] sm:$0xff] }
 0x532   : > { %v4703_v39 = vld [vmem:[#allocation12 + $0x140] sm:$0xff] }
 0x533   : > { %3964 = vrot.lane.b32.xlu1 %v3957_v12, %s11275_s0  ;;  %4239 = vst.msk [vmem:[#allocation4 + $0x76] sm:$0x7] %vm3532_vm3, %v13532_v59  ;;  %v4281_v12 = vld [vmem:[#allocation3 + $0x20a] ss:$2 sm:$0x7] }
 0x534   : > { %4102 = vrot.lane.b32.xlu0 %v4096_v8, %s11275_s0  ;;  %v4255_v22 = vpop.permute.xlu0 %4254  ;;  %v13599_v16 = vmax.f32 %v4281_v12, %v4285_v33  ;;  %v4708_v8 = vld [vmem:[#allocation12 + $0x168] sm:$0xff] }
 0x535   : > { %v4259_v43 = vmax.f32 %v13418_v47, %v4255_v22  ;;  %v4702_v22 = vld [vmem:[#allocation12 + $0x138] sm:$0xff] }
 0x537   : > { %4032 = vrot.lane.b32.xlu1 %v4026_v31, %s11275_s0 }
 0x538   : > { %4104 = vrot.lane.b32.xlu0 %v4097_v51, %s11275_s0  ;;  %v4301_v52 = vpop.permute.xlu0 %4300  ;;  %v4707_v51 = vld [vmem:[#allocation12 + $0x160] sm:$0xff] }
 0x539   : > { %v4306_v4 = vmax.f32 %v13422_v29, %v4301_v52  ;;  %v4253_v29 = vpop.permute.xlu1 %4252  ;;  %v4882_v52 = vld [vmem:[#allocation12 + $0x1b8] sm:$0xff] }
 0x53a   : > { %v4258_v30 = vmax.f32 %v13408_v17, %v4253_v29  ;;  %v4700_v29 = vld [vmem:[#allocation12 + $0x128] sm:$0xff] }
 0x53b   : > { %3990 = vrot.lane.b32.xlu1 %v3978_v48, %s11277_s16  ;;  %4308 = vst.msk [vmem:[#allocation4 + $0x79] sm:$0xff] %vm3530_vm2, %v4306_v4 }
 0x53c   : > { %4062 = vrot.lane.b32.xlu0 %v4049_v18, %s11277_s16  ;;  %v4323_v24 = vpop.permute.xlu0 %4322 }
 0x53d   : > { %v4328_v60 = vmax.f32 %v13426_v40, %v4323_v24 }
 0x53f   : > { %3992 = vrot.lane.b32.xlu1 %v3979_v53, %s11277_s16  ;;  %v4886_v53 = vld [vmem:[#allocation12 + $0x1d8] sm:$0xff] }
 0x540   : > { %4130 = vrot.lane.b32.xlu0 %v4118_v26, %s11277_s16 }
 0x543   : > { %4034 = vrot.lane.b32.xlu1 %v4027_v38, %s11275_s0 }
 0x544   : > { %4172 = vrot.lane.b32.xlu0 %v4166_v44, %s11275_s0  ;;  %v4705_v44 = vld [vmem:[#allocation12 + $0x150] sm:$0xff] }
 0x547   : > { %4054 = vrot.lane.b32.xlu1 %v4049_v18, %s11276_s24 }
 0x548   : > { %4192 = vrot.lane.b32.xlu0 %v4188_v61, %s11276_s24 }
 0x54b   : > { %4122 = vrot.lane.b32.xlu1 %v4118_v26, %s11276_s24  ;;  %v4701_v26 = vld [vmem:[#allocation12 + $0x130] sm:$0xff] }
 0x54c   : > { %4194 = vrot.lane.b32.xlu0 %v4189_v46, %s11276_s24 }
 0x54f   : > { %4124 = vrot.lane.b32.xlu1 %v4119_v32, %s11276_s24 }
 0x550   : > { %4262 = vrot.lane.b32.xlu0 %v4258_v30, %s11276_s24 }
 0x551   : > { %v3537_v14 = vpop.permute.xlu0 %3536 }
 0x552   : > { %3543 = vst.msk [vmem:[#allocation4] sm:$0xff] %vm3542_vm4, %v3537_v14  ;;  %v4879_v14 = vld [vmem:[#allocation12 + $0x1a0] sm:$0xff] }
 0x553   : > { %4132 = vrot.lane.b32.xlu1 %v4119_v32, %s11277_s16  ;;  %v4699_v32 = vld [vmem:[#allocation12 + $0x120] sm:$0xff] }
 0x554   : > { %4270 = vrot.lane.b32.xlu0 %v4258_v30, %s11277_s16  ;;  %v4880_v30 = vld [vmem:[#allocation12 + $0x1a8] sm:$0xff] }
 0x555   : > { %v3539_v56 = vpop.permute.xlu1 %3538 }
 0x556   : > { %3545 = vst.msk [vmem:[#allocation4 + $0x8] sm:$0x7] %vm3544_vm5, %v3539_v56  ;;  %v3561_v20 = vpop.permute.xlu0 %3560  ;;  %v4698_v56 = vld [vmem:[#allocation12 + $0x118] sm:$0xff] }
 0x557   : > { %3567 = vst.msk [vmem:[#allocation4 + $0x8] sm:$0x7] %vm3566_vm6, %v3561_v20  ;;  %4174 = vrot.lane.b32.xlu1 %v13516_v2, %s11275_s0  ;;  %v4885_v2 = vld [vmem:[#allocation12 + $0x1d0] sm:$0xff] }
 0x558   : > { %4264 = vrot.lane.b32.xlu0 %v4259_v43, %s11276_s24 }
 0x559   : > { %v3559_v17 = vpop.permute.xlu1 %3558 }
 0x55a   : > { %3565 = vst.msk [vmem:[#allocation4] sm:$0xff] %vm3564_vm7, %v3559_v17  ;;  %v3571_v47 = vpop.permute.xlu0 %3570  ;;  %v4878_v17 = vld [vmem:[#allocation12 + $0x198] sm:$0xff] }
 0x55b   : > { %3577 = vst.msk [vmem:[#allocation4 + $0x8] sm:$0x7] %vm3576_vm8, %v3571_v47  ;;  %4242 = vrot.lane.b32.xlu1 %v4236_v37, %s11275_s0  ;;  %v4697_v47 = vld [vmem:[#allocation12 + $0x110] sm:$0xff] }
 0x55c   : > { %4312 = vrot.lane.b32.xlu0 %v4306_v4, %s11275_s0 }
 0x55d   : > { %v3613_v54 = vpop.permute.xlu1 %3612 }
 0x55e   : > { %3618 = vst.msk [vmem:[#allocation4 + $0xb] sm:$0xff] %vm3542_vm4, %v3613_v54  ;;  %v3683_v6 = vpop.permute.xlu0 %3682 }
 0x55f   : > { %3688 = vst.msk [vmem:[#allocation4 + $0x16] sm:$0xff] %vm3542_vm4, %v3683_v6  ;;  %4200 = vrot.lane.b32.xlu1 %v4188_v61, %s11277_s16  ;;  %v4876_v6 = vld [vmem:[#allocation12 + $0x188] sm:$0xff] }
 0x560   : > { %4340 = vrot.lane.b32.xlu0 %v4328_v60, %s11277_s16 }
 0x561   : > { %v3569_v25 = vpop.permute.xlu1 %3568 }
 0x562   : > { %3575 = vst.msk [vmem:[#allocation4] sm:$0xff] %vm3574_vm9, %v3569_v25  ;;  %v3685_v40 = vpop.permute.xlu0 %3684  ;;  %v4695_v25 = vld [vmem:[#allocation12 + $0x100] sm:$0xff] }
 0x563   : > { %3689 = vst.msk [vmem:[#allocation4 + $0x1e] sm:$0x7] %vm3544_vm5, %v3685_v40  ;;  %4202 = vrot.lane.b32.xlu1 %v4189_v46, %s11277_s16 }
 0x564   : > { %4324 = vrot.lane.b32.xlu0 %v13584_v49, %s11275_s0 }
 0x565   : > { %v3633_v11 = vpop.permute.xlu1 %3632 }
 0x566   : > { %3638 = vst.msk [vmem:[#allocation4 + $0xb] sm:$0xff] %vm3564_vm7, %v3633_v11  ;;  %v3643_v63 = vpop.permute.xlu0 %3642 }
 0x567   : > { %4244 = vrot.lane.b32.xlu1 %v13532_v59, %s11275_s0  ;;  %v4883_v59 = vld [vmem:[#allocation12 + $0x1c0] sm:$0xff] }
 0x569   : > { %v3641_v34 = vpop.permute.xlu1 %3640  ;;  %v4379_v62 = vld [vmem:[#allocation4 + $0x1] sm:$0xff] }
 0x56a   : > { %v4349_v10 = vld [vmem:[#allocation4] sm:$0xff]  ;;  %3646 = vst.msk [vmem:[#allocation4 + $0xb] sm:$0xff] %vm3574_vm9, %v3641_v34  ;;  %9857 = vmatprep.mubr.f32.mxu0 %v4379_v62  ;;  %v3711_v58 = vpop.permute.xlu0 %3710  ;;  %v4875_v34 = vld [vmem:[#allocation12 + $0x180] sm:$0xff] }
 0x56b   : > { %9910 = vmatprep.mubr.f32.mxu1 %v4349_v10  ;;  %4272 = vrot.lane.b32.xlu1 %v4259_v43, %s11277_s16  ;;  %v13622_v10 = vld [vmem:[#allocation12 + $0x278] sm:$0xff] }
 0x56d   : > { %v3615_v50 = vpop.permute.xlu1 %3614 }
 0x56e   : > { %3619 = vst.msk [vmem:[#allocation4 + $0x13] sm:$0x7] %vm3544_vm5, %v3615_v50  ;;  %v3753_v31 = vpop.permute.xlu0 %3752 }
 0x56f   : > { %3758 = vst.msk [vmem:[#allocation4 + $0x21] sm:$0xff] %vm3542_vm4, %v3753_v31  ;;  %4332 = vrot.lane.b32.xlu1 %v4328_v60, %s11276_s24  ;;  %v4877_v60 = vld [vmem:[#allocation12 + $0x190] sm:$0xff] }
 0x571   : > { %v3635_v36 = vpop.permute.xlu1 %3634  ;;  %v4380_v41 = vld [vmem:[#allocation4 + $0x9] sm:$0xff] }
 0x572   : > { %v4350_v1 = vld [vmem:[#allocation4 + $0x8] sm:$0xff]  ;;  %3639 = vst.msk [vmem:[#allocation4 + $0x13] sm:$0x7] %vm3566_vm6, %v3635_v36  ;;  %9858 = vmatmul.mubr.f32.vlgmr.msra.gmra.mxu0 %v4380_v41  ;;  %v3773_v38 = vpop.permute.xlu0 %3772 }
 0x573   : > { %9911 = vmatmul.mubr.f32.vlgmr.msra.gmra.mxu1 %v4350_v1  ;;  %3647 = vst.msk [vmem:[#allocation4 + $0x13] sm:$0x7] %vm3576_vm8, %v3643_v63  ;;  %4302 = vrot.lane.b32.xlu1 %v13599_v16, %s11275_s0 }
 0x574   : > { %3778 = vst.msk [vmem:[#allocation4 + $0x21] sm:$0xff] %vm3564_vm7, %v3773_v38  ;;  %9932 = vmatpush3.msra.mxu0 %v13547_v23  ;;  %9985 = vmatpush3.msra.mxu1 %v13549_v0  ;;  %v4881_v23 = vld [vmem:[#allocation12 + $0x1b0] sm:$0xff] }
 0x575   : > { %9933 = vmatprep.subr.mxu0 %v4709_v19  ;;  %v3703_v7 = vpop.permute.xlu1 %3702  ;;  %9986 = vmatprep.subr.mxu1 %v4889_v35 }
 0x576   : > { %9934 = vmatpush3.msra.mxu0 %v4709_v19  ;;  %3708 = vst.msk [vmem:[#allocation4 + $0x16] sm:$0xff] %vm3564_vm7, %v3703_v7  ;;  %v3775_v48 = vpop.permute.xlu0 %3774  ;;  %9987 = vmatpush3.msra.mxu1 %v4889_v35 }
 0x577   : > { %9935 = vmatprep.subr.mxu0 %v4708_v8  ;;  %3716 = vst.msk [vmem:[#allocation4 + $0x16] sm:$0xff] %vm3574_vm9, %v3711_v58  ;;  %9988 = vmatprep.subr.mxu1 %v4888_v3  ;;  %v13625_v58 = vld [vmem:[#allocation12 + $0x2f8] sm:$0xff] }
 0x578   : > { %9936 = vmatpush3.msra.mxu0 %v4708_v8  ;;  %9989 = vmatpush3.msra.mxu1 %v4888_v3 }
 0x579   : > { %9937 = vmatprep.subr.mxu0 %v4707_v51  ;;  %v3705_v15 = vpop.permute.xlu1 %3704  ;;  %9990 = vmatprep.subr.mxu1 %v4887_v21 }
 0x57a   : > { %9938 = vmatpush3.msra.mxu0 %v4707_v51  ;;  %3709 = vst.msk [vmem:[#allocation4 + $0x1e] sm:$0x7] %vm3566_vm6, %v3705_v15  ;;  %v3843_v42 = vpop.permute.xlu0 %3842  ;;  %9991 = vmatpush3.msra.mxu1 %v4887_v21 }
 0x57b   : > { %9939 = vmatprep.subr.mxu0 %v4706_v55  ;;  %9992 = vmatprep.subr.mxu1 %v4886_v53 }
 0x57c   : > { %9940 = vmatpush3.msra.mxu0 %v4706_v55  ;;  %9993 = vmatpush3.msra.mxu1 %v4886_v53 }
 0x57d   : > { %9941 = vmatprep.subr.mxu0 %v4705_v44  ;;  %v3713_v9 = vpop.permute.xlu1 %3712  ;;  %9994 = vmatprep.subr.mxu1 %v4885_v2 }
 0x57e   : > { %9942 = vmatpush3.msra.mxu0 %v4705_v44  ;;  %3717 = vst.msk [vmem:[#allocation4 + $0x1e] sm:$0x7] %vm3576_vm8, %v3713_v9  ;;  %v3851_v45 = vpop.permute.xlu0 %3850  ;;  %v4381_v37 = vld [vmem:[#allocation4 + $0x11] sm:$0xff]  ;;  %9995 = vmatpush3.msra.mxu1 %v4885_v2 }
 0x57f   : > { %v4351_v27 = vld [vmem:[#allocation4 + $0x10] sm:$0xff]  ;;  %9943 = vmatprep.subr.mxu0 %v4704_v28  ;;  %9860 = vmatprep.mubr.f32.mxu0 %v4381_v37 }
 0x580   : > { %9913 = vmatprep.mubr.f32.mxu1 %v4351_v27  ;;  %9996 = vmatprep.subr.mxu1 %v4884_v5 }
 0x581   : > { %9944 = vmatpush3.msra.mxu0 %v4704_v28  ;;  %v3755_v18 = vpop.permute.xlu1 %3754  ;;  %9997 = vmatpush3.msra.mxu1 %v4884_v5 }
 0x582   : > { %9945 = vmatprep.subr.mxu0 %v4703_v39  ;;  %3759 = vst.msk [vmem:[#allocation4 + $0x29] sm:$0x7] %vm3544_vm5, %v3755_v18  ;;  %v3893_v4 = vpop.permute.xlu0 %3892  ;;  %9998 = vmatprep.subr.mxu1 %v4883_v59 }
 0x583   : > { %9946 = vmatpush3.msra.mxu0 %v4703_v39  ;;  %3779 = vst.msk [vmem:[#allocation4 + $0x29] sm:$0x7] %vm3566_vm6, %v3775_v48  ;;  %9999 = vmatpush3.msra.mxu1 %v4883_v59 }
 0x584   : > { %3898 = vst.msk [vmem:[#allocation4 + $0x37] sm:$0xff] %vm3542_vm4, %v3893_v4  ;;  %9947 = vmatprep.subr.mxu0 %v4702_v22  ;;  %10000 = vmatprep.subr.mxu1 %v4882_v52 }
 0x585   : > { %9948 = vmatpush3.msra.mxu0 %v4702_v22  ;;  %v3823_v0 = vpop.permute.xlu1 %3822  ;;  %v4382_v61 = vld [vmem:[#allocation4 + $0x19] sm:$0xff]  ;;  %10001 = vmatpush3.msra.mxu1 %v4882_v52 }
 0x586   : > { %v4352_v46 = vld [vmem:[#allocation4 + $0x18] sm:$0xff]  ;;  %9949 = vmatprep.subr.mxu0 %v4701_v26  ;;  %3828 = vst.msk [vmem:[#allocation4 + $0x2c] sm:$0xff] %vm3542_vm4, %v3823_v0  ;;  %9861 = vmatmul.mubr.f32.gmra.mxu0 %v4382_v61  ;;  %v3895_v24 = vpop.permute.xlu0 %3894 }
 0x587   : > { %9914 = vmatmul.mubr.f32.gmra.mxu1 %v4352_v46  ;;  %3848 = vst.msk [vmem:[#allocation4 + $0x2c] sm:$0xff] %vm3564_vm7, %v3843_v42  ;;  %10002 = vmatprep.subr.mxu1 %v4881_v23 }
 0x588   : > { %3899 = vst.msk [vmem:[#allocation4 + $0x3f] sm:$0x7] %vm3544_vm5, %v3895_v24  ;;  %9950 = vmatpush3.msra.mxu0 %v4701_v26  ;;  %10003 = vmatpush3.msra.mxu1 %v4881_v23 }
 0x589   : > { %3856 = vst.msk [vmem:[#allocation4 + $0x2c] sm:$0xff] %vm3574_vm9, %v3851_v45  ;;  %9951 = vmatprep.subr.mxu0 %v4700_v29  ;;  %v3781_v43 = vpop.permute.xlu1 %3780  ;;  %10004 = vmatprep.subr.mxu1 %v4880_v30 }
 0x58a   : > { %9952 = vmatpush3.msra.mxu0 %v4700_v29  ;;  %3786 = vst.msk [vmem:[#allocation4 + $0x21] sm:$0xff] %vm3574_vm9, %v3781_v43  ;;  %v3853_v20 = vpop.permute.xlu0 %3852  ;;  %10005 = vmatpush3.msra.mxu1 %v4880_v30 }
 0x58b   : > { %9953 = vmatprep.subr.mxu0 %v4699_v32  ;;  %10006 = vmatprep.subr.mxu1 %v4879_v14 }
 0x58c   : > { %9954 = vmatpush3.msra.mxu0 %v4699_v32  ;;  %10007 = vmatpush3.msra.mxu1 %v4879_v14 }
 0x58d   : > { %9955 = vmatprep.subr.mxu0 %v4698_v56  ;;  %v3783_v54 = vpop.permute.xlu1 %3782  ;;  %10008 = vmatprep.subr.mxu1 %v4878_v17 }
 0x58e   : > { %9956 = vmatpush3.msra.mxu0 %v4698_v56  ;;  %3787 = vst.msk [vmem:[#allocation4 + $0x29] sm:$0x7] %vm3576_vm8, %v3783_v54  ;;  %v3921_v13 = vpop.permute.xlu0 %3920  ;;  %10009 = vmatpush3.msra.mxu1 %v4878_v17 }
 0x58f   : > { %9957 = vmatprep.subr.mxu0 %v4697_v47  ;;  %10010 = vmatprep.subr.mxu1 %v4877_v60 }
 0x590   : > { %9958 = vmatpush3.msra.mxu0 %v4697_v47  ;;  %10011 = vmatpush3.msra.mxu1 %v4877_v60 }
 0x591   : > { %9959 = vmatprep.subr.mxu0 %v4696_v57  ;;  %v3825_v40 = vpop.permute.xlu1 %3824  ;;  %v4383_v11 = vld [vmem:[#allocation4 + $0x21] sm:$0xff]  ;;  %10012 = vmatprep.subr.mxu1 %v4876_v6 }
 0x592   : > { %v4353_v63 = vld [vmem:[#allocation4 + $0x20] sm:$0xff]  ;;  %9960 = vmatpush3.msra.mxu0 %v4696_v57  ;;  %3829 = vst.msk [vmem:[#allocation4 + $0x34] sm:$0x7] %vm3544_vm5, %v3825_v40  ;;  %9863 = vmatprep.mubr.f32.mxu0 %v4383_v11  ;;  %v3963_v62 = vpop.permute.xlu0 %3962  ;;  %v4860_v40 = vld [vmem:[#allocation4 + $0xc] sm:$0xff] }
 0x593   : > { %9916 = vmatprep.mubr.f32.mxu1 %v4353_v63  ;;  %3968 = vst.msk [vmem:[#allocation4 + $0x42] sm:$0xff] %vm3542_vm4, %v3963_v62  ;;  %10013 = vmatpush3.msra.mxu1 %v4876_v6  ;;  %v4681_v63 = vld [vmem:[#allocation4 + $0x13] sm:$0xff] }
 0x594   : > { %9961 = vmatprep.subr.mxu0 %v4695_v25  ;;  %10014 = vmatprep.subr.mxu1 %v4875_v34  ;;  %v5069_v62 = vld [vmem:[#allocation12 + $0x270] sm:$0xff] }
 0x595   : > { %9962 = vmatpush3.msra.mxu0 %v4695_v25  ;;  %v3845_v12 = vpop.permute.xlu1 %3844  ;;  %v4384_v33 = vld [vmem:[#allocation4 + $0x29] sm:$0xff]  ;;  %10015 = vmatpush3.msra.mxu1 %v4875_v34  ;;  %v4861_v34 = vld [vmem:[#allocation4 + $0x14] sm:$0xff] }
 0x596   : > { %v4354_v50 = vld [vmem:[#allocation4 + $0x28] sm:$0xff]  ;;  %10037 = vmatprep.subr.mxu0 %v13622_v10  ;;  %3849 = vst.msk [vmem:[#allocation4 + $0x34] sm:$0x7] %vm3566_vm6, %v3845_v12  ;;  %9864 = vmatmul.mubr.f32.gmra.mxu0 %v4384_v33  ;;  %v3983_v31 = vpop.permute.xlu0 %3982  ;;  %v5249_v12 = vld [vmem:[#allocation12 + $0x2f0] sm:$0xff] }
 0x597   : > { %9917 = vmatmul.mubr.f32.gmra.mxu1 %v4354_v50  ;;  %3857 = vst.msk [vmem:[#allocation4 + $0x34] sm:$0x7] %vm3576_vm8, %v3853_v20  ;;  %10090 = vmatprep.subr.mxu1 %v13625_v58  ;;  %v4682_v33 = vld [vmem:[#allocation4 + $0x1b] sm:$0xff] }
 0x598   : > { %3988 = vst.msk [vmem:[#allocation4 + $0x42] sm:$0xff] %vm3564_vm7, %v3983_v31  ;;  %v4862_v50 = vld [vmem:[#allocation4 + $0x1c] sm:$0xff]  ;;  %v5068_v31 = vld [vmem:[#allocation12 + $0x268] sm:$0xff] }
 0x599   : > { %v3913_v36 = vpop.permute.xlu1 %3912 }
 0x59a   : > { %3918 = vst.msk [vmem:[#allocation4 + $0x37] sm:$0xff] %vm3564_vm7, %v3913_v36  ;;  %v3985_v41 = vpop.permute.xlu0 %3984  ;;  %v5248_v36 = vld [vmem:[#allocation12 + $0x2e8] sm:$0xff] }
 0x59b   : > { %3926 = vst.msk [vmem:[#allocation4 + $0x37] sm:$0xff] %vm3574_vm9, %v3921_v13 }
 0x59d   : > { %v3915_v1 = vpop.permute.xlu1 %3914 }
 0x59e   : > { %3919 = vst.msk [vmem:[#allocation4 + $0x3f] sm:$0x7] %vm3566_vm6, %v3915_v1  ;;  %v4053_v19 = vpop.permute.xlu0 %4052 }
 0x5a1   : > { %v3923_v38 = vpop.permute.xlu1 %3922 }
 0x5a2   : > { %3927 = vst.msk [vmem:[#allocation4 + $0x3f] sm:$0x7] %vm3576_vm8, %v3923_v38  ;;  %v4061_v35 = vpop.permute.xlu0 %4060  ;;  %v4385_v8 = vld [vmem:[#allocation4 + $0x31] sm:$0xff]  ;;  %v4863_v38 = vld [vmem:[#allocation4 + $0x24] sm:$0xff] }
 0x5a3   : > { %v4355_v3 = vld [vmem:[#allocation4 + $0x30] sm:$0xff]  ;;  %9866 = vmatprep.mubr.f32.mxu0 %v4385_v8 }
 0x5a4   : > { %9919 = vmatprep.mubr.f32.mxu1 %v4355_v3  ;;  %v4864_v8 = vld [vmem:[#allocation4 + $0x2c] sm:$0xff]  ;;  %v5066_v3 = vld [vmem:[#allocation12 + $0x258] sm:$0xff] }
 0x5a5   : > { %v3965_v7 = vpop.permute.xlu1 %3964 }
 0x5a6   : > { %3969 = vst.msk [vmem:[#allocation4 + $0x4a] sm:$0x7] %vm3544_vm5, %v3965_v7  ;;  %v4103_v51 = vpop.permute.xlu0 %4102  ;;  %v4685_v7 = vld [vmem:[#allocation4 + $0x33] sm:$0xff] }
 0x5a7   : > { %3989 = vst.msk [vmem:[#allocation4 + $0x4a] sm:$0x7] %vm3566_vm6, %v3985_v41 }
 0x5a8   : > { %4108 = vst.msk [vmem:[#allocation4 + $0x58] sm:$0xff] %vm3542_vm4, %v4103_v51  ;;  %v4865_v51 = vld [vmem:[#allocation4 + $0x34] sm:$0xff] }
 0x5a9   : > { %v4033_v48 = vpop.permute.xlu1 %4032  ;;  %v4386_v21 = vld [vmem:[#allocation4 + $0x39] sm:$0xff] }
 0x5aa   : > { %v4356_v55 = vld [vmem:[#allocation4 + $0x38] sm:$0xff]  ;;  %4038 = vst.msk [vmem:[#allocation4 + $0x4d] sm:$0xff] %vm3542_vm4, %v4033_v48  ;;  %9867 = vmatmul.mubr.f32.gmra.mxu0 %v4386_v21  ;;  %v4105_v53 = vpop.permute.xlu0 %4104  ;;  %v14535_v21 = vmov 0.0  }
 0x5ab   : > { %9920 = vmatmul.mubr.f32.gmra.mxu1 %v4356_v55  ;;  %4058 = vst.msk [vmem:[#allocation4 + $0x4d] sm:$0xff] %vm3564_vm7, %v4053_v19  ;;  %v4683_v19 = vld [vmem:[#allocation4 + $0x23] sm:$0xff]  ;;  %v5065_v48 = vld [vmem:[#allocation12 + $0x250] sm:$0xff]  ;;  %4348 = vst [vmem:[#allocation4 + $0x84] sm:$0xf] %v14535_v21 }
 0x5ac   : > { %4109 = vst.msk [vmem:[#allocation4 + $0x60] sm:$0x7] %vm3544_vm5, %v4105_v53  ;;  %5449 = vst [vmem:[#allocation5 + $0x6e] sm:$0x3] %v14535_v21  ;;  %v5245_v53 = vld [vmem:[#allocation12 + $0x2d0] sm:$0xff] }
 0x5ad   : > { %4066 = vst.msk [vmem:[#allocation4 + $0x4d] sm:$0xff] %vm3574_vm9, %v4061_v35  ;;  %v3991_v15 = vpop.permute.xlu1 %3990  ;;  %v4684_v35 = vld [vmem:[#allocation4 + $0x2b] sm:$0xff]  ;;  %6457 = vst [vmem:[#allocation6 + $0x58] sm:$0xff] %v14535_v21 }
 0x5ae   : > { %3996 = vst.msk [vmem:[#allocation4 + $0x42] sm:$0xff] %vm3574_vm9, %v3991_v15  ;;  %v4063_v44 = vpop.permute.xlu0 %4062 }
 0x5b1   : > { %v3993_v42 = vpop.permute.xlu1 %3992 }
 0x5b2   : > { %3997 = vst.msk [vmem:[#allocation4 + $0x4a] sm:$0x7] %vm3576_vm8, %v3993_v42  ;;  %v4131_v2 = vpop.permute.xlu0 %4130  ;;  %v5244_v42 = vld [vmem:[#allocation12 + $0x2c8] sm:$0xff] }
 0x5b5   : > { %v4035_v28 = vpop.permute.xlu1 %4034  ;;  %v4387_v9 = vld [vmem:[#allocation4 + $0x41] sm:$0xff] }
 0x5b6   : > { %v4357_v5 = vld [vmem:[#allocation4 + $0x40] sm:$0xff]  ;;  %4039 = vst.msk [vmem:[#allocation4 + $0x55] sm:$0x7] %vm3544_vm5, %v4035_v28  ;;  %9869 = vmatprep.mubr.f32.mxu0 %v4387_v9  ;;  %v4173_v45 = vpop.permute.xlu0 %4172  ;;  %v5063_v9 = vld [vmem:[#allocation12 + $0x240] sm:$0xff] }
 0x5b7   : > { %9922 = vmatprep.mubr.f32.mxu1 %v4357_v5  ;;  %4178 = vst.msk [vmem:[#allocation4 + $0x63] sm:$0xff] %vm3542_vm4, %v4173_v45  ;;  %v4686_v55 = vld [vmem:[#allocation4 + $0x3b] sm:$0xff]  ;;  %v5243_v5 = vld [vmem:[#allocation12 + $0x2c0] sm:$0xff] }
 0x5b8   : > { %v4866_v15 = vld [vmem:[#allocation4 + $0x3c] sm:$0xff] }
 0x5b9   : > { %v4055_v37 = vpop.permute.xlu1 %4054  ;;  %v4388_v27 = vld [vmem:[#allocation4 + $0x49] sm:$0xff] }
 0x5ba   : > { %v4358_v39 = vld [vmem:[#allocation4 + $0x48] sm:$0xff]  ;;  %4059 = vst.msk [vmem:[#allocation4 + $0x55] sm:$0x7] %vm3566_vm6, %v4055_v37  ;;  %9870 = vmatmul.mubr.f32.gmra.mxu0 %v4388_v27  ;;  %v4193_v59 = vpop.permute.xlu0 %4192  ;;  %v5062_v27 = vld [vmem:[#allocation12 + $0x238] sm:$0xff] }
 0x5bb   : > { %9923 = vmatmul.mubr.f32.gmra.mxu1 %v4358_v39  ;;  %4067 = vst.msk [vmem:[#allocation4 + $0x55] sm:$0x7] %vm3576_vm8, %v4063_v44  ;;  %v5064_v44 = vld [vmem:[#allocation12 + $0x248] sm:$0xff]  ;;  %v4867_v28 = vld [vmem:[#allocation4 + $0x44] sm:$0xff] }
 0x5bc   : > { %4198 = vst.msk [vmem:[#allocation4 + $0x63] sm:$0xff] %vm3564_vm7, %v4193_v59  ;;  %v4688_v45 = vld [vmem:[#allocation4 + $0x4b] sm:$0xff]  ;;  %v5242_v39 = vld [vmem:[#allocation12 + $0x2b8] sm:$0xff] }
 0x5bd   : > { %v4123_v22 = vpop.permute.xlu1 %4122  ;;  %v4868_v37 = vld [vmem:[#allocation4 + $0x4c] sm:$0xff] }
 0x5be   : > { %4128 = vst.msk [vmem:[#allocation4 + $0x58] sm:$0xff] %vm3564_vm7, %v4123_v22  ;;  %v4195_v18 = vpop.permute.xlu0 %4194 }
 0x5bf   : > { %4136 = vst.msk [vmem:[#allocation4 + $0x58] sm:$0xff] %vm3574_vm9, %v4131_v2  ;;  %v4687_v2 = vld [vmem:[#allocation4 + $0x43] sm:$0xff] }
 0x5c1   : > { %v4125_v52 = vpop.permute.xlu1 %4124 }
 0x5c2   : > { %4129 = vst.msk [vmem:[#allocation4 + $0x60] sm:$0x7] %vm3566_vm6, %v4125_v52  ;;  %v4263_v4 = vpop.permute.xlu0 %4262  ;;  %v4359_v26 = vld [vmem:[#allocation4 + $0x50] sm:$0xff]  ;;  %v5241_v52 = vld [vmem:[#allocation12 + $0x2b0] sm:$0xff] }
 0x5c3   : > { %9925 = vmatprep.mubr.f32.mxu1 %v4359_v26 }
 0x5c5   : > { %v4133_v23 = vpop.permute.xlu1 %4132 }
 0x5c6   : > { %4137 = vst.msk [vmem:[#allocation4 + $0x60] sm:$0x7] %vm3576_vm8, %v4133_v23  ;;  %v4271_v0 = vpop.permute.xlu0 %4270  ;;  %v4389_v61 = vld [vmem:[#allocation4 + $0x51] sm:$0xff] }
 0x5c7   : > { %v4360_v46 = vld [vmem:[#allocation4 + $0x58] sm:$0xff]  ;;  %9872 = vmatprep.mubr.f32.mxu0 %v4389_v61  ;;  %v5060_v23 = vld [vmem:[#allocation12 + $0x228] sm:$0xff] }
 0x5c8   : > { %9926 = vmatmul.mubr.f32.gmra.mxu1 %v4360_v46  ;;  %v4689_v59 = vld [vmem:[#allocation4 + $0x53] sm:$0xff] }
 0x5c9   : > { %v4175_v29 = vpop.permute.xlu1 %4174  ;;  %v4869_v22 = vld [vmem:[#allocation4 + $0x54] sm:$0xff] }
 0x5ca   : > { %4179 = vst.msk [vmem:[#allocation4 + $0x6b] sm:$0x7] %vm3544_vm5, %v4175_v29  ;;  %v4265_v24 = vpop.permute.xlu0 %4264  ;;  %v5059_v29 = vld [vmem:[#allocation12 + $0x220] sm:$0xff] }
 0x5cb   : > { %4199 = vst.msk [vmem:[#allocation4 + $0x6b] sm:$0x7] %vm3566_vm6, %v4195_v18  ;;  %v5061_v18 = vld [vmem:[#allocation12 + $0x230] sm:$0xff] }
 0x5cd   : > { %v4243_v30 = vpop.permute.xlu1 %4242  ;;  %v4390_v32 = vld [vmem:[#allocation4 + $0x59] sm:$0xff] }
 0x5ce   : > { %4248 = vst.msk [vmem:[#allocation4 + $0x6e] sm:$0xff] %vm3542_vm4, %v4243_v30  ;;  %9873 = vmatmul.mubr.f32.gmra.mxu0 %v4390_v32  ;;  %v4313_v14 = vpop.permute.xlu0 %4312 }
 0x5cf   : > { %4268 = vst.msk [vmem:[#allocation4 + $0x6e] sm:$0xff] %vm3564_vm7, %v4263_v4  ;;  %v4690_v4 = vld [vmem:[#allocation4 + $0x5b] sm:$0xff] }
 0x5d0   : > { %4318 = vst.msk [vmem:[#allocation4 + $0x79] sm:$0xff] %vm3542_vm4, %v4313_v14  ;;  %v5058_v14 = vld [vmem:[#allocation12 + $0x218] sm:$0xff] }
 0x5d1   : > { %4276 = vst.msk [vmem:[#allocation4 + $0x6e] sm:$0xff] %vm3574_vm9, %v4271_v0  ;;  %v4201_v43 = vpop.permute.xlu1 %4200  ;;  %v5240_v0 = vld [vmem:[#allocation12 + $0x2a8] sm:$0xff] }
 0x5d2   : > { %4206 = vst.msk [vmem:[#allocation4 + $0x63] sm:$0xff] %vm3574_vm9, %v4201_v43  ;;  %v4341_v56 = vpop.permute.xlu0 %4340  ;;  %v5238_v43 = vld [vmem:[#allocation12 + $0x298] sm:$0xff] }
 0x5d5   : > { %v4203_v20 = vpop.permute.xlu1 %4202 }
 0x5d6   : > { %4207 = vst.msk [vmem:[#allocation4 + $0x6b] sm:$0x7] %vm3576_vm8, %v4203_v20  ;;  %v4325_v17 = vpop.permute.xlu0 %4324 }
 0x5d7   : > { %v13663_v47 = vmax.f32 %v13584_v49, %v4325_v17  ;;  %v4680_v49 = vld [vmem:[#allocation4 + $0xb] sm:$0xff]  ;;  %v5057_v17 = vld [vmem:[#allocation12 + $0x210] sm:$0xff] }
 0x5d9   : > { %v4245_v60 = vpop.permute.xlu1 %4244  ;;  %v4391_v54 = vld [vmem:[#allocation4 + $0x61] sm:$0xff]  ;;  %4334 = vrot.lane.b32.xlu0 %v13663_v47, %s11276_s24  ;;  %s14577_s24 = sld [smem:[#allocation32_spill]] }
 0x5da   : > { %v4361_v57 = vld [vmem:[#allocation4 + $0x60] sm:$0xff]  ;;  %4249 = vst.msk [vmem:[#allocation4 + $0x76] sm:$0x7] %vm3544_vm5, %v4245_v60  ;;  %9875 = vmatprep.mubr.f32.mxu0 %v4391_v54  ;;  %v5040_v60 = vld [vmem:[#allocation4 + $0x16] sm:$0xff] }
 0x5db   : > { %9928 = vmatprep.mubr.f32.mxu1 %v4361_v57  ;;  %4269 = vst.msk [vmem:[#allocation4 + $0x76] sm:$0x7] %vm3566_vm6, %v4265_v24  ;;  %v4870_v26 = vld [vmem:[#allocation4 + $0x5c] sm:$0xff]  ;;  %v5239_v24 = vld [vmem:[#allocation12 + $0x2a0] sm:$0xff]  ;;  %v5056_v57 = vld [vmem:[#allocation12 + $0x208] sm:$0xff] }
 0x5dc   : > { %v4691_v61 = vld [vmem:[#allocation4 + $0x63] sm:$0xff]  ;;  %v5220_v54 = vld [vmem:[#allocation4 + $0x17] sm:$0xff] }
 0x5dd   : > { %v4273_v13 = vpop.permute.xlu1 %4272  ;;  %v4392_v6 = vld [vmem:[#allocation4 + $0x69] sm:$0x3f] }
 0x5de   : > { %v4362_v25 = vld [vmem:[#allocation4 + $0x68] sm:$0x3f]  ;;  %4277 = vst.msk [vmem:[#allocation4 + $0x76] sm:$0x7] %vm3576_vm8, %v4273_v13  ;;  %9876 = vmatmul.mubr.f32.gmra.mxu0 %v4392_v6  ;;  %v5236_v13 = vld [vmem:[#allocation12 + $0x288] sm:$0xff] }
 0x5df   : > { %9929 = vmatmul.mubr.f32.gmra.mxu1 %v4362_v25  ;;  %9963 = vmatprep.mubr.f32.mxu0 %v4680_v49  ;;  %v4871_v46 = vld [vmem:[#allocation4 + $0x64] sm:$0xff]  ;;  %v4872_v32 = vld [vmem:[#allocation4 + $0x6c] sm:$0xff] }
 0x5e0   : > { %10016 = vmatprep.mubr.f32.mxu1 %v4860_v40  ;;  %v4692_v30 = vld [vmem:[#allocation4 + $0x6b] sm:$0xff]  ;;  %v5041_v49 = vld [vmem:[#allocation4 + $0x1e] sm:$0xff] }
 0x5e1   : > { %v4333_v11 = vpop.permute.xlu1 %4332  ;;  %v5055_v6 = vld [vmem:[#allocation12 + $0x200] sm:$0xff]  ;;  %v5221_v40 = vld [vmem:[#allocation4 + $0x1f] sm:$0xff] }
 0x5e2   : > { %4338 = vst.msk [vmem:[#allocation4 + $0x79] sm:$0xff] %vm3564_vm7, %v4333_v11  ;;  %9964 = vmatmul.mubr.f32.vlgmr.msra.gmra.mxu0 %v4681_v63  ;;  %v5235_v25 = vld [vmem:[#allocation12 + $0x280] sm:$0xff] }
 0x5e3   : > { %10017 = vmatmul.mubr.f32.vlgmr.msra.gmra.mxu1 %v4861_v34  ;;  %4346 = vst.msk [vmem:[#allocation4 + $0x79] sm:$0xff] %vm3574_vm9, %v4341_v56  ;;  %10038 = vmatpush3.msra.mxu0 %v13622_v10  ;;  %v5067_v10 = vld [vmem:[#allocation12 + $0x260] sm:$0xff] }
 0x5e4   : > { %10091 = vmatpush3.msra.mxu1 %v13625_v58  ;;  %9966 = vmatprep.mubr.f32.mxu0 %v4682_v33  ;;  %v5247_v58 = vld [vmem:[#allocation12 + $0x2e0] sm:$0xff]  ;;  %v5224_v33 = vld [vmem:[#allocation4 + $0x37] sm:$0xff] }
 0x5e5   : > { %10019 = vmatprep.mubr.f32.mxu1 %v4862_v50  ;;  %10039 = vmatprep.subr.mxu0 %v5069_v62  ;;  %v4303_v41 = vpop.permute.xlu1 %4302  ;;  %v4693_v56 = vld [vmem:[#allocation4 + $0x73] sm:$0x3f]  ;;  %v5042_v11 = vld [vmem:[#allocation4 + $0x26] sm:$0xff]  ;;  %v5045_v50 = vld [vmem:[#allocation4 + $0x3e] sm:$0xff] }
 0x5e6   : > { %10092 = vmatprep.subr.mxu1 %v5249_v12  ;;  %10040 = vmatpush3.msra.mxu0 %v5069_v62  ;;  %v4307_v1 = vmax.f32 %v13599_v16, %v4303_v41  ;;  %v5246_v16 = vld [vmem:[#allocation12 + $0x2d8] sm:$0xff]  ;;  %v5043_v34 = vld [vmem:[#allocation4 + $0x2e] sm:$0xff] }
 0x5e7   : > { %10093 = vmatpush3.msra.mxu1 %v5249_v12  ;;  %10041 = vmatprep.subr.mxu0 %v5068_v31  ;;  %v5222_v63 = vld [vmem:[#allocation4 + $0x27] sm:$0xff]  ;;  %v5223_v62 = vld [vmem:[#allocation4 + $0x2f] sm:$0xff] }
 0x5e8   : > { %10094 = vmatprep.subr.mxu1 %v5248_v36  ;;  %4309 = vst.msk [vmem:[#allocation4 + $0x81] sm:$0x7] %vm3532_vm3, %v4307_v1  ;;  %9967 = vmatmul.mubr.f32.gmra.mxu0 %v4683_v19  ;;  %v5044_v12 = vld [vmem:[#allocation4 + $0x36] sm:$0xff]  ;;  %v5226_v41 = vld [vmem:[#allocation4 + $0x47] sm:$0xff] }
 0x5e9   : > { %10020 = vmatmul.mubr.f32.gmra.mxu1 %v4863_v38  ;;  %10042 = vmatpush3.msra.mxu0 %v5068_v31  ;;  %v5225_v31 = vld [vmem:[#allocation4 + $0x3f] sm:$0xff]  ;;  %v5227_v19 = vld [vmem:[#allocation4 + $0x4f] sm:$0xff] }
 0x5ea   : > { %10095 = vmatpush3.msra.mxu1 %v5248_v36  ;;  %9969 = vmatprep.mubr.f32.mxu0 %v4684_v35  ;;  %v4873_v20 = vld [vmem:[#allocation4 + $0x74] sm:$0x3f]  ;;  %v5046_v36 = vld [vmem:[#allocation4 + $0x46] sm:$0xff] }
 0x5eb   : > { %10022 = vmatprep.mubr.f32.mxu1 %v4864_v8  ;;  %10043 = vmatprep.subr.mxu0 %v5067_v10  ;;  %v5048_v38 = vld [vmem:[#allocation4 + $0x56] sm:$0xff]  ;;  %v5229_v35 = vld [vmem:[#allocation4 + $0x5f] sm:$0xff] }
 0x5ec   : > { %10096 = vmatprep.subr.mxu1 %v5247_v58  ;;  %4314 = vrot.lane.b32.xlu1 %v4307_v1, %s11275_s0  ;;  %v5047_v1 = vld [vmem:[#allocation4 + $0x4e] sm:$0xff]  ;;  %v5050_v8 = vld [vmem:[#allocation4 + $0x66] sm:$0xff] }
 0x5ed   : > { %10044 = vmatpush3.msra.mxu0 %v5067_v10  ;;  %10097 = vmatpush3.msra.mxu1 %v5247_v58  ;;  %v5228_v10 = vld [vmem:[#allocation4 + $0x57] sm:$0xff] }
 0x5ee   : > { %10045 = vmatprep.subr.mxu0 %v5066_v3  ;;  %10098 = vmatprep.subr.mxu1 %v5246_v16  ;;  %v5049_v58 = vld [vmem:[#allocation4 + $0x5e] sm:$0xff] }
 0x5ef   : > { %9970 = vmatmul.mubr.f32.gmra.mxu0 %v4685_v7  ;;  %10023 = vmatmul.mubr.f32.gmra.mxu1 %v4865_v51  ;;  %v5231_v7 = vld [vmem:[#allocation4 + $0x6f] sm:$0xff] }
 0x5f0   : > { %10046 = vmatpush3.msra.mxu0 %v5066_v3  ;;  %10099 = vmatpush3.msra.mxu1 %v5246_v16  ;;  %v5230_v3 = vld [vmem:[#allocation4 + $0x67] sm:$0xff]  ;;  %v5052_v51 = vld [vmem:[#allocation4 + $0x76] sm:$0xff] }
 0x5f1   : > { %9972 = vmatprep.mubr.f32.mxu0 %v4686_v55  ;;  %10025 = vmatprep.mubr.f32.mxu1 %v4866_v15  ;;  %v5051_v16 = vld [vmem:[#allocation4 + $0x6e] sm:$0xff]  ;;  %v5476_v55 = vld [vmem:[#allocation14 + $0x78] sm:$0xff] }
 0x5f2   : > { %10047 = vmatprep.subr.mxu0 %v5065_v48  ;;  %10100 = vmatprep.subr.mxu1 %v5245_v53  ;;  %v5474_v15 = vld [vmem:[#allocation14 + $0x68] sm:$0xff] }
 0x5f3   : > { %10048 = vmatpush3.msra.mxu0 %v5065_v48  ;;  %10101 = vmatpush3.msra.mxu1 %v5245_v53  ;;  %v5232_v48 = vld [vmem:[#allocation4 + $0x77] sm:$0xff] }
 0x5f4   : > { %4342 = vrot.lane.b32.xlu1 %v13663_v47, %s11277_s16  ;;  %10049 = vmatprep.subr.mxu0 %v5064_v44  ;;  %v5237_v47 = vld [vmem:[#allocation12 + $0x290] sm:$0xff] }
 0x5f5   : > { %10102 = vmatprep.subr.mxu1 %v5244_v42  ;;  %9973 = vmatmul.mubr.f32.gmra.mxu0 %v4687_v2  ;;  %v5475_v53 = vld [vmem:[#allocation14 + $0x70] sm:$0xff]  ;;  %v5472_v2 = vld [vmem:[#allocation14 + $0x58] sm:$0xff] }
 0x5f6   : > { %10026 = vmatmul.mubr.f32.gmra.mxu1 %v4867_v28  ;;  %10050 = vmatpush3.msra.mxu0 %v5064_v44  ;;  %v5504_v44 = vld [vmem:[#allocation14 + $0xf8] sm:$0xff]  ;;  %v5503_v28 = vld [vmem:[#allocation14 + $0xf0] sm:$0xff] }
 0x5f7   : > { %10103 = vmatpush3.msra.mxu1 %v5244_v42  ;;  %9975 = vmatprep.mubr.f32.mxu0 %v4688_v45  ;;  %v5473_v42 = vld [vmem:[#allocation14 + $0x60] sm:$0xff]  ;;  %v5470_v45 = vld [vmem:[#allocation14 + $0x48] sm:$0xff] }
 0x5f8   : > { %10028 = vmatprep.mubr.f32.mxu1 %v4868_v37  ;;  %10051 = vmatprep.subr.mxu0 %v5063_v9  ;;  %v5501_v37 = vld [vmem:[#allocation14 + $0xe0] sm:$0xff] }
 0x5f9   : > { %10104 = vmatprep.subr.mxu1 %v5243_v5  ;;  %10052 = vmatpush3.msra.mxu0 %v5063_v9  ;;  %v5471_v9 = vld [vmem:[#allocation14 + $0x50] sm:$0xff] }
 0x5fa   : > { %10105 = vmatpush3.msra.mxu1 %v5243_v5  ;;  %10053 = vmatprep.subr.mxu0 %v5062_v27  ;;  %v5502_v5 = vld [vmem:[#allocation14 + $0xe8] sm:$0xff] }
 0x5fb   : > { %10106 = vmatprep.subr.mxu1 %v5242_v39  ;;  %9976 = vmatmul.mubr.f32.gmra.mxu0 %v4689_v59  ;;  %v5468_v59 = vld [vmem:[#allocation14 + $0x38] sm:$0xff] }
 0x5fc   : > { %10029 = vmatmul.mubr.f32.gmra.mxu1 %v4869_v22  ;;  %10054 = vmatpush3.msra.mxu0 %v5062_v27  ;;  %v5469_v27 = vld [vmem:[#allocation14 + $0x40] sm:$0xff]  ;;  %v5499_v22 = vld [vmem:[#allocation14 + $0xd0] sm:$0xff] }
 0x5fd   : > { %10107 = vmatpush3.msra.mxu1 %v5242_v39  ;;  %9978 = vmatprep.mubr.f32.mxu0 %v4690_v4  ;;  %v5500_v39 = vld [vmem:[#allocation14 + $0xd8] sm:$0xff]  ;;  %v5466_v4 = vld [vmem:[#allocation14 + $0x28] sm:$0xff] }
 0x5fe   : > { %10031 = vmatprep.mubr.f32.mxu1 %v4870_v26  ;;  %10055 = vmatprep.subr.mxu0 %v5061_v18  ;;  %v5497_v26 = vld [vmem:[#allocation14 + $0xc0] sm:$0xff] }
 0x5ff   : > { %10108 = vmatprep.subr.mxu1 %v5241_v52  ;;  %10056 = vmatpush3.msra.mxu0 %v5061_v18  ;;  %v5467_v18 = vld [vmem:[#allocation14 + $0x30] sm:$0xff] }
 0x600   : > { %10109 = vmatpush3.msra.mxu1 %v5241_v52  ;;  %10057 = vmatprep.subr.mxu0 %v5060_v23  ;;  %v5498_v52 = vld [vmem:[#allocation14 + $0xc8] sm:$0xff] }
 0x601   : > { %10110 = vmatprep.subr.mxu1 %v5240_v0  ;;  %9979 = vmatmul.mubr.f32.gmra.mxu0 %v4691_v61  ;;  %v5464_v61 = vld [vmem:[#allocation14 + $0x18] sm:$0xff] }
 0x602   : > { %10032 = vmatmul.mubr.f32.gmra.mxu1 %v4871_v46  ;;  %10058 = vmatpush3.msra.mxu0 %v5060_v23  ;;  %v5465_v23 = vld [vmem:[#allocation14 + $0x20] sm:$0xff]  ;;  %v5495_v46 = vld [vmem:[#allocation14 + $0xb0] sm:$0xff] }
 0x603   : > { %10111 = vmatpush3.msra.mxu1 %v5240_v0  ;;  %9981 = vmatprep.mubr.f32.mxu0 %v4692_v30  ;;  %v5496_v0 = vld [vmem:[#allocation14 + $0xb8] sm:$0xff]  ;;  %v5462_v30 = vld [vmem:[#allocation14 + $0x8] sm:$0xff] }
 0x604   : > { %10034 = vmatprep.mubr.f32.mxu1 %v4872_v32  ;;  %10059 = vmatprep.subr.mxu0 %v5059_v29  ;;  %v5493_v32 = vld [vmem:[#allocation14 + $0xa0] sm:$0xff] }
 0x605   : > { %10112 = vmatprep.subr.mxu1 %v5239_v24  ;;  %10060 = vmatpush3.msra.mxu0 %v5059_v29  ;;  %v5463_v29 = vld [vmem:[#allocation14 + $0x10] sm:$0xff] }
 0x606   : > { %10113 = vmatpush3.msra.mxu1 %v5239_v24  ;;  %10061 = vmatprep.subr.mxu0 %v5058_v14  ;;  %v5494_v24 = vld [vmem:[#allocation14 + $0xa8] sm:$0xff] }
 0x607   : > { %10114 = vmatprep.subr.mxu1 %v5238_v43  ;;  %9982 = vmatmul.mubr.f32.gmra.mxu0 %v4693_v56 }
 0x608   : > { %10035 = vmatmul.mubr.f32.gmra.mxu1 %v4873_v20  ;;  %10062 = vmatpush3.msra.mxu0 %v5058_v14  ;;  %v5461_v14 = vld [vmem:[#allocation14] sm:$0xff]  ;;  %v5491_v20 = vld [vmem:[#allocation14 + $0x90] sm:$0xff] }
 0x609   : > { %10115 = vmatpush3.msra.mxu1 %v5238_v43  ;;  %10063 = vmatprep.subr.mxu0 %v5057_v17  ;;  %v5492_v43 = vld [vmem:[#allocation14 + $0x98] sm:$0xff] }
 0x60a   : > { %10069 = vmatprep.mubr.f32.mxu0 %v5040_v60  ;;  %10116 = vmatprep.subr.mxu1 %v5237_v47  ;;  %v5489_v60 = vld [vmem:[#allocation14 + $0x80] sm:$0xff] }
 0x60b   : > { %10122 = vmatprep.mubr.f32.mxu1 %v5220_v54  ;;  %10064 = vmatpush3.msra.mxu0 %v5057_v17 }
 0x60c   : > { %10117 = vmatpush3.msra.mxu1 %v5237_v47  ;;  %10065 = vmatprep.subr.mxu0 %v5056_v57  ;;  %v5490_v47 = vld [vmem:[#allocation14 + $0x88] sm:$0xff] }
 0x60d   : > { %10118 = vmatprep.subr.mxu1 %v5236_v13  ;;  %10066 = vmatpush3.msra.mxu0 %v5056_v57 }
 0x60e   : > { %10119 = vmatpush3.msra.mxu1 %v5236_v13  ;;  %10067 = vmatprep.subr.mxu0 %v5055_v6 }
 0x60f   : > { %10120 = vmatprep.subr.mxu1 %v5235_v25  ;;  %10068 = vmatpush3.msra.mxu0 %v5055_v6 }
 0x610   : > { %10121 = vmatpush3.msra.mxu1 %v5235_v25  ;;  %10070 = vmatmul.mubr.f32.vlgmr.msra.gmra.mxu0 %v5041_v49 }
 0x611   : > { %10123 = vmatmul.mubr.f32.vlgmr.msra.gmra.mxu1 %v5221_v40  ;;  %10072 = vmatprep.mubr.f32.mxu0 %v5042_v11 }
 0x612   : > { %10125 = vmatprep.mubr.f32.mxu1 %v5222_v63  ;;  %10143 = vmatprep.subr.mxu0 %v14535_v21 }
 0x613   : > { %10208 = vmatprep.subr.mxu1 %v14535_v21  ;;  %10144 = vmatpush3.msra.mxu0 %v5504_v44 }
 0x614   : > { %10073 = vmatmul.mubr.f32.gmra.mxu0 %v5043_v34  ;;  %10209 = vmatpush3.msra.mxu1 %v5476_v55 }
 0x615   : > { %10126 = vmatmul.mubr.f32.gmra.mxu1 %v5223_v62  ;;  %10075 = vmatprep.mubr.f32.mxu0 %v5044_v12 }
 0x616   : > { %10128 = vmatprep.mubr.f32.mxu1 %v5224_v33  ;;  %10210 = vmatprep.subr.mxu1 %v14535_v21 }
 0x617   : > { %10211 = vmatpush3.msra.mxu1 %v5475_v53  ;;  %10145 = vmatprep.subr.mxu0 %v14535_v21 }
 0x618   : > { %10076 = vmatmul.mubr.f32.gmra.mxu0 %v5045_v50  ;;  %10212 = vmatprep.subr.mxu1 %v14535_v21 }
 0x619   : > { %10129 = vmatmul.mubr.f32.gmra.mxu1 %v5225_v31  ;;  %10078 = vmatprep.mubr.f32.mxu0 %v5046_v36 }
 0x61a   : > { %10131 = vmatprep.mubr.f32.mxu1 %v5226_v41  ;;  %10213 = vmatpush3.msra.mxu1 %v5474_v15 }
 0x61b   : > { %10214 = vmatprep.subr.mxu1 %v14535_v21  ;;  %10146 = vmatpush3.msra.mxu0 %v5503_v28 }
 0x61c   : > { %10079 = vmatmul.mubr.f32.gmra.mxu0 %v5047_v1  ;;  %10215 = vmatpush3.msra.mxu1 %v5473_v42 }
 0x61d   : > { %10132 = vmatmul.mubr.f32.gmra.mxu1 %v5227_v19  ;;  %10081 = vmatprep.mubr.f32.mxu0 %v5048_v38 }
 0x61e   : > { %10134 = vmatprep.mubr.f32.mxu1 %v5228_v10  ;;  %10216 = vmatprep.subr.mxu1 %v14535_v21 }
 0x61f   : > { %10217 = vmatpush3.msra.mxu1 %v5472_v2  ;;  %10147 = vmatprep.subr.mxu0 %v14535_v21 }
 0x620   : > { %10082 = vmatmul.mubr.f32.gmra.mxu0 %v5049_v58  ;;  %10218 = vmatprep.subr.mxu1 %v14535_v21 }
 0x621   : > { %10135 = vmatmul.mubr.f32.gmra.mxu1 %v5229_v35  ;;  %10084 = vmatprep.mubr.f32.mxu0 %v5050_v8 }
 0x622   : > { %10137 = vmatprep.mubr.f32.mxu1 %v5230_v3  ;;  %10219 = vmatpush3.msra.mxu1 %v5471_v9 }
 0x623   : > { %10148 = vmatpush3.msra.mxu0 %v5502_v5  ;;  %10220 = vmatprep.subr.mxu1 %v14535_v21 }
 0x624   : > { %10085 = vmatmul.mubr.f32.gmra.mxu0 %v5051_v16  ;;  %10149 = vmatprep.subr.mxu0 %v14535_v21 }
 0x625   : > { %10138 = vmatmul.mubr.f32.gmra.mxu1 %v5231_v7  ;;  %10087 = vmatprep.mubr.f32.mxu0 %v5052_v51 }
 0x626   : > { %10140 = vmatprep.mubr.f32.mxu1 %v5232_v48  ;;  %10221 = vmatpush3.msra.mxu1 %v5470_v45 }
 0x627   : > { %10222 = vmatprep.subr.mxu1 %v14535_v21  ;;  %10150 = vmatpush3.msra.mxu0 %v5501_v37 }
 0x628   : > { %10223 = vmatpush3.msra.mxu1 %v5469_v27  ;;  %10151 = vmatprep.subr.mxu0 %v14535_v21 }
 0x629   : > { %10224 = vmatprep.subr.mxu1 %v14535_v21  ;;  %10152 = vmatpush3.msra.mxu0 %v5500_v39 }
 0x62a   : > { %10225 = vmatpush3.msra.mxu1 %v5468_v59  ;;  %10153 = vmatprep.subr.mxu0 %v14535_v21 }
 0x62b   : > { %10226 = vmatprep.subr.mxu1 %v14535_v21  ;;  %10154 = vmatpush3.msra.mxu0 %v5499_v22 }
 0x62c   : > { %10227 = vmatpush3.msra.mxu1 %v5467_v18  ;;  %10155 = vmatprep.subr.mxu0 %v14535_v21 }
 0x62d   : > { %10228 = vmatprep.subr.mxu1 %v14535_v21  ;;  %10156 = vmatpush3.msra.mxu0 %v5498_v52 }
 0x62e   : > { %10229 = vmatpush3.msra.mxu1 %v5466_v4  ;;  %10157 = vmatprep.subr.mxu0 %v14535_v21 }
 0x62f   : > { %10230 = vmatprep.subr.mxu1 %v14535_v21  ;;  %10158 = vmatpush3.msra.mxu0 %v5497_v26 }
 0x630   : > { %10231 = vmatpush3.msra.mxu1 %v5465_v23  ;;  %10159 = vmatprep.subr.mxu0 %v14535_v21 }
 0x631   : > { %10232 = vmatprep.subr.mxu1 %v14535_v21  ;;  %10160 = vmatpush3.msra.mxu0 %v5496_v0 }
 0x632   : > { %10233 = vmatpush3.msra.mxu1 %v5464_v61  ;;  %10161 = vmatprep.subr.mxu0 %v14535_v21  ;;  %v9859_v6 = vpop.f32.mrf.mxu0 }
 0x633   : > { %10234 = vmatprep.subr.mxu1 %v14535_v21  ;;  %10162 = vmatpush3.msra.mxu0 %v5495_v46  ;;  %v9912_v25 = vpop.f32.mrf.mxu1 }
 0x634   : > { %10235 = vmatpush3.msra.mxu1 %v5463_v29  ;;  %10163 = vmatprep.subr.mxu0 %v14535_v21  ;;  %v4476_v49 = vpop.f32.mrf.mxu0 }
 0x635   : > { %10236 = vmatprep.subr.mxu1 %v14535_v21  ;;  %10164 = vmatpush3.msra.mxu0 %v5494_v24  ;;  %v4611_v40 = vpop.f32.mrf.mxu1 }
 0x636   : > { %10237 = vmatpush3.msra.mxu1 %v5462_v30  ;;  %10165 = vmatprep.subr.mxu0 %v14535_v21 }
 0x637   : > { %10238 = vmatprep.subr.mxu1 %v14535_v21  ;;  %10166 = vmatpush3.msra.mxu0 %v5493_v32 }
 0x638   : > { %10239 = vmatpush3.msra.mxu1 %v5461_v14  ;;  %10167 = vmatprep.subr.mxu0 %v14535_v21 }
 0x639   : > { %10338 = vmatprep.subr.mxu1 %v14535_v21  ;;  %10168 = vmatpush3.msra.mxu0 %v5492_v43 }
 0x63a   : > { %10169 = vmatprep.subr.mxu0 %v14535_v21 }
 0x63b   : > { %10170 = vmatpush3.msra.mxu0 %v5491_v20 }
 0x63c   : > { %10171 = vmatprep.subr.mxu0 %v14535_v21 }
 0x63d   : > { %10172 = vmatpush3.msra.mxu0 %v5490_v47  ;;  %v4612_v47 = vadd.f32 %v4611_v40, %v4476_v49  ;;  %v13783_v49 = vld [vmem:[%s14519_s8] ss:$0 sm:$0xff] }
 0x63e   : > { %10173 = vmatprep.subr.mxu0 %v14535_v21 }
 0x63f   : > { %10174 = vmatpush3.msra.mxu0 %v5489_v60 }
 0x640   : > { %10273 = vmatprep.subr.mxu0 %v14535_v21 }
 0x646   : > { %v9862_v11 = vpop.f32.mrf.mxu0 }
 0x647   : > { %v9915_v63 = vpop.f32.mrf.mxu1 }
 0x648   : > { %v4486_v34 = vpop.f32.mrf.mxu0 }
 0x649   : > { %v4621_v62 = vpop.f32.mrf.mxu1 }
 0x64b   : > { %v4335_v56 = vpop.permute.xlu0 %4334 }
 0x656   : > { %v9865_v12 = vpop.f32.mrf.mxu0 }
 0x657   : > { %v9918_v33 = vpop.f32.mrf.mxu1 }
 0x658   : > { %v13723_v50 = vpop.f32.mrf.mxu0 }
 0x659   : > { %v4631_v31 = vpop.f32.mrf.mxu1 }
 0x65e   : > { %v4315_v17 = vpop.permute.xlu1 %4314 }
 0x65f   : > { %4319 = vst.msk [vmem:[#allocation4 + $0x81] sm:$0x7] %vm3544_vm5, %v4315_v17 }
 0x660   : > { %4339 = vst.msk [vmem:[#allocation4 + $0x81] sm:$0x7] %vm3566_vm6, %v4335_v56  ;;  %v4617_v56 = vadd.f32 %v9912_v25, %v9859_v6  ;;  %v4632_v25 = vadd.f32 %v4631_v31, %v13723_v50 }
 0x666   : > { %v4343_v54 = vpop.permute.xlu1 %4342 }
 0x667   : > { %4347 = vst.msk [vmem:[#allocation4 + $0x81] sm:$0x7] %vm3576_vm8, %v4343_v54  ;;  %v4627_v54 = vadd.f32 %v9915_v63, %v9862_v11 }
 0x66a   : > { %v13725_v36 = vpop.f32.mrf.mxu0 }
 0x66b   : > { %v13727_v41 = vpop.f32.mrf.mxu1 }
 0x66c   : > { %v13729_v1 = vpop.f32.mrf.mxu0 }
 0x66d   : > { %v13731_v19 = vpop.f32.mrf.mxu1 }
 0x66e   : > { %v5053_v57 = vld [vmem:[#allocation4 + $0x7e] sm:$0x3f] }
 0x66f   : > { %v5233_v13 = vld [vmem:[#allocation4 + $0x7f] sm:$0x3f]  ;;  %10088 = vmatmul.mubr.f32.gmra.mxu0 %v5053_v57 }
 0x670   : > { %10141 = vmatmul.mubr.f32.gmra.mxu1 %v5233_v13  ;;  %10175 = vmatprep.mubr.msk.f32.mxu0 %vm11279_vm10, %v14535_v21 }
 0x671   : > { %10240 = vmatprep.mubr.msk.f32.mxu1 %vm11279_vm10, %v14535_v21 }
 0x67a   : > { %v13733_v38 = vpop.f32.mrf.mxu0 }
 0x67b   : > { %v13735_v10 = vpop.f32.mrf.mxu1 }
 0x67c   : > { %v13737_v58 = vpop.f32.mrf.mxu0 }
 0x67d   : > { %v13739_v35 = vpop.f32.mrf.mxu1 }
 0x688   : > { %v13741_v8 = vpop.f32.mrf.mxu1 }
 0x68a   : > { %v13745_v16 = vpop.f32.mrf.mxu1 }
 0x68e   : > { %v13743_v3 = vpop.f32.mrf.mxu0 }
 0x690   : > { %v13747_v7 = vpop.f32.mrf.mxu0 }
 0x69e   : > { %v9877_v51 = vpop.f32.mrf.mxu0 }
 0x69f   : > { %v9930_v48 = vpop.f32.mrf.mxu1 }
 0x6a0   : > { %v4677_v55 = vadd.f32 %v9930_v48, %v9877_v51  ;;  %v13749_v53 = vpop.f32.mrf.mxu0  ;;  %v4622_v48 = vadd.f32 %v4621_v62, %v4486_v34 }
 0x6a1   : > { %14565 = vst [vmem:[#allocation21_spill] sm:$0xff] %v13749_v53  ;;  %v13751_v15 = vpop.f32.mrf.mxu1  ;;  %v4637_v53 = vadd.f32 %v9918_v33, %v9865_v12  ;;  %v4647_v12 = vadd.f32 %v13727_v41, %v13725_v36  ;;  %v4657_v41 = vadd.f32 %v13735_v10, %v13733_v38 }
 0x6a2   : > { %14566 = vst [vmem:[#allocation22_spill] sm:$0xff] %v13751_v15  ;;  %v9965_v44 = vpop.f32.mrf.mxu0 }
 0x6a3   : > { %v10018_v42 = vpop.f32.mrf.mxu1  ;;  %v4847_v60 = vadd.f32 %v9965_v44, %v4617_v56  ;;  %v4652_v56 = vadd.f32 %v13739_v35, %v13737_v58 }
 0x6a4   : > { %v4777_v2 = vpop.f32.mrf.mxu0 }
 0x6a5   : > { %v4957_v28 = vpop.f32.mrf.mxu1  ;;  %v4846_v57 = vadd.f32 %v4777_v2, %v4612_v47  ;;  %v5027_v21 = vadd.f32 %v10018_v42, %v4847_v60  ;;  %v4642_v2 = vadd.f32 %v13731_v19, %v13729_v1 }
 0x6a8   : > { %v9968_v9 = vpop.f32.mrf.mxu0 }
 0x6a9   : > { %v10021_v5 = vpop.f32.mrf.mxu1  ;;  %v4849_v15 = vadd.f32 %v9968_v9, %v4627_v54 }
 0x6aa   : > { %v4787_v45 = vpop.f32.mrf.mxu0 }
 0x6ab   : > { %v4967_v37 = vpop.f32.mrf.mxu1  ;;  %v5029_v63 = vadd.f32 %v10021_v5, %v4849_v15 }
 0x6af   : > { %v9971_v27 = vpop.f32.mrf.mxu0  ;;  %v10024_v39 = vpop.f32.mrf.mxu1 }
 0x6b1   : > { %v4797_v59 = vpop.f32.mrf.mxu0  ;;  %v4977_v22 = vpop.f32.mrf.mxu1 }
 0x6b2   : > { %v4850_v33 = vadd.f32 %v4797_v59, %v4632_v25 }
 0x6b5   : > { %v9974_v18 = vpop.f32.mrf.mxu0 }
 0x6b6   : > { %v13753_v52 = vpop.f32.mrf.mxu1  ;;  %v4853_v9 = vadd.f32 %v9974_v18, %v4647_v12  ;;  %v5931_v18 = vld [vmem:[#allocation14 + $0x1f8] sm:$0xff] }
 0x6b7   : > { %v4807_v4 = vpop.f32.mrf.mxu0 }
 0x6b8   : > { %v13755_v26 = vpop.f32.mrf.mxu1  ;;  %v4852_v59 = vadd.f32 %v4807_v4, %v4642_v2 }
 0x6ba   : > { %v5032_v58 = vadd.f32 %v13755_v26, %v4852_v59 }
 0x6bb   : > { %v13757_v23 = vpop.f32.mrf.mxu0 }
 0x6bc   : > { %v13759_v0 = vpop.f32.mrf.mxu1  ;;  %v4855_v47 = vadd.f32 %v13757_v23, %v4657_v41  ;;  %v5927_v41 = vld [vmem:[#allocation14 + $0x1d8] sm:$0xff] }
 0x6bd   : > { %v13761_v61 = vpop.f32.mrf.mxu0 }
 0x6be   : > { %v13763_v46 = vpop.f32.mrf.mxu1  ;;  %v4854_v35 = vadd.f32 %v13761_v61, %v4652_v56  ;;  %v5035_v26 = vadd.f32 %v13759_v0, %v4855_v47  ;;  %v5771_v47 = vld [vmem:[#allocation14 + $0x170] sm:$0xff] }
 0x6c1   : > { %v13765_v29 = vpop.f32.mrf.mxu0 }
 0x6c2   : > { %v13767_v24 = vpop.f32.mrf.mxu1 }
 0x6c3   : > { %14567 = vst [vmem:[#allocation23_spill] sm:$0xff] %v13767_v24  ;;  %v13769_v30 = vpop.f32.mrf.mxu0 }
 0x6c4   : > { %14568 = vst [vmem:[#allocation24_spill] sm:$0xff] %v13769_v30  ;;  %v13771_v32 = vpop.f32.mrf.mxu1  ;;  %v5026_v30 = vadd.f32 %v4957_v28, %v4846_v57  ;;  %v5930_v57 = vld [vmem:[#allocation14 + $0x1f0] sm:$0xff] }
 0x6c5   : > { %14569 = vst [vmem:[#allocation25_spill] sm:$0xff] %v13771_v32 }
 0x6c7   : > { %v9983_v14 = vpop.f32.mrf.mxu0 }
 0x6c8   : > { %v4859_v43 = vadd.f32 %v9983_v14, %v4677_v55  ;;  %v10036_v20 = vpop.f32.mrf.mxu1  ;;  %v4848_v55 = vadd.f32 %v4787_v45, %v4622_v48  ;;  %v4851_v14 = vadd.f32 %v9971_v27, %v4637_v53  ;;  %v4667_v48 = vadd.f32 %v13741_v8, %v13743_v3  ;;  %v5929_v8 = vld [vmem:[#allocation14 + $0x1e8] sm:$0xff] }
 0x6c9   : > { %v13775_v13 = vpop.f32.mrf.mxu0  ;;  %v4662_v3 = vadd.f32 %v13745_v16, %v13747_v7  ;;  %v5034_v16 = vadd.f32 %v13763_v46, %v4854_v35 }
 0x6ca   : > { %v13773_v17 = vadd.f32 %v10036_v20, %v4859_v43  ;;  %v13777_v51 = vpop.f32.mrf.mxu1  ;;  %v5031_v28 = vadd.f32 %v10024_v39, %v4851_v14  ;;  %v5033_v20 = vadd.f32 %v13753_v52, %v4853_v9  ;;  %v4857_v61 = vadd.f32 %v13765_v29, %v4667_v48  ;;  %v14572_v46 = vld [vmem:[#allocation23_spill] sm:$0xff] }
 0x6cb   : > { %v14571_v7 = vld [vmem:[#allocation24_spill] sm:$0xff] }
 0x6cc   : > { %v4856_v0 = vadd.f32 %v14571_v7, %v4662_v3  ;;  %v5037_v2 = vadd.f32 %v14572_v46, %v4857_v61  ;;  %v5925_v3 = vld [vmem:[#allocation14 + $0x1c8] sm:$0xff]  ;;  %v5919_v46 = vld [vmem:[#allocation14 + $0x198] sm:$0xff] }
 0x6d0   : > { %v10071_v24 = vpop.f32.mrf.mxu0 }
 0x6d1   : > { %v10124_v32 = vpop.f32.mrf.mxu1  ;;  %v5207_v6 = vadd.f32 %v10071_v24, %v5027_v21  ;;  %v5028_v21 = vadd.f32 %v4967_v37, %v4848_v55  ;;  %v5030_v37 = vadd.f32 %v4977_v22, %v4850_v33  ;;  %v14570_v55 = vmov 0.0  }
 0x6d2   : > { %v5137_v40 = vpop.f32.mrf.mxu0 }
 0x6d3   : > { %v5317_v11 = vpop.f32.mrf.mxu1  ;;  %v5387_v34 = vadd.f32 %v10124_v32, %v5207_v6  ;;  %v5206_v62 = vadd.f32 %v5137_v40, %v5026_v30 }
 0x6d4   : > { %v10074_v44 = vpop.f32.mrf.mxu0 }
 0x6d5   : > { %v10127_v42 = vpop.f32.mrf.mxu1  ;;  %v5408_v50 = vadd.f32 %v13783_v49, %v5387_v34  ;;  %v5386_v31 = vadd.f32 %v5317_v11, %v5206_v62  ;;  %v5209_v53 = vadd.f32 %v10074_v44, %v5029_v63  ;;  %v5928_v44 = vld [vmem:[#allocation14 + $0x1e0] sm:$0xff] }
 0x6d6   : > { %v5147_v45 = vpop.f32.mrf.mxu0 }
 0x6d7   : > { %v5327_v15 = vpop.f32.mrf.mxu1  ;;  %v5422_v5 = vmax.f32 %v5408_v50, 0.0  ;;  %v5407_v27 = vadd.f32 %v13783_v49, %v5386_v31  ;;  %v5389_v24 = vadd.f32 %v10127_v42, %v5209_v53  ;;  %v5208_v36 = vadd.f32 %v5147_v45, %v5028_v21 }
 0x6d8   : > { %v10077_v30 = vpop.f32.mrf.mxu0 }
 0x6d9   : > { %v10130_v32 = vpop.f32.mrf.mxu1  ;;  %5436 = vst [vmem:[#allocation5 + $0x8] sm:$0xff] %v5422_v5  ;;  %v5421_v43 = vmax.f32 %v5407_v27, 0.0  ;;  %v13794_v1 = vadd.f32 %v13783_v49, %v5389_v24  ;;  %v5388_v19 = vadd.f32 %v5327_v15, %v5208_v36  ;;  %v5211_v39 = vadd.f32 %v10077_v30, %v5031_v28  ;;  %v5772_v15 = vld [vmem:[#allocation14 + $0x178] sm:$0xff] }
 0x6da   : > { %v5157_v38 = vpop.f32.mrf.mxu0 }
 0x6db   : > { %v5337_v10 = vpop.f32.mrf.mxu1  ;;  %5435 = vst [vmem:[#allocation5] sm:$0xff] %v5421_v43  ;;  %v5424_v22 = vmax.f32 %v13794_v1, 0.0  ;;  %v5409_v4 = vadd.f32 %v13783_v49, %v5388_v19  ;;  %v5391_v60 = vadd.f32 %v10130_v32, %v5211_v39  ;;  %v5210_v54 = vadd.f32 %v5157_v38, %v5030_v37  ;;  %10241 = vmatmul.mubr.f32.vlgmr.msra.gmra.mxu1 %v5421_v43  ;;  %v14573_v37 = vld [vmem:[#allocation25_spill] sm:$0xff] }
 0x6dc   : > { %v10080_v52 = vpop.f32.mrf.mxu0  ;;  %10243 = vmatprep.mubr.msk.f32.mxu1 %vm11279_vm10, %v14570_v55  ;;  %10339 = vmatpush3.msra.mxu1 %v5931_v18  ;;  %v5036_v59 = vadd.f32 %v14573_v37, %v4856_v0  ;;  %v5762_v0 = vld [vmem:[#allocation14 + $0x128] sm:$0xff] }
 0x6dd   : > { %v10133_v23 = vpop.f32.mrf.mxu1  ;;  %5438 = vst [vmem:[#allocation5 + $0x18] sm:$0xff] %v5424_v22  ;;  %v5423_v6 = vmax.f32 %v5409_v4, 0.0  ;;  %v13811_v25 = vadd.f32 %v13783_v49, %v5391_v60  ;;  %v5390_v14 = vadd.f32 %v5337_v10, %v5210_v54  ;;  %v5213_v40 = vadd.f32 %v10080_v52, %v5033_v20  ;;  %10340 = vmatprep.subr.mxu1 %v14570_v55  ;;  %v5926_v54 = vld [vmem:[#allocation14 + $0x1d0] sm:$0xff]  ;;  %v5770_v52 = vld [vmem:[#allocation14 + $0x168] sm:$0xff] }
 0x6de   : > { %v5167_v11 = vpop.f32.mrf.mxu0  ;;  %10341 = vmatpush3.msra.mxu1 %v5930_v57 }
 0x6df   : > { %v5347_v63 = vpop.f32.mrf.mxu1  ;;  %5437 = vst [vmem:[#allocation5 + $0x10] sm:$0xff] %v5423_v6  ;;  %v5426_v34 = vmax.f32 %v13811_v25, 0.0  ;;  %v13820_v62 = vadd.f32 %v13783_v49, %v5390_v14  ;;  %v5393_v12 = vadd.f32 %v10133_v23, %v5213_v40  ;;  %v5212_v33 = vadd.f32 %v5167_v11, %v5032_v58  ;;  %10244 = vmatmul.mubr.f32.gmra.mxu1 %v5422_v5  ;;  %v5766_v11 = vld [vmem:[#allocation14 + $0x148] sm:$0xff] }
 0x6e0   : > { %10342 = vmatprep.subr.mxu1 %v14570_v55  ;;  %v10083_v29 = vpop.f32.mrf.mxu0  ;;  %10246 = vmatprep.mubr.msk.f32.mxu1 %vm11279_vm10, %v14570_v55  ;;  %v13893_v25 = vld [vmem:[#allocation6 + $0x58] sm:$0xff] }
 0x6e1   : > { %v10136_v42 = vpop.f32.mrf.mxu1  ;;  %10343 = vmatpush3.msra.mxu1 %v5929_v8  ;;  %5440 = vst [vmem:[#allocation5 + $0x28] sm:$0xff] %v5426_v34  ;;  %v5425_v21 = vmax.f32 %v13820_v62, 0.0  ;;  %v13831_v50 = vadd.f32 %v13783_v49, %v5393_v12  ;;  %v5392_v31 = vadd.f32 %v5347_v63, %v5212_v33  ;;  %v5215_v53 = vadd.f32 %v10083_v29, %v5035_v26  ;;  %v5768_v8 = vld [vmem:[#allocation14 + $0x158] sm:$0xff]  ;;  %v5767_v26 = vld [vmem:[#allocation14 + $0x150] sm:$0xff]  ;;  %v5765_v63 = vld [vmem:[#allocation14 + $0x140] sm:$0xff] }
 0x6e2   : > { %10344 = vmatprep.subr.mxu1 %v14570_v55  ;;  %v5177_v28 = vpop.f32.mrf.mxu0  ;;  %v5477_v45 = vld [vmem:[#allocation5 + $0x1] sm:$0xff]  ;;  %v5923_v12 = vld [vmem:[#allocation14 + $0x1b8] sm:$0xff] }
 0x6e3   : > { %v5357_v9 = vpop.f32.mrf.mxu1  ;;  %10345 = vmatpush3.msra.mxu1 %v5928_v44  ;;  %5439 = vst [vmem:[#allocation5 + $0x20] sm:$0xff] %v5425_v21  ;;  %v5428_v5 = vmax.f32 %v13831_v50, 0.0  ;;  %v13837_v27 = vadd.f32 %v13783_v49, %v5392_v31  ;;  %v5395_v24 = vadd.f32 %v10136_v42, %v5215_v53  ;;  %v5214_v36 = vadd.f32 %v5177_v28, %v5034_v16  ;;  %v5924_v62 = vld [vmem:[#allocation14 + $0x1c0] sm:$0xff]  ;;  %v5763_v44 = vld [vmem:[#allocation14 + $0x130] sm:$0xff]  ;;  %v5921_v29 = vld [vmem:[#allocation14 + $0x1a8] sm:$0xff] }
 0x6e4   : > { %10176 = vmatmul.mubr.f32.vlgmr.msra.gmra.mxu0 %v5477_v45  ;;  %10247 = vmatmul.mubr.f32.gmra.mxu1 %v5423_v6  ;;  %v10086_v30 = vpop.f32.mrf.mxu0  ;;  %v5769_v6 = vld [vmem:[#allocation14 + $0x160] sm:$0xff]  ;;  %v5922_v16 = vld [vmem:[#allocation14 + $0x1b0] sm:$0xff]  ;;  %v5760_v31 = vld [vmem:[#allocation14 + $0x118] sm:$0xff] }
 0x6e5   : > { %v10139_v32 = vpop.f32.mrf.mxu1  ;;  %10178 = vmatprep.mubr.msk.f32.mxu0 %vm11279_vm10, %v14570_v55  ;;  %10249 = vmatprep.mubr.msk.f32.mxu1 %vm11279_vm10, %v14570_v55  ;;  %5442 = vst [vmem:[#allocation5 + $0x38] sm:$0xff] %v5428_v5  ;;  %v5427_v43 = vmax.f32 %v13837_v27, 0.0  ;;  %v13848_v19 = vadd.f32 %v13783_v49, %v5395_v24  ;;  %v5394_v39 = vadd.f32 %v5357_v9, %v5214_v36  ;;  %v5920_v50 = vld [vmem:[#allocation14 + $0x1a0] sm:$0xff]  ;;  %v5918_v28 = vld [vmem:[#allocation14 + $0x190] sm:$0xff]  ;;  %v5758_v45 = vld [vmem:[#allocation14 + $0x108] sm:$0xff] }
 0x6e6   : > { %v5217_v18 = vadd.f32 %v10086_v30, %v5037_v2  ;;  %10274 = vmatpush3.msra.mxu0 %v5772_v15  ;;  %10346 = vmatprep.subr.mxu1 %v14570_v55  ;;  %v5187_v56 = vpop.f32.mrf.mxu0  ;;  %v5478_v20 = vld [vmem:[#allocation5 + $0x9] sm:$0xff]  ;;  %v5479_v1 = vld [vmem:[#allocation5 + $0x11] sm:$0xff]  ;;  %v5916_v27 = vld [vmem:[#allocation14 + $0x180] sm:$0xff] }
 0x6e7   : > { %10275 = vmatprep.subr.mxu0 %v14570_v55  ;;  %10347 = vmatpush3.msra.mxu1 %v5927_v41  ;;  %5441 = vst [vmem:[#allocation5 + $0x30] sm:$0xff] %v5427_v43  ;;  %v5430_v38 = vmax.f32 %v13848_v19, 0.0  ;;  %v13854_v10 = vadd.f32 %v13783_v49, %v5394_v39  ;;  %v5216_v60 = vadd.f32 %v5187_v56, %v5036_v59  ;;  %v5367_v57 = vpop.f32.mrf.mxu1  ;;  %v5759_v2 = vld [vmem:[#allocation14 + $0x110] sm:$0xff]  ;;  %v5917_v15 = vld [vmem:[#allocation14 + $0x188] sm:$0xff]  ;;  %v6090_v41 = vld [vmem:[#allocation14 + $0x278] sm:$0xff] }
 0x6e8   : > { %v5397_v4 = vadd.f32 %v10139_v32, %v5217_v18  ;;  %10179 = vmatmul.mubr.f32.gmra.mxu0 %v5478_v20  ;;  %10250 = vmatmul.mubr.f32.gmra.mxu1 %v5424_v22  ;;  %v5745_v24 = vld [vmem:[#allocation5 + $0xb] sm:$0xff]  ;;  %v5746_v37 = vld [vmem:[#allocation5 + $0x13] sm:$0xff] }
 0x6e9   : > { %10181 = vmatprep.mubr.msk.f32.mxu0 %vm11279_vm10, %v14570_v55  ;;  %10252 = vmatprep.mubr.msk.f32.mxu1 %vm11279_vm10, %v14570_v55  ;;  %5444 = vst [vmem:[#allocation5 + $0x48] sm:$0xff] %v5430_v38  ;;  %v5429_v48 = vmax.f32 %v13854_v10, 0.0  ;;  %v5396_v35 = vadd.f32 %v5367_v57, %v5216_v60  ;;  %v5904_v36 = vld [vmem:[#allocation5 + $0xc] sm:$0xff]  ;;  %v6249_v59 = vld [vmem:[#allocation14 + $0x2f8] sm:$0xff] }
 0x6ea   : > { %v5418_v58 = vadd.f32 %v13783_v49, %v5397_v4  ;;  %10276 = vmatpush3.msra.mxu0 %v5771_v47  ;;  %10348 = vmatprep.subr.mxu1 %v14570_v55  ;;  %v5480_v40 = vld [vmem:[#allocation5 + $0x19] sm:$0xff]  ;;  %v5481_v61 = vld [vmem:[#allocation5 + $0x21] sm:$0xff]  ;;  %v6089_v32 = vld [vmem:[#allocation14 + $0x270] sm:$0xff] }
 0x6eb   : > { %10277 = vmatprep.subr.mxu0 %v14570_v55  ;;  %10349 = vmatpush3.msra.mxu1 %v5926_v54  ;;  %5443 = vst [vmem:[#allocation5 + $0x40] sm:$0xff] %v5429_v48  ;;  %v13871_v23 = vadd.f32 %v13783_v49, %v5396_v35  ;;  %v5905_v30 = vld [vmem:[#allocation5 + $0x14] sm:$0xff]  ;;  %v5906_v39 = vld [vmem:[#allocation5 + $0x1c] sm:$0xff]  ;;  %v6088_v18 = vld [vmem:[#allocation14 + $0x268] sm:$0xff] }
 0x6ec   : > { %v5432_v22 = vmax.f32 %v5418_v58, 0.0  ;;  %10182 = vmatmul.mubr.f32.gmra.mxu0 %v5479_v1  ;;  %10253 = vmatmul.mubr.f32.gmra.mxu1 %v5425_v21  ;;  %v5761_v21 = vld [vmem:[#allocation14 + $0x120] sm:$0xff]  ;;  %v6248_v19 = vld [vmem:[#allocation14 + $0x2f0] sm:$0xff]  ;;  %v6247_v20 = vld [vmem:[#allocation14 + $0x2e8] sm:$0xff] }
 0x6ed   : > { %10184 = vmatprep.mubr.msk.f32.mxu0 %vm11279_vm10, %v14570_v55  ;;  %10278 = vmatpush3.msra.mxu0 %v5770_v52  ;;  %v5431_v14 = vmax.f32 %v13871_v23, 0.0  ;;  %v5748_v56 = vld [vmem:[#allocation5 + $0x23] sm:$0xff]  ;;  %v6086_v4 = vld [vmem:[#allocation14 + $0x258] sm:$0xff]  ;;  %v6085_v35 = vld [vmem:[#allocation14 + $0x250] sm:$0xff] }
 0x6ee   : > { %5446 = vst [vmem:[#allocation5 + $0x58] sm:$0xff] %v5432_v22  ;;  %10279 = vmatprep.subr.mxu0 %v14570_v55  ;;  %10255 = vmatprep.mubr.msk.f32.mxu1 %vm11279_vm10, %v14570_v55  ;;  %v5483_v33 = vld [vmem:[#allocation5 + $0x31] sm:$0xff]  ;;  %v5907_v47 = vld [vmem:[#allocation5 + $0x24] sm:$0xff] }
 0x6ef   : > { %10280 = vmatpush3.msra.mxu0 %v5769_v6  ;;  %10350 = vmatprep.subr.mxu1 %v14570_v55  ;;  %5445 = vst [vmem:[#allocation5 + $0x50] sm:$0xff] %v5431_v14  ;;  %v5749_v10 = vld [vmem:[#allocation5 + $0x2b] sm:$0xff]  ;;  %v6246_v54 = vld [vmem:[#allocation14 + $0x2e0] sm:$0xff]  ;;  %v5750_v57 = vld [vmem:[#allocation5 + $0x33] sm:$0xff] }
 0x6f0   : > { %10185 = vmatmul.mubr.f32.gmra.mxu0 %v5480_v40  ;;  %10256 = vmatmul.mubr.f32.gmra.mxu1 %v5426_v34  ;;  %v5482_v34 = vld [vmem:[#allocation5 + $0x29] sm:$0xff]  ;;  %v5909_v58 = vld [vmem:[#allocation5 + $0x34] sm:$0xff]  ;;  %v14574_v52 = vld [vmem:[#allocation21_spill] sm:$0xff] }
 0x6f1   : > { %10187 = vmatprep.mubr.msk.f32.mxu0 %vm11279_vm10, %v14570_v55  ;;  %10281 = vmatprep.subr.mxu0 %v14570_v55  ;;  %v5908_v60 = vld [vmem:[#allocation5 + $0x2c] sm:$0xff] }
 0x6f2   : > { %10282 = vmatpush3.msra.mxu0 %v5768_v8  ;;  %10258 = vmatprep.mubr.msk.f32.mxu1 %vm11279_vm10, %v14570_v55  ;;  %v5484_v7 = vld [vmem:[#allocation5 + $0x39] sm:$0xff]  ;;  %v5485_v42 = vld [vmem:[#allocation5 + $0x41] sm:$0xff]  ;;  %v6244_v6 = vld [vmem:[#allocation14 + $0x2d0] sm:$0xff] }
 0x6f3   : > { %10283 = vmatprep.subr.mxu0 %v14570_v55  ;;  %10351 = vmatpush3.msra.mxu1 %v5925_v3  ;;  %v14575_v1 = vld [vmem:[#allocation22_spill] sm:$0xff]  ;;  %v5751_v23 = vld [vmem:[#allocation5 + $0x3b] sm:$0xff] }
 0x6f4   : > { %10188 = vmatmul.mubr.f32.gmra.mxu0 %v5481_v61  ;;  %10259 = vmatmul.mubr.f32.gmra.mxu1 %v5427_v43  ;;  %v5747_v43 = vld [vmem:[#allocation5 + $0x1b] sm:$0xff]  ;;  %v4672_v22 = vadd.f32 %v14575_v1, %v14574_v52  ;;  %v6084_v40 = vld [vmem:[#allocation14 + $0x248] sm:$0xff] }
 0x6f5   : > { %10190 = vmatprep.mubr.msk.f32.mxu0 %vm11279_vm10, %v14570_v55  ;;  %10284 = vmatpush3.msra.mxu0 %v5767_v26  ;;  %v5752_v3 = vld [vmem:[#allocation5 + $0x43] sm:$0xff] }
 0x6f6   : > { %10285 = vmatprep.subr.mxu0 %v14570_v55  ;;  %10352 = vmatprep.subr.mxu1 %v13893_v25  ;;  %v5764_v55 = vld [vmem:[#allocation14 + $0x138] sm:$0xff]  ;;  %v5486_v53 = vld [vmem:[#allocation5 + $0x49] sm:$0xff]  ;;  %v4858_v8 = vadd.f32 %v13775_v13, %v4672_v22 }
 0x6f7   : > { %10286 = vmatpush3.msra.mxu0 %v5766_v11  ;;  %10261 = vmatprep.mubr.msk.f32.mxu1 %vm11279_vm10, %v13893_v25  ;;  %v5487_v9 = vld [vmem:[#allocation5 + $0x51] sm:$0xff]  ;;  %v6243_v26 = vld [vmem:[#allocation14 + $0x2c8] sm:$0xff]  ;;  %v6083_v11 = vld [vmem:[#allocation14 + $0x240] sm:$0xff] }
 0x6f8   : > { %10191 = vmatmul.mubr.f32.gmra.mxu0 %v5482_v34  ;;  %10287 = vmatprep.subr.mxu0 %v13893_v25  ;;  %v5911_v61 = vld [vmem:[#allocation5 + $0x44] sm:$0xff]  ;;  %v5038_v34 = vadd.f32 %v13777_v51, %v4858_v8  ;;  %v5912_v51 = vld [vmem:[#allocation5 + $0x4c] sm:$0xff]  ;;  %v6071_v1 = vld [vmem:[#allocation5 + $0x56] sm:$0xff] }
 0x6f9   : > { %10193 = vmatprep.mubr.msk.f32.mxu0 %vm11279_vm10, %v13893_v25  ;;  %10288 = vmatpush3.msra.mxu0 %v5765_v63  ;;  %v6229_v52 = vld [vmem:[#allocation5 + $0x4f] sm:$0xff]  ;;  %v6230_v22 = vld [vmem:[#allocation5 + $0x57] sm:$0xff] }
 0x6fa   : > { %10353 = vmatpush3.msra.mxu1 %v5924_v62  ;;  %10289 = vmatprep.subr.mxu0 %v13893_v25  ;;  %v6508_v8 = vld [vmem:[#allocation15 + $0xf8] sm:$0xff] }
 0x6fb   : > { %10262 = vmatmul.mubr.f32.gmra.mxu1 %v5428_v5  ;;  %10354 = vmatprep.subr.mxu1 %v13893_v25  ;;  %v5757_v5 = vld [vmem:[#allocation14 + $0x100] sm:$0xff] }
 0x6fc   : > { %10194 = vmatmul.mubr.f32.gmra.mxu0 %v5483_v33  ;;  %10355 = vmatpush3.msra.mxu1 %v5923_v12 }
 0x6fd   : > { %10196 = vmatprep.mubr.msk.f32.mxu0 %vm11279_vm10, %v13893_v25  ;;  %10290 = vmatpush3.msra.mxu0 %v5764_v55  ;;  %v5753_v55 = vld [vmem:[#allocation5 + $0x4b] sm:$0xff] }
 0x6fe   : > { %10291 = vmatprep.subr.mxu0 %v13893_v25  ;;  %10356 = vmatprep.subr.mxu1 %v13893_v25 }
 0x6ff   : > { %10264 = vmatprep.mubr.msk.f32.mxu1 %vm11279_vm10, %v13893_v25  ;;  %10292 = vmatpush3.msra.mxu0 %v5763_v44  ;;  %v6082_v44 = vld [vmem:[#allocation14 + $0x238] sm:$0xff] }
 0x700   : > { %10197 = vmatmul.mubr.f32.gmra.mxu0 %v5484_v7  ;;  %10357 = vmatpush3.msra.mxu1 %v5922_v16  ;;  %v6242_v7 = vld [vmem:[#allocation14 + $0x2c0] sm:$0xff] }
 0x701   : > { %10199 = vmatprep.mubr.msk.f32.mxu0 %vm11279_vm10, %v13893_v25  ;;  %10265 = vmatmul.mubr.f32.gmra.mxu1 %v5429_v48  ;;  %v6245_v48 = vld [vmem:[#allocation14 + $0x2d8] sm:$0xff] }
 0x702   : > { %10293 = vmatprep.subr.mxu0 %v13893_v25  ;;  %10358 = vmatprep.subr.mxu1 %v13893_v25 }
 0x703   : > { %10294 = vmatpush3.msra.mxu0 %v5762_v0  ;;  %10359 = vmatpush3.msra.mxu1 %v5921_v29 }
 0x704   : > { %10200 = vmatmul.mubr.f32.gmra.mxu0 %v5485_v42  ;;  %10295 = vmatprep.subr.mxu0 %v13893_v25  ;;  %v6081_v42 = vld [vmem:[#allocation14 + $0x230] sm:$0xff] }
 0x705   : > { %10360 = vmatprep.subr.mxu1 %v13893_v25  ;;  %10202 = vmatprep.mubr.msk.f32.mxu0 %vm11279_vm10, %v13893_v25 }
 0x706   : > { %10267 = vmatprep.mubr.msk.f32.mxu1 %vm11279_vm10, %v13893_v25  ;;  %10296 = vmatpush3.msra.mxu0 %v5761_v21  ;;  %v5754_v21 = vld [vmem:[#allocation5 + $0x53] sm:$0xff] }
 0x707   : > { %10361 = vmatpush3.msra.mxu1 %v5920_v50  ;;  %10297 = vmatprep.subr.mxu0 %v13893_v25 }
 0x708   : > { %10203 = vmatmul.mubr.f32.gmra.mxu0 %v5486_v53  ;;  %10268 = vmatmul.mubr.f32.gmra.mxu1 %v5430_v38  ;;  %v6087_v38 = vld [vmem:[#allocation14 + $0x260] sm:$0xff]  ;;  %v6241_v53 = vld [vmem:[#allocation14 + $0x2b8] sm:$0xff] }
 0x709   : > { %10362 = vmatprep.subr.mxu1 %v13893_v25  ;;  %10298 = vmatpush3.msra.mxu0 %v5760_v31 }
 0x70a   : > { %10363 = vmatpush3.msra.mxu1 %v5919_v46  ;;  %10299 = vmatprep.subr.mxu0 %v13893_v25  ;;  %v5913_v46 = vld [vmem:[#allocation5 + $0x54] sm:$0xff] }
 0x70b   : > { %10364 = vmatprep.subr.mxu1 %v13893_v25  ;;  %10205 = vmatprep.mubr.msk.f32.mxu0 %vm11279_vm10, %v13893_v25 }
 0x70c   : > { %10270 = vmatprep.mubr.msk.f32.mxu1 %vm11279_vm10, %v13893_v25  ;;  %10300 = vmatpush3.msra.mxu0 %v5759_v2  ;;  %v6080_v2 = vld [vmem:[#allocation14 + $0x228] sm:$0xff] }
 0x70d   : > { %10365 = vmatpush3.msra.mxu1 %v5918_v28  ;;  %10206 = vmatmul.mubr.f32.gmra.mxu0 %v5487_v9  ;;  %v6240_v9 = vld [vmem:[#allocation14 + $0x2b0] sm:$0xff] }
 0x70e   : > { %10271 = vmatmul.mubr.f32.gmra.mxu1 %v5431_v14  ;;  %10301 = vmatprep.subr.mxu0 %v13893_v25  ;;  %v5910_v14 = vld [vmem:[#allocation5 + $0x3c] sm:$0xff] }
 0x70f   : > { %10366 = vmatprep.subr.mxu1 %v13893_v25  ;;  %10302 = vmatpush3.msra.mxu0 %v5758_v45  ;;  %v6079_v45 = vld [vmem:[#allocation14 + $0x220] sm:$0xff] }
 0x710   : > { %10367 = vmatpush3.msra.mxu1 %v5917_v15  ;;  %10303 = vmatprep.subr.mxu0 %v13893_v25  ;;  %v6078_v15 = vld [vmem:[#allocation14 + $0x218] sm:$0xff] }
 0x711   : > { %10368 = vmatprep.subr.mxu1 %v13893_v25  ;;  %10304 = vmatpush3.msra.mxu0 %v5757_v5  ;;  %v6238_v5 = vld [vmem:[#allocation14 + $0x2a0] sm:$0xff] }
 0x712   : > { %10305 = vmatprep.mubr.msk.f32.mxu0 %vm11279_vm10, %v13893_v25  ;;  %10369 = vmatpush3.msra.mxu1 %v5916_v27  ;;  %v6077_v27 = vld [vmem:[#allocation14 + $0x210] sm:$0xff] }
 0x713   : > { %10370 = vmatprep.mubr.msk.f32.mxu1 %vm11279_vm10, %v13893_v25  ;;  %10306 = vmatmul.mubr.f32.vlgmr.msra.gmra.mxu0 %v5745_v24  ;;  %v6237_v24 = vld [vmem:[#allocation14 + $0x298] sm:$0xff] }
 0x714   : > { %10371 = vmatmul.mubr.f32.vlgmr.msra.gmra.mxu1 %v5904_v36  ;;  %10308 = vmatprep.mubr.msk.f32.mxu0 %vm11279_vm10, %v13893_v25  ;;  %v6236_v36 = vld [vmem:[#allocation14 + $0x290] sm:$0xff] }
 0x715   : > { %10373 = vmatprep.mubr.msk.f32.mxu1 %vm11279_vm10, %v13893_v25  ;;  %10403 = vmatprep.subr.mxu0 %v13893_v25 }
 0x716   : > { %10404 = vmatpush3.msra.mxu0 %v6090_v41  ;;  %10468 = vmatprep.subr.mxu1 %v13893_v25  ;;  %v6076_v41 = vld [vmem:[#allocation14 + $0x208] sm:$0xff] }
 0x717   : > { %10309 = vmatmul.mubr.f32.gmra.mxu0 %v5746_v37  ;;  %10405 = vmatprep.subr.mxu0 %v13893_v25 }
 0x718   : > { %10374 = vmatmul.mubr.f32.gmra.mxu1 %v5905_v30  ;;  %10311 = vmatprep.mubr.msk.f32.mxu0 %vm11279_vm10, %v13893_v25  ;;  %v6235_v30 = vld [vmem:[#allocation14 + $0x288] sm:$0xff] }
 0x719   : > { %10376 = vmatprep.mubr.msk.f32.mxu1 %vm11279_vm10, %v13893_v25  ;;  %10469 = vmatpush3.msra.mxu1 %v6249_v59 }
 0x71a   : > { %10406 = vmatpush3.msra.mxu0 %v6089_v32  ;;  %10470 = vmatprep.subr.mxu1 %v13893_v25  ;;  %v6075_v32 = vld [vmem:[#allocation14 + $0x200] sm:$0xff] }
 0x71b   : > { %10312 = vmatmul.mubr.f32.gmra.mxu0 %v5747_v43  ;;  %10407 = vmatprep.subr.mxu0 %v13893_v25  ;;  %v6234_v43 = vld [vmem:[#allocation14 + $0x280] sm:$0xff] }
 0x71c   : > { %10377 = vmatmul.mubr.f32.gmra.mxu1 %v5906_v39  ;;  %10314 = vmatprep.mubr.msk.f32.mxu0 %vm11279_vm10, %v13893_v25  ;;  %v6222_v39 = vld [vmem:[#allocation5 + $0x17] sm:$0xff] }
 0x71d   : > { %10379 = vmatprep.mubr.msk.f32.mxu1 %vm11279_vm10, %v13893_v25  ;;  %10471 = vmatpush3.msra.mxu1 %v6248_v19  ;;  %v6063_v19 = vld [vmem:[#allocation5 + $0x16] sm:$0xff] }
 0x71e   : > { %10408 = vmatpush3.msra.mxu0 %v6088_v18  ;;  %10472 = vmatprep.subr.mxu1 %v13893_v25  ;;  %v6064_v18 = vld [vmem:[#allocation5 + $0x1e] sm:$0xff] }
 0x71f   : > { %10315 = vmatmul.mubr.f32.gmra.mxu0 %v5748_v56  ;;  %10409 = vmatprep.subr.mxu0 %v13893_v25  ;;  %v6223_v56 = vld [vmem:[#allocation5 + $0x1f] sm:$0xff] }
 0x720   : > { %10380 = vmatmul.mubr.f32.gmra.mxu1 %v5907_v47  ;;  %10317 = vmatprep.mubr.msk.f32.mxu0 %vm11279_vm10, %v13893_v25  ;;  %v6224_v47 = vld [vmem:[#allocation5 + $0x27] sm:$0xff] }
 0x721   : > { %10382 = vmatprep.mubr.msk.f32.mxu1 %vm11279_vm10, %v13893_v25  ;;  %10473 = vmatpush3.msra.mxu1 %v6247_v20  ;;  %v6065_v20 = vld [vmem:[#allocation5 + $0x26] sm:$0xff] }
 0x722   : > { %10410 = vmatpush3.msra.mxu0 %v6087_v38  ;;  %10474 = vmatprep.subr.mxu1 %v13893_v25  ;;  %v6066_v38 = vld [vmem:[#allocation5 + $0x2e] sm:$0xff] }
 0x723   : > { %10318 = vmatmul.mubr.f32.gmra.mxu0 %v5749_v10  ;;  %10411 = vmatprep.subr.mxu0 %v13893_v25  ;;  %v6225_v10 = vld [vmem:[#allocation5 + $0x2f] sm:$0xff] }
 0x724   : > { %10383 = vmatmul.mubr.f32.gmra.mxu1 %v5908_v60  ;;  %10320 = vmatprep.mubr.msk.f32.mxu0 %vm11279_vm10, %v13893_v25  ;;  %v6226_v60 = vld [vmem:[#allocation5 + $0x37] sm:$0xff] }
 0x725   : > { %10385 = vmatprep.mubr.msk.f32.mxu1 %vm11279_vm10, %v13893_v25  ;;  %10412 = vmatpush3.msra.mxu0 %v6086_v4  ;;  %v6067_v4 = vld [vmem:[#allocation5 + $0x36] sm:$0xff] }
 0x726   : > { %10475 = vmatpush3.msra.mxu1 %v6246_v54  ;;  %10413 = vmatprep.subr.mxu0 %v13893_v25  ;;  %v6068_v54 = vld [vmem:[#allocation5 + $0x3e] sm:$0xff] }
 0x727   : > { %10321 = vmatmul.mubr.f32.gmra.mxu0 %v5750_v57  ;;  %10476 = vmatprep.subr.mxu1 %v13893_v25  ;;  %v6227_v57 = vld [vmem:[#allocation5 + $0x3f] sm:$0xff] }
 0x728   : > { %10386 = vmatmul.mubr.f32.gmra.mxu1 %v5909_v58  ;;  %10323 = vmatprep.mubr.msk.f32.mxu0 %vm11279_vm10, %v13893_v25  ;;  %v6228_v58 = vld [vmem:[#allocation5 + $0x47] sm:$0xff] }
 0x729   : > { %10388 = vmatprep.mubr.msk.f32.mxu1 %vm11279_vm10, %v13893_v25  ;;  %10477 = vmatpush3.msra.mxu1 %v6245_v48  ;;  %v6069_v48 = vld [vmem:[#allocation5 + $0x46] sm:$0xff] }
 0x72a   : > { %10414 = vmatpush3.msra.mxu0 %v6085_v35  ;;  %10478 = vmatprep.subr.mxu1 %v13893_v25  ;;  %v6070_v35 = vld [vmem:[#allocation5 + $0x4e] sm:$0xff] }
 0x72b   : > { %10324 = vmatmul.mubr.f32.gmra.mxu0 %v5751_v23  ;;  %10415 = vmatprep.subr.mxu0 %v13893_v25 }
 0x72c   : > { %10389 = vmatmul.mubr.f32.gmra.mxu1 %v5910_v14  ;;  %10326 = vmatprep.mubr.msk.f32.mxu0 %vm11279_vm10, %v13893_v25 }
 0x72d   : > { %10391 = vmatprep.mubr.msk.f32.mxu1 %vm11279_vm10, %v13893_v25  ;;  %10479 = vmatpush3.msra.mxu1 %v6244_v6 }
 0x72e   : > { %10416 = vmatpush3.msra.mxu0 %v6084_v40  ;;  %10480 = vmatprep.subr.mxu1 %v13893_v25 }
 0x72f   : > { %10327 = vmatmul.mubr.f32.gmra.mxu0 %v5752_v3  ;;  %10417 = vmatprep.subr.mxu0 %v13893_v25  ;;  %v10089_v63 = vpop.f32.mrf.mxu0  ;;  %v6482_v3 = vld [vmem:[#allocation15 + $0x78] sm:$0xff] }
 0x730   : > { %v10142_v13 = vpop.f32.mrf.mxu1  ;;  %10392 = vmatmul.mubr.f32.gmra.mxu1 %v5911_v61  ;;  %10329 = vmatprep.mubr.msk.f32.mxu0 %vm11279_vm10, %v13893_v25  ;;  %v5219_v62 = vadd.f32 %v10089_v63, %v13773_v17  ;;  %v6481_v61 = vld [vmem:[#allocation15 + $0x70] sm:$0xff]  ;;  %v6480_v63 = vld [vmem:[#allocation15 + $0x68] sm:$0xff] }
 0x731   : > { %10394 = vmatprep.mubr.msk.f32.mxu1 %vm11279_vm10, %v13893_v25  ;;  %10481 = vmatpush3.msra.mxu1 %v6243_v26  ;;  %v5197_v12 = vpop.f32.mrf.mxu0  ;;  %v6507_v26 = vld [vmem:[#allocation15 + $0xf0] sm:$0xff] }
 0x732   : > { %10418 = vmatpush3.msra.mxu0 %v6083_v11  ;;  %v5399_v33 = vadd.f32 %v10142_v13, %v5219_v62  ;;  %10482 = vmatprep.subr.mxu1 %v13893_v25  ;;  %v5218_v16 = vadd.f32 %v5197_v12, %v5038_v34  ;;  %v5377_v0 = vpop.f32.mrf.mxu1  ;;  %v6506_v11 = vld [vmem:[#allocation15 + $0xe8] sm:$0xff]  ;;  %v6505_v13 = vld [vmem:[#allocation15 + $0xe0] sm:$0xff]  ;;  %v6504_v62 = vld [vmem:[#allocation15 + $0xd8] sm:$0xff] }
 0x733   : > { %10330 = vmatmul.mubr.f32.gmra.mxu0 %v5753_v55  ;;  %10419 = vmatprep.subr.mxu0 %v13893_v25  ;;  %v6479_v34 = vld [vmem:[#allocation15 + $0x60] sm:$0xff]  ;;  %v6478_v12 = vld [vmem:[#allocation15 + $0x58] sm:$0xff]  ;;  %v6503_v55 = vld [vmem:[#allocation15 + $0xd0] sm:$0xff] }
 0x734   : > { %10395 = vmatmul.mubr.f32.gmra.mxu1 %v5912_v51  ;;  %10332 = vmatprep.mubr.msk.f32.mxu0 %vm11279_vm10, %v13893_v25  ;;  %v5420_v17 = vadd.f32 %v13783_v49, %v5399_v33  ;;  %v5398_v29 = vadd.f32 %v5377_v0, %v5218_v16  ;;  %v6477_v33 = vld [vmem:[#allocation15 + $0x50] sm:$0xff]  ;;  %v6476_v16 = vld [vmem:[#allocation15 + $0x48] sm:$0xff]  ;;  %v6475_v51 = vld [vmem:[#allocation15 + $0x40] sm:$0xff] }
 0x735   : > { %10397 = vmatprep.mubr.msk.f32.mxu1 %vm11279_vm10, %v13893_v25  ;;  %10420 = vmatpush3.msra.mxu0 %v6082_v44  ;;  %v6502_v44 = vld [vmem:[#allocation15 + $0xc8] sm:$0xff]  ;;  %v6500_v0 = vld [vmem:[#allocation15 + $0xb8] sm:$0xff] }
 0x736   : > { %v5434_v50 = vmax.f32 %v5420_v17, 0.0  ;;  %10483 = vmatpush3.msra.mxu1 %v6242_v7  ;;  %v5419_v31 = vadd.f32 %v13783_v49, %v5398_v29  ;;  %10421 = vmatprep.subr.mxu0 %v13893_v25  ;;  %v6239_v49 = vld [vmem:[#allocation14 + $0x2a8] sm:$0xff]  ;;  %v6501_v7 = vld [vmem:[#allocation15 + $0xc0] sm:$0xff]  ;;  %v6474_v17 = vld [vmem:[#allocation15 + $0x38] sm:$0xff] }
 0x737   : > { %10333 = vmatmul.mubr.f32.gmra.mxu0 %v5754_v21  ;;  %10484 = vmatprep.subr.mxu1 %v13893_v25  ;;  %v6473_v29 = vld [vmem:[#allocation15 + $0x30] sm:$0xff]  ;;  %v6472_v21 = vld [vmem:[#allocation15 + $0x28] sm:$0xff] }
 0x738   : > { %10398 = vmatmul.mubr.f32.gmra.mxu1 %v5913_v46  ;;  %5448 = vst [vmem:[#allocation5 + $0x68] sm:$0x3f] %v5434_v50  ;;  %v5433_v28 = vmax.f32 %v5419_v31, 0.0  ;;  %10422 = vmatpush3.msra.mxu0 %v6081_v42  ;;  %v6499_v42 = vld [vmem:[#allocation15 + $0xb0] sm:$0xff]  ;;  %v6471_v31 = vld [vmem:[#allocation15 + $0x20] sm:$0xff]  ;;  %v6498_v46 = vld [vmem:[#allocation15 + $0xa8] sm:$0xff] }
 0x739   : > { %10485 = vmatpush3.msra.mxu1 %v6241_v53  ;;  %10423 = vmatprep.subr.mxu0 %v13893_v25 }
 0x73a   : > { %5447 = vst [vmem:[#allocation5 + $0x60] sm:$0xff] %v5433_v28  ;;  %10486 = vmatprep.subr.mxu1 %v13893_v25  ;;  %10424 = vmatpush3.msra.mxu0 %v6080_v2  ;;  %v6470_v2 = vld [vmem:[#allocation15 + $0x18] sm:$0xff] }
 0x73b   : > { %10487 = vmatpush3.msra.mxu1 %v6240_v9  ;;  %10425 = vmatprep.subr.mxu0 %v13893_v25  ;;  %v6469_v9 = vld [vmem:[#allocation15 + $0x10] sm:$0xff] }
 0x73c   : > { %10488 = vmatprep.subr.mxu1 %v13893_v25  ;;  %10426 = vmatpush3.msra.mxu0 %v6079_v45 }
 0x73d   : > { %10489 = vmatpush3.msra.mxu1 %v6239_v49  ;;  %10427 = vmatprep.subr.mxu0 %v13893_v25  ;;  %v6497_v49 = vld [vmem:[#allocation15 + $0xa0] sm:$0xff] }
 0x73e   : > { %10490 = vmatprep.subr.mxu1 %v13893_v25  ;;  %10428 = vmatpush3.msra.mxu0 %v6078_v15  ;;  %v6496_v15 = vld [vmem:[#allocation15 + $0x98] sm:$0xff] }
 0x73f   : > { %10491 = vmatpush3.msra.mxu1 %v6238_v5  ;;  %10429 = vmatprep.subr.mxu0 %v13893_v25  ;;  %v6468_v5 = vld [vmem:[#allocation15 + $0x8] sm:$0xff] }
 0x740   : > { %10492 = vmatprep.subr.mxu1 %v13893_v25  ;;  %10430 = vmatpush3.msra.mxu0 %v6077_v27 }
 0x741   : > { %10493 = vmatpush3.msra.mxu1 %v6237_v24  ;;  %10431 = vmatprep.subr.mxu0 %v13893_v25  ;;  %v5914_v37 = vld [vmem:[#allocation5 + $0x5c] sm:$0xff]  ;;  %v6073_v14 = vld [vmem:[#allocation5 + $0x66] sm:$0xff] }
 0x742   : > { %10494 = vmatprep.subr.mxu1 %v13893_v25  ;;  %10335 = vmatprep.mubr.msk.f32.mxu0 %vm11279_vm10, %v13893_v25  ;;  %v5755_v59 = vld [vmem:[#allocation5 + $0x5b] sm:$0xff]  ;;  %v6232_v40 = vld [vmem:[#allocation5 + $0x67] sm:$0xff] }
 0x743   : > { %10495 = vmatpush3.msra.mxu1 %v6236_v36  ;;  %10400 = vmatprep.mubr.msk.f32.mxu1 %vm11279_vm10, %v13893_v25  ;;  %v6072_v23 = vld [vmem:[#allocation5 + $0x5e] sm:$0xff] }
 0x744   : > { %10432 = vmatpush3.msra.mxu0 %v6076_v41  ;;  %10401 = vmatmul.mubr.f32.gmra.mxu1 %v5914_v37  ;;  %v6231_v6 = vld [vmem:[#allocation5 + $0x5f] sm:$0xff] }
 0x745   : > { %10336 = vmatmul.mubr.f32.gmra.mxu0 %v5755_v59  ;;  %10496 = vmatprep.subr.mxu1 %v13893_v25  ;;  %v6467_v41 = vld [vmem:[#allocation15] sm:$0xff] }
 0x746   : > { %10433 = vmatprep.subr.mxu0 %v13893_v25  ;;  %10497 = vmatpush3.msra.mxu1 %v6235_v30  ;;  %v6495_v30 = vld [vmem:[#allocation15 + $0x90] sm:$0xff] }
 0x747   : > { %10434 = vmatpush3.msra.mxu0 %v6075_v32  ;;  %10498 = vmatprep.subr.mxu1 %v13893_v25 }
 0x748   : > { %10435 = vmatprep.mubr.msk.f32.mxu0 %vm11279_vm10, %v13893_v25  ;;  %10499 = vmatpush3.msra.mxu1 %v6234_v43 }
 0x749   : > { %10500 = vmatprep.mubr.msk.f32.mxu1 %vm11279_vm10, %v13893_v25  ;;  %10436 = vmatmul.mubr.f32.vlgmr.msra.gmra.mxu0 %v6063_v19 }
 0x74a   : > { %10501 = vmatmul.mubr.f32.vlgmr.msra.gmra.mxu1 %v6222_v39  ;;  %10438 = vmatprep.mubr.msk.f32.mxu0 %vm11279_vm10, %v13893_v25 }
 0x74b   : > { %10503 = vmatprep.mubr.msk.f32.mxu1 %vm11279_vm10, %v13893_v25  ;;  %10533 = vmatprep.subr.mxu0 %v13893_v25 }
 0x74c   : > { %10592 = vmatprep.subr.mxu1 %v13893_v25  ;;  %10534 = vmatpush3.msra.mxu0 %v6508_v8 }
 0x74d   : > { %10439 = vmatmul.mubr.f32.gmra.mxu0 %v6064_v18  ;;  %10593 = vmatpush3.msra.mxu1 %v6482_v3 }
 0x74e   : > { %10504 = vmatmul.mubr.f32.gmra.mxu1 %v6223_v56  ;;  %10441 = vmatprep.mubr.msk.f32.mxu0 %vm11279_vm10, %v13893_v25  ;;  %v6494_v56 = vld [vmem:[#allocation15 + $0x88] sm:$0xff] }
 0x74f   : > { %10506 = vmatprep.mubr.msk.f32.mxu1 %vm11279_vm10, %v13893_v25  ;;  %10535 = vmatprep.subr.mxu0 %v13893_v25 }
 0x750   : > { %10594 = vmatprep.subr.mxu1 %v13893_v25  ;;  %10536 = vmatpush3.msra.mxu0 %v6507_v26 }
 0x751   : > { %10442 = vmatmul.mubr.f32.gmra.mxu0 %v6065_v20  ;;  %10595 = vmatpush3.msra.mxu1 %v6481_v61  ;;  %v6493_v20 = vld [vmem:[#allocation15 + $0x80] sm:$0xff] }
 0x752   : > { %10507 = vmatmul.mubr.f32.gmra.mxu1 %v6224_v47  ;;  %10444 = vmatprep.mubr.msk.f32.mxu0 %vm11279_vm10, %v13893_v25 }
 0x753   : > { %10509 = vmatprep.mubr.msk.f32.mxu1 %vm11279_vm10, %v13893_v25  ;;  %10537 = vmatprep.subr.mxu0 %v13893_v25 }
 0x754   : > { %10596 = vmatprep.subr.mxu1 %v13893_v25  ;;  %10538 = vmatpush3.msra.mxu0 %v6506_v11 }
 0x755   : > { %10445 = vmatmul.mubr.f32.gmra.mxu0 %v6066_v38  ;;  %10597 = vmatpush3.msra.mxu1 %v6480_v63 }
 0x756   : > { %10510 = vmatmul.mubr.f32.gmra.mxu1 %v6225_v10  ;;  %10447 = vmatprep.mubr.msk.f32.mxu0 %vm11279_vm10, %v13893_v25 }
 0x757   : > { %10512 = vmatprep.mubr.msk.f32.mxu1 %vm11279_vm10, %v13893_v25  ;;  %10539 = vmatprep.subr.mxu0 %v13893_v25 }
 0x758   : > { %10598 = vmatprep.subr.mxu1 %v13893_v25  ;;  %10540 = vmatpush3.msra.mxu0 %v6505_v13 }
 0x759   : > { %10448 = vmatmul.mubr.f32.gmra.mxu0 %v6067_v4  ;;  %10599 = vmatpush3.msra.mxu1 %v6479_v34 }
 0x75a   : > { %10513 = vmatmul.mubr.f32.gmra.mxu1 %v6226_v60  ;;  %10450 = vmatprep.mubr.msk.f32.mxu0 %vm11279_vm10, %v13893_v25 }
 0x75b   : > { %10515 = vmatprep.mubr.msk.f32.mxu1 %vm11279_vm10, %v13893_v25  ;;  %10541 = vmatprep.subr.mxu0 %v13893_v25 }
 0x75c   : > { %10600 = vmatprep.subr.mxu1 %v13893_v25  ;;  %10542 = vmatpush3.msra.mxu0 %v6504_v62 }
 0x75d   : > { %10451 = vmatmul.mubr.f32.gmra.mxu0 %v6068_v54  ;;  %10601 = vmatpush3.msra.mxu1 %v6478_v12 }
 0x75e   : > { %10516 = vmatmul.mubr.f32.gmra.mxu1 %v6227_v57  ;;  %10453 = vmatprep.mubr.msk.f32.mxu0 %vm11279_vm10, %v13893_v25 }
 0x75f   : > { %10518 = vmatprep.mubr.msk.f32.mxu1 %vm11279_vm10, %v13893_v25  ;;  %10543 = vmatprep.subr.mxu0 %v13893_v25 }
 0x760   : > { %10602 = vmatprep.subr.mxu1 %v13893_v25  ;;  %10544 = vmatpush3.msra.mxu0 %v6503_v55 }
 0x761   : > { %10454 = vmatmul.mubr.f32.gmra.mxu0 %v6069_v48  ;;  %10545 = vmatprep.subr.mxu0 %v13893_v25 }
 0x762   : > { %10519 = vmatmul.mubr.f32.gmra.mxu1 %v6228_v58  ;;  %10456 = vmatprep.mubr.msk.f32.mxu0 %vm11279_vm10, %v13893_v25 }
 0x763   : > { %10521 = vmatprep.mubr.msk.f32.mxu1 %vm11279_vm10, %v13893_v25  ;;  %10603 = vmatpush3.msra.mxu1 %v6477_v33 }
 0x764   : > { %10546 = vmatpush3.msra.mxu0 %v6502_v44  ;;  %10604 = vmatprep.subr.mxu1 %v13893_v25 }
 0x765   : > { %10457 = vmatmul.mubr.f32.gmra.mxu0 %v6070_v35  ;;  %10547 = vmatprep.subr.mxu0 %v13893_v25 }
 0x766   : > { %10522 = vmatmul.mubr.f32.gmra.mxu1 %v6229_v52  ;;  %10459 = vmatprep.mubr.msk.f32.mxu0 %vm11279_vm10, %v13893_v25 }
 0x767   : > { %10524 = vmatprep.mubr.msk.f32.mxu1 %vm11279_vm10, %v13893_v25  ;;  %10605 = vmatpush3.msra.mxu1 %v6476_v16 }
 0x768   : > { %10606 = vmatprep.subr.mxu1 %v13893_v25  ;;  %10548 = vmatpush3.msra.mxu0 %v6501_v7 }
 0x769   : > { %10460 = vmatmul.mubr.f32.gmra.mxu0 %v6071_v1  ;;  %10607 = vmatpush3.msra.mxu1 %v6475_v51 }
 0x76a   : > { %10525 = vmatmul.mubr.f32.gmra.mxu1 %v6230_v22  ;;  %10462 = vmatprep.mubr.msk.f32.mxu0 %vm11279_vm10, %v13893_v25 }
 0x76b   : > { %10527 = vmatprep.mubr.msk.f32.mxu1 %vm11279_vm10, %v13893_v25  ;;  %10608 = vmatprep.subr.mxu1 %v13893_v25 }
 0x76c   : > { %10549 = vmatprep.subr.mxu0 %v13893_v25  ;;  %10609 = vmatpush3.msra.mxu1 %v6474_v17 }
 0x76d   : > { %10463 = vmatmul.mubr.f32.gmra.mxu0 %v6072_v23  ;;  %10610 = vmatprep.subr.mxu1 %v13893_v25 }
 0x76e   : > { %10528 = vmatmul.mubr.f32.gmra.mxu1 %v6231_v6  ;;  %10465 = vmatprep.mubr.msk.f32.mxu0 %vm11279_vm10, %v13893_v25 }
 0x76f   : > { %10530 = vmatprep.mubr.msk.f32.mxu1 %vm11279_vm10, %v13893_v25  ;;  %10550 = vmatpush3.msra.mxu0 %v6500_v0 }
 0x770   : > { %10551 = vmatprep.subr.mxu0 %v13893_v25  ;;  %10611 = vmatpush3.msra.mxu1 %v6473_v29 }
 0x771   : > { %10466 = vmatmul.mubr.f32.gmra.mxu0 %v6073_v14  ;;  %10612 = vmatprep.subr.mxu1 %v13893_v25 }
 0x772   : > { %10531 = vmatmul.mubr.f32.gmra.mxu1 %v6232_v40  ;;  %10565 = vmatprep.mubr.msk.f32.mxu0 %vm11279_vm10, %v13893_v25 }
 0x773   : > { %10624 = vmatprep.mubr.msk.f32.mxu1 %vm11279_vm10, %v13893_v25  ;;  %10552 = vmatpush3.msra.mxu0 %v6499_v42 }
 0x774   : > { %10553 = vmatprep.subr.mxu0 %v13893_v25  ;;  %10613 = vmatpush3.msra.mxu1 %v6472_v21 }
 0x775   : > { %10614 = vmatprep.subr.mxu1 %v13893_v25  ;;  %10554 = vmatpush3.msra.mxu0 %v6498_v46 }
 0x776   : > { %10615 = vmatpush3.msra.mxu1 %v6471_v31  ;;  %10555 = vmatprep.subr.mxu0 %v13893_v25 }
 0x777   : > { %10616 = vmatprep.subr.mxu1 %v13893_v25  ;;  %10556 = vmatpush3.msra.mxu0 %v6497_v49 }
 0x778   : > { %10617 = vmatpush3.msra.mxu1 %v6470_v2  ;;  %10557 = vmatprep.subr.mxu0 %v13893_v25 }
 0x779   : > { %10618 = vmatprep.subr.mxu1 %v13893_v25  ;;  %10558 = vmatpush3.msra.mxu0 %v6496_v15 }
 0x77a   : > { %10619 = vmatpush3.msra.mxu1 %v6469_v9  ;;  %10559 = vmatprep.subr.mxu0 %v13893_v25 }
 0x77b   : > { %10620 = vmatprep.subr.mxu1 %v13893_v25  ;;  %10560 = vmatpush3.msra.mxu0 %v6495_v30 }
 0x77c   : > { %10621 = vmatpush3.msra.mxu1 %v6468_v5  ;;  %10561 = vmatprep.subr.mxu0 %v13893_v25 }
 0x77d   : > { %10622 = vmatprep.subr.mxu1 %v13893_v25  ;;  %10562 = vmatpush3.msra.mxu0 %v6494_v56 }
 0x77e   : > { %10623 = vmatpush3.msra.mxu1 %v6467_v41  ;;  %10563 = vmatprep.subr.mxu0 %v13893_v25 }
 0x77f   : > { %10710 = vmatprep.subr.mxu1 %v13893_v25  ;;  %10564 = vmatpush3.msra.mxu0 %v6493_v20 }
 0x780   : > { %10651 = vmatprep.subr.mxu0 %v13893_v25 }
 0x79b   : > { %v5691_v50 = vpop.f32.mrf.mxu1 }
 0x79d   : > { %v10242_v53 = vpop.f32.mrf.mxu1 }
 0x79f   : > { %v5696_v28 = vpop.f32.mrf.mxu1 }
 0x7a1   : > { %v10245_v45 = vpop.f32.mrf.mxu1 }
 0x7a4   : > { %v5571_v27 = vpop.f32.mrf.mxu0  ;;  %v5701_v24 = vpop.f32.mrf.mxu1 }
 0x7a5   : > { %v14098_v36 = vadd.f32 %v5691_v50, %v5571_v27 }
 0x7a6   : > { %v10177_v37 = vpop.f32.mrf.mxu0  ;;  %v10248_v59 = vpop.f32.mrf.mxu1 }
 0x7a8   : > { %v5576_v32 = vpop.f32.mrf.mxu0  ;;  %v5706_v43 = vpop.f32.mrf.mxu1 }
 0x7a9   : > { %v14104_v19 = vadd.f32 %v5696_v28, %v5576_v32 }
 0x7aa   : > { %v10180_v39 = vpop.f32.mrf.mxu0  ;;  %v10251_v18 = vpop.f32.mrf.mxu1 }
 0x7ac   : > { %v5581_v47 = vpop.f32.mrf.mxu0  ;;  %v5711_v38 = vpop.f32.mrf.mxu1 }
 0x7ad   : > { %v14107_v10 = vadd.f32 %v5701_v24, %v5581_v47 }
 0x7ae   : > { %v10183_v4 = vpop.f32.mrf.mxu0  ;;  %v10254_v60 = vpop.f32.mrf.mxu1 }
 0x7b0   : > { %v5586_v54 = vpop.f32.mrf.mxu0  ;;  %v5716_v57 = vpop.f32.mrf.mxu1 }
 0x7b1   : > { %v14110_v48 = vadd.f32 %v5706_v43, %v5586_v54 }
 0x7b2   : > { %v10186_v58 = vpop.f32.mrf.mxu0  ;;  %v10257_v35 = vpop.f32.mrf.mxu1 }
 0x7b4   : > { %v5591_v52 = vpop.f32.mrf.mxu0  ;;  %v5721_v1 = vpop.f32.mrf.mxu1 }
 0x7b5   : > { %v14112_v22 = vadd.f32 %v5711_v38, %v5591_v52 }
 0x7b6   : > { %v10189_v23 = vpop.f32.mrf.mxu0  ;;  %v10260_v6 = vpop.f32.mrf.mxu1 }
 0x7b8   : > { %v5596_v14 = vpop.f32.mrf.mxu0 }
 0x7b9   : > { %v14114_v40 = vadd.f32 %v5716_v57, %v5596_v14 }
 0x7ba   : > { %v10192_v8 = vpop.f32.mrf.mxu0 }
 0x7bb   : > { %v5726_v3 = vpop.f32.mrf.mxu1 }
 0x7bc   : > { %v5601_v26 = vpop.f32.mrf.mxu0 }
 0x7bd   : > { %v14116_v61 = vadd.f32 %v5721_v1, %v5601_v26  ;;  %v10263_v25 = vpop.f32.mrf.mxu1 }
 0x7be   : > { %v10195_v11 = vpop.f32.mrf.mxu0 }
 0x7c0   : > { %v5606_v63 = vpop.f32.mrf.mxu0 }
 0x7c1   : > { %v14118_v13 = vadd.f32 %v5726_v3, %v5606_v63  ;;  %v5731_v34 = vpop.f32.mrf.mxu1 }
 0x7c2   : > { %v10198_v62 = vpop.f32.mrf.mxu0 }
 0x7c3   : > { %v10266_v12 = vpop.f32.mrf.mxu1 }
 0x7c4   : > { %v5611_v55 = vpop.f32.mrf.mxu0 }
 0x7c5   : > { %v14120_v33 = vadd.f32 %v5731_v34, %v5611_v55 }
 0x7c6   : > { %v10201_v44 = vpop.f32.mrf.mxu0 }
 0x7c8   : > { %v5616_v16 = vpop.f32.mrf.mxu0  ;;  %v5736_v51 = vpop.f32.mrf.mxu1 }
 0x7c9   : > { %v14122_v7 = vadd.f32 %v5736_v51, %v5616_v16 }
 0x7ca   : > { %v10204_v0 = vpop.f32.mrf.mxu0  ;;  %v10269_v17 = vpop.f32.mrf.mxu1 }
 0x7cd   : > { %v5621_v29 = vpop.f32.mrf.mxu0 }
 0x7ce   : > { %v5741_v42 = vpop.f32.mrf.mxu1 }
 0x7cf   : > { %v14124_v21 = vadd.f32 %v5741_v42, %v5621_v29  ;;  %v10207_v50 = vpop.f32.mrf.mxu0  ;;  %v14157_v42 = vld [vmem:[%s14521_s10] ss:$0 sm:$0xff] }
 0x7d0   : > { %v10272_v31 = vpop.f32.mrf.mxu1 }
 0x7d3   : > { %v5839_v53 = vpop.f32.mrf.mxu0 }
 0x7d4   : > { %v5998_v46 = vpop.f32.mrf.mxu1  ;;  %v5893_v34 = vadd.f32 %v5839_v53, %v14098_v36 }
 0x7d5   : > { %v10307_v2 = vpop.f32.mrf.mxu0 }
 0x7d6   : > { %v10372_v28 = vpop.f32.mrf.mxu1  ;;  %v6052_v16 = vadd.f32 %v5998_v46, %v5893_v34 }
 0x7d7   : > { %v5844_v9 = vpop.f32.mrf.mxu0 }
 0x7d8   : > { %v6003_v45 = vpop.f32.mrf.mxu1  ;;  %v5894_v51 = vadd.f32 %v5844_v9, %v14104_v19  ;;  %v14165_v9 = vld [vmem:[%s14522_s11] ss:$0 sm:$0xff] }
 0x7d9   : > { %v10310_v49 = vpop.f32.mrf.mxu0 }
 0x7da   : > { %v10375_v15 = vpop.f32.mrf.mxu1  ;;  %v6053_v31 = vadd.f32 %v6003_v45, %v5894_v51 }
 0x7db   : > { %v5849_v5 = vpop.f32.mrf.mxu0 }
 0x7dc   : > { %v6008_v27 = vpop.f32.mrf.mxu1  ;;  %v5895_v36 = vadd.f32 %v5849_v5, %v14107_v10  ;;  %v14170_v10 = vld [vmem:[%s14523_s12] ss:$0 sm:$0xff] }
 0x7dd   : > { %v10313_v24 = vpop.f32.mrf.mxu0 }
 0x7de   : > { %v10378_v41 = vpop.f32.mrf.mxu1 }
 0x7df   : > { %v5854_v37 = vpop.f32.mrf.mxu0  ;;  %v6054_v41 = vadd.f32 %v6008_v27, %v5895_v36 }
 0x7e0   : > { %v6013_v59 = vpop.f32.mrf.mxu1  ;;  %v5896_v19 = vadd.f32 %v5854_v37, %v14110_v48 }
 0x7e1   : > { %v10316_v30 = vpop.f32.mrf.mxu0 }
 0x7e2   : > { %v10381_v32 = vpop.f32.mrf.mxu1 }
 0x7e3   : > { %v5859_v43 = vpop.f32.mrf.mxu0 }
 0x7e4   : > { %v14126_v39 = vpop.f32.mrf.mxu1 }
 0x7e5   : > { %v10319_v18 = vpop.f32.mrf.mxu0 }
 0x7e6   : > { %v10384_v56 = vpop.f32.mrf.mxu1 }
 0x7e7   : > { %v14128_v20 = vpop.f32.mrf.mxu0 }
 0x7e8   : > { %v14130_v47 = vpop.f32.mrf.mxu1 }
 0x7e9   : > { %v10322_v38 = vpop.f32.mrf.mxu0 }
 0x7ea   : > { %v10387_v4 = vpop.f32.mrf.mxu1  ;;  %v6055_v38 = vadd.f32 %v6013_v59, %v5896_v19  ;;  %v5898_v59 = vadd.f32 %v14128_v20, %v14114_v40 }
 0x7eb   : > { %v14132_v60 = vpop.f32.mrf.mxu0 }
 0x7ec   : > { %v14134_v54 = vpop.f32.mrf.mxu1 }
 0x7ed   : > { %v10325_v57 = vpop.f32.mrf.mxu0 }
 0x7ee   : > { %v10390_v58 = vpop.f32.mrf.mxu1  ;;  %v5897_v57 = vadd.f32 %v5859_v43, %v14112_v22  ;;  %v14180_v43 = vld [vmem:[#allocation6 + $0x58] sm:$0xff] }
 0x7ef   : > { %v14136_v35 = vpop.f32.mrf.mxu0 }
 0x7f0   : > { %v14138_v52 = vpop.f32.mrf.mxu1 }
 0x7f1   : > { %v10328_v1 = vpop.f32.mrf.mxu0 }
 0x7f2   : > { %v10393_v23 = vpop.f32.mrf.mxu1 }
 0x7f3   : > { %v14140_v6 = vpop.f32.mrf.mxu0 }
 0x7f4   : > { %v14142_v14 = vpop.f32.mrf.mxu1 }
 0x7f5   : > { %v10331_v8 = vpop.f32.mrf.mxu0 }
 0x7f6   : > { %v10396_v3 = vpop.f32.mrf.mxu1  ;;  %v6899_v8 = vld [vmem:[#allocation15 + $0x1f8] sm:$0xff] }
 0x7f7   : > { %v14144_v26 = vpop.f32.mrf.mxu0 }
 0x7f8   : > { %v14146_v25 = vpop.f32.mrf.mxu1 }
 0x7f9   : > { %v10334_v11 = vpop.f32.mrf.mxu0 }
 0x7fa   : > { %v10399_v63 = vpop.f32.mrf.mxu1 }
 0x804   : > { %v14149_v62 = vpop.f32.mrf.mxu1 }
 0x805   : > { %v14151_v12 = vpop.f32.mrf.mxu0 }
 0x806   : > { %v10402_v55 = vpop.f32.mrf.mxu1 }
 0x807   : > { %v10337_v44 = vpop.f32.mrf.mxu0 }
 0x808   : > { %v6898_v44 = vld [vmem:[#allocation15 + $0x1f0] sm:$0xff] }
 0x809   : > { %v6157_v0 = vpop.f32.mrf.mxu0 }
 0x80a   : > { %v6211_v17 = vadd.f32 %v6157_v0, %v6052_v16  ;;  %v6316_v29 = vpop.f32.mrf.mxu1  ;;  %v6056_v16 = vadd.f32 %v14126_v39, %v5897_v57  ;;  %v6896_v39 = vld [vmem:[#allocation15 + $0x1e0] sm:$0xff]  ;;  %v6754_v57 = vld [vmem:[#allocation15 + $0x178] sm:$0xff] }
 0x80b   : > { %v10437_v50 = vpop.f32.mrf.mxu0 }
 0x80c   : > { %v6370_v53 = vadd.f32 %v6316_v29, %v6211_v17  ;;  %v10502_v2 = vpop.f32.mrf.mxu1  ;;  %v6897_v50 = vld [vmem:[#allocation15 + $0x1e8] sm:$0xff] }
 0x80d   : > { %v6162_v28 = vpop.f32.mrf.mxu0  ;;  %v6057_v2 = vadd.f32 %v14130_v47, %v5898_v59  ;;  %v6752_v59 = vld [vmem:[#allocation15 + $0x168] sm:$0xff] }
 0x80e   : > { %v6388_v49 = vadd.f32 %v14157_v42, %v6370_v53  ;;  %v6212_v46 = vadd.f32 %v6162_v28, %v6053_v31  ;;  %v6321_v15 = vpop.f32.mrf.mxu1 }
 0x80f   : > { %v10440_v24 = vpop.f32.mrf.mxu0 }
 0x810   : > { %v6399_v30 = vmax.f32 %v6388_v49, 0.0  ;;  %v6371_v45 = vadd.f32 %v6321_v15, %v6212_v46  ;;  %v10505_v32 = vpop.f32.mrf.mxu1  ;;  %v5899_v49 = vadd.f32 %v14132_v60, %v14116_v61  ;;  %v6894_v61 = vld [vmem:[#allocation15 + $0x1d0] sm:$0xff]  ;;  %v5900_v60 = vadd.f32 %v14136_v35, %v14118_v13 }
 0x811   : > { %v6167_v5 = vpop.f32.mrf.mxu0 }
 0x812   : > { %v6417_v18 = vmul.f32 %v14165_v9, %v6399_v30  ;;  %v6389_v48 = vadd.f32 %v14157_v42, %v6371_v45  ;;  %v6213_v37 = vadd.f32 %v6167_v5, %v6054_v41  ;;  %v6326_v56 = vpop.f32.mrf.mxu1  ;;  %v6895_v41 = vld [vmem:[#allocation15 + $0x1d8] sm:$0xff] }
 0x813   : > { %v10443_v4 = vpop.f32.mrf.mxu0 }
 0x814   : > { %v6435_v27 = vadd.f32 %v14170_v10, %v6417_v18  ;;  %v6400_v58 = vmax.f32 %v6389_v48, 0.0  ;;  %v6372_v1 = vadd.f32 %v6326_v56, %v6213_v37  ;;  %v10508_v23 = vpop.f32.mrf.mxu1  ;;  %v6058_v48 = vadd.f32 %v14134_v54, %v5899_v49  ;;  %v6753_v54 = vld [vmem:[#allocation15 + $0x170] sm:$0xff] }
 0x815   : > { %v6172_v3 = vpop.f32.mrf.mxu0 }
 0x816   : > { %6446 = vst [vmem:[#allocation6] sm:$0xff] %v6435_v27  ;;  %v6418_v11 = vmul.f32 %v14165_v9, %v6400_v58  ;;  %v6390_v63 = vadd.f32 %v14157_v42, %v6372_v1  ;;  %v6214_v34 = vadd.f32 %v6172_v3, %v6055_v38  ;;  %v6331_v55 = vpop.f32.mrf.mxu1  ;;  %10625 = vmatmul.mubr.f32.vlgmr.msra.gmra.mxu1 %v6435_v27 }
 0x817   : > { %v10446_v22 = vpop.f32.mrf.mxu0  ;;  %10627 = vmatprep.mubr.msk.f32.mxu1 %vm11279_vm10, %v14180_v43  ;;  %10711 = vmatpush3.msra.mxu1 %v6899_v8  ;;  %v6059_v8 = vadd.f32 %v14138_v52, %v5900_v60 }
 0x818   : > { %v6436_v51 = vadd.f32 %v14170_v10, %v6418_v11  ;;  %v6401_v0 = vmax.f32 %v6390_v63, 0.0  ;;  %v6373_v17 = vadd.f32 %v6331_v55, %v6214_v34  ;;  %v10511_v29 = vpop.f32.mrf.mxu1  ;;  %10712 = vmatprep.subr.mxu1 %v14180_v43  ;;  %v5901_v11 = vadd.f32 %v14140_v6, %v14120_v33 }
 0x819   : > { %v6177_v31 = vpop.f32.mrf.mxu0  ;;  %10713 = vmatpush3.msra.mxu1 %v6898_v44  ;;  %v5902_v29 = vadd.f32 %v14144_v26, %v14122_v7 }
 0x81a   : > { %6447 = vst [vmem:[#allocation6 + $0x8] sm:$0xff] %v6436_v51  ;;  %v6419_v40 = vmul.f32 %v14165_v9, %v6401_v0  ;;  %v6391_v20 = vadd.f32 %v14157_v42, %v6373_v17  ;;  %v6215_v36 = vadd.f32 %v6177_v31, %v6056_v16  ;;  %v6336_v53 = vpop.f32.mrf.mxu1  ;;  %10628 = vmatmul.mubr.f32.gmra.mxu1 %v6436_v51  ;;  %v6751_v0 = vld [vmem:[#allocation15 + $0x160] sm:$0xff]  ;;  %v6893_v17 = vld [vmem:[#allocation15 + $0x1c8] sm:$0xff] }
 0x81b   : > { %10714 = vmatprep.subr.mxu1 %v14180_v43  ;;  %v10449_v28 = vpop.f32.mrf.mxu0  ;;  %10630 = vmatprep.mubr.msk.f32.mxu1 %vm11279_vm10, %v14180_v43  ;;  %v6060_v31 = vadd.f32 %v14142_v14, %v5901_v11  ;;  %v6890_v11 = vld [vmem:[#allocation15 + $0x1b0] sm:$0xff] }
 0x81c   : > { %10715 = vmatpush3.msra.mxu1 %v6897_v50  ;;  %v6437_v46 = vadd.f32 %v14170_v10, %v6419_v40  ;;  %v6402_v15 = vmax.f32 %v6391_v20, 0.0  ;;  %v6374_v19 = vadd.f32 %v6336_v53, %v6215_v36  ;;  %v10514_v24 = vpop.f32.mrf.mxu1 }
 0x81d   : > { %10716 = vmatprep.subr.mxu1 %v14180_v43  ;;  %v6182_v30 = vpop.f32.mrf.mxu0  ;;  %v5903_v24 = vadd.f32 %v14151_v12, %v14124_v21 }
 0x81e   : > { %10717 = vmatpush3.msra.mxu1 %v6896_v39  ;;  %6448 = vst [vmem:[#allocation6 + $0x10] sm:$0xff] %v6437_v46  ;;  %v6420_v47 = vmul.f32 %v14165_v9, %v6402_v15  ;;  %v6392_v45 = vadd.f32 %v14157_v42, %v6374_v19  ;;  %v6216_v32 = vadd.f32 %v6182_v30, %v6057_v2  ;;  %v6341_v5 = vpop.f32.mrf.mxu1  ;;  %v6750_v39 = vld [vmem:[#allocation15 + $0x158] sm:$0xff] }
 0x81f   : > { %10631 = vmatmul.mubr.f32.gmra.mxu1 %v6437_v46  ;;  %10718 = vmatprep.subr.mxu1 %v14180_v43  ;;  %v10452_v18 = vpop.f32.mrf.mxu0  ;;  %v6749_v46 = vld [vmem:[#allocation15 + $0x150] sm:$0xff]  ;;  %v6061_v15 = vadd.f32 %v14146_v25, %v5902_v29 }
 0x820   : > { %10633 = vmatprep.mubr.msk.f32.mxu1 %vm11279_vm10, %v14180_v43  ;;  %10719 = vmatpush3.msra.mxu1 %v6895_v41  ;;  %v6438_v37 = vadd.f32 %v14170_v10, %v6420_v47  ;;  %v6403_v56 = vmax.f32 %v6392_v45, 0.0  ;;  %v6375_v38 = vadd.f32 %v6341_v5, %v6216_v32  ;;  %v10517_v4 = vpop.f32.mrf.mxu1  ;;  %v6748_v32 = vld [vmem:[#allocation15 + $0x148] sm:$0xff] }
 0x821   : > { %10720 = vmatprep.subr.mxu1 %v14180_v43  ;;  %v6187_v27 = vpop.f32.mrf.mxu0  ;;  %v6483_v58 = vld [vmem:[#allocation6 + $0x1] sm:$0xff] }
 0x822   : > { %10721 = vmatpush3.msra.mxu1 %v6894_v61  ;;  %6449 = vst [vmem:[#allocation6 + $0x18] sm:$0xff] %v6438_v37  ;;  %v6421_v13 = vmul.f32 %v14165_v9, %v6403_v56  ;;  %v6393_v35 = vadd.f32 %v14157_v42, %v6375_v38  ;;  %v6217_v1 = vadd.f32 %v6187_v27, %v6058_v48  ;;  %v6346_v23 = vpop.f32.mrf.mxu1  ;;  %v6892_v61 = vld [vmem:[#allocation15 + $0x1c0] sm:$0xff] }
 0x823   : > { %10566 = vmatmul.mubr.f32.vlgmr.msra.gmra.mxu0 %v6483_v58  ;;  %10634 = vmatmul.mubr.f32.gmra.mxu1 %v6438_v37  ;;  %v10455_v3 = vpop.f32.mrf.mxu0  ;;  %v6747_v48 = vld [vmem:[#allocation15 + $0x140] sm:$0xff]  ;;  %v6062_v56 = vadd.f32 %v14149_v62, %v5903_v24  ;;  %v6891_v58 = vld [vmem:[#allocation15 + $0x1b8] sm:$0xff]  ;;  %v7043_v24 = vld [vmem:[#allocation15 + $0x270] sm:$0xff] }
 0x824   : > { %10652 = vmatpush3.msra.mxu0 %v6754_v57  ;;  %10568 = vmatprep.mubr.msk.f32.mxu0 %vm11279_vm10, %v14180_v43  ;;  %v6439_v63 = vadd.f32 %v14170_v10, %v6421_v13  ;;  %v6404_v34 = vmax.f32 %v6393_v35, 0.0  ;;  %v6376_v55 = vadd.f32 %v6346_v23, %v6217_v1  ;;  %v10520_v44 = vpop.f32.mrf.mxu1  ;;  %v6746_v1 = vld [vmem:[#allocation15 + $0x138] sm:$0xff] }
 0x825   : > { %10653 = vmatprep.subr.mxu0 %v14180_v43  ;;  %10636 = vmatprep.mubr.msk.f32.mxu1 %vm11279_vm10, %v14180_v43  ;;  %v6192_v52 = vpop.f32.mrf.mxu0  ;;  %v6484_v22 = vld [vmem:[#allocation6 + $0x9] sm:$0xff] }
 0x826   : > { %10654 = vmatpush3.msra.mxu0 %v6753_v54  ;;  %10722 = vmatprep.subr.mxu1 %v14180_v43  ;;  %6450 = vst [vmem:[#allocation6 + $0x20] sm:$0xff] %v6439_v63  ;;  %v6422_v16 = vmul.f32 %v14165_v9, %v6404_v34  ;;  %v6394_v33 = vadd.f32 %v14157_v42, %v6376_v55  ;;  %v6351_v51 = vpop.f32.mrf.mxu1 }
 0x827   : > { %v6218_v6 = vadd.f32 %v6192_v52, %v6059_v8  ;;  %10569 = vmatmul.mubr.f32.gmra.mxu0 %v6484_v22  ;;  %10655 = vmatprep.subr.mxu0 %v14180_v43  ;;  %v10458_v50 = vpop.f32.mrf.mxu0  ;;  %v6745_v52 = vld [vmem:[#allocation15 + $0x130] sm:$0xff] }
 0x828   : > { %10656 = vmatpush3.msra.mxu0 %v6752_v59  ;;  %10571 = vmatprep.mubr.msk.f32.mxu0 %vm11279_vm10, %v14180_v43  ;;  %v6440_v40 = vadd.f32 %v14170_v10, %v6422_v16  ;;  %v6405_v20 = vmax.f32 %v6394_v33, 0.0  ;;  %v10523_v53 = vpop.f32.mrf.mxu1  ;;  %v6889_v33 = vld [vmem:[#allocation15 + $0x1a8] sm:$0xff]  ;;  %v6743_v50 = vld [vmem:[#allocation15 + $0x120] sm:$0xff] }
 0x829   : > { %v6377_v36 = vadd.f32 %v6351_v51, %v6218_v6  ;;  %10657 = vmatprep.subr.mxu0 %v14180_v43  ;;  %10637 = vmatmul.mubr.f32.gmra.mxu1 %v6439_v63  ;;  %v6197_v2 = vpop.f32.mrf.mxu0  ;;  %v6485_v28 = vld [vmem:[#allocation6 + $0x11] sm:$0xff] }
 0x82a   : > { %10658 = vmatpush3.msra.mxu0 %v6751_v0  ;;  %10723 = vmatpush3.msra.mxu1 %v6893_v17  ;;  %6451 = vst [vmem:[#allocation6 + $0x28] sm:$0xff] %v6440_v40  ;;  %v6423_v7 = vmul.f32 %v14165_v9, %v6405_v20  ;;  %v6219_v49 = vadd.f32 %v6197_v2, %v6060_v31  ;;  %v6356_v14 = vpop.f32.mrf.mxu1  ;;  %v6744_v0 = vld [vmem:[#allocation15 + $0x128] sm:$0xff]  ;;  %v6888_v17 = vld [vmem:[#allocation15 + $0x1a0] sm:$0xff]  ;;  %v6886_v20 = vld [vmem:[#allocation15 + $0x190] sm:$0xff] }
 0x82b   : > { %v6395_v26 = vadd.f32 %v14157_v42, %v6377_v36  ;;  %10572 = vmatmul.mubr.f32.gmra.mxu0 %v6485_v28  ;;  %10659 = vmatprep.subr.mxu0 %v14180_v43  ;;  %v10461_v19 = vpop.f32.mrf.mxu0  ;;  %v6885_v53 = vld [vmem:[#allocation15 + $0x188] sm:$0xff]  ;;  %v6884_v2 = vld [vmem:[#allocation15 + $0x180] sm:$0xff] }
 0x82c   : > { %10660 = vmatpush3.msra.mxu0 %v6750_v39  ;;  %10574 = vmatprep.mubr.msk.f32.mxu0 %vm11279_vm10, %v14180_v43  ;;  %v6441_v41 = vadd.f32 %v14170_v10, %v6423_v7  ;;  %v6378_v47 = vadd.f32 %v6356_v14, %v6219_v49  ;;  %v10526_v45 = vpop.f32.mrf.mxu1  ;;  %v6741_v39 = vld [vmem:[#allocation15 + $0x110] sm:$0xff]  ;;  %v6740_v28 = vld [vmem:[#allocation15 + $0x108] sm:$0xff]  ;;  %v6739_v49 = vld [vmem:[#allocation15 + $0x100] sm:$0xff] }
 0x82d   : > { %v6406_v30 = vmax.f32 %v6395_v26, 0.0  ;;  %10661 = vmatprep.subr.mxu0 %v14180_v43  ;;  %10724 = vmatprep.subr.mxu1 %v14180_v43  ;;  %v6202_v5 = vpop.f32.mrf.mxu0  ;;  %v6486_v25 = vld [vmem:[#allocation6 + $0x19] sm:$0xff]  ;;  %v6874_v26 = vld [vmem:[#allocation6 + $0xc] sm:$0xff] }
 0x82e   : > { %10662 = vmatpush3.msra.mxu0 %v6749_v46  ;;  %10639 = vmatprep.mubr.msk.f32.mxu1 %vm11279_vm10, %v14180_v43  ;;  %6452 = vst [vmem:[#allocation6 + $0x30] sm:$0xff] %v6441_v41  ;;  %v6396_v12 = vadd.f32 %v14157_v42, %v6378_v47  ;;  %v6220_v60 = vadd.f32 %v6202_v5, %v6061_v15  ;;  %v6361_v18 = vpop.f32.mrf.mxu1  ;;  %v7044_v14 = vld [vmem:[#allocation15 + $0x278] sm:$0xff]  ;;  %v6875_v19 = vld [vmem:[#allocation6 + $0x14] sm:$0xff]  ;;  %v6876_v45 = vld [vmem:[#allocation6 + $0x1c] sm:$0xff] }
 0x82f   : > { %v6424_v21 = vmul.f32 %v14165_v9, %v6406_v30  ;;  %10575 = vmatmul.mubr.f32.gmra.mxu0 %v6486_v25  ;;  %10663 = vmatprep.subr.mxu0 %v14180_v43  ;;  %v10464_v37 = vpop.f32.mrf.mxu0  ;;  %v6729_v46 = vld [vmem:[#allocation6 + $0xb] sm:$0xff]  ;;  %v6730_v30 = vld [vmem:[#allocation6 + $0x13] sm:$0xff] }
 0x830   : > { %10664 = vmatpush3.msra.mxu0 %v6748_v32  ;;  %10577 = vmatprep.mubr.msk.f32.mxu0 %vm11279_vm10, %v14180_v43  ;;  %v6407_v4 = vmax.f32 %v6396_v12, 0.0  ;;  %v6379_v57 = vadd.f32 %v6361_v18, %v6220_v60  ;;  %v10529_v27 = vpop.f32.mrf.mxu1  ;;  %v7189_v15 = vld [vmem:[#allocation15 + $0x2f8] sm:$0xff]  ;;  %v7042_v47 = vld [vmem:[#allocation15 + $0x268] sm:$0xff]  ;;  %v7041_v5 = vld [vmem:[#allocation15 + $0x260] sm:$0xff] }
 0x831   : > { %v6442_v38 = vadd.f32 %v14170_v10, %v6424_v21  ;;  %10665 = vmatprep.subr.mxu0 %v14180_v43  ;;  %10725 = vmatpush3.msra.mxu1 %v6892_v61  ;;  %v6207_v13 = vpop.f32.mrf.mxu0  ;;  %v6487_v35 = vld [vmem:[#allocation6 + $0x21] sm:$0xff]  ;;  %v7187_v32 = vld [vmem:[#allocation15 + $0x2e8] sm:$0xff]  ;;  %v7186_v25 = vld [vmem:[#allocation15 + $0x2e0] sm:$0xff] }
 0x832   : > { %10640 = vmatmul.mubr.f32.gmra.mxu1 %v6440_v40  ;;  %10666 = vmatpush3.msra.mxu0 %v6747_v48  ;;  %v6425_v23 = vmul.f32 %v14165_v9, %v6407_v4  ;;  %v6397_v54 = vadd.f32 %v14157_v42, %v6379_v57  ;;  %v6221_v62 = vadd.f32 %v6207_v13, %v6062_v56  ;;  %v6366_v8 = vpop.f32.mrf.mxu1  ;;  %v6887_v40 = vld [vmem:[#allocation15 + $0x198] sm:$0xff]  ;;  %v6731_v61 = vld [vmem:[#allocation6 + $0x1b] sm:$0xff]  ;;  %v7182_v57 = vld [vmem:[#allocation15 + $0x2c0] sm:$0xff] }
 0x833   : > { %6453 = vst [vmem:[#allocation6 + $0x38] sm:$0xff] %v6442_v38  ;;  %10578 = vmatmul.mubr.f32.gmra.mxu0 %v6487_v35  ;;  %10726 = vmatprep.subr.mxu1 %v14180_v43  ;;  %v10467_v3 = vpop.f32.mrf.mxu0  ;;  %v7040_v21 = vld [vmem:[#allocation15 + $0x258] sm:$0xff]  ;;  %v7184_v18 = vld [vmem:[#allocation15 + $0x2d0] sm:$0xff]  ;;  %v7038_v4 = vld [vmem:[#allocation15 + $0x248] sm:$0xff] }
 0x834   : > { %10667 = vmatprep.subr.mxu0 %v14180_v43  ;;  %10727 = vmatpush3.msra.mxu1 %v6891_v58  ;;  %v6443_v63 = vadd.f32 %v14170_v10, %v6425_v23  ;;  %v6408_v34 = vmax.f32 %v6397_v54, 0.0  ;;  %v6380_v55 = vadd.f32 %v6366_v8, %v6221_v62  ;;  %v10532_v44 = vpop.f32.mrf.mxu1  ;;  %v6877_v12 = vld [vmem:[#allocation6 + $0x24] sm:$0xff]  ;;  %v7037_v27 = vld [vmem:[#allocation15 + $0x240] sm:$0xff]  ;;  %v7179_v3 = vld [vmem:[#allocation15 + $0x2a8] sm:$0xff] }
 0x835   : > { %10668 = vmatpush3.msra.mxu0 %v6746_v1  ;;  %10728 = vmatprep.subr.mxu1 %v14180_v43  ;;  %v6488_v59 = vld [vmem:[#allocation6 + $0x29] sm:$0xff]  ;;  %v7039_v48 = vld [vmem:[#allocation15 + $0x250] sm:$0xff] }
 0x836   : > { %10580 = vmatprep.mubr.msk.f32.mxu0 %vm11279_vm10, %v14180_v43  ;;  %10642 = vmatprep.mubr.msk.f32.mxu1 %vm11279_vm10, %v14180_v43  ;;  %6454 = vst [vmem:[#allocation6 + $0x40] sm:$0xff] %v6443_v63  ;;  %v6426_v22 = vmul.f32 %v14165_v9, %v6408_v34  ;;  %v6398_v16 = vadd.f32 %v14157_v42, %v6380_v55  ;;  %v7185_v60 = vld [vmem:[#allocation15 + $0x2d8] sm:$0xff]  ;;  %v7180_v23 = vld [vmem:[#allocation15 + $0x2b0] sm:$0xff]  ;;  %v7178_v63 = vld [vmem:[#allocation15 + $0x2a0] sm:$0xff] }
 0x837   : > { %10729 = vmatpush3.msra.mxu1 %v6890_v11  ;;  %10581 = vmatmul.mubr.f32.gmra.mxu0 %v6488_v59  ;;  %v6732_v37 = vld [vmem:[#allocation6 + $0x23] sm:$0xff]  ;;  %v6878_v56 = vld [vmem:[#allocation6 + $0x2c] sm:$0xff]  ;;  %v7034_v11 = vld [vmem:[#allocation15 + $0x228] sm:$0xff] }
 0x838   : > { %10643 = vmatmul.mubr.f32.gmra.mxu1 %v6441_v41  ;;  %10669 = vmatprep.subr.mxu0 %v14180_v43  ;;  %v6444_v6 = vadd.f32 %v14170_v10, %v6426_v22  ;;  %v6409_v51 = vmax.f32 %v6398_v16, 0.0  ;;  %v7188_v41 = vld [vmem:[#allocation15 + $0x2f0] sm:$0xff]  ;;  %v6733_v58 = vld [vmem:[#allocation6 + $0x2b] sm:$0xff] }
 0x839   : > { %10730 = vmatprep.subr.mxu1 %v14180_v43  ;;  %10670 = vmatpush3.msra.mxu0 %v6745_v52  ;;  %v7181_v35 = vld [vmem:[#allocation15 + $0x2b8] sm:$0xff]  ;;  %v7035_v62 = vld [vmem:[#allocation15 + $0x230] sm:$0xff]  ;;  %v7033_v55 = vld [vmem:[#allocation15 + $0x220] sm:$0xff] }
 0x83a   : > { %10731 = vmatpush3.msra.mxu1 %v6889_v33  ;;  %10671 = vmatprep.subr.mxu0 %v14180_v43  ;;  %v6489_v29 = vld [vmem:[#allocation6 + $0x31] sm:$0xff]  ;;  %6455 = vst [vmem:[#allocation6 + $0x48] sm:$0xff] %v6444_v6  ;;  %v6427_v42 = vmul.f32 %v14165_v9, %v6409_v51  ;;  %v6742_v9 = vld [vmem:[#allocation15 + $0x118] sm:$0xff]  ;;  %v7176_v22 = vld [vmem:[#allocation15 + $0x290] sm:$0xff] }
 0x83b   : > { %10732 = vmatprep.subr.mxu1 %v14180_v43  ;;  %10583 = vmatprep.mubr.msk.f32.mxu0 %vm11279_vm10, %v14180_v43  ;;  %v6879_v13 = vld [vmem:[#allocation6 + $0x34] sm:$0xff]  ;;  %v7036_v1 = vld [vmem:[#allocation15 + $0x238] sm:$0xff]  ;;  %v7031_v51 = vld [vmem:[#allocation15 + $0x210] sm:$0xff] }
 0x83c   : > { %10645 = vmatprep.mubr.msk.f32.mxu1 %vm11279_vm10, %v14180_v43  ;;  %10672 = vmatpush3.msra.mxu0 %v6744_v0  ;;  %v6445_v31 = vadd.f32 %v14170_v10, %v6427_v42  ;;  %v6734_v54 = vld [vmem:[#allocation6 + $0x33] sm:$0xff]  ;;  %v7177_v59 = vld [vmem:[#allocation15 + $0x298] sm:$0xff] }
 0x83d   : > { %10733 = vmatpush3.msra.mxu1 %v6888_v17  ;;  %10584 = vmatmul.mubr.f32.gmra.mxu0 %v6489_v29  ;;  %v6490_v36 = vld [vmem:[#allocation6 + $0x39] sm:$0xff]  ;;  %v6491_v7 = vld [vmem:[#allocation6 + $0x41] sm:$0x3]  ;;  %v7032_v52 = vld [vmem:[#allocation15 + $0x218] sm:$0xff] }
 0x83e   : > { %10646 = vmatmul.mubr.f32.gmra.mxu1 %v6442_v38  ;;  %10673 = vmatprep.subr.mxu0 %v14180_v43  ;;  %6456 = vst [vmem:[#allocation6 + $0x50] sm:$0xff] %v6445_v31  ;;  %v6466_v10 = vld [vmem:[#allocation6 + $0x40] sm:$0x3]  ;;  %v7183_v38 = vld [vmem:[#allocation15 + $0x2c8] sm:$0xff]  ;;  %v7174_v0 = vld [vmem:[#allocation15 + $0x280] sm:$0xff] }
 0x83f   : > { %10734 = vmatprep.subr.mxu1 %v14180_v43  ;;  %10674 = vmatpush3.msra.mxu0 %v6743_v50  ;;  %v6880_v8 = vld [vmem:[#allocation6 + $0x3c] sm:$0xff]  ;;  %v7029_v50 = vld [vmem:[#allocation15 + $0x200] sm:$0xff] }
 0x840   : > { %10735 = vmatpush3.msra.mxu1 %v6887_v40  ;;  %10675 = vmatprep.subr.mxu0 %v14180_v43  ;;  %v6735_v34 = vld [vmem:[#allocation6 + $0x3b] sm:$0xff] }
 0x841   : > { %10736 = vmatprep.subr.mxu1 %v14180_v43  ;;  %10586 = vmatprep.mubr.msk.f32.mxu0 %vm11279_vm10, %v14180_v43  ;;  %v6881_v44 = vld [vmem:[#allocation6 + $0x44] sm:$0xff]  ;;  %v7175_v33 = vld [vmem:[#allocation15 + $0x288] sm:$0xff]  ;;  %v6882_v6 = vld [vmem:[#allocation6 + $0x4c] sm:$0x3] }
 0x842   : > { %10648 = vmatprep.mubr.msk.f32.mxu1 %vm11279_vm10, %v14180_v43  ;;  %10676 = vmatpush3.msra.mxu0 %v6742_v9  ;;  %v6736_v16 = vld [vmem:[#allocation6 + $0x43] sm:$0xff]  ;;  %v7030_v17 = vld [vmem:[#allocation15 + $0x208] sm:$0xff]  ;;  %v6737_v29 = vld [vmem:[#allocation6 + $0x4b] sm:$0x3] }
 0x843   : > { %10737 = vmatpush3.msra.mxu1 %v6886_v20  ;;  %10587 = vmatmul.mubr.f32.gmra.mxu0 %v6490_v36  ;;  %v7164_v42 = vld [vmem:[#allocation6 + $0x17] sm:$0xff]  ;;  %v7165_v40 = vld [vmem:[#allocation6 + $0x1f] sm:$0xff]  ;;  %v7166_v20 = vld [vmem:[#allocation6 + $0x27] sm:$0xff] }
 0x844   : > { %10649 = vmatmul.mubr.f32.gmra.mxu1 %v6466_v10  ;;  %10738 = vmatprep.subr.mxu1 %v14180_v43  ;;  %v7019_v31 = vld [vmem:[#allocation6 + $0x16] sm:$0xff]  ;;  %v7020_v9 = vld [vmem:[#allocation6 + $0x1e] sm:$0xff]  ;;  %v7021_v36 = vld [vmem:[#allocation6 + $0x26] sm:$0xff] }
 0x845   : > { %10677 = vmatprep.subr.mxu0 %v14180_v43  ;;  %10739 = vmatpush3.msra.mxu1 %v6885_v53  ;;  %v7167_v10 = vld [vmem:[#allocation6 + $0x2f] sm:$0xff] }
 0x846   : > { %10678 = vmatpush3.msra.mxu0 %v6741_v39  ;;  %10740 = vmatprep.subr.mxu1 %v14180_v43  ;;  %v7022_v53 = vld [vmem:[#allocation6 + $0x2e] sm:$0xff]  ;;  %v7168_v39 = vld [vmem:[#allocation6 + $0x37] sm:$0xff] }
 0x847   : > { %10589 = vmatprep.mubr.msk.f32.mxu0 %vm11279_vm10, %v14180_v43  ;;  %10679 = vmatprep.subr.mxu0 %v14180_v43 }
 0x848   : > { %10741 = vmatpush3.msra.mxu1 %v6884_v2  ;;  %10742 = vmatprep.mubr.msk.f32.mxu1 %vm11279_vm10, %v14180_v43  ;;  %v7023_v2 = vld [vmem:[#allocation6 + $0x36] sm:$0xff] }
 0x849   : > { %10590 = vmatmul.mubr.f32.gmra.mxu0 %v6491_v7  ;;  %10743 = vmatmul.mubr.f32.vlgmr.msra.gmra.mxu1 %v6874_v26  ;;  %v7024_v7 = vld [vmem:[#allocation6 + $0x3e] sm:$0xff]  ;;  %v7170_v26 = vld [vmem:[#allocation6 + $0x47] sm:$0xff] }
 0x84a   : > { %10680 = vmatpush3.msra.mxu0 %v6740_v28  ;;  %10683 = vmatprep.mubr.msk.f32.mxu0 %vm11279_vm10, %v14180_v43  ;;  %v7169_v28 = vld [vmem:[#allocation6 + $0x3f] sm:$0xff] }
 0x84b   : > { %10681 = vmatprep.subr.mxu0 %v14180_v43  ;;  %10745 = vmatprep.mubr.msk.f32.mxu1 %vm11279_vm10, %v14180_v43 }
 0x84c   : > { %10682 = vmatpush3.msra.mxu0 %v6739_v49  ;;  %10828 = vmatprep.subr.mxu1 %v14180_v43  ;;  %v7025_v49 = vld [vmem:[#allocation6 + $0x46] sm:$0xff] }
 0x84d   : > { %10769 = vmatprep.subr.mxu0 %v14180_v43  ;;  %10684 = vmatmul.mubr.f32.vlgmr.msra.gmra.mxu0 %v6729_v46  ;;  %v7026_v46 = vld [vmem:[#allocation6 + $0x4e] sm:$0xff] }
 0x84e   : > { %10746 = vmatmul.mubr.f32.gmra.mxu1 %v6875_v19  ;;  %10770 = vmatpush3.msra.mxu0 %v7044_v14  ;;  %v7171_v14 = vld [vmem:[#allocation6 + $0x4f] sm:$0xff] }
 0x84f   : > { %10829 = vmatpush3.msra.mxu1 %v7189_v15  ;;  %10771 = vmatprep.subr.mxu0 %v14180_v43  ;;  %v7172_v15 = vld [vmem:[#allocation6 + $0x57] sm:$0x3] }
 0x850   : > { %10830 = vmatprep.subr.mxu1 %v14180_v43  ;;  %10686 = vmatprep.mubr.msk.f32.mxu0 %vm11279_vm10, %v14180_v43  ;;  %v7027_v19 = vld [vmem:[#allocation6 + $0x56] sm:$0x3] }
 0x851   : > { %10748 = vmatprep.mubr.msk.f32.mxu1 %vm11279_vm10, %v14180_v43  ;;  %10772 = vmatpush3.msra.mxu0 %v7043_v24 }
 0x852   : > { %10831 = vmatpush3.msra.mxu1 %v7188_v41  ;;  %10687 = vmatmul.mubr.f32.gmra.mxu0 %v6730_v30 }
 0x853   : > { %10749 = vmatmul.mubr.f32.gmra.mxu1 %v6876_v45  ;;  %10773 = vmatprep.subr.mxu0 %v14180_v43 }
 0x854   : > { %10832 = vmatprep.subr.mxu1 %v14180_v43  ;;  %10774 = vmatpush3.msra.mxu0 %v7042_v47 }
 0x855   : > { %10833 = vmatpush3.msra.mxu1 %v7187_v32  ;;  %10775 = vmatprep.subr.mxu0 %v14180_v43 }
 0x856   : > { %10834 = vmatprep.subr.mxu1 %v14180_v43  ;;  %10689 = vmatprep.mubr.msk.f32.mxu0 %vm11279_vm10, %v14180_v43 }
 0x857   : > { %10751 = vmatprep.mubr.msk.f32.mxu1 %vm11279_vm10, %v14180_v43  ;;  %10776 = vmatpush3.msra.mxu0 %v7041_v5 }
 0x858   : > { %10835 = vmatpush3.msra.mxu1 %v7186_v25  ;;  %10690 = vmatmul.mubr.f32.gmra.mxu0 %v6731_v61 }
 0x859   : > { %10752 = vmatmul.mubr.f32.gmra.mxu1 %v6877_v12  ;;  %10777 = vmatprep.subr.mxu0 %v14180_v43 }
 0x85a   : > { %10836 = vmatprep.subr.mxu1 %v14180_v43  ;;  %10778 = vmatpush3.msra.mxu0 %v7040_v21 }
 0x85b   : > { %10837 = vmatpush3.msra.mxu1 %v7185_v60  ;;  %10692 = vmatprep.mubr.msk.f32.mxu0 %vm11279_vm10, %v14180_v43 }
 0x85c   : > { %10838 = vmatprep.subr.mxu1 %v14180_v43  ;;  %10754 = vmatprep.mubr.msk.f32.mxu1 %vm11279_vm10, %v14180_v43 }
 0x85d   : > { %10779 = vmatprep.subr.mxu0 %v14180_v43  ;;  %10839 = vmatpush3.msra.mxu1 %v7184_v18 }
 0x85e   : > { %10693 = vmatmul.mubr.f32.gmra.mxu0 %v6732_v37  ;;  %10755 = vmatmul.mubr.f32.gmra.mxu1 %v6878_v56 }
 0x85f   : > { %10780 = vmatpush3.msra.mxu0 %v7039_v48  ;;  %10840 = vmatprep.subr.mxu1 %v14180_v43 }
 0x860   : > { %10781 = vmatprep.subr.mxu0 %v14180_v43  ;;  %10841 = vmatpush3.msra.mxu1 %v7183_v38 }
 0x861   : > { %10782 = vmatpush3.msra.mxu0 %v7038_v4  ;;  %10842 = vmatprep.subr.mxu1 %v14180_v43 }
 0x862   : > { %10695 = vmatprep.mubr.msk.f32.mxu0 %vm11279_vm10, %v14180_v43  ;;  %10757 = vmatprep.mubr.msk.f32.mxu1 %vm11279_vm10, %v14180_v43 }
 0x863   : > { %10783 = vmatprep.subr.mxu0 %v14180_v43  ;;  %10843 = vmatpush3.msra.mxu1 %v7182_v57 }
 0x864   : > { %10696 = vmatmul.mubr.f32.gmra.mxu0 %v6733_v58  ;;  %10758 = vmatmul.mubr.f32.gmra.mxu1 %v6879_v13 }
 0x865   : > { %10784 = vmatpush3.msra.mxu0 %v7037_v27  ;;  %10844 = vmatprep.subr.mxu1 %v14180_v43 }
 0x866   : > { %10785 = vmatprep.subr.mxu0 %v14180_v43  ;;  %10845 = vmatpush3.msra.mxu1 %v7181_v35 }
 0x867   : > { %10786 = vmatpush3.msra.mxu0 %v7036_v1  ;;  %10846 = vmatprep.subr.mxu1 %v14180_v43 }
 0x868   : > { %10698 = vmatprep.mubr.msk.f32.mxu0 %vm11279_vm10, %v14180_v43  ;;  %10760 = vmatprep.mubr.msk.f32.mxu1 %vm11279_vm10, %v14180_v43 }
 0x869   : > { %10847 = vmatpush3.msra.mxu1 %v7180_v23  ;;  %10699 = vmatmul.mubr.f32.gmra.mxu0 %v6734_v54 }
 0x86a   : > { %10761 = vmatmul.mubr.f32.gmra.mxu1 %v6880_v8  ;;  %10787 = vmatprep.subr.mxu0 %v14180_v43 }
 0x86b   : > { %10848 = vmatprep.subr.mxu1 %v14180_v43  ;;  %10788 = vmatpush3.msra.mxu0 %v7035_v62 }
 0x86c   : > { %10849 = vmatpush3.msra.mxu1 %v7179_v3  ;;  %10789 = vmatprep.subr.mxu0 %v14180_v43 }
 0x86d   : > { %10850 = vmatprep.subr.mxu1 %v14180_v43  ;;  %10701 = vmatprep.mubr.msk.f32.mxu0 %vm11279_vm10, %v14180_v43 }
 0x86e   : > { %10763 = vmatprep.mubr.msk.f32.mxu1 %vm11279_vm10, %v14180_v43  ;;  %10790 = vmatpush3.msra.mxu0 %v7034_v11 }
 0x86f   : > { %10851 = vmatpush3.msra.mxu1 %v7178_v63  ;;  %10702 = vmatmul.mubr.f32.gmra.mxu0 %v6735_v34 }
 0x870   : > { %10764 = vmatmul.mubr.f32.gmra.mxu1 %v6881_v44  ;;  %10791 = vmatprep.subr.mxu0 %v14180_v43 }
 0x871   : > { %10852 = vmatprep.subr.mxu1 %v14180_v43  ;;  %10792 = vmatpush3.msra.mxu0 %v7033_v55 }
 0x872   : > { %10853 = vmatpush3.msra.mxu1 %v7177_v59  ;;  %10793 = vmatprep.subr.mxu0 %v14180_v43 }
 0x873   : > { %10854 = vmatprep.subr.mxu1 %v14180_v43  ;;  %10704 = vmatprep.mubr.msk.f32.mxu0 %vm11279_vm10, %v14180_v43 }
 0x874   : > { %10766 = vmatprep.mubr.msk.f32.mxu1 %vm11279_vm10, %v14180_v43  ;;  %10794 = vmatpush3.msra.mxu0 %v7032_v52 }
 0x875   : > { %10855 = vmatpush3.msra.mxu1 %v7176_v22  ;;  %10705 = vmatmul.mubr.f32.gmra.mxu0 %v6736_v16 }
 0x876   : > { %10767 = vmatmul.mubr.f32.gmra.mxu1 %v6882_v6  ;;  %10856 = vmatprep.subr.mxu1 %v14180_v43 }
 0x877   : > { %10795 = vmatprep.subr.mxu0 %v14180_v43  ;;  %10857 = vmatpush3.msra.mxu1 %v7175_v33 }
 0x878   : > { %10796 = vmatpush3.msra.mxu0 %v7031_v51  ;;  %10858 = vmatprep.subr.mxu1 %v14180_v43 }
 0x879   : > { %10707 = vmatprep.mubr.msk.f32.mxu0 %vm11279_vm10, %v14180_v43  ;;  %10797 = vmatprep.subr.mxu0 %v14180_v43 }
 0x87a   : > { %10859 = vmatpush3.msra.mxu1 %v7174_v0  ;;  %10860 = vmatprep.mubr.msk.f32.mxu1 %vm11279_vm10, %v14180_v43 }
 0x87b   : > { %10708 = vmatmul.mubr.f32.gmra.mxu0 %v6737_v29  ;;  %10861 = vmatmul.mubr.f32.vlgmr.msra.gmra.mxu1 %v7164_v42 }
 0x87c   : > { %10798 = vmatpush3.msra.mxu0 %v7030_v17  ;;  %10801 = vmatprep.mubr.msk.f32.mxu0 %vm11279_vm10, %v14180_v43 }
 0x87d   : > { %10799 = vmatprep.subr.mxu0 %v14180_v43  ;;  %10863 = vmatprep.mubr.msk.f32.mxu1 %vm11279_vm10, %v14180_v43 }
 0x87e   : > { %10800 = vmatpush3.msra.mxu0 %v7029_v50 }
 0x87f   : > { %10802 = vmatmul.mubr.f32.vlgmr.msra.gmra.mxu0 %v7019_v31  ;;  %10864 = vmatmul.mubr.f32.gmra.mxu1 %v7165_v40 }
 0x880   : > { %10804 = vmatprep.mubr.msk.f32.mxu0 %vm11279_vm10, %v14180_v43  ;;  %10866 = vmatprep.mubr.msk.f32.mxu1 %vm11279_vm10, %v14180_v43 }
 0x883   : > { %10805 = vmatmul.mubr.f32.gmra.mxu0 %v7020_v9  ;;  %10867 = vmatmul.mubr.f32.gmra.mxu1 %v7166_v20 }
 0x884   : > { %10807 = vmatprep.mubr.msk.f32.mxu0 %vm11279_vm10, %v14180_v43  ;;  %10869 = vmatprep.mubr.msk.f32.mxu1 %vm11279_vm10, %v14180_v43 }
 0x887   : > { %10808 = vmatmul.mubr.f32.gmra.mxu0 %v7021_v36  ;;  %10870 = vmatmul.mubr.f32.gmra.mxu1 %v7167_v10 }
 0x888   : > { %10810 = vmatprep.mubr.msk.f32.mxu0 %vm11279_vm10, %v14180_v43  ;;  %10872 = vmatprep.mubr.msk.f32.mxu1 %vm11279_vm10, %v14180_v43 }
 0x88b   : > { %10811 = vmatmul.mubr.f32.gmra.mxu0 %v7022_v53  ;;  %10873 = vmatmul.mubr.f32.gmra.mxu1 %v7168_v39 }
 0x88c   : > { %10813 = vmatprep.mubr.msk.f32.mxu0 %vm11279_vm10, %v14180_v43  ;;  %10875 = vmatprep.mubr.msk.f32.mxu1 %vm11279_vm10, %v14180_v43 }
 0x88f   : > { %10814 = vmatmul.mubr.f32.gmra.mxu0 %v7023_v2  ;;  %10876 = vmatmul.mubr.f32.gmra.mxu1 %v7169_v28 }
 0x890   : > { %10816 = vmatprep.mubr.msk.f32.mxu0 %vm11279_vm10, %v14180_v43  ;;  %10878 = vmatprep.mubr.msk.f32.mxu1 %vm11279_vm10, %v14180_v43 }
 0x893   : > { %10817 = vmatmul.mubr.f32.gmra.mxu0 %v7024_v7  ;;  %10879 = vmatmul.mubr.f32.gmra.mxu1 %v7170_v26 }
 0x894   : > { %10819 = vmatprep.mubr.msk.f32.mxu0 %vm11279_vm10, %v14180_v43  ;;  %10881 = vmatprep.mubr.msk.f32.mxu1 %vm11279_vm10, %v14180_v43 }
 0x897   : > { %10820 = vmatmul.mubr.f32.gmra.mxu0 %v7025_v49  ;;  %10882 = vmatmul.mubr.f32.gmra.mxu1 %v7171_v14 }
 0x898   : > { %10822 = vmatprep.mubr.msk.f32.mxu0 %vm11279_vm10, %v14180_v43  ;;  %10884 = vmatprep.mubr.msk.f32.mxu1 %vm11279_vm10, %v14180_v43 }
 0x89b   : > { %10823 = vmatmul.mubr.f32.gmra.mxu0 %v7026_v46  ;;  %10885 = vmatmul.mubr.f32.gmra.mxu1 %v7172_v15 }
 0x89c   : > { %10825 = vmatprep.mubr.msk.f32.mxu0 %vm11279_vm10, %v14180_v43 }
 0x89f   : > { %10826 = vmatmul.mubr.f32.gmra.mxu0 %v7027_v19 }
 0x8d6   : > { %v6685_v24 = vpop.f32.mrf.mxu1 }
 0x8d8   : > { %v10626_v41 = vpop.f32.mrf.mxu1 }
 0x8da   : > { %v6690_v30 = vpop.f32.mrf.mxu1 }
 0x8dc   : > { %v10629_v47 = vpop.f32.mrf.mxu1 }
 0x8df   : > { %v6695_v45 = vpop.f32.mrf.mxu1 }
 0x8e1   : > { %v10632_v32 = vpop.f32.mrf.mxu1 }
 0x8e3   : > { %v6575_v5 = vpop.f32.mrf.mxu0  ;;  %v6700_v25 = vpop.f32.mrf.mxu1 }
 0x8e4   : > { %v14392_v61 = vadd.f32 %v6685_v24, %v6575_v5 }
 0x8e5   : > { %v10567_v21 = vpop.f32.mrf.mxu0  ;;  %v10635_v12 = vpop.f32.mrf.mxu1 }
 0x8e7   : > { %v6580_v60 = vpop.f32.mrf.mxu0 }
 0x8e8   : > { %v14394_v18 = vadd.f32 %v6690_v30, %v6580_v60 }
 0x8e9   : > { %v10570_v48 = vpop.f32.mrf.mxu0  ;;  %v6705_v37 = vpop.f32.mrf.mxu1 }
 0x8eb   : > { %v6585_v43 = vpop.f32.mrf.mxu0  ;;  %v10638_v56 = vpop.f32.mrf.mxu1 }
 0x8ec   : > { %v14396_v38 = vadd.f32 %v6695_v45, %v6585_v43 }
 0x8ed   : > { %v10573_v4 = vpop.f32.mrf.mxu0 }
 0x8ef   : > { %v6590_v57 = vpop.f32.mrf.mxu0 }
 0x8f0   : > { %v14398_v27 = vadd.f32 %v6700_v25, %v6590_v57 }
 0x8f1   : > { %v10576_v58 = vpop.f32.mrf.mxu0 }
 0x8f2   : > { %v6710_v13 = vpop.f32.mrf.mxu1 }
 0x8f3   : > { %v6595_v35 = vpop.f32.mrf.mxu0 }
 0x8f4   : > { %v14400_v1 = vadd.f32 %v6705_v37, %v6595_v35  ;;  %v10641_v23 = vpop.f32.mrf.mxu1 }
 0x8f5   : > { %v10579_v54 = vpop.f32.mrf.mxu0 }
 0x8f7   : > { %v6600_v62 = vpop.f32.mrf.mxu0 }
 0x8f8   : > { %v14402_v8 = vadd.f32 %v6710_v13, %v6600_v62  ;;  %v6715_v3 = vpop.f32.mrf.mxu1 }
 0x8f9   : > { %v10582_v11 = vpop.f32.mrf.mxu0 }
 0x8fa   : > { %v10644_v63 = vpop.f32.mrf.mxu1 }
 0x8fb   : > { %v14431_v63 = vld [vmem:[%s14576_s18] ss:$0 sm:$0xff] }
 0x8fd   : > { %v6605_v34 = vpop.f32.mrf.mxu0 }
 0x8fe   : > { %v14404_v55 = vadd.f32 %v6715_v3, %v6605_v34  ;;  %v6720_v44 = vpop.f32.mrf.mxu1 }
 0x8ff   : > { %v10585_v59 = vpop.f32.mrf.mxu0 }
 0x900   : > { %v10647_v52 = vpop.f32.mrf.mxu1 }
 0x903   : > { %v6610_v22 = vpop.f32.mrf.mxu0 }
 0x904   : > { %v14406_v16 = vadd.f32 %v6720_v44, %v6610_v22  ;;  %v6725_v33 = vpop.f32.mrf.mxu1 }
 0x905   : > { %v10588_v6 = vpop.f32.mrf.mxu0 }
 0x906   : > { %v10650_v51 = vpop.f32.mrf.mxu1 }
 0x909   : > { %v6615_v0 = vpop.f32.mrf.mxu0  ;;  %v6966_v17 = vpop.f32.mrf.mxu1 }
 0x90a   : > { %v14408_v29 = vadd.f32 %v6725_v33, %v6615_v0  ;;  %v14439_v0 = vld [vmem:[%s14577_s24] ss:$0 sm:$0xff] }
 0x90b   : > { %v10591_v42 = vpop.f32.mrf.mxu0  ;;  %v10744_v50 = vpop.f32.mrf.mxu1 }
 0x90d   : > { %v6821_v31 = vpop.f32.mrf.mxu0 }
 0x90e   : > { %v6971_v40 = vpop.f32.mrf.mxu1  ;;  %v6865_v4 = vadd.f32 %v6821_v31, %v14392_v61 }
 0x90f   : > { %v10685_v9 = vpop.f32.mrf.mxu0 }
 0x910   : > { %v10747_v20 = vpop.f32.mrf.mxu1  ;;  %v7010_v54 = vadd.f32 %v6966_v17, %v6865_v4 }
 0x912   : > { %v6826_v36 = vpop.f32.mrf.mxu0 }
 0x913   : > { %v6976_v10 = vpop.f32.mrf.mxu1  ;;  %v6866_v23 = vadd.f32 %v6826_v36, %v14394_v18 }
 0x914   : > { %v10688_v53 = vpop.f32.mrf.mxu0 }
 0x915   : > { %v10750_v39 = vpop.f32.mrf.mxu1  ;;  %v7011_v52 = vadd.f32 %v6971_v40, %v6866_v23 }
 0x918   : > { %v6831_v2 = vpop.f32.mrf.mxu0 }
 0x919   : > { %v6981_v28 = vpop.f32.mrf.mxu1  ;;  %v6867_v61 = vadd.f32 %v6831_v2, %v14396_v38  ;;  %v14444_v38 = vld [vmem:[%s14578_s7] ss:$0 sm:$0xff] }
 0x91a   : > { %v10691_v7 = vpop.f32.mrf.mxu0 }
 0x91b   : > { %v10753_v26 = vpop.f32.mrf.mxu1  ;;  %v7012_v9 = vadd.f32 %v6976_v10, %v6867_v61 }
 0x91e   : > { %v6836_v49 = vpop.f32.mrf.mxu0  ;;  %v14410_v14 = vpop.f32.mrf.mxu1 }
 0x91f   : > { %v6868_v51 = vadd.f32 %v6836_v49, %v14398_v27 }
 0x920   : > { %v10694_v46 = vpop.f32.mrf.mxu0  ;;  %v10756_v15 = vpop.f32.mrf.mxu1 }
 0x921   : > { %v7013_v7 = vadd.f32 %v6981_v28, %v6868_v51 }
 0x924   : > { %v6841_v19 = vpop.f32.mrf.mxu0  ;;  %v14412_v24 = vpop.f32.mrf.mxu1 }
 0x925   : > { %v6869_v26 = vadd.f32 %v6841_v19, %v14400_v1 }
 0x926   : > { %v10697_v41 = vpop.f32.mrf.mxu0  ;;  %v10759_v30 = vpop.f32.mrf.mxu1 }
 0x929   : > { %v6846_v47 = vpop.f32.mrf.mxu0 }
 0x92a   : > { %v14414_v45 = vpop.f32.mrf.mxu1 }
 0x92b   : > { %v10700_v32 = vpop.f32.mrf.mxu0 }
 0x92c   : > { %v10762_v5 = vpop.f32.mrf.mxu1 }
 0x92f   : > { %v14416_v25 = vpop.f32.mrf.mxu0 }
 0x930   : > { %v14418_v21 = vpop.f32.mrf.mxu1 }
 0x931   : > { %v10703_v12 = vpop.f32.mrf.mxu0 }
 0x932   : > { %v10765_v60 = vpop.f32.mrf.mxu1  ;;  %v6870_v12 = vadd.f32 %v6846_v47, %v14402_v8 }
 0x935   : > { %v14420_v48 = vpop.f32.mrf.mxu0 }
 0x936   : > { %v14422_v37 = vpop.f32.mrf.mxu1 }
 0x937   : > { %v10706_v43 = vpop.f32.mrf.mxu0 }
 0x938   : > { %v10768_v56 = vpop.f32.mrf.mxu1 }
 0x939   : > { %v7014_v56 = vadd.f32 %v14410_v14, %v6869_v26 }
 0x93b   : > { %v14425_v57 = vpop.f32.mrf.mxu0  ;;  %v7256_v58 = vpop.f32.mrf.mxu1 }
 0x93d   : > { %v10709_v13 = vpop.f32.mrf.mxu0  ;;  %v10862_v35 = vpop.f32.mrf.mxu1 }
 0x93f   : > { %v7111_v62 = vpop.f32.mrf.mxu0  ;;  %v7261_v3 = vpop.f32.mrf.mxu1 }
 0x940   : > { %v7155_v11 = vadd.f32 %v7111_v62, %v7010_v54  ;;  %v7015_v54 = vadd.f32 %v14412_v24, %v6870_v12  ;;  %v6871_v62 = vadd.f32 %v14416_v25, %v14404_v55  ;;  %v6872_v24 = vadd.f32 %v14420_v48, %v14406_v16 }
 0x941   : > { %v10803_v34 = vpop.f32.mrf.mxu0  ;;  %v10865_v44 = vpop.f32.mrf.mxu1  ;;  %v6873_v48 = vadd.f32 %v14425_v57, %v14408_v29 }
 0x942   : > { %v7300_v59 = vadd.f32 %v7256_v58, %v7155_v11  ;;  %v7017_v16 = vadd.f32 %v14418_v21, %v6872_v24 }
 0x943   : > { %v7116_v22 = vpop.f32.mrf.mxu0  ;;  %v7266_v33 = vpop.f32.mrf.mxu1 }
 0x944   : > { %v7316_v6 = vadd.f32 %v14431_v63, %v7300_v59  ;;  %v7156_v18 = vadd.f32 %v7116_v22, %v7011_v52 }
 0x945   : > { %v10806_v17 = vpop.f32.mrf.mxu0  ;;  %v10868_v42 = vpop.f32.mrf.mxu1 }
 0x946   : > { %v7325_v50 = vmax.f32 %v7316_v6, 0.0  ;;  %v7301_v31 = vadd.f32 %v7261_v3, %v7156_v18  ;;  %v7016_v18 = vadd.f32 %v14414_v45, %v6871_v62 }
 0x947   : > { %v7121_v40 = vpop.f32.mrf.mxu0  ;;  %v7271_v20 = vpop.f32.mrf.mxu1 }
 0x948   : > { %v7341_v27 = vmul.f32 %v14439_v0, %v7325_v50  ;;  %v7317_v36 = vadd.f32 %v14431_v63, %v7301_v31  ;;  %v7157_v53 = vadd.f32 %v7121_v40, %v7012_v9 }
 0x949   : > { %v10809_v39 = vpop.f32.mrf.mxu0  ;;  %v10871_v2 = vpop.f32.mrf.mxu1 }
 0x94a   : > { %v7357_v10 = vadd.f32 %v14444_v38, %v7341_v27  ;;  %v7326_v49 = vmax.f32 %v7317_v36, 0.0  ;;  %v7302_v46 = vadd.f32 %v7266_v33, %v7157_v53 }
 0x94b   : > { %v7126_v15 = vpop.f32.mrf.mxu0  ;;  %v7276_v41 = vpop.f32.mrf.mxu1 }
 0x94c   : > { %7366 = vst [vmem:[%s11563_s21] sm:$0xff] %v7357_v10  ;;  %v7342_v30 = vmul.f32 %v14439_v0, %v7326_v49  ;;  %v7318_v32 = vadd.f32 %v14431_v63, %v7302_v46  ;;  %v7158_v5 = vadd.f32 %v7126_v15, %v7013_v7  ;;  %v7018_v49 = vadd.f32 %v14422_v37, %v6873_v48 }
 0x94d   : > { %v10812_v60 = vpop.f32.mrf.mxu0  ;;  %v10874_v28 = vpop.f32.mrf.mxu1 }
 0x94e   : > { %v7358_v1 = vadd.f32 %v14444_v38, %v7342_v30  ;;  %v7327_v19 = vmax.f32 %v7318_v32, 0.0  ;;  %v7303_v43 = vadd.f32 %v7271_v20, %v7158_v5 }
 0x94f   : > { %v7131_v4 = vpop.f32.mrf.mxu0  ;;  %v7281_v58 = vpop.f32.mrf.mxu1 }
 0x950   : > { %7367 = vst [vmem:[%s11563_s21 + $0x8] sm:$0x3] %v7358_v1  ;;  %7368 = vst [vmem:[%s11563_s21 + $0x7] sm:$0xf8] %v7358_v1  ;;  %v7343_v13 = vmul.f32 %v14439_v0, %v7327_v19  ;;  %v7319_v35 = vadd.f32 %v14431_v63, %v7303_v43  ;;  %v7159_v23 = vadd.f32 %v7131_v4, %v7014_v56 }
 0x951   : > { %v10815_v8 = vpop.f32.mrf.mxu0  ;;  %v10877_v47 = vpop.f32.mrf.mxu1 }
 0x952   : > { %v7359_v14 = vadd.f32 %v14444_v38, %v7343_v13  ;;  %v7328_v3 = vmax.f32 %v7319_v35, 0.0  ;;  %v7304_v11 = vadd.f32 %v7276_v41, %v7159_v23 }
 0x953   : > { %v7136_v34 = vpop.f32.mrf.mxu0  ;;  %v7286_v44 = vpop.f32.mrf.mxu1 }
 0x954   : > { %7369 = vst [vmem:[%s11563_s21 + $0xf] sm:$0x1f] %v7359_v14  ;;  %7370 = vst [vmem:[%s11563_s21 + $0xe] sm:$0xc0] %v7359_v14  ;;  %v7344_v61 = vmul.f32 %v14439_v0, %v7328_v3  ;;  %v7320_v59 = vadd.f32 %v14431_v63, %v7304_v11  ;;  %v7160_v52 = vadd.f32 %v7136_v34, %v7015_v54 }
 0x955   : > { %v10818_v22 = vpop.f32.mrf.mxu0  ;;  %v10880_v33 = vpop.f32.mrf.mxu1 }
 0x956   : > { %v7360_v55 = vadd.f32 %v14444_v38, %v7344_v61  ;;  %v7329_v25 = vmax.f32 %v7320_v59, 0.0  ;;  %v7305_v6 = vadd.f32 %v7281_v58, %v7160_v52 }
 0x957   : > { %v7141_v51 = vpop.f32.mrf.mxu0  ;;  %v7291_v17 = vpop.f32.mrf.mxu1 }
 0x958   : > { %7371 = vst [vmem:[%s11563_s21 + $0x16] sm:$0xff] %v7360_v55  ;;  %v7345_v42 = vmul.f32 %v14439_v0, %v7329_v25  ;;  %v7321_v50 = vadd.f32 %v14431_v63, %v7305_v6  ;;  %v7161_v31 = vadd.f32 %v7141_v51, %v7016_v18 }
 0x959   : > { %v10821_v9 = vpop.f32.mrf.mxu0  ;;  %v10883_v40 = vpop.f32.mrf.mxu1 }
 0x95a   : > { %v7361_v20 = vadd.f32 %v14444_v38, %v7345_v42  ;;  %v7330_v45 = vmax.f32 %v7321_v50, 0.0  ;;  %v7306_v27 = vadd.f32 %v7286_v44, %v7161_v31 }
 0x95b   : > { %v7146_v36 = vpop.f32.mrf.mxu0  ;;  %v7296_v53 = vpop.f32.mrf.mxu1 }
 0x95c   : > { %7372 = vst [vmem:[%s11563_s21 + $0x1d] sm:$0xfe] %v7361_v20  ;;  %v7346_v39 = vmul.f32 %v14439_v0, %v7330_v45  ;;  %v7322_v2 = vadd.f32 %v14431_v63, %v7306_v27  ;;  %v7162_v7 = vadd.f32 %v7146_v36, %v7017_v16 }
 0x95d   : > { %v10824_v26 = vpop.f32.mrf.mxu0  ;;  %v10886_v21 = vpop.f32.mrf.mxu1 }
 0x95e   : > { %v7362_v29 = vadd.f32 %v14444_v38, %v7346_v39  ;;  %v7331_v57 = vmax.f32 %v7322_v2, 0.0  ;;  %v7307_v10 = vadd.f32 %v7291_v17, %v7162_v7 }
 0x95f   : > { %v7151_v46 = vpop.f32.mrf.mxu0 }
 0x960   : > { %7373 = vst [vmem:[%s11563_s21 + $0x25] sm:$0x7] %v7362_v29  ;;  %7374 = vst [vmem:[%s11563_s21 + $0x24] sm:$0xf0] %v7362_v29  ;;  %v7347_v15 = vmul.f32 %v14439_v0, %v7331_v57  ;;  %v7323_v41 = vadd.f32 %v14431_v63, %v7307_v10  ;;  %v7163_v30 = vadd.f32 %v7151_v46, %v7018_v49 }
 0x961   : > { %v10827_v32 = vpop.f32.mrf.mxu0 }
 0x962   : > { %v7363_v5 = vadd.f32 %v14444_v38, %v7347_v15  ;;  %v7332_v12 = vmax.f32 %v7323_v41, 0.0  ;;  %v7308_v60 = vadd.f32 %v7296_v53, %v7163_v30 }
 0x964   : > { %7375 = vst [vmem:[%s11563_s21 + $0x2c] sm:$0x3f] %v7363_v5  ;;  %7376 = vst [vmem:[%s11563_s21 + $0x2b] sm:$0x80] %v7363_v5  ;;  %v7348_v28 = vmul.f32 %v14439_v0, %v7332_v12  ;;  %v7324_v37 = vadd.f32 %v14431_v63, %v7308_v60 }
 0x966   : > { %v7364_v1 = vadd.f32 %v14444_v38, %v7348_v28  ;;  %v7333_v19 = vmax.f32 %v7324_v37, 0.0 }
 0x968   : > { %7377 = vst [vmem:[%s11563_s21 + $0x33] sm:$0xff] %v7364_v1  ;;  %v7349_v43 = vmul.f32 %v14439_v0, %v7333_v19 }
 0x96a   : > { %v7365_v56 = vadd.f32 %v14444_v38, %v7349_v43 }
 0x96c   : > { %7378 = vst [vmem:[%s11563_s21 + $0x3b] sm:$0x1] %v7365_v56 }
 0x96d PF: > { %p30_p7 = scmp.ge.s32.totalorder %s11479_s1, 4   ;;  %s14579_s24 = smov %s11245_s25 }
 0x96e   : > { %s14580_s25 = smov %s11249_s26  ;;  %s14581_s26 = smov %s11490_s15 }
 0x96f   : > { %s14582_s27 = smov %s11479_s1  ;;  %32 = sbr.rel (!%p30_p7) target bundleno = 15 (0xf), region = 316 }
 0x974   :  { %7400 = vsyncpa [#allocation8], 1 }
 0x975   :  { %7402 = vsyncpa [#allocation8 + $0x1], 1 }
 0x976   :  { %7403 = vsyncpa [#allocation10], 1 }
 0x977   :  { %7404 = vsyncpa [#allocation13], 1 }
 0x978   :  { %7405 = vsyncpa [#allocation16], 1 }

</bundles_post_ra>
